<compile_context>
chip_gen: v6e
topology: v6e:2x2x1
jax: 0.10.0
libtpu: 0.0.40
codegen_flags: <defaults>
</compile_context>

<pallas_src>
import jax
import jax.numpy as jnp
from jax.experimental import pallas as pl
from jax.experimental.pallas import tpu as pltpu

KERN, STRIDE, PAD = 4, 2, 1
NEG_SLOPE = 0.2
BN_EPS = 1e-5


# --------------------------------------------------------------------------- #
# Kernel
# --------------------------------------------------------------------------- #
def _conv_block_rows(in_pad_ref, w_bf16, sel_f32, patch_ref, emit_row):
    """One conv block (k=4, s=2, p=1) for a single image, row by row.

    in_pad_ref : (1, H+2, W+2, Cin) zero-padded activations (VMEM ref, f32)
    w_bf16     : (16*Cin, Cout) conv weight value, rows ordered (kh, kw, cin)
    sel_f32    : (Wo, Ws) 0/1 matrix selecting even stride-1 columns
    patch_ref  : (Ws, 16*Cin) VMEM scratch holding one row's patch matrix
    emit_row   : callback(i, z) with z = (Wo, Cout) f32 conv output (no bias)
    """
    _, hp, wp, cin = in_pad_ref.shape
    ho = (hp - 2 * PAD) // STRIDE                 # output rows
    ws = wp - (KERN - 1)                          # stride-1 output width
    for i in range(ho):
        # patch[s, (kh*KERN + kw)*Cin + c] = padded[2*i + kh, kw + s, c]
        for kh in range(KERN):
            row = STRIDE * i + kh
            for kw in range(KERN):
                t = kh * KERN + kw
                patch_ref[:, pl.ds(t * cin, cin)] = (
                    in_pad_ref[0, row, pl.ds(kw, ws), :])
        # MXU GEMM in bf16 (f32 accumulate): all stride-1 columns of row i.
        full = jnp.dot(patch_ref[...].astype(jnp.bfloat16), w_bf16,
                       preferred_element_type=jnp.float32)          # (Ws, Co)
        # Exact stride-2 column subsampling as a 0/1 matmul (stays f32).
        z = jnp.dot(sel_f32, full,
                    preferred_element_type=jnp.float32)             # (Wo, Co)
        emit_row(i, z)


def _make_fused_kernel(num_blocks):
    """Builds the fused forward-pass kernel for `num_blocks` conv blocks."""

    def kernel(*refs):
        # ---- unpack refs: inputs, output, scratch --------------------------
        it = iter(refs)
        x_ref = next(it)
        blocks = []
        for li in range(num_blocks):
            w_ref = next(it)
            sel_ref = next(it)
            scale_ref = next(it) if li < num_blocks - 1 else None
            shift_ref = next(it)
            blocks.append((w_ref, sel_ref, scale_ref, shift_ref))
        fw_ref = next(it)
        fb_ref = next(it)
        out_ref = next(it)
        pad_refs = [next(it) for _ in range(num_blocks - 1)]
        patch_refs = [next(it) for _ in range(num_blocks)]

        # ---- zero padded scratch (borders must be 0; interior overwritten) -
        for pref in pad_refs:
            pref[...] = jnp.zeros_like(pref)

        # ---- hoist small per-layer constants out of the row loops ----------
        consts = []
        for w_ref, sel_ref, scale_ref, shift_ref in blocks:
            consts.append((w_ref[...], sel_ref[...],
                           None if scale_ref is None else scale_ref[...],
                           shift_ref[...]))

        wo_last = consts[-1][1].shape[0]
        acc = [fb_ref[...]]                      # (1, 1) running final-linear sum

        in_ref = x_ref
        for li, (w, sel, scale, shift) in enumerate(consts):
            if li < num_blocks - 1:
                dst = pad_refs[li]

                def emit(i, z, dst=dst, scale=scale, shift=shift):
                    y = z * scale + shift                 # folded bias + BN
                    y = jnp.where(y >= 0.0, y, NEG_SLOPE * y)   # LeakyReLU
                    dst[0, i + 1, pl.ds(1, y.shape[0]), :] = y

                _conv_block_rows(in_ref, w, sel, patch_refs[li], emit)
                in_ref = dst
            else:
                # Last conv (1 channel, no BN / LReLU) fused with the final
                # nn.Linear(h*h, 1): accumulate flat @ final_w row by row.
                def emit(i, z, shift=shift):
                    y = z + shift                                     # (Wo, 1)
                    fw_rows = fw_ref[pl.ds(i * wo_last, wo_last), :]  # (Wo, 1)
                    acc[0] = acc[0] + jnp.sum(y * fw_rows, axis=0,
                                              keepdims=True)

                _conv_block_rows(in_ref, w, sel, patch_refs[li], emit)

        out_ref[0] = acc[0]

    return kernel


# --------------------------------------------------------------------------- #
# Host wrapper
# --------------------------------------------------------------------------- #
def forward(x_nchw, params, use_sigmoid=False):
    """Forward pass of SkipConvDiscriminator2 (eval-mode BN) on TPU."""
    convs = params["convs"]
    num_blocks = len(convs)
    assert int(convs[-1]["w"].shape[-1]) == 1, \
        "last conv block must have exactly 1 output channel"

    x = jnp.transpose(x_nchw, (0, 2, 3, 1)).astype(jnp.float32)  # NCHW -> NHWC
    x_pad = jnp.pad(x, ((0, 0), (PAD, PAD), (PAD, PAD), (0, 0)))
    batch, hp, wp, cin0 = x_pad.shape

    operands = [x_pad]
    in_specs = [pl.BlockSpec((1, hp, wp, cin0), lambda b: (b, 0, 0, 0))]
    pad_shapes, patch_shapes = [], []

    spatial = hp - 2 * PAD
    for li, p in enumerate(convs):
        w = p["w"]                                   # (KERN, KERN, cin, cout)
        cin, cout = int(w.shape[2]), int(w.shape[3])
        wo = spatial // STRIDE
        ws = spatial + 2 * PAD - (KERN - 1)          # stride-1 output width

        w2d = w.reshape(KERN * KERN * cin, cout).astype(jnp.bfloat16)
        sel = jax.nn.one_hot(STRIDE * jnp.arange(wo), ws, dtype=jnp.float32)
        operands += [w2d, sel]
        if li < num_blocks - 1:
            s = (p["gamma"] / jnp.sqrt(p["var"] + BN_EPS)).astype(jnp.float32)
            t = (p["beta"] + (p["b"] - p["mean"]) * s).astype(jnp.float32)
            operands += [s[None, :], t[None, :]]
            pad_shapes.append((1, wo + 2 * PAD, wo + 2 * PAD, cout))
        else:
            operands += [p["b"][None, :].astype(jnp.float32)]
        patch_shapes.append((ws, KERN * KERN * cin))
        spatial = wo

    operands.append(params["final_w"].astype(jnp.float32))            # (h*h, 1)
    operands.append(params["final_b"].reshape(1, 1).astype(jnp.float32))

    # All small parameter operands: whole-array blocks, constant index maps.
    for arr in operands[1:]:
        in_specs.append(
            pl.BlockSpec(arr.shape, lambda b, _n=arr.ndim: (0,) * _n))

    scratch = ([pltpu.VMEM(sh, jnp.float32) for sh in pad_shapes] +
               [pltpu.VMEM(sh, jnp.float32) for sh in patch_shapes])

    out = pl.pallas_call(
        _make_fused_kernel(num_blocks),
        out_shape=jax.ShapeDtypeStruct((batch, 1, 1), jnp.float32),
        grid=(batch,),
        in_specs=in_specs,
        out_specs=pl.BlockSpec((1, 1, 1), lambda b: (b, 0, 0)),
        scratch_shapes=scratch,
        compiler_params=pltpu.CompilerParams(
            dimension_semantics=("parallel",),
            vmem_limit_bytes=32 * 1024 * 1024),
    )(*operands)

    y = out.reshape(out.shape[0], 1)
    if use_sigmoid:
        y = jax.nn.sigmoid(y)
    return jnp.squeeze(y)


# --------------------------------------------------------------------------- #
# Pure-JAX reference (used only to validate the kernel numerics)
# --------------------------------------------------------------------------- #
def reference_forward(x_nchw, params, use_sigmoid=False):
    x = jnp.transpose(x_nchw, (0, 2, 3, 1)).astype(jnp.float32)
    n = len(params["convs"])
    for i, p in enumerate(params["convs"]):
        y = jax.lax.conv_general_dilated(
            x, p["w"], window_strides=(STRIDE, STRIDE),
            padding=((PAD, PAD), (PAD, PAD)),
            dimension_numbers=("NHWC", "HWIO", "NHWC"),
            precision=jax.lax.Precision.HIGHEST) + p["b"]
        if i < n - 1:
            s = p["gamma"] / jnp.sqrt(p["var"] + BN_EPS)
            y = (y - p["mean"]) * s + p["beta"]
            y = jnp.where(y >= 0.0, y, NEG_SLOPE * y)
        x = y
    flat = x.reshape(x.shape[0], -1)
    out = flat @ params["final_w"] + params["final_b"]
    if use_sigmoid:
        out = jax.nn.sigmoid(out)
    return jnp.squeeze(out)


# --------------------------------------------------------------------------- #
# Deterministic init
# --------------------------------------------------------------------------- #
def init_params(key, in_channels, hidden_dims, h):
    dims = [in_channels] + list(hidden_dims)
    convs = []
    for i in range(len(dims) - 1):
        cin, cout = dims[i], dims[i + 1]
        key, k1, k2, k3, k4, k5, k6 = jax.random.split(key, 7)
        p = {
            "w": 0.1 * jax.random.normal(k1, (KERN, KERN, cin, cout), jnp.float32),
            "b": 0.1 * jax.random.normal(k2, (cout,), jnp.float32),
        }
        if i < len(dims) - 2:
            p["gamma"] = 1.0 + 0.1 * jax.random.normal(k3, (cout,), jnp.float32)
            p["beta"] = 0.1 * jax.random.normal(k4, (cout,), jnp.float32)
            p["mean"] = 0.1 * jax.random.normal(k5, (cout,), jnp.float32)
            p["var"] = jnp.abs(jax.random.normal(k6, (cout,), jnp.float32)) + 0.5
        convs.append(p)
    for _ in range(len(hidden_dims)):
        h = (h + 2 * PAD - KERN) // STRIDE + 1
    key, kf1, kf2 = jax.random.split(key, 3)
    return {
        "convs": convs,
        "final_w": 0.1 * jax.random.normal(kf1, (h * h, 1), jnp.float32),
        "final_b": 0.1 * jax.random.normal(kf2, (1,), jnp.float32),
    }


if __name__ == "__main__":
    # Small shapes consistent with the module: in_channels=2, three conv
    # blocks (last one 1-channel), image size 16 -> 8 -> 4 -> 2.
    B, C, H = 2, 2, 16
    hidden_dims = [8, 16, 1]

    key = jax.random.PRNGKey(0)
    kx, kp = jax.random.split(key)
    x = jax.random.normal(kx, (B, C, H, H), jnp.float32)
    params = init_params(kp, C, hidden_dims, H)

    y = jax.jit(forward)(x, params)             # shape (B,)
    jax.block_until_ready(y)
    assert y.shape == (B,)

    y_ref = reference_forward(x, params)
    max_err = float(jnp.max(jnp.abs(y - y_ref)))
    assert max_err < 5e-2, f"kernel/reference mismatch: {max_err}"

    print("KERNEL_OK")
</pallas_src>

<mosaic_0001>
module attributes {stable_mosaic.version = 11 : i64} {
  func.func @kernel(%arg0: i32, %arg1: memref<1x18x18x2xf32, #tpu.memory_space<vmem>>, %arg2: memref<32x8xbf16, #tpu.memory_space<vmem>>, %arg3: memref<8x15xf32, #tpu.memory_space<vmem>>, %arg4: memref<1x8xf32, #tpu.memory_space<vmem>>, %arg5: memref<1x8xf32, #tpu.memory_space<vmem>>, %arg6: memref<128x16xbf16, #tpu.memory_space<vmem>>, %arg7: memref<4x7xf32, #tpu.memory_space<vmem>>, %arg8: memref<1x16xf32, #tpu.memory_space<vmem>>, %arg9: memref<1x16xf32, #tpu.memory_space<vmem>>, %arg10: memref<256x1xbf16, #tpu.memory_space<vmem>>, %arg11: memref<2x3xf32, #tpu.memory_space<vmem>>, %arg12: memref<1x1xf32, #tpu.memory_space<vmem>>, %arg13: memref<4x1xf32, #tpu.memory_space<vmem>>, %arg14: memref<1x1xf32, #tpu.memory_space<vmem>>, %arg15: memref<1x1x1xf32, #tpu.memory_space<vmem>>, %arg16: memref<1x10x10x8xf32, #tpu.memory_space<vmem>>, %arg17: memref<1x6x6x16xf32, #tpu.memory_space<vmem>>, %arg18: memref<15x32xf32, #tpu.memory_space<vmem>>, %arg19: memref<7x128xf32, #tpu.memory_space<vmem>>, %arg20: memref<3x256xf32, #tpu.memory_space<vmem>>) attributes {dimension_semantics = [#tpu.dimension_semantics<parallel>], iteration_bounds = array<i64: 2>, scalar_prefetch = 0 : i64, scratch_operands = 5 : i64, tpu.core_type = #tpu.core_type<tc>, window_params = [{transform_indices = @transform_0, window_bounds = array<i64: 1, 18, 18, 2>}, {pipeline_mode = #tpu.pipeline_mode<synchronous>, transform_indices = @transform_1, window_bounds = array<i64: 32, 8>}, {pipeline_mode = #tpu.pipeline_mode<synchronous>, transform_indices = @transform_2, window_bounds = array<i64: 8, 15>}, {pipeline_mode = #tpu.pipeline_mode<synchronous>, transform_indices = @transform_3, window_bounds = array<i64: 1, 8>}, {pipeline_mode = #tpu.pipeline_mode<synchronous>, transform_indices = @transform_4, window_bounds = array<i64: 1, 8>}, {pipeline_mode = #tpu.pipeline_mode<synchronous>, transform_indices = @transform_5, window_bounds = array<i64: 128, 16>}, {pipeline_mode = #tpu.pipeline_mode<synchronous>, transform_indices = @transform_6, window_bounds = array<i64: 4, 7>}, {pipeline_mode = #tpu.pipeline_mode<synchronous>, transform_indices = @transform_7, window_bounds = array<i64: 1, 16>}, {pipeline_mode = #tpu.pipeline_mode<synchronous>, transform_indices = @transform_8, window_bounds = array<i64: 1, 16>}, {pipeline_mode = #tpu.pipeline_mode<synchronous>, transform_indices = @transform_9, window_bounds = array<i64: 256, 1>}, {pipeline_mode = #tpu.pipeline_mode<synchronous>, transform_indices = @transform_10, window_bounds = array<i64: 2, 3>}, {pipeline_mode = #tpu.pipeline_mode<synchronous>, transform_indices = @transform_11, window_bounds = array<i64: 1, 1>}, {pipeline_mode = #tpu.pipeline_mode<synchronous>, transform_indices = @transform_12, window_bounds = array<i64: 4, 1>}, {pipeline_mode = #tpu.pipeline_mode<synchronous>, transform_indices = @transform_13, window_bounds = array<i64: 1, 1>}, {transform_indices = @transform_14, window_bounds = array<i64: 1, 1, 1>}]} {
    %cst = arith.constant 0.000000e+00 : f32
    %0 = vector.broadcast %cst : f32 to vector<1x10x10x8xf32>
    %c0 = arith.constant 0 : index
    %c0_0 = arith.constant 0 : index
    %c0_1 = arith.constant 0 : index
    %c0_2 = arith.constant 0 : index
    %1 = vector.load %arg16[%c0, %c0_0, %c0_1, %c0_2] : memref<1x10x10x8xf32, #tpu.memory_space<vmem>>, vector<1x10x10x8xf32>
    tpu.vector_store %arg16[%c0, %c0_0, %c0_1, %c0_2], %0 {strides = array<i32>} : memref<1x10x10x8xf32, #tpu.memory_space<vmem>>, vector<1x10x10x8xf32>,
    %cst_3 = arith.constant 0.000000e+00 : f32
    %2 = vector.broadcast %cst_3 : f32 to vector<1x6x6x16xf32>
    %c0_4 = arith.constant 0 : index
    %c0_5 = arith.constant 0 : index
    %c0_6 = arith.constant 0 : index
    %c0_7 = arith.constant 0 : index
    %3 = vector.load %arg17[%c0_4, %c0_5, %c0_6, %c0_7] : memref<1x6x6x16xf32, #tpu.memory_space<vmem>>, vector<1x6x6x16xf32>
    tpu.vector_store %arg17[%c0_4, %c0_5, %c0_6, %c0_7], %2 {strides = array<i32>} : memref<1x6x6x16xf32, #tpu.memory_space<vmem>>, vector<1x6x6x16xf32>,
    %c0_8 = arith.constant 0 : index
    %c0_9 = arith.constant 0 : index
    %4 = vector.load %arg2[%c0_8, %c0_9] : memref<32x8xbf16, #tpu.memory_space<vmem>>, vector<32x8xbf16>
    %c0_10 = arith.constant 0 : index
    %c0_11 = arith.constant 0 : index
    %5 = vector.load %arg3[%c0_10, %c0_11] : memref<8x15xf32, #tpu.memory_space<vmem>>, vector<8x15xf32>
    %c0_12 = arith.constant 0 : index
    %c0_13 = arith.constant 0 : index
    %6 = vector.load %arg4[%c0_12, %c0_13] : memref<1x8xf32, #tpu.memory_space<vmem>>, vector<1x8xf32>
    %c0_14 = arith.constant 0 : index
    %c0_15 = arith.constant 0 : index
    %7 = vector.load %arg5[%c0_14, %c0_15] : memref<1x8xf32, #tpu.memory_space<vmem>>, vector<1x8xf32>
    %c0_16 = arith.constant 0 : index
    %c0_17 = arith.constant 0 : index
    %8 = vector.load %arg6[%c0_16, %c0_17] : memref<128x16xbf16, #tpu.memory_space<vmem>>, vector<128x16xbf16>
    %c0_18 = arith.constant 0 : index
    %c0_19 = arith.constant 0 : index
    %9 = vector.load %arg7[%c0_18, %c0_19] : memref<4x7xf32, #tpu.memory_space<vmem>>, vector<4x7xf32>
    %c0_20 = arith.constant 0 : index
    %c0_21 = arith.constant 0 : index
    %10 = vector.load %arg8[%c0_20, %c0_21] : memref<1x16xf32, #tpu.memory_space<vmem>>, vector<1x16xf32>
    %c0_22 = arith.constant 0 : index
    %c0_23 = arith.constant 0 : index
    %11 = vector.load %arg9[%c0_22, %c0_23] : memref<1x16xf32, #tpu.memory_space<vmem>>, vector<1x16xf32>
    %c0_24 = arith.constant 0 : index
    %c0_25 = arith.constant 0 : index
    %12 = vector.load %arg10[%c0_24, %c0_25] : memref<256x1xbf16, #tpu.memory_space<vmem>>, vector<256x1xbf16>
    %c0_26 = arith.constant 0 : index
    %c0_27 = arith.constant 0 : index
    %13 = vector.load %arg11[%c0_26, %c0_27] : memref<2x3xf32, #tpu.memory_space<vmem>>, vector<2x3xf32>
    %c0_28 = arith.constant 0 : index
    %c0_29 = arith.constant 0 : index
    %14 = vector.load %arg12[%c0_28, %c0_29] : memref<1x1xf32, #tpu.memory_space<vmem>>, vector<1x1xf32>
    %c0_30 = arith.constant 0 : index
    %c0_31 = arith.constant 0 : index
    %15 = vector.load %arg14[%c0_30, %c0_31] : memref<1x1xf32, #tpu.memory_space<vmem>>, vector<1x1xf32>
    %c0_32 = arith.constant 0 : index
    %c0_33 = arith.constant 0 : index
    %c0_34 = arith.constant 0 : index
    %c0_35 = arith.constant 0 : index
    %16 = vector.load %arg1[%c0_32, %c0_33, %c0_34, %c0_35] : memref<1x18x18x2xf32, #tpu.memory_space<vmem>>, vector<1x1x15x2xf32>
    %17 = vector.shape_cast %16 : vector<1x1x15x2xf32> to vector<15x2xf32>
    %c0_36 = arith.constant 0 : index
    %c0_37 = arith.constant 0 : index
    %18 = vector.load %arg18[%c0_36, %c0_37] : memref<15x32xf32, #tpu.memory_space<vmem>>, vector<15x2xf32>
    tpu.vector_store %arg18[%c0_36, %c0_37], %17 {strides = array<i32>} : memref<15x32xf32, #tpu.memory_space<vmem>>, vector<15x2xf32>,
    %c0_38 = arith.constant 0 : index
    %c0_39 = arith.constant 0 : index
    %c1 = arith.constant 1 : index
    %c0_40 = arith.constant 0 : index
    %19 = vector.load %arg1[%c0_38, %c0_39, %c1, %c0_40] : memref<1x18x18x2xf32, #tpu.memory_space<vmem>>, vector<1x1x15x2xf32>
    %20 = vector.shape_cast %19 : vector<1x1x15x2xf32> to vector<15x2xf32>
    %c0_41 = arith.constant 0 : index
    %c2 = arith.constant 2 : index
    %21 = vector.load %arg18[%c0_41, %c2] : memref<15x32xf32, #tpu.memory_space<vmem>>, vector<15x2xf32>
    tpu.vector_store %arg18[%c0_41, %c2], %20 {strides = array<i32>} : memref<15x32xf32, #tpu.memory_space<vmem>>, vector<15x2xf32>,
    %c0_42 = arith.constant 0 : index
    %c0_43 = arith.constant 0 : index
    %c2_44 = arith.constant 2 : index
    %c0_45 = arith.constant 0 : index
    %22 = vector.load %arg1[%c0_42, %c0_43, %c2_44, %c0_45] : memref<1x18x18x2xf32, #tpu.memory_space<vmem>>, vector<1x1x15x2xf32>
    %23 = vector.shape_cast %22 : vector<1x1x15x2xf32> to vector<15x2xf32>
    %c0_46 = arith.constant 0 : index
    %c4 = arith.constant 4 : index
    %24 = vector.load %arg18[%c0_46, %c4] : memref<15x32xf32, #tpu.memory_space<vmem>>, vector<15x2xf32>
    tpu.vector_store %arg18[%c0_46, %c4], %23 {strides = array<i32>} : memref<15x32xf32, #tpu.memory_space<vmem>>, vector<15x2xf32>,
    %c0_47 = arith.constant 0 : index
    %c0_48 = arith.constant 0 : index
    %c3 = arith.constant 3 : index
    %c0_49 = arith.constant 0 : index
    %25 = vector.load %arg1[%c0_47, %c0_48, %c3, %c0_49] : memref<1x18x18x2xf32, #tpu.memory_space<vmem>>, vector<1x1x15x2xf32>
    %26 = vector.shape_cast %25 : vector<1x1x15x2xf32> to vector<15x2xf32>
    %c0_50 = arith.constant 0 : index
    %c6 = arith.constant 6 : index
    %27 = vector.load %arg18[%c0_50, %c6] : memref<15x32xf32, #tpu.memory_space<vmem>>, vector<15x2xf32>
    tpu.vector_store %arg18[%c0_50, %c6], %26 {strides = array<i32>} : memref<15x32xf32, #tpu.memory_space<vmem>>, vector<15x2xf32>,
    %c0_51 = arith.constant 0 : index
    %c1_52 = arith.constant 1 : index
    %c0_53 = arith.constant 0 : index
    %c0_54 = arith.constant 0 : index
    %28 = vector.load %arg1[%c0_51, %c1_52, %c0_53, %c0_54] : memref<1x18x18x2xf32, #tpu.memory_space<vmem>>, vector<1x1x15x2xf32>
    %29 = vector.shape_cast %28 : vector<1x1x15x2xf32> to vector<15x2xf32>
    %c0_55 = arith.constant 0 : index
    %c8 = arith.constant 8 : index
    %30 = vector.load %arg18[%c0_55, %c8] : memref<15x32xf32, #tpu.memory_space<vmem>>, vector<15x2xf32>
    tpu.vector_store %arg18[%c0_55, %c8], %29 {strides = array<i32>} : memref<15x32xf32, #tpu.memory_space<vmem>>, vector<15x2xf32>,
    %c0_56 = arith.constant 0 : index
    %c1_57 = arith.constant 1 : index
    %c1_58 = arith.constant 1 : index
    %c0_59 = arith.constant 0 : index
    %31 = vector.load %arg1[%c0_56, %c1_57, %c1_58, %c0_59] : memref<1x18x18x2xf32, #tpu.memory_space<vmem>>, vector<1x1x15x2xf32>
    %32 = vector.shape_cast %31 : vector<1x1x15x2xf32> to vector<15x2xf32>
    %c0_60 = arith.constant 0 : index
    %c10 = arith.constant 10 : index
    %33 = vector.load %arg18[%c0_60, %c10] : memref<15x32xf32, #tpu.memory_space<vmem>>, vector<15x2xf32>
    tpu.vector_store %arg18[%c0_60, %c10], %32 {strides = array<i32>} : memref<15x32xf32, #tpu.memory_space<vmem>>, vector<15x2xf32>,
    %c0_61 = arith.constant 0 : index
    %c1_62 = arith.constant 1 : index
    %c2_63 = arith.constant 2 : index
    %c0_64 = arith.constant 0 : index
    %34 = vector.load %arg1[%c0_61, %c1_62, %c2_63, %c0_64] : memref<1x18x18x2xf32, #tpu.memory_space<vmem>>, vector<1x1x15x2xf32>
    %35 = vector.shape_cast %34 : vector<1x1x15x2xf32> to vector<15x2xf32>
    %c0_65 = arith.constant 0 : index
    %c12 = arith.constant 12 : index
    %36 = vector.load %arg18[%c0_65, %c12] : memref<15x32xf32, #tpu.memory_space<vmem>>, vector<15x2xf32>
    tpu.vector_store %arg18[%c0_65, %c12], %35 {strides = array<i32>} : memref<15x32xf32, #tpu.memory_space<vmem>>, vector<15x2xf32>,
    %c0_66 = arith.constant 0 : index
    %c1_67 = arith.constant 1 : index
    %c3_68 = arith.constant 3 : index
    %c0_69 = arith.constant 0 : index
    %37 = vector.load %arg1[%c0_66, %c1_67, %c3_68, %c0_69] : memref<1x18x18x2xf32, #tpu.memory_space<vmem>>, vector<1x1x15x2xf32>
    %38 = vector.shape_cast %37 : vector<1x1x15x2xf32> to vector<15x2xf32>
    %c0_70 = arith.constant 0 : index
    %c14 = arith.constant 14 : index
    %39 = vector.load %arg18[%c0_70, %c14] : memref<15x32xf32, #tpu.memory_space<vmem>>, vector<15x2xf32>
    tpu.vector_store %arg18[%c0_70, %c14], %38 {strides = array<i32>} : memref<15x32xf32, #tpu.memory_space<vmem>>, vector<15x2xf32>,
    %c0_71 = arith.constant 0 : index
    %c2_72 = arith.constant 2 : index
    %c0_73 = arith.constant 0 : index
    %c0_74 = arith.constant 0 : index
    %40 = vector.load %arg1[%c0_71, %c2_72, %c0_73, %c0_74] : memref<1x18x18x2xf32, #tpu.memory_space<vmem>>, vector<1x1x15x2xf32>
    %41 = vector.shape_cast %40 : vector<1x1x15x2xf32> to vector<15x2xf32>
    %c0_75 = arith.constant 0 : index
    %c16 = arith.constant 16 : index
    %42 = vector.load %arg18[%c0_75, %c16] : memref<15x32xf32, #tpu.memory_space<vmem>>, vector<15x2xf32>
    tpu.vector_store %arg18[%c0_75, %c16], %41 {strides = array<i32>} : memref<15x32xf32, #tpu.memory_space<vmem>>, vector<15x2xf32>,
    %c0_76 = arith.constant 0 : index
    %c2_77 = arith.constant 2 : index
    %c1_78 = arith.constant 1 : index
    %c0_79 = arith.constant 0 : index
    %43 = vector.load %arg1[%c0_76, %c2_77, %c1_78, %c0_79] : memref<1x18x18x2xf32, #tpu.memory_space<vmem>>, vector<1x1x15x2xf32>
    %44 = vector.shape_cast %43 : vector<1x1x15x2xf32> to vector<15x2xf32>
    %c0_80 = arith.constant 0 : index
    %c18 = arith.constant 18 : index
    %45 = vector.load %arg18[%c0_80, %c18] : memref<15x32xf32, #tpu.memory_space<vmem>>, vector<15x2xf32>
    tpu.vector_store %arg18[%c0_80, %c18], %44 {strides = array<i32>} : memref<15x32xf32, #tpu.memory_space<vmem>>, vector<15x2xf32>,
    %c0_81 = arith.constant 0 : index
    %c2_82 = arith.constant 2 : index
    %c2_83 = arith.constant 2 : index
    %c0_84 = arith.constant 0 : index
    %46 = vector.load %arg1[%c0_81, %c2_82, %c2_83, %c0_84] : memref<1x18x18x2xf32, #tpu.memory_space<vmem>>, vector<1x1x15x2xf32>
    %47 = vector.shape_cast %46 : vector<1x1x15x2xf32> to vector<15x2xf32>
    %c0_85 = arith.constant 0 : index
    %c20 = arith.constant 20 : index
    %48 = vector.load %arg18[%c0_85, %c20] : memref<15x32xf32, #tpu.memory_space<vmem>>, vector<15x2xf32>
    tpu.vector_store %arg18[%c0_85, %c20], %47 {strides = array<i32>} : memref<15x32xf32, #tpu.memory_space<vmem>>, vector<15x2xf32>,
    %c0_86 = arith.constant 0 : index
    %c2_87 = arith.constant 2 : index
    %c3_88 = arith.constant 3 : index
    %c0_89 = arith.constant 0 : index
    %49 = vector.load %arg1[%c0_86, %c2_87, %c3_88, %c0_89] : memref<1x18x18x2xf32, #tpu.memory_space<vmem>>, vector<1x1x15x2xf32>
    %50 = vector.shape_cast %49 : vector<1x1x15x2xf32> to vector<15x2xf32>
    %c0_90 = arith.constant 0 : index
    %c22 = arith.constant 22 : index
    %51 = vector.load %arg18[%c0_90, %c22] : memref<15x32xf32, #tpu.memory_space<vmem>>, vector<15x2xf32>
    tpu.vector_store %arg18[%c0_90, %c22], %50 {strides = array<i32>} : memref<15x32xf32, #tpu.memory_space<vmem>>, vector<15x2xf32>,
    %c0_91 = arith.constant 0 : index
    %c3_92 = arith.constant 3 : index
    %c0_93 = arith.constant 0 : index
    %c0_94 = arith.constant 0 : index
    %52 = vector.load %arg1[%c0_91, %c3_92, %c0_93, %c0_94] : memref<1x18x18x2xf32, #tpu.memory_space<vmem>>, vector<1x1x15x2xf32>
    %53 = vector.shape_cast %52 : vector<1x1x15x2xf32> to vector<15x2xf32>
    %c0_95 = arith.constant 0 : index
    %c24 = arith.constant 24 : index
    %54 = vector.load %arg18[%c0_95, %c24] : memref<15x32xf32, #tpu.memory_space<vmem>>, vector<15x2xf32>
    tpu.vector_store %arg18[%c0_95, %c24], %53 {strides = array<i32>} : memref<15x32xf32, #tpu.memory_space<vmem>>, vector<15x2xf32>,
    %c0_96 = arith.constant 0 : index
    %c3_97 = arith.constant 3 : index
    %c1_98 = arith.constant 1 : index
    %c0_99 = arith.constant 0 : index
    %55 = vector.load %arg1[%c0_96, %c3_97, %c1_98, %c0_99] : memref<1x18x18x2xf32, #tpu.memory_space<vmem>>, vector<1x1x15x2xf32>
    %56 = vector.shape_cast %55 : vector<1x1x15x2xf32> to vector<15x2xf32>
    %c0_100 = arith.constant 0 : index
    %c26 = arith.constant 26 : index
    %57 = vector.load %arg18[%c0_100, %c26] : memref<15x32xf32, #tpu.memory_space<vmem>>, vector<15x2xf32>
    tpu.vector_store %arg18[%c0_100, %c26], %56 {strides = array<i32>} : memref<15x32xf32, #tpu.memory_space<vmem>>, vector<15x2xf32>,
    %c0_101 = arith.constant 0 : index
    %c3_102 = arith.constant 3 : index
    %c2_103 = arith.constant 2 : index
    %c0_104 = arith.constant 0 : index
    %58 = vector.load %arg1[%c0_101, %c3_102, %c2_103, %c0_104] : memref<1x18x18x2xf32, #tpu.memory_space<vmem>>, vector<1x1x15x2xf32>
    %59 = vector.shape_cast %58 : vector<1x1x15x2xf32> to vector<15x2xf32>
    %c0_105 = arith.constant 0 : index
    %c28 = arith.constant 28 : index
    %60 = vector.load %arg18[%c0_105, %c28] : memref<15x32xf32, #tpu.memory_space<vmem>>, vector<15x2xf32>
    tpu.vector_store %arg18[%c0_105, %c28], %59 {strides = array<i32>} : memref<15x32xf32, #tpu.memory_space<vmem>>, vector<15x2xf32>,
    %c0_106 = arith.constant 0 : index
    %c3_107 = arith.constant 3 : index
    %c3_108 = arith.constant 3 : index
    %c0_109 = arith.constant 0 : index
    %61 = vector.load %arg1[%c0_106, %c3_107, %c3_108, %c0_109] : memref<1x18x18x2xf32, #tpu.memory_space<vmem>>, vector<1x1x15x2xf32>
    %62 = vector.shape_cast %61 : vector<1x1x15x2xf32> to vector<15x2xf32>
    %c0_110 = arith.constant 0 : index
    %c30 = arith.constant 30 : index
    %63 = vector.load %arg18[%c0_110, %c30] : memref<15x32xf32, #tpu.memory_space<vmem>>, vector<15x2xf32>
    tpu.vector_store %arg18[%c0_110, %c30], %62 {strides = array<i32>} : memref<15x32xf32, #tpu.memory_space<vmem>>, vector<15x2xf32>,
    %c0_111 = arith.constant 0 : index
    %c0_112 = arith.constant 0 : index
    %64 = vector.load %arg18[%c0_111, %c0_112] : memref<15x32xf32, #tpu.memory_space<vmem>>, vector<15x32xf32>
    %65 = arith.truncf %64 : vector<15x32xf32> to vector<15x32xbf16>
    %cst_113 = arith.constant dense<0.000000e+00> : vector<15x8xf32>
    %66 = tpu.matmul %65, %4, %cst_113 {dimension_numbers = #tpu.dot_dimension_numbers<[1], [0], [0], [1], [0, 0, 1, 1], [], []>} : vector<15x32xbf16>, vector<32x8xbf16>, vector<15x8xf32> -> vector<15x8xf32>
    %cst_114 = arith.constant dense<0.000000e+00> : vector<8x8xf32>
    %67 = tpu.matmul %5, %66, %cst_114 {dimension_numbers = #tpu.dot_dimension_numbers<[1], [0], [0], [1], [0, 0, 1, 1], [], []>} : vector<8x15xf32>, vector<15x8xf32>, vector<8x8xf32> -> vector<8x8xf32>
    %68 = vector.broadcast %6 : vector<1x8xf32> to vector<8x8xf32>
    %69 = arith.mulf %67, %68 : vector<8x8xf32>
    %70 = vector.broadcast %7 : vector<1x8xf32> to vector<8x8xf32>
    %71 = arith.addf %69, %70 : vector<8x8xf32>
    %cst_115 = arith.constant 0.000000e+00 : f32
    %72 = vector.broadcast %cst_115 : f32 to vector<8x8xf32>
    %73 = arith.cmpf oge, %71, %72 : vector<8x8xf32>
    %cst_116 = arith.constant 2.000000e-01 : f32
    %74 = vector.broadcast %cst_116 : f32 to vector<8x8xf32>
    %75 = arith.mulf %74, %71 : vector<8x8xf32>
    %76 = arith.select %73, %71, %75 : vector<8x8xi1>, vector<8x8xf32>
    %c0_117 = arith.constant 0 : index
    %c1_118 = arith.constant 1 : index
    %c1_119 = arith.constant 1 : index
    %c0_120 = arith.constant 0 : index
    %77 = vector.load %arg16[%c0_117, %c1_118, %c1_119, %c0_120] : memref<1x10x10x8xf32, #tpu.memory_space<vmem>>, vector<1x1x8x8xf32>
    %78 = vector.shape_cast %77 : vector<1x1x8x8xf32> to vector<8x8xf32>
    %79 = vector.shape_cast %76 : vector<8x8xf32> to vector<1x1x8x8xf32>
    tpu.vector_store %arg16[%c0_117, %c1_118, %c1_119, %c0_120], %79 {strides = array<i32>} : memref<1x10x10x8xf32, #tpu.memory_space<vmem>>, vector<1x1x8x8xf32>,
    %c0_121 = arith.constant 0 : index
    %c2_122 = arith.constant 2 : index
    %c0_123 = arith.constant 0 : index
    %c0_124 = arith.constant 0 : index
    %80 = vector.load %arg1[%c0_121, %c2_122, %c0_123, %c0_124] : memref<1x18x18x2xf32, #tpu.memory_space<vmem>>, vector<1x1x15x2xf32>
    %81 = vector.shape_cast %80 : vector<1x1x15x2xf32> to vector<15x2xf32>
    %c0_125 = arith.constant 0 : index
    %c0_126 = arith.constant 0 : index
    %82 = vector.load %arg18[%c0_125, %c0_126] : memref<15x32xf32, #tpu.memory_space<vmem>>, vector<15x2xf32>
    tpu.vector_store %arg18[%c0_125, %c0_126], %81 {strides = array<i32>} : memref<15x32xf32, #tpu.memory_space<vmem>>, vector<15x2xf32>,
    %c0_127 = arith.constant 0 : index
    %c2_128 = arith.constant 2 : index
    %c1_129 = arith.constant 1 : index
    %c0_130 = arith.constant 0 : index
    %83 = vector.load %arg1[%c0_127, %c2_128, %c1_129, %c0_130] : memref<1x18x18x2xf32, #tpu.memory_space<vmem>>, vector<1x1x15x2xf32>
    %84 = vector.shape_cast %83 : vector<1x1x15x2xf32> to vector<15x2xf32>
    %c0_131 = arith.constant 0 : index
    %c2_132 = arith.constant 2 : index
    %85 = vector.load %arg18[%c0_131, %c2_132] : memref<15x32xf32, #tpu.memory_space<vmem>>, vector<15x2xf32>
    tpu.vector_store %arg18[%c0_131, %c2_132], %84 {strides = array<i32>} : memref<15x32xf32, #tpu.memory_space<vmem>>, vector<15x2xf32>,
    %c0_133 = arith.constant 0 : index
    %c2_134 = arith.constant 2 : index
    %c2_135 = arith.constant 2 : index
    %c0_136 = arith.constant 0 : index
    %86 = vector.load %arg1[%c0_133, %c2_134, %c2_135, %c0_136] : memref<1x18x18x2xf32, #tpu.memory_space<vmem>>, vector<1x1x15x2xf32>
    %87 = vector.shape_cast %86 : vector<1x1x15x2xf32> to vector<15x2xf32>
    %c0_137 = arith.constant 0 : index
    %c4_138 = arith.constant 4 : index
    %88 = vector.load %arg18[%c0_137, %c4_138] : memref<15x32xf32, #tpu.memory_space<vmem>>, vector<15x2xf32>
    tpu.vector_store %arg18[%c0_137, %c4_138], %87 {strides = array<i32>} : memref<15x32xf32, #tpu.memory_space<vmem>>, vector<15x2xf32>,
    %c0_139 = arith.constant 0 : index
    %c2_140 = arith.constant 2 : index
    %c3_141 = arith.constant 3 : index
    %c0_142 = arith.constant 0 : index
    %89 = vector.load %arg1[%c0_139, %c2_140, %c3_141, %c0_142] : memref<1x18x18x2xf32, #tpu.memory_space<vmem>>, vector<1x1x15x2xf32>
    %90 = vector.shape_cast %89 : vector<1x1x15x2xf32> to vector<15x2xf32>
    %c0_143 = arith.constant 0 : index
    %c6_144 = arith.constant 6 : index
    %91 = vector.load %arg18[%c0_143, %c6_144] : memref<15x32xf32, #tpu.memory_space<vmem>>, vector<15x2xf32>
    tpu.vector_store %arg18[%c0_143, %c6_144], %90 {strides = array<i32>} : memref<15x32xf32, #tpu.memory_space<vmem>>, vector<15x2xf32>,
    %c0_145 = arith.constant 0 : index
    %c3_146 = arith.constant 3 : index
    %c0_147 = arith.constant 0 : index
    %c0_148 = arith.constant 0 : index
    %92 = vector.load %arg1[%c0_145, %c3_146, %c0_147, %c0_148] : memref<1x18x18x2xf32, #tpu.memory_space<vmem>>, vector<1x1x15x2xf32>
    %93 = vector.shape_cast %92 : vector<1x1x15x2xf32> to vector<15x2xf32>
    %c0_149 = arith.constant 0 : index
    %c8_150 = arith.constant 8 : index
    %94 = vector.load %arg18[%c0_149, %c8_150] : memref<15x32xf32, #tpu.memory_space<vmem>>, vector<15x2xf32>
    tpu.vector_store %arg18[%c0_149, %c8_150], %93 {strides = array<i32>} : memref<15x32xf32, #tpu.memory_space<vmem>>, vector<15x2xf32>,
    %c0_151 = arith.constant 0 : index
    %c3_152 = arith.constant 3 : index
    %c1_153 = arith.constant 1 : index
    %c0_154 = arith.constant 0 : index
    %95 = vector.load %arg1[%c0_151, %c3_152, %c1_153, %c0_154] : memref<1x18x18x2xf32, #tpu.memory_space<vmem>>, vector<1x1x15x2xf32>
    %96 = vector.shape_cast %95 : vector<1x1x15x2xf32> to vector<15x2xf32>
    %c0_155 = arith.constant 0 : index
    %c10_156 = arith.constant 10 : index
    %97 = vector.load %arg18[%c0_155, %c10_156] : memref<15x32xf32, #tpu.memory_space<vmem>>, vector<15x2xf32>
    tpu.vector_store %arg18[%c0_155, %c10_156], %96 {strides = array<i32>} : memref<15x32xf32, #tpu.memory_space<vmem>>, vector<15x2xf32>,
    %c0_157 = arith.constant 0 : index
    %c3_158 = arith.constant 3 : index
    %c2_159 = arith.constant 2 : index
    %c0_160 = arith.constant 0 : index
    %98 = vector.load %arg1[%c0_157, %c3_158, %c2_159, %c0_160] : memref<1x18x18x2xf32, #tpu.memory_space<vmem>>, vector<1x1x15x2xf32>
    %99 = vector.shape_cast %98 : vector<1x1x15x2xf32> to vector<15x2xf32>
    %c0_161 = arith.constant 0 : index
    %c12_162 = arith.constant 12 : index
    %100 = vector.load %arg18[%c0_161, %c12_162] : memref<15x32xf32, #tpu.memory_space<vmem>>, vector<15x2xf32>
    tpu.vector_store %arg18[%c0_161, %c12_162], %99 {strides = array<i32>} : memref<15x32xf32, #tpu.memory_space<vmem>>, vector<15x2xf32>,
    %c0_163 = arith.constant 0 : index
    %c3_164 = arith.constant 3 : index
    %c3_165 = arith.constant 3 : index
    %c0_166 = arith.constant 0 : index
    %101 = vector.load %arg1[%c0_163, %c3_164, %c3_165, %c0_166] : memref<1x18x18x2xf32, #tpu.memory_space<vmem>>, vector<1x1x15x2xf32>
    %102 = vector.shape_cast %101 : vector<1x1x15x2xf32> to vector<15x2xf32>
    %c0_167 = arith.constant 0 : index
    %c14_168 = arith.constant 14 : index
    %103 = vector.load %arg18[%c0_167, %c14_168] : memref<15x32xf32, #tpu.memory_space<vmem>>, vector<15x2xf32>
    tpu.vector_store %arg18[%c0_167, %c14_168], %102 {strides = array<i32>} : memref<15x32xf32, #tpu.memory_space<vmem>>, vector<15x2xf32>,
    %c0_169 = arith.constant 0 : index
    %c4_170 = arith.constant 4 : index
    %c0_171 = arith.constant 0 : index
    %c0_172 = arith.constant 0 : index
    %104 = vector.load %arg1[%c0_169, %c4_170, %c0_171, %c0_172] : memref<1x18x18x2xf32, #tpu.memory_space<vmem>>, vector<1x1x15x2xf32>
    %105 = vector.shape_cast %104 : vector<1x1x15x2xf32> to vector<15x2xf32>
    %c0_173 = arith.constant 0 : index
    %c16_174 = arith.constant 16 : index
    %106 = vector.load %arg18[%c0_173, %c16_174] : memref<15x32xf32, #tpu.memory_space<vmem>>, vector<15x2xf32>
    tpu.vector_store %arg18[%c0_173, %c16_174], %105 {strides = array<i32>} : memref<15x32xf32, #tpu.memory_space<vmem>>, vector<15x2xf32>,
    %c0_175 = arith.constant 0 : index
    %c4_176 = arith.constant 4 : index
    %c1_177 = arith.constant 1 : index
    %c0_178 = arith.constant 0 : index
    %107 = vector.load %arg1[%c0_175, %c4_176, %c1_177, %c0_178] : memref<1x18x18x2xf32, #tpu.memory_space<vmem>>, vector<1x1x15x2xf32>
    %108 = vector.shape_cast %107 : vector<1x1x15x2xf32> to vector<15x2xf32>
    %c0_179 = arith.constant 0 : index
    %c18_180 = arith.constant 18 : index
    %109 = vector.load %arg18[%c0_179, %c18_180] : memref<15x32xf32, #tpu.memory_space<vmem>>, vector<15x2xf32>
    tpu.vector_store %arg18[%c0_179, %c18_180], %108 {strides = array<i32>} : memref<15x32xf32, #tpu.memory_space<vmem>>, vector<15x2xf32>,
    %c0_181 = arith.constant 0 : index
    %c4_182 = arith.constant 4 : index
    %c2_183 = arith.constant 2 : index
    %c0_184 = arith.constant 0 : index
    %110 = vector.load %arg1[%c0_181, %c4_182, %c2_183, %c0_184] : memref<1x18x18x2xf32, #tpu.memory_space<vmem>>, vector<1x1x15x2xf32>
    %111 = vector.shape_cast %110 : vector<1x1x15x2xf32> to vector<15x2xf32>
    %c0_185 = arith.constant 0 : index
    %c20_186 = arith.constant 20 : index
    %112 = vector.load %arg18[%c0_185, %c20_186] : memref<15x32xf32, #tpu.memory_space<vmem>>, vector<15x2xf32>
    tpu.vector_store %arg18[%c0_185, %c20_186], %111 {strides = array<i32>} : memref<15x32xf32, #tpu.memory_space<vmem>>, vector<15x2xf32>,
    %c0_187 = arith.constant 0 : index
    %c4_188 = arith.constant 4 : index
    %c3_189 = arith.constant 3 : index
    %c0_190 = arith.constant 0 : index
    %113 = vector.load %arg1[%c0_187, %c4_188, %c3_189, %c0_190] : memref<1x18x18x2xf32, #tpu.memory_space<vmem>>, vector<1x1x15x2xf32>
    %114 = vector.shape_cast %113 : vector<1x1x15x2xf32> to vector<15x2xf32>
    %c0_191 = arith.constant 0 : index
    %c22_192 = arith.constant 22 : index
    %115 = vector.load %arg18[%c0_191, %c22_192] : memref<15x32xf32, #tpu.memory_space<vmem>>, vector<15x2xf32>
    tpu.vector_store %arg18[%c0_191, %c22_192], %114 {strides = array<i32>} : memref<15x32xf32, #tpu.memory_space<vmem>>, vector<15x2xf32>,
    %c0_193 = arith.constant 0 : index
    %c5 = arith.constant 5 : index
    %c0_194 = arith.constant 0 : index
    %c0_195 = arith.constant 0 : index
    %116 = vector.load %arg1[%c0_193, %c5, %c0_194, %c0_195] : memref<1x18x18x2xf32, #tpu.memory_space<vmem>>, vector<1x1x15x2xf32>
    %117 = vector.shape_cast %116 : vector<1x1x15x2xf32> to vector<15x2xf32>
    %c0_196 = arith.constant 0 : index
    %c24_197 = arith.constant 24 : index
    %118 = vector.load %arg18[%c0_196, %c24_197] : memref<15x32xf32, #tpu.memory_space<vmem>>, vector<15x2xf32>
    tpu.vector_store %arg18[%c0_196, %c24_197], %117 {strides = array<i32>} : memref<15x32xf32, #tpu.memory_space<vmem>>, vector<15x2xf32>,
    %c0_198 = arith.constant 0 : index
    %c5_199 = arith.constant 5 : index
    %c1_200 = arith.constant 1 : index
    %c0_201 = arith.constant 0 : index
    %119 = vector.load %arg1[%c0_198, %c5_199, %c1_200, %c0_201] : memref<1x18x18x2xf32, #tpu.memory_space<vmem>>, vector<1x1x15x2xf32>
    %120 = vector.shape_cast %119 : vector<1x1x15x2xf32> to vector<15x2xf32>
    %c0_202 = arith.constant 0 : index
    %c26_203 = arith.constant 26 : index
    %121 = vector.load %arg18[%c0_202, %c26_203] : memref<15x32xf32, #tpu.memory_space<vmem>>, vector<15x2xf32>
    tpu.vector_store %arg18[%c0_202, %c26_203], %120 {strides = array<i32>} : memref<15x32xf32, #tpu.memory_space<vmem>>, vector<15x2xf32>,
    %c0_204 = arith.constant 0 : index
    %c5_205 = arith.constant 5 : index
    %c2_206 = arith.constant 2 : index
    %c0_207 = arith.constant 0 : index
    %122 = vector.load %arg1[%c0_204, %c5_205, %c2_206, %c0_207] : memref<1x18x18x2xf32, #tpu.memory_space<vmem>>, vector<1x1x15x2xf32>
    %123 = vector.shape_cast %122 : vector<1x1x15x2xf32> to vector<15x2xf32>
    %c0_208 = arith.constant 0 : index
    %c28_209 = arith.constant 28 : index
    %124 = vector.load %arg18[%c0_208, %c28_209] : memref<15x32xf32, #tpu.memory_space<vmem>>, vector<15x2xf32>
    tpu.vector_store %arg18[%c0_208, %c28_209], %123 {strides = array<i32>} : memref<15x32xf32, #tpu.memory_space<vmem>>, vector<15x2xf32>,
    %c0_210 = arith.constant 0 : index
    %c5_211 = arith.constant 5 : index
    %c3_212 = arith.constant 3 : index
    %c0_213 = arith.constant 0 : index
    %125 = vector.load %arg1[%c0_210, %c5_211, %c3_212, %c0_213] : memref<1x18x18x2xf32, #tpu.memory_space<vmem>>, vector<1x1x15x2xf32>
    %126 = vector.shape_cast %125 : vector<1x1x15x2xf32> to vector<15x2xf32>
    %c0_214 = arith.constant 0 : index
    %c30_215 = arith.constant 30 : index
    %127 = vector.load %arg18[%c0_214, %c30_215] : memref<15x32xf32, #tpu.memory_space<vmem>>, vector<15x2xf32>
    tpu.vector_store %arg18[%c0_214, %c30_215], %126 {strides = array<i32>} : memref<15x32xf32, #tpu.memory_space<vmem>>, vector<15x2xf32>,
    %c0_216 = arith.constant 0 : index
    %c0_217 = arith.constant 0 : index
    %128 = vector.load %arg18[%c0_216, %c0_217] : memref<15x32xf32, #tpu.memory_space<vmem>>, vector<15x32xf32>
    %129 = arith.truncf %128 : vector<15x32xf32> to vector<15x32xbf16>
    %cst_218 = arith.constant dense<0.000000e+00> : vector<15x8xf32>
    %130 = tpu.matmul %129, %4, %cst_218 {dimension_numbers = #tpu.dot_dimension_numbers<[1], [0], [0], [1], [0, 0, 1, 1], [], []>} : vector<15x32xbf16>, vector<32x8xbf16>, vector<15x8xf32> -> vector<15x8xf32>
    %cst_219 = arith.constant dense<0.000000e+00> : vector<8x8xf32>
    %131 = tpu.matmul %5, %130, %cst_219 {dimension_numbers = #tpu.dot_dimension_numbers<[1], [0], [0], [1], [0, 0, 1, 1], [], []>} : vector<8x15xf32>, vector<15x8xf32>, vector<8x8xf32> -> vector<8x8xf32>
    %132 = vector.broadcast %6 : vector<1x8xf32> to vector<8x8xf32>
    %133 = arith.mulf %131, %132 : vector<8x8xf32>
    %134 = vector.broadcast %7 : vector<1x8xf32> to vector<8x8xf32>
    %135 = arith.addf %133, %134 : vector<8x8xf32>
    %cst_220 = arith.constant 0.000000e+00 : f32
    %136 = vector.broadcast %cst_220 : f32 to vector<8x8xf32>
    %137 = arith.cmpf oge, %135, %136 : vector<8x8xf32>
    %cst_221 = arith.constant 2.000000e-01 : f32
    %138 = vector.broadcast %cst_221 : f32 to vector<8x8xf32>
    %139 = arith.mulf %138, %135 : vector<8x8xf32>
    %140 = arith.select %137, %135, %139 : vector<8x8xi1>, vector<8x8xf32>
    %c0_222 = arith.constant 0 : index
    %c2_223 = arith.constant 2 : index
    %c1_224 = arith.constant 1 : index
    %c0_225 = arith.constant 0 : index
    %141 = vector.load %arg16[%c0_222, %c2_223, %c1_224, %c0_225] : memref<1x10x10x8xf32, #tpu.memory_space<vmem>>, vector<1x1x8x8xf32>
    %142 = vector.shape_cast %141 : vector<1x1x8x8xf32> to vector<8x8xf32>
    %143 = vector.shape_cast %140 : vector<8x8xf32> to vector<1x1x8x8xf32>
    tpu.vector_store %arg16[%c0_222, %c2_223, %c1_224, %c0_225], %143 {strides = array<i32>} : memref<1x10x10x8xf32, #tpu.memory_space<vmem>>, vector<1x1x8x8xf32>,
    %c0_226 = arith.constant 0 : index
    %c4_227 = arith.constant 4 : index
    %c0_228 = arith.constant 0 : index
    %c0_229 = arith.constant 0 : index
    %144 = vector.load %arg1[%c0_226, %c4_227, %c0_228, %c0_229] : memref<1x18x18x2xf32, #tpu.memory_space<vmem>>, vector<1x1x15x2xf32>
    %145 = vector.shape_cast %144 : vector<1x1x15x2xf32> to vector<15x2xf32>
    %c0_230 = arith.constant 0 : index
    %c0_231 = arith.constant 0 : index
    %146 = vector.load %arg18[%c0_230, %c0_231] : memref<15x32xf32, #tpu.memory_space<vmem>>, vector<15x2xf32>
    tpu.vector_store %arg18[%c0_230, %c0_231], %145 {strides = array<i32>} : memref<15x32xf32, #tpu.memory_space<vmem>>, vector<15x2xf32>,
    %c0_232 = arith.constant 0 : index
    %c4_233 = arith.constant 4 : index
    %c1_234 = arith.constant 1 : index
    %c0_235 = arith.constant 0 : index
    %147 = vector.load %arg1[%c0_232, %c4_233, %c1_234, %c0_235] : memref<1x18x18x2xf32, #tpu.memory_space<vmem>>, vector<1x1x15x2xf32>
    %148 = vector.shape_cast %147 : vector<1x1x15x2xf32> to vector<15x2xf32>
    %c0_236 = arith.constant 0 : index
    %c2_237 = arith.constant 2 : index
    %149 = vector.load %arg18[%c0_236, %c2_237] : memref<15x32xf32, #tpu.memory_space<vmem>>, vector<15x2xf32>
    tpu.vector_store %arg18[%c0_236, %c2_237], %148 {strides = array<i32>} : memref<15x32xf32, #tpu.memory_space<vmem>>, vector<15x2xf32>,
    %c0_238 = arith.constant 0 : index
    %c4_239 = arith.constant 4 : index
    %c2_240 = arith.constant 2 : index
    %c0_241 = arith.constant 0 : index
    %150 = vector.load %arg1[%c0_238, %c4_239, %c2_240, %c0_241] : memref<1x18x18x2xf32, #tpu.memory_space<vmem>>, vector<1x1x15x2xf32>
    %151 = vector.shape_cast %150 : vector<1x1x15x2xf32> to vector<15x2xf32>
    %c0_242 = arith.constant 0 : index
    %c4_243 = arith.constant 4 : index
    %152 = vector.load %arg18[%c0_242, %c4_243] : memref<15x32xf32, #tpu.memory_space<vmem>>, vector<15x2xf32>
    tpu.vector_store %arg18[%c0_242, %c4_243], %151 {strides = array<i32>} : memref<15x32xf32, #tpu.memory_space<vmem>>, vector<15x2xf32>,
    %c0_244 = arith.constant 0 : index
    %c4_245 = arith.constant 4 : index
    %c3_246 = arith.constant 3 : index
    %c0_247 = arith.constant 0 : index
    %153 = vector.load %arg1[%c0_244, %c4_245, %c3_246, %c0_247] : memref<1x18x18x2xf32, #tpu.memory_space<vmem>>, vector<1x1x15x2xf32>
    %154 = vector.shape_cast %153 : vector<1x1x15x2xf32> to vector<15x2xf32>
    %c0_248 = arith.constant 0 : index
    %c6_249 = arith.constant 6 : index
    %155 = vector.load %arg18[%c0_248, %c6_249] : memref<15x32xf32, #tpu.memory_space<vmem>>, vector<15x2xf32>
    tpu.vector_store %arg18[%c0_248, %c6_249], %154 {strides = array<i32>} : memref<15x32xf32, #tpu.memory_space<vmem>>, vector<15x2xf32>,
    %c0_250 = arith.constant 0 : index
    %c5_251 = arith.constant 5 : index
    %c0_252 = arith.constant 0 : index
    %c0_253 = arith.constant 0 : index
    %156 = vector.load %arg1[%c0_250, %c5_251, %c0_252, %c0_253] : memref<1x18x18x2xf32, #tpu.memory_space<vmem>>, vector<1x1x15x2xf32>
    %157 = vector.shape_cast %156 : vector<1x1x15x2xf32> to vector<15x2xf32>
    %c0_254 = arith.constant 0 : index
    %c8_255 = arith.constant 8 : index
    %158 = vector.load %arg18[%c0_254, %c8_255] : memref<15x32xf32, #tpu.memory_space<vmem>>, vector<15x2xf32>
    tpu.vector_store %arg18[%c0_254, %c8_255], %157 {strides = array<i32>} : memref<15x32xf32, #tpu.memory_space<vmem>>, vector<15x2xf32>,
    %c0_256 = arith.constant 0 : index
    %c5_257 = arith.constant 5 : index
    %c1_258 = arith.constant 1 : index
    %c0_259 = arith.constant 0 : index
    %159 = vector.load %arg1[%c0_256, %c5_257, %c1_258, %c0_259] : memref<1x18x18x2xf32, #tpu.memory_space<vmem>>, vector<1x1x15x2xf32>
    %160 = vector.shape_cast %159 : vector<1x1x15x2xf32> to vector<15x2xf32>
    %c0_260 = arith.constant 0 : index
    %c10_261 = arith.constant 10 : index
    %161 = vector.load %arg18[%c0_260, %c10_261] : memref<15x32xf32, #tpu.memory_space<vmem>>, vector<15x2xf32>
    tpu.vector_store %arg18[%c0_260, %c10_261], %160 {strides = array<i32>} : memref<15x32xf32, #tpu.memory_space<vmem>>, vector<15x2xf32>,
    %c0_262 = arith.constant 0 : index
    %c5_263 = arith.constant 5 : index
    %c2_264 = arith.constant 2 : index
    %c0_265 = arith.constant 0 : index
    %162 = vector.load %arg1[%c0_262, %c5_263, %c2_264, %c0_265] : memref<1x18x18x2xf32, #tpu.memory_space<vmem>>, vector<1x1x15x2xf32>
    %163 = vector.shape_cast %162 : vector<1x1x15x2xf32> to vector<15x2xf32>
    %c0_266 = arith.constant 0 : index
    %c12_267 = arith.constant 12 : index
    %164 = vector.load %arg18[%c0_266, %c12_267] : memref<15x32xf32, #tpu.memory_space<vmem>>, vector<15x2xf32>
    tpu.vector_store %arg18[%c0_266, %c12_267], %163 {strides = array<i32>} : memref<15x32xf32, #tpu.memory_space<vmem>>, vector<15x2xf32>,
    %c0_268 = arith.constant 0 : index
    %c5_269 = arith.constant 5 : index
    %c3_270 = arith.constant 3 : index
    %c0_271 = arith.constant 0 : index
    %165 = vector.load %arg1[%c0_268, %c5_269, %c3_270, %c0_271] : memref<1x18x18x2xf32, #tpu.memory_space<vmem>>, vector<1x1x15x2xf32>
    %166 = vector.shape_cast %165 : vector<1x1x15x2xf32> to vector<15x2xf32>
    %c0_272 = arith.constant 0 : index
    %c14_273 = arith.constant 14 : index
    %167 = vector.load %arg18[%c0_272, %c14_273] : memref<15x32xf32, #tpu.memory_space<vmem>>, vector<15x2xf32>
    tpu.vector_store %arg18[%c0_272, %c14_273], %166 {strides = array<i32>} : memref<15x32xf32, #tpu.memory_space<vmem>>, vector<15x2xf32>,
    %c0_274 = arith.constant 0 : index
    %c6_275 = arith.constant 6 : index
    %c0_276 = arith.constant 0 : index
    %c0_277 = arith.constant 0 : index
    %168 = vector.load %arg1[%c0_274, %c6_275, %c0_276, %c0_277] : memref<1x18x18x2xf32, #tpu.memory_space<vmem>>, vector<1x1x15x2xf32>
    %169 = vector.shape_cast %168 : vector<1x1x15x2xf32> to vector<15x2xf32>
    %c0_278 = arith.constant 0 : index
    %c16_279 = arith.constant 16 : index
    %170 = vector.load %arg18[%c0_278, %c16_279] : memref<15x32xf32, #tpu.memory_space<vmem>>, vector<15x2xf32>
    tpu.vector_store %arg18[%c0_278, %c16_279], %169 {strides = array<i32>} : memref<15x32xf32, #tpu.memory_space<vmem>>, vector<15x2xf32>,
    %c0_280 = arith.constant 0 : index
    %c6_281 = arith.constant 6 : index
    %c1_282 = arith.constant 1 : index
    %c0_283 = arith.constant 0 : index
    %171 = vector.load %arg1[%c0_280, %c6_281, %c1_282, %c0_283] : memref<1x18x18x2xf32, #tpu.memory_space<vmem>>, vector<1x1x15x2xf32>
    %172 = vector.shape_cast %171 : vector<1x1x15x2xf32> to vector<15x2xf32>
    %c0_284 = arith.constant 0 : index
    %c18_285 = arith.constant 18 : index
    %173 = vector.load %arg18[%c0_284, %c18_285] : memref<15x32xf32, #tpu.memory_space<vmem>>, vector<15x2xf32>
    tpu.vector_store %arg18[%c0_284, %c18_285], %172 {strides = array<i32>} : memref<15x32xf32, #tpu.memory_space<vmem>>, vector<15x2xf32>,
    %c0_286 = arith.constant 0 : index
    %c6_287 = arith.constant 6 : index
    %c2_288 = arith.constant 2 : index
    %c0_289 = arith.constant 0 : index
    %174 = vector.load %arg1[%c0_286, %c6_287, %c2_288, %c0_289] : memref<1x18x18x2xf32, #tpu.memory_space<vmem>>, vector<1x1x15x2xf32>
    %175 = vector.shape_cast %174 : vector<1x1x15x2xf32> to vector<15x2xf32>
    %c0_290 = arith.constant 0 : index
    %c20_291 = arith.constant 20 : index
    %176 = vector.load %arg18[%c0_290, %c20_291] : memref<15x32xf32, #tpu.memory_space<vmem>>, vector<15x2xf32>
    tpu.vector_store %arg18[%c0_290, %c20_291], %175 {strides = array<i32>} : memref<15x32xf32, #tpu.memory_space<vmem>>, vector<15x2xf32>,
    %c0_292 = arith.constant 0 : index
    %c6_293 = arith.constant 6 : index
    %c3_294 = arith.constant 3 : index
    %c0_295 = arith.constant 0 : index
    %177 = vector.load %arg1[%c0_292, %c6_293, %c3_294, %c0_295] : memref<1x18x18x2xf32, #tpu.memory_space<vmem>>, vector<1x1x15x2xf32>
    %178 = vector.shape_cast %177 : vector<1x1x15x2xf32> to vector<15x2xf32>
    %c0_296 = arith.constant 0 : index
    %c22_297 = arith.constant 22 : index
    %179 = vector.load %arg18[%c0_296, %c22_297] : memref<15x32xf32, #tpu.memory_space<vmem>>, vector<15x2xf32>
    tpu.vector_store %arg18[%c0_296, %c22_297], %178 {strides = array<i32>} : memref<15x32xf32, #tpu.memory_space<vmem>>, vector<15x2xf32>,
    %c0_298 = arith.constant 0 : index
    %c7 = arith.constant 7 : index
    %c0_299 = arith.constant 0 : index
    %c0_300 = arith.constant 0 : index
    %180 = vector.load %arg1[%c0_298, %c7, %c0_299, %c0_300] : memref<1x18x18x2xf32, #tpu.memory_space<vmem>>, vector<1x1x15x2xf32>
    %181 = vector.shape_cast %180 : vector<1x1x15x2xf32> to vector<15x2xf32>
    %c0_301 = arith.constant 0 : index
    %c24_302 = arith.constant 24 : index
    %182 = vector.load %arg18[%c0_301, %c24_302] : memref<15x32xf32, #tpu.memory_space<vmem>>, vector<15x2xf32>
    tpu.vector_store %arg18[%c0_301, %c24_302], %181 {strides = array<i32>} : memref<15x32xf32, #tpu.memory_space<vmem>>, vector<15x2xf32>,
    %c0_303 = arith.constant 0 : index
    %c7_304 = arith.constant 7 : index
    %c1_305 = arith.constant 1 : index
    %c0_306 = arith.constant 0 : index
    %183 = vector.load %arg1[%c0_303, %c7_304, %c1_305, %c0_306] : memref<1x18x18x2xf32, #tpu.memory_space<vmem>>, vector<1x1x15x2xf32>
    %184 = vector.shape_cast %183 : vector<1x1x15x2xf32> to vector<15x2xf32>
    %c0_307 = arith.constant 0 : index
    %c26_308 = arith.constant 26 : index
    %185 = vector.load %arg18[%c0_307, %c26_308] : memref<15x32xf32, #tpu.memory_space<vmem>>, vector<15x2xf32>
    tpu.vector_store %arg18[%c0_307, %c26_308], %184 {strides = array<i32>} : memref<15x32xf32, #tpu.memory_space<vmem>>, vector<15x2xf32>,
    %c0_309 = arith.constant 0 : index
    %c7_310 = arith.constant 7 : index
    %c2_311 = arith.constant 2 : index
    %c0_312 = arith.constant 0 : index
    %186 = vector.load %arg1[%c0_309, %c7_310, %c2_311, %c0_312] : memref<1x18x18x2xf32, #tpu.memory_space<vmem>>, vector<1x1x15x2xf32>
    %187 = vector.shape_cast %186 : vector<1x1x15x2xf32> to vector<15x2xf32>
    %c0_313 = arith.constant 0 : index
    %c28_314 = arith.constant 28 : index
    %188 = vector.load %arg18[%c0_313, %c28_314] : memref<15x32xf32, #tpu.memory_space<vmem>>, vector<15x2xf32>
    tpu.vector_store %arg18[%c0_313, %c28_314], %187 {strides = array<i32>} : memref<15x32xf32, #tpu.memory_space<vmem>>, vector<15x2xf32>,
    %c0_315 = arith.constant 0 : index
    %c7_316 = arith.constant 7 : index
    %c3_317 = arith.constant 3 : index
    %c0_318 = arith.constant 0 : index
    %189 = vector.load %arg1[%c0_315, %c7_316, %c3_317, %c0_318] : memref<1x18x18x2xf32, #tpu.memory_space<vmem>>, vector<1x1x15x2xf32>
    %190 = vector.shape_cast %189 : vector<1x1x15x2xf32> to vector<15x2xf32>
    %c0_319 = arith.constant 0 : index
    %c30_320 = arith.constant 30 : index
    %191 = vector.load %arg18[%c0_319, %c30_320] : memref<15x32xf32, #tpu.memory_space<vmem>>, vector<15x2xf32>
    tpu.vector_store %arg18[%c0_319, %c30_320], %190 {strides = array<i32>} : memref<15x32xf32, #tpu.memory_space<vmem>>, vector<15x2xf32>,
    %c0_321 = arith.constant 0 : index
    %c0_322 = arith.constant 0 : index
    %192 = vector.load %arg18[%c0_321, %c0_322] : memref<15x32xf32, #tpu.memory_space<vmem>>, vector<15x32xf32>
    %193 = arith.truncf %192 : vector<15x32xf32> to vector<15x32xbf16>
    %cst_323 = arith.constant dense<0.000000e+00> : vector<15x8xf32>
    %194 = tpu.matmul %193, %4, %cst_323 {dimension_numbers = #tpu.dot_dimension_numbers<[1], [0], [0], [1], [0, 0, 1, 1], [], []>} : vector<15x32xbf16>, vector<32x8xbf16>, vector<15x8xf32> -> vector<15x8xf32>
    %cst_324 = arith.constant dense<0.000000e+00> : vector<8x8xf32>
    %195 = tpu.matmul %5, %194, %cst_324 {dimension_numbers = #tpu.dot_dimension_numbers<[1], [0], [0], [1], [0, 0, 1, 1], [], []>} : vector<8x15xf32>, vector<15x8xf32>, vector<8x8xf32> -> vector<8x8xf32>
    %196 = vector.broadcast %6 : vector<1x8xf32> to vector<8x8xf32>
    %197 = arith.mulf %195, %196 : vector<8x8xf32>
    %198 = vector.broadcast %7 : vector<1x8xf32> to vector<8x8xf32>
    %199 = arith.addf %197, %198 : vector<8x8xf32>
    %cst_325 = arith.constant 0.000000e+00 : f32
    %200 = vector.broadcast %cst_325 : f32 to vector<8x8xf32>
    %201 = arith.cmpf oge, %199, %200 : vector<8x8xf32>
    %cst_326 = arith.constant 2.000000e-01 : f32
    %202 = vector.broadcast %cst_326 : f32 to vector<8x8xf32>
    %203 = arith.mulf %202, %199 : vector<8x8xf32>
    %204 = arith.select %201, %199, %203 : vector<8x8xi1>, vector<8x8xf32>
    %c0_327 = arith.constant 0 : index
    %c3_328 = arith.constant 3 : index
    %c1_329 = arith.constant 1 : index
    %c0_330 = arith.constant 0 : index
    %205 = vector.load %arg16[%c0_327, %c3_328, %c1_329, %c0_330] : memref<1x10x10x8xf32, #tpu.memory_space<vmem>>, vector<1x1x8x8xf32>
    %206 = vector.shape_cast %205 : vector<1x1x8x8xf32> to vector<8x8xf32>
    %207 = vector.shape_cast %204 : vector<8x8xf32> to vector<1x1x8x8xf32>
    tpu.vector_store %arg16[%c0_327, %c3_328, %c1_329, %c0_330], %207 {strides = array<i32>} : memref<1x10x10x8xf32, #tpu.memory_space<vmem>>, vector<1x1x8x8xf32>,
    %c0_331 = arith.constant 0 : index
    %c6_332 = arith.constant 6 : index
    %c0_333 = arith.constant 0 : index
    %c0_334 = arith.constant 0 : index
    %208 = vector.load %arg1[%c0_331, %c6_332, %c0_333, %c0_334] : memref<1x18x18x2xf32, #tpu.memory_space<vmem>>, vector<1x1x15x2xf32>
    %209 = vector.shape_cast %208 : vector<1x1x15x2xf32> to vector<15x2xf32>
    %c0_335 = arith.constant 0 : index
    %c0_336 = arith.constant 0 : index
    %210 = vector.load %arg18[%c0_335, %c0_336] : memref<15x32xf32, #tpu.memory_space<vmem>>, vector<15x2xf32>
    tpu.vector_store %arg18[%c0_335, %c0_336], %209 {strides = array<i32>} : memref<15x32xf32, #tpu.memory_space<vmem>>, vector<15x2xf32>,
    %c0_337 = arith.constant 0 : index
    %c6_338 = arith.constant 6 : index
    %c1_339 = arith.constant 1 : index
    %c0_340 = arith.constant 0 : index
    %211 = vector.load %arg1[%c0_337, %c6_338, %c1_339, %c0_340] : memref<1x18x18x2xf32, #tpu.memory_space<vmem>>, vector<1x1x15x2xf32>
    %212 = vector.shape_cast %211 : vector<1x1x15x2xf32> to vector<15x2xf32>
    %c0_341 = arith.constant 0 : index
    %c2_342 = arith.constant 2 : index
    %213 = vector.load %arg18[%c0_341, %c2_342] : memref<15x32xf32, #tpu.memory_space<vmem>>, vector<15x2xf32>
    tpu.vector_store %arg18[%c0_341, %c2_342], %212 {strides = array<i32>} : memref<15x32xf32, #tpu.memory_space<vmem>>, vector<15x2xf32>,
    %c0_343 = arith.constant 0 : index
    %c6_344 = arith.constant 6 : index
    %c2_345 = arith.constant 2 : index
    %c0_346 = arith.constant 0 : index
    %214 = vector.load %arg1[%c0_343, %c6_344, %c2_345, %c0_346] : memref<1x18x18x2xf32, #tpu.memory_space<vmem>>, vector<1x1x15x2xf32>
    %215 = vector.shape_cast %214 : vector<1x1x15x2xf32> to vector<15x2xf32>
    %c0_347 = arith.constant 0 : index
    %c4_348 = arith.constant 4 : index
    %216 = vector.load %arg18[%c0_347, %c4_348] : memref<15x32xf32, #tpu.memory_space<vmem>>, vector<15x2xf32>
    tpu.vector_store %arg18[%c0_347, %c4_348], %215 {strides = array<i32>} : memref<15x32xf32, #tpu.memory_space<vmem>>, vector<15x2xf32>,
    %c0_349 = arith.constant 0 : index
    %c6_350 = arith.constant 6 : index
    %c3_351 = arith.constant 3 : index
    %c0_352 = arith.constant 0 : index
    %217 = vector.load %arg1[%c0_349, %c6_350, %c3_351, %c0_352] : memref<1x18x18x2xf32, #tpu.memory_space<vmem>>, vector<1x1x15x2xf32>
    %218 = vector.shape_cast %217 : vector<1x1x15x2xf32> to vector<15x2xf32>
    %c0_353 = arith.constant 0 : index
    %c6_354 = arith.constant 6 : index
    %219 = vector.load %arg18[%c0_353, %c6_354] : memref<15x32xf32, #tpu.memory_space<vmem>>, vector<15x2xf32>
    tpu.vector_store %arg18[%c0_353, %c6_354], %218 {strides = array<i32>} : memref<15x32xf32, #tpu.memory_space<vmem>>, vector<15x2xf32>,
    %c0_355 = arith.constant 0 : index
    %c7_356 = arith.constant 7 : index
    %c0_357 = arith.constant 0 : index
    %c0_358 = arith.constant 0 : index
    %220 = vector.load %arg1[%c0_355, %c7_356, %c0_357, %c0_358] : memref<1x18x18x2xf32, #tpu.memory_space<vmem>>, vector<1x1x15x2xf32>
    %221 = vector.shape_cast %220 : vector<1x1x15x2xf32> to vector<15x2xf32>
    %c0_359 = arith.constant 0 : index
    %c8_360 = arith.constant 8 : index
    %222 = vector.load %arg18[%c0_359, %c8_360] : memref<15x32xf32, #tpu.memory_space<vmem>>, vector<15x2xf32>
    tpu.vector_store %arg18[%c0_359, %c8_360], %221 {strides = array<i32>} : memref<15x32xf32, #tpu.memory_space<vmem>>, vector<15x2xf32>,
    %c0_361 = arith.constant 0 : index
    %c7_362 = arith.constant 7 : index
    %c1_363 = arith.constant 1 : index
    %c0_364 = arith.constant 0 : index
    %223 = vector.load %arg1[%c0_361, %c7_362, %c1_363, %c0_364] : memref<1x18x18x2xf32, #tpu.memory_space<vmem>>, vector<1x1x15x2xf32>
    %224 = vector.shape_cast %223 : vector<1x1x15x2xf32> to vector<15x2xf32>
    %c0_365 = arith.constant 0 : index
    %c10_366 = arith.constant 10 : index
    %225 = vector.load %arg18[%c0_365, %c10_366] : memref<15x32xf32, #tpu.memory_space<vmem>>, vector<15x2xf32>
    tpu.vector_store %arg18[%c0_365, %c10_366], %224 {strides = array<i32>} : memref<15x32xf32, #tpu.memory_space<vmem>>, vector<15x2xf32>,
    %c0_367 = arith.constant 0 : index
    %c7_368 = arith.constant 7 : index
    %c2_369 = arith.constant 2 : index
    %c0_370 = arith.constant 0 : index
    %226 = vector.load %arg1[%c0_367, %c7_368, %c2_369, %c0_370] : memref<1x18x18x2xf32, #tpu.memory_space<vmem>>, vector<1x1x15x2xf32>
    %227 = vector.shape_cast %226 : vector<1x1x15x2xf32> to vector<15x2xf32>
    %c0_371 = arith.constant 0 : index
    %c12_372 = arith.constant 12 : index
    %228 = vector.load %arg18[%c0_371, %c12_372] : memref<15x32xf32, #tpu.memory_space<vmem>>, vector<15x2xf32>
    tpu.vector_store %arg18[%c0_371, %c12_372], %227 {strides = array<i32>} : memref<15x32xf32, #tpu.memory_space<vmem>>, vector<15x2xf32>,
    %c0_373 = arith.constant 0 : index
    %c7_374 = arith.constant 7 : index
    %c3_375 = arith.constant 3 : index
    %c0_376 = arith.constant 0 : index
    %229 = vector.load %arg1[%c0_373, %c7_374, %c3_375, %c0_376] : memref<1x18x18x2xf32, #tpu.memory_space<vmem>>, vector<1x1x15x2xf32>
    %230 = vector.shape_cast %229 : vector<1x1x15x2xf32> to vector<15x2xf32>
    %c0_377 = arith.constant 0 : index
    %c14_378 = arith.constant 14 : index
    %231 = vector.load %arg18[%c0_377, %c14_378] : memref<15x32xf32, #tpu.memory_space<vmem>>, vector<15x2xf32>
    tpu.vector_store %arg18[%c0_377, %c14_378], %230 {strides = array<i32>} : memref<15x32xf32, #tpu.memory_space<vmem>>, vector<15x2xf32>,
    %c0_379 = arith.constant 0 : index
    %c8_380 = arith.constant 8 : index
    %c0_381 = arith.constant 0 : index
    %c0_382 = arith.constant 0 : index
    %232 = vector.load %arg1[%c0_379, %c8_380, %c0_381, %c0_382] : memref<1x18x18x2xf32, #tpu.memory_space<vmem>>, vector<1x1x15x2xf32>
    %233 = vector.shape_cast %232 : vector<1x1x15x2xf32> to vector<15x2xf32>
    %c0_383 = arith.constant 0 : index
    %c16_384 = arith.constant 16 : index
    %234 = vector.load %arg18[%c0_383, %c16_384] : memref<15x32xf32, #tpu.memory_space<vmem>>, vector<15x2xf32>
    tpu.vector_store %arg18[%c0_383, %c16_384], %233 {strides = array<i32>} : memref<15x32xf32, #tpu.memory_space<vmem>>, vector<15x2xf32>,
    %c0_385 = arith.constant 0 : index
    %c8_386 = arith.constant 8 : index
    %c1_387 = arith.constant 1 : index
    %c0_388 = arith.constant 0 : index
    %235 = vector.load %arg1[%c0_385, %c8_386, %c1_387, %c0_388] : memref<1x18x18x2xf32, #tpu.memory_space<vmem>>, vector<1x1x15x2xf32>
    %236 = vector.shape_cast %235 : vector<1x1x15x2xf32> to vector<15x2xf32>
    %c0_389 = arith.constant 0 : index
    %c18_390 = arith.constant 18 : index
    %237 = vector.load %arg18[%c0_389, %c18_390] : memref<15x32xf32, #tpu.memory_space<vmem>>, vector<15x2xf32>
    tpu.vector_store %arg18[%c0_389, %c18_390], %236 {strides = array<i32>} : memref<15x32xf32, #tpu.memory_space<vmem>>, vector<15x2xf32>,
    %c0_391 = arith.constant 0 : index
    %c8_392 = arith.constant 8 : index
    %c2_393 = arith.constant 2 : index
    %c0_394 = arith.constant 0 : index
    %238 = vector.load %arg1[%c0_391, %c8_392, %c2_393, %c0_394] : memref<1x18x18x2xf32, #tpu.memory_space<vmem>>, vector<1x1x15x2xf32>
    %239 = vector.shape_cast %238 : vector<1x1x15x2xf32> to vector<15x2xf32>
    %c0_395 = arith.constant 0 : index
    %c20_396 = arith.constant 20 : index
    %240 = vector.load %arg18[%c0_395, %c20_396] : memref<15x32xf32, #tpu.memory_space<vmem>>, vector<15x2xf32>
    tpu.vector_store %arg18[%c0_395, %c20_396], %239 {strides = array<i32>} : memref<15x32xf32, #tpu.memory_space<vmem>>, vector<15x2xf32>,
    %c0_397 = arith.constant 0 : index
    %c8_398 = arith.constant 8 : index
    %c3_399 = arith.constant 3 : index
    %c0_400 = arith.constant 0 : index
    %241 = vector.load %arg1[%c0_397, %c8_398, %c3_399, %c0_400] : memref<1x18x18x2xf32, #tpu.memory_space<vmem>>, vector<1x1x15x2xf32>
    %242 = vector.shape_cast %241 : vector<1x1x15x2xf32> to vector<15x2xf32>
    %c0_401 = arith.constant 0 : index
    %c22_402 = arith.constant 22 : index
    %243 = vector.load %arg18[%c0_401, %c22_402] : memref<15x32xf32, #tpu.memory_space<vmem>>, vector<15x2xf32>
    tpu.vector_store %arg18[%c0_401, %c22_402], %242 {strides = array<i32>} : memref<15x32xf32, #tpu.memory_space<vmem>>, vector<15x2xf32>,
    %c0_403 = arith.constant 0 : index
    %c9 = arith.constant 9 : index
    %c0_404 = arith.constant 0 : index
    %c0_405 = arith.constant 0 : index
    %244 = vector.load %arg1[%c0_403, %c9, %c0_404, %c0_405] : memref<1x18x18x2xf32, #tpu.memory_space<vmem>>, vector<1x1x15x2xf32>
    %245 = vector.shape_cast %244 : vector<1x1x15x2xf32> to vector<15x2xf32>
    %c0_406 = arith.constant 0 : index
    %c24_407 = arith.constant 24 : index
    %246 = vector.load %arg18[%c0_406, %c24_407] : memref<15x32xf32, #tpu.memory_space<vmem>>, vector<15x2xf32>
    tpu.vector_store %arg18[%c0_406, %c24_407], %245 {strides = array<i32>} : memref<15x32xf32, #tpu.memory_space<vmem>>, vector<15x2xf32>,
    %c0_408 = arith.constant 0 : index
    %c9_409 = arith.constant 9 : index
    %c1_410 = arith.constant 1 : index
    %c0_411 = arith.constant 0 : index
    %247 = vector.load %arg1[%c0_408, %c9_409, %c1_410, %c0_411] : memref<1x18x18x2xf32, #tpu.memory_space<vmem>>, vector<1x1x15x2xf32>
    %248 = vector.shape_cast %247 : vector<1x1x15x2xf32> to vector<15x2xf32>
    %c0_412 = arith.constant 0 : index
    %c26_413 = arith.constant 26 : index
    %249 = vector.load %arg18[%c0_412, %c26_413] : memref<15x32xf32, #tpu.memory_space<vmem>>, vector<15x2xf32>
    tpu.vector_store %arg18[%c0_412, %c26_413], %248 {strides = array<i32>} : memref<15x32xf32, #tpu.memory_space<vmem>>, vector<15x2xf32>,
    %c0_414 = arith.constant 0 : index
    %c9_415 = arith.constant 9 : index
    %c2_416 = arith.constant 2 : index
    %c0_417 = arith.constant 0 : index
    %250 = vector.load %arg1[%c0_414, %c9_415, %c2_416, %c0_417] : memref<1x18x18x2xf32, #tpu.memory_space<vmem>>, vector<1x1x15x2xf32>
    %251 = vector.shape_cast %250 : vector<1x1x15x2xf32> to vector<15x2xf32>
    %c0_418 = arith.constant 0 : index
    %c28_419 = arith.constant 28 : index
    %252 = vector.load %arg18[%c0_418, %c28_419] : memref<15x32xf32, #tpu.memory_space<vmem>>, vector<15x2xf32>
    tpu.vector_store %arg18[%c0_418, %c28_419], %251 {strides = array<i32>} : memref<15x32xf32, #tpu.memory_space<vmem>>, vector<15x2xf32>,
    %c0_420 = arith.constant 0 : index
    %c9_421 = arith.constant 9 : index
    %c3_422 = arith.constant 3 : index
    %c0_423 = arith.constant 0 : index
    %253 = vector.load %arg1[%c0_420, %c9_421, %c3_422, %c0_423] : memref<1x18x18x2xf32, #tpu.memory_space<vmem>>, vector<1x1x15x2xf32>
    %254 = vector.shape_cast %253 : vector<1x1x15x2xf32> to vector<15x2xf32>
    %c0_424 = arith.constant 0 : index
    %c30_425 = arith.constant 30 : index
    %255 = vector.load %arg18[%c0_424, %c30_425] : memref<15x32xf32, #tpu.memory_space<vmem>>, vector<15x2xf32>
    tpu.vector_store %arg18[%c0_424, %c30_425], %254 {strides = array<i32>} : memref<15x32xf32, #tpu.memory_space<vmem>>, vector<15x2xf32>,
    %c0_426 = arith.constant 0 : index
    %c0_427 = arith.constant 0 : index
    %256 = vector.load %arg18[%c0_426, %c0_427] : memref<15x32xf32, #tpu.memory_space<vmem>>, vector<15x32xf32>
    %257 = arith.truncf %256 : vector<15x32xf32> to vector<15x32xbf16>
    %cst_428 = arith.constant dense<0.000000e+00> : vector<15x8xf32>
    %258 = tpu.matmul %257, %4, %cst_428 {dimension_numbers = #tpu.dot_dimension_numbers<[1], [0], [0], [1], [0, 0, 1, 1], [], []>} : vector<15x32xbf16>, vector<32x8xbf16>, vector<15x8xf32> -> vector<15x8xf32>
    %cst_429 = arith.constant dense<0.000000e+00> : vector<8x8xf32>
    %259 = tpu.matmul %5, %258, %cst_429 {dimension_numbers = #tpu.dot_dimension_numbers<[1], [0], [0], [1], [0, 0, 1, 1], [], []>} : vector<8x15xf32>, vector<15x8xf32>, vector<8x8xf32> -> vector<8x8xf32>
    %260 = vector.broadcast %6 : vector<1x8xf32> to vector<8x8xf32>
    %261 = arith.mulf %259, %260 : vector<8x8xf32>
    %262 = vector.broadcast %7 : vector<1x8xf32> to vector<8x8xf32>
    %263 = arith.addf %261, %262 : vector<8x8xf32>
    %cst_430 = arith.constant 0.000000e+00 : f32
    %264 = vector.broadcast %cst_430 : f32 to vector<8x8xf32>
    %265 = arith.cmpf oge, %263, %264 : vector<8x8xf32>
    %cst_431 = arith.constant 2.000000e-01 : f32
    %266 = vector.broadcast %cst_431 : f32 to vector<8x8xf32>
    %267 = arith.mulf %266, %263 : vector<8x8xf32>
    %268 = arith.select %265, %263, %267 : vector<8x8xi1>, vector<8x8xf32>
    %c0_432 = arith.constant 0 : index
    %c4_433 = arith.constant 4 : index
    %c1_434 = arith.constant 1 : index
    %c0_435 = arith.constant 0 : index
    %269 = vector.load %arg16[%c0_432, %c4_433, %c1_434, %c0_435] : memref<1x10x10x8xf32, #tpu.memory_space<vmem>>, vector<1x1x8x8xf32>
    %270 = vector.shape_cast %269 : vector<1x1x8x8xf32> to vector<8x8xf32>
    %271 = vector.shape_cast %268 : vector<8x8xf32> to vector<1x1x8x8xf32>
    tpu.vector_store %arg16[%c0_432, %c4_433, %c1_434, %c0_435], %271 {strides = array<i32>} : memref<1x10x10x8xf32, #tpu.memory_space<vmem>>, vector<1x1x8x8xf32>,
    %c0_436 = arith.constant 0 : index
    %c8_437 = arith.constant 8 : index
    %c0_438 = arith.constant 0 : index
    %c0_439 = arith.constant 0 : index
    %272 = vector.load %arg1[%c0_436, %c8_437, %c0_438, %c0_439] : memref<1x18x18x2xf32, #tpu.memory_space<vmem>>, vector<1x1x15x2xf32>
    %273 = vector.shape_cast %272 : vector<1x1x15x2xf32> to vector<15x2xf32>
    %c0_440 = arith.constant 0 : index
    %c0_441 = arith.constant 0 : index
    %274 = vector.load %arg18[%c0_440, %c0_441] : memref<15x32xf32, #tpu.memory_space<vmem>>, vector<15x2xf32>
    tpu.vector_store %arg18[%c0_440, %c0_441], %273 {strides = array<i32>} : memref<15x32xf32, #tpu.memory_space<vmem>>, vector<15x2xf32>,
    %c0_442 = arith.constant 0 : index
    %c8_443 = arith.constant 8 : index
    %c1_444 = arith.constant 1 : index
    %c0_445 = arith.constant 0 : index
    %275 = vector.load %arg1[%c0_442, %c8_443, %c1_444, %c0_445] : memref<1x18x18x2xf32, #tpu.memory_space<vmem>>, vector<1x1x15x2xf32>
    %276 = vector.shape_cast %275 : vector<1x1x15x2xf32> to vector<15x2xf32>
    %c0_446 = arith.constant 0 : index
    %c2_447 = arith.constant 2 : index
    %277 = vector.load %arg18[%c0_446, %c2_447] : memref<15x32xf32, #tpu.memory_space<vmem>>, vector<15x2xf32>
    tpu.vector_store %arg18[%c0_446, %c2_447], %276 {strides = array<i32>} : memref<15x32xf32, #tpu.memory_space<vmem>>, vector<15x2xf32>,
    %c0_448 = arith.constant 0 : index
    %c8_449 = arith.constant 8 : index
    %c2_450 = arith.constant 2 : index
    %c0_451 = arith.constant 0 : index
    %278 = vector.load %arg1[%c0_448, %c8_449, %c2_450, %c0_451] : memref<1x18x18x2xf32, #tpu.memory_space<vmem>>, vector<1x1x15x2xf32>
    %279 = vector.shape_cast %278 : vector<1x1x15x2xf32> to vector<15x2xf32>
    %c0_452 = arith.constant 0 : index
    %c4_453 = arith.constant 4 : index
    %280 = vector.load %arg18[%c0_452, %c4_453] : memref<15x32xf32, #tpu.memory_space<vmem>>, vector<15x2xf32>
    tpu.vector_store %arg18[%c0_452, %c4_453], %279 {strides = array<i32>} : memref<15x32xf32, #tpu.memory_space<vmem>>, vector<15x2xf32>,
    %c0_454 = arith.constant 0 : index
    %c8_455 = arith.constant 8 : index
    %c3_456 = arith.constant 3 : index
    %c0_457 = arith.constant 0 : index
    %281 = vector.load %arg1[%c0_454, %c8_455, %c3_456, %c0_457] : memref<1x18x18x2xf32, #tpu.memory_space<vmem>>, vector<1x1x15x2xf32>
    %282 = vector.shape_cast %281 : vector<1x1x15x2xf32> to vector<15x2xf32>
    %c0_458 = arith.constant 0 : index
    %c6_459 = arith.constant 6 : index
    %283 = vector.load %arg18[%c0_458, %c6_459] : memref<15x32xf32, #tpu.memory_space<vmem>>, vector<15x2xf32>
    tpu.vector_store %arg18[%c0_458, %c6_459], %282 {strides = array<i32>} : memref<15x32xf32, #tpu.memory_space<vmem>>, vector<15x2xf32>,
    %c0_460 = arith.constant 0 : index
    %c9_461 = arith.constant 9 : index
    %c0_462 = arith.constant 0 : index
    %c0_463 = arith.constant 0 : index
    %284 = vector.load %arg1[%c0_460, %c9_461, %c0_462, %c0_463] : memref<1x18x18x2xf32, #tpu.memory_space<vmem>>, vector<1x1x15x2xf32>
    %285 = vector.shape_cast %284 : vector<1x1x15x2xf32> to vector<15x2xf32>
    %c0_464 = arith.constant 0 : index
    %c8_465 = arith.constant 8 : index
    %286 = vector.load %arg18[%c0_464, %c8_465] : memref<15x32xf32, #tpu.memory_space<vmem>>, vector<15x2xf32>
    tpu.vector_store %arg18[%c0_464, %c8_465], %285 {strides = array<i32>} : memref<15x32xf32, #tpu.memory_space<vmem>>, vector<15x2xf32>,
    %c0_466 = arith.constant 0 : index
    %c9_467 = arith.constant 9 : index
    %c1_468 = arith.constant 1 : index
    %c0_469 = arith.constant 0 : index
    %287 = vector.load %arg1[%c0_466, %c9_467, %c1_468, %c0_469] : memref<1x18x18x2xf32, #tpu.memory_space<vmem>>, vector<1x1x15x2xf32>
    %288 = vector.shape_cast %287 : vector<1x1x15x2xf32> to vector<15x2xf32>
    %c0_470 = arith.constant 0 : index
    %c10_471 = arith.constant 10 : index
    %289 = vector.load %arg18[%c0_470, %c10_471] : memref<15x32xf32, #tpu.memory_space<vmem>>, vector<15x2xf32>
    tpu.vector_store %arg18[%c0_470, %c10_471], %288 {strides = array<i32>} : memref<15x32xf32, #tpu.memory_space<vmem>>, vector<15x2xf32>,
    %c0_472 = arith.constant 0 : index
    %c9_473 = arith.constant 9 : index
    %c2_474 = arith.constant 2 : index
    %c0_475 = arith.constant 0 : index
    %290 = vector.load %arg1[%c0_472, %c9_473, %c2_474, %c0_475] : memref<1x18x18x2xf32, #tpu.memory_space<vmem>>, vector<1x1x15x2xf32>
    %291 = vector.shape_cast %290 : vector<1x1x15x2xf32> to vector<15x2xf32>
    %c0_476 = arith.constant 0 : index
    %c12_477 = arith.constant 12 : index
    %292 = vector.load %arg18[%c0_476, %c12_477] : memref<15x32xf32, #tpu.memory_space<vmem>>, vector<15x2xf32>
    tpu.vector_store %arg18[%c0_476, %c12_477], %291 {strides = array<i32>} : memref<15x32xf32, #tpu.memory_space<vmem>>, vector<15x2xf32>,
    %c0_478 = arith.constant 0 : index
    %c9_479 = arith.constant 9 : index
    %c3_480 = arith.constant 3 : index
    %c0_481 = arith.constant 0 : index
    %293 = vector.load %arg1[%c0_478, %c9_479, %c3_480, %c0_481] : memref<1x18x18x2xf32, #tpu.memory_space<vmem>>, vector<1x1x15x2xf32>
    %294 = vector.shape_cast %293 : vector<1x1x15x2xf32> to vector<15x2xf32>
    %c0_482 = arith.constant 0 : index
    %c14_483 = arith.constant 14 : index
    %295 = vector.load %arg18[%c0_482, %c14_483] : memref<15x32xf32, #tpu.memory_space<vmem>>, vector<15x2xf32>
    tpu.vector_store %arg18[%c0_482, %c14_483], %294 {strides = array<i32>} : memref<15x32xf32, #tpu.memory_space<vmem>>, vector<15x2xf32>,
    %c0_484 = arith.constant 0 : index
    %c10_485 = arith.constant 10 : index
    %c0_486 = arith.constant 0 : index
    %c0_487 = arith.constant 0 : index
    %296 = vector.load %arg1[%c0_484, %c10_485, %c0_486, %c0_487] : memref<1x18x18x2xf32, #tpu.memory_space<vmem>>, vector<1x1x15x2xf32>
    %297 = vector.shape_cast %296 : vector<1x1x15x2xf32> to vector<15x2xf32>
    %c0_488 = arith.constant 0 : index
    %c16_489 = arith.constant 16 : index
    %298 = vector.load %arg18[%c0_488, %c16_489] : memref<15x32xf32, #tpu.memory_space<vmem>>, vector<15x2xf32>
    tpu.vector_store %arg18[%c0_488, %c16_489], %297 {strides = array<i32>} : memref<15x32xf32, #tpu.memory_space<vmem>>, vector<15x2xf32>,
    %c0_490 = arith.constant 0 : index
    %c10_491 = arith.constant 10 : index
    %c1_492 = arith.constant 1 : index
    %c0_493 = arith.constant 0 : index
    %299 = vector.load %arg1[%c0_490, %c10_491, %c1_492, %c0_493] : memref<1x18x18x2xf32, #tpu.memory_space<vmem>>, vector<1x1x15x2xf32>
    %300 = vector.shape_cast %299 : vector<1x1x15x2xf32> to vector<15x2xf32>
    %c0_494 = arith.constant 0 : index
    %c18_495 = arith.constant 18 : index
    %301 = vector.load %arg18[%c0_494, %c18_495] : memref<15x32xf32, #tpu.memory_space<vmem>>, vector<15x2xf32>
    tpu.vector_store %arg18[%c0_494, %c18_495], %300 {strides = array<i32>} : memref<15x32xf32, #tpu.memory_space<vmem>>, vector<15x2xf32>,
    %c0_496 = arith.constant 0 : index
    %c10_497 = arith.constant 10 : index
    %c2_498 = arith.constant 2 : index
    %c0_499 = arith.constant 0 : index
    %302 = vector.load %arg1[%c0_496, %c10_497, %c2_498, %c0_499] : memref<1x18x18x2xf32, #tpu.memory_space<vmem>>, vector<1x1x15x2xf32>
    %303 = vector.shape_cast %302 : vector<1x1x15x2xf32> to vector<15x2xf32>
    %c0_500 = arith.constant 0 : index
    %c20_501 = arith.constant 20 : index
    %304 = vector.load %arg18[%c0_500, %c20_501] : memref<15x32xf32, #tpu.memory_space<vmem>>, vector<15x2xf32>
    tpu.vector_store %arg18[%c0_500, %c20_501], %303 {strides = array<i32>} : memref<15x32xf32, #tpu.memory_space<vmem>>, vector<15x2xf32>,
    %c0_502 = arith.constant 0 : index
    %c10_503 = arith.constant 10 : index
    %c3_504 = arith.constant 3 : index
    %c0_505 = arith.constant 0 : index
    %305 = vector.load %arg1[%c0_502, %c10_503, %c3_504, %c0_505] : memref<1x18x18x2xf32, #tpu.memory_space<vmem>>, vector<1x1x15x2xf32>
    %306 = vector.shape_cast %305 : vector<1x1x15x2xf32> to vector<15x2xf32>
    %c0_506 = arith.constant 0 : index
    %c22_507 = arith.constant 22 : index
    %307 = vector.load %arg18[%c0_506, %c22_507] : memref<15x32xf32, #tpu.memory_space<vmem>>, vector<15x2xf32>
    tpu.vector_store %arg18[%c0_506, %c22_507], %306 {strides = array<i32>} : memref<15x32xf32, #tpu.memory_space<vmem>>, vector<15x2xf32>,
    %c0_508 = arith.constant 0 : index
    %c11 = arith.constant 11 : index
    %c0_509 = arith.constant 0 : index
    %c0_510 = arith.constant 0 : index
    %308 = vector.load %arg1[%c0_508, %c11, %c0_509, %c0_510] : memref<1x18x18x2xf32, #tpu.memory_space<vmem>>, vector<1x1x15x2xf32>
    %309 = vector.shape_cast %308 : vector<1x1x15x2xf32> to vector<15x2xf32>
    %c0_511 = arith.constant 0 : index
    %c24_512 = arith.constant 24 : index
    %310 = vector.load %arg18[%c0_511, %c24_512] : memref<15x32xf32, #tpu.memory_space<vmem>>, vector<15x2xf32>
    tpu.vector_store %arg18[%c0_511, %c24_512], %309 {strides = array<i32>} : memref<15x32xf32, #tpu.memory_space<vmem>>, vector<15x2xf32>,
    %c0_513 = arith.constant 0 : index
    %c11_514 = arith.constant 11 : index
    %c1_515 = arith.constant 1 : index
    %c0_516 = arith.constant 0 : index
    %311 = vector.load %arg1[%c0_513, %c11_514, %c1_515, %c0_516] : memref<1x18x18x2xf32, #tpu.memory_space<vmem>>, vector<1x1x15x2xf32>
    %312 = vector.shape_cast %311 : vector<1x1x15x2xf32> to vector<15x2xf32>
    %c0_517 = arith.constant 0 : index
    %c26_518 = arith.constant 26 : index
    %313 = vector.load %arg18[%c0_517, %c26_518] : memref<15x32xf32, #tpu.memory_space<vmem>>, vector<15x2xf32>
    tpu.vector_store %arg18[%c0_517, %c26_518], %312 {strides = array<i32>} : memref<15x32xf32, #tpu.memory_space<vmem>>, vector<15x2xf32>,
    %c0_519 = arith.constant 0 : index
    %c11_520 = arith.constant 11 : index
    %c2_521 = arith.constant 2 : index
    %c0_522 = arith.constant 0 : index
    %314 = vector.load %arg1[%c0_519, %c11_520, %c2_521, %c0_522] : memref<1x18x18x2xf32, #tpu.memory_space<vmem>>, vector<1x1x15x2xf32>
    %315 = vector.shape_cast %314 : vector<1x1x15x2xf32> to vector<15x2xf32>
    %c0_523 = arith.constant 0 : index
    %c28_524 = arith.constant 28 : index
    %316 = vector.load %arg18[%c0_523, %c28_524] : memref<15x32xf32, #tpu.memory_space<vmem>>, vector<15x2xf32>
    tpu.vector_store %arg18[%c0_523, %c28_524], %315 {strides = array<i32>} : memref<15x32xf32, #tpu.memory_space<vmem>>, vector<15x2xf32>,
    %c0_525 = arith.constant 0 : index
    %c11_526 = arith.constant 11 : index
    %c3_527 = arith.constant 3 : index
    %c0_528 = arith.constant 0 : index
    %317 = vector.load %arg1[%c0_525, %c11_526, %c3_527, %c0_528] : memref<1x18x18x2xf32, #tpu.memory_space<vmem>>, vector<1x1x15x2xf32>
    %318 = vector.shape_cast %317 : vector<1x1x15x2xf32> to vector<15x2xf32>
    %c0_529 = arith.constant 0 : index
    %c30_530 = arith.constant 30 : index
    %319 = vector.load %arg18[%c0_529, %c30_530] : memref<15x32xf32, #tpu.memory_space<vmem>>, vector<15x2xf32>
    tpu.vector_store %arg18[%c0_529, %c30_530], %318 {strides = array<i32>} : memref<15x32xf32, #tpu.memory_space<vmem>>, vector<15x2xf32>,
    %c0_531 = arith.constant 0 : index
    %c0_532 = arith.constant 0 : index
    %320 = vector.load %arg18[%c0_531, %c0_532] : memref<15x32xf32, #tpu.memory_space<vmem>>, vector<15x32xf32>
    %321 = arith.truncf %320 : vector<15x32xf32> to vector<15x32xbf16>
    %cst_533 = arith.constant dense<0.000000e+00> : vector<15x8xf32>
    %322 = tpu.matmul %321, %4, %cst_533 {dimension_numbers = #tpu.dot_dimension_numbers<[1], [0], [0], [1], [0, 0, 1, 1], [], []>} : vector<15x32xbf16>, vector<32x8xbf16>, vector<15x8xf32> -> vector<15x8xf32>
    %cst_534 = arith.constant dense<0.000000e+00> : vector<8x8xf32>
    %323 = tpu.matmul %5, %322, %cst_534 {dimension_numbers = #tpu.dot_dimension_numbers<[1], [0], [0], [1], [0, 0, 1, 1], [], []>} : vector<8x15xf32>, vector<15x8xf32>, vector<8x8xf32> -> vector<8x8xf32>
    %324 = vector.broadcast %6 : vector<1x8xf32> to vector<8x8xf32>
    %325 = arith.mulf %323, %324 : vector<8x8xf32>
    %326 = vector.broadcast %7 : vector<1x8xf32> to vector<8x8xf32>
    %327 = arith.addf %325, %326 : vector<8x8xf32>
    %cst_535 = arith.constant 0.000000e+00 : f32
    %328 = vector.broadcast %cst_535 : f32 to vector<8x8xf32>
    %329 = arith.cmpf oge, %327, %328 : vector<8x8xf32>
    %cst_536 = arith.constant 2.000000e-01 : f32
    %330 = vector.broadcast %cst_536 : f32 to vector<8x8xf32>
    %331 = arith.mulf %330, %327 : vector<8x8xf32>
    %332 = arith.select %329, %327, %331 : vector<8x8xi1>, vector<8x8xf32>
    %c0_537 = arith.constant 0 : index
    %c5_538 = arith.constant 5 : index
    %c1_539 = arith.constant 1 : index
    %c0_540 = arith.constant 0 : index
    %333 = vector.load %arg16[%c0_537, %c5_538, %c1_539, %c0_540] : memref<1x10x10x8xf32, #tpu.memory_space<vmem>>, vector<1x1x8x8xf32>
    %334 = vector.shape_cast %333 : vector<1x1x8x8xf32> to vector<8x8xf32>
    %335 = vector.shape_cast %332 : vector<8x8xf32> to vector<1x1x8x8xf32>
    tpu.vector_store %arg16[%c0_537, %c5_538, %c1_539, %c0_540], %335 {strides = array<i32>} : memref<1x10x10x8xf32, #tpu.memory_space<vmem>>, vector<1x1x8x8xf32>,
    %c0_541 = arith.constant 0 : index
    %c10_542 = arith.constant 10 : index
    %c0_543 = arith.constant 0 : index
    %c0_544 = arith.constant 0 : index
    %336 = vector.load %arg1[%c0_541, %c10_542, %c0_543, %c0_544] : memref<1x18x18x2xf32, #tpu.memory_space<vmem>>, vector<1x1x15x2xf32>
    %337 = vector.shape_cast %336 : vector<1x1x15x2xf32> to vector<15x2xf32>
    %c0_545 = arith.constant 0 : index
    %c0_546 = arith.constant 0 : index
    %338 = vector.load %arg18[%c0_545, %c0_546] : memref<15x32xf32, #tpu.memory_space<vmem>>, vector<15x2xf32>
    tpu.vector_store %arg18[%c0_545, %c0_546], %337 {strides = array<i32>} : memref<15x32xf32, #tpu.memory_space<vmem>>, vector<15x2xf32>,
    %c0_547 = arith.constant 0 : index
    %c10_548 = arith.constant 10 : index
    %c1_549 = arith.constant 1 : index
    %c0_550 = arith.constant 0 : index
    %339 = vector.load %arg1[%c0_547, %c10_548, %c1_549, %c0_550] : memref<1x18x18x2xf32, #tpu.memory_space<vmem>>, vector<1x1x15x2xf32>
    %340 = vector.shape_cast %339 : vector<1x1x15x2xf32> to vector<15x2xf32>
    %c0_551 = arith.constant 0 : index
    %c2_552 = arith.constant 2 : index
    %341 = vector.load %arg18[%c0_551, %c2_552] : memref<15x32xf32, #tpu.memory_space<vmem>>, vector<15x2xf32>
    tpu.vector_store %arg18[%c0_551, %c2_552], %340 {strides = array<i32>} : memref<15x32xf32, #tpu.memory_space<vmem>>, vector<15x2xf32>,
    %c0_553 = arith.constant 0 : index
    %c10_554 = arith.constant 10 : index
    %c2_555 = arith.constant 2 : index
    %c0_556 = arith.constant 0 : index
    %342 = vector.load %arg1[%c0_553, %c10_554, %c2_555, %c0_556] : memref<1x18x18x2xf32, #tpu.memory_space<vmem>>, vector<1x1x15x2xf32>
    %343 = vector.shape_cast %342 : vector<1x1x15x2xf32> to vector<15x2xf32>
    %c0_557 = arith.constant 0 : index
    %c4_558 = arith.constant 4 : index
    %344 = vector.load %arg18[%c0_557, %c4_558] : memref<15x32xf32, #tpu.memory_space<vmem>>, vector<15x2xf32>
    tpu.vector_store %arg18[%c0_557, %c4_558], %343 {strides = array<i32>} : memref<15x32xf32, #tpu.memory_space<vmem>>, vector<15x2xf32>,
    %c0_559 = arith.constant 0 : index
    %c10_560 = arith.constant 10 : index
    %c3_561 = arith.constant 3 : index
    %c0_562 = arith.constant 0 : index
    %345 = vector.load %arg1[%c0_559, %c10_560, %c3_561, %c0_562] : memref<1x18x18x2xf32, #tpu.memory_space<vmem>>, vector<1x1x15x2xf32>
    %346 = vector.shape_cast %345 : vector<1x1x15x2xf32> to vector<15x2xf32>
    %c0_563 = arith.constant 0 : index
    %c6_564 = arith.constant 6 : index
    %347 = vector.load %arg18[%c0_563, %c6_564] : memref<15x32xf32, #tpu.memory_space<vmem>>, vector<15x2xf32>
    tpu.vector_store %arg18[%c0_563, %c6_564], %346 {strides = array<i32>} : memref<15x32xf32, #tpu.memory_space<vmem>>, vector<15x2xf32>,
    %c0_565 = arith.constant 0 : index
    %c11_566 = arith.constant 11 : index
    %c0_567 = arith.constant 0 : index
    %c0_568 = arith.constant 0 : index
    %348 = vector.load %arg1[%c0_565, %c11_566, %c0_567, %c0_568] : memref<1x18x18x2xf32, #tpu.memory_space<vmem>>, vector<1x1x15x2xf32>
    %349 = vector.shape_cast %348 : vector<1x1x15x2xf32> to vector<15x2xf32>
    %c0_569 = arith.constant 0 : index
    %c8_570 = arith.constant 8 : index
    %350 = vector.load %arg18[%c0_569, %c8_570] : memref<15x32xf32, #tpu.memory_space<vmem>>, vector<15x2xf32>
    tpu.vector_store %arg18[%c0_569, %c8_570], %349 {strides = array<i32>} : memref<15x32xf32, #tpu.memory_space<vmem>>, vector<15x2xf32>,
    %c0_571 = arith.constant 0 : index
    %c11_572 = arith.constant 11 : index
    %c1_573 = arith.constant 1 : index
    %c0_574 = arith.constant 0 : index
    %351 = vector.load %arg1[%c0_571, %c11_572, %c1_573, %c0_574] : memref<1x18x18x2xf32, #tpu.memory_space<vmem>>, vector<1x1x15x2xf32>
    %352 = vector.shape_cast %351 : vector<1x1x15x2xf32> to vector<15x2xf32>
    %c0_575 = arith.constant 0 : index
    %c10_576 = arith.constant 10 : index
    %353 = vector.load %arg18[%c0_575, %c10_576] : memref<15x32xf32, #tpu.memory_space<vmem>>, vector<15x2xf32>
    tpu.vector_store %arg18[%c0_575, %c10_576], %352 {strides = array<i32>} : memref<15x32xf32, #tpu.memory_space<vmem>>, vector<15x2xf32>,
    %c0_577 = arith.constant 0 : index
    %c11_578 = arith.constant 11 : index
    %c2_579 = arith.constant 2 : index
    %c0_580 = arith.constant 0 : index
    %354 = vector.load %arg1[%c0_577, %c11_578, %c2_579, %c0_580] : memref<1x18x18x2xf32, #tpu.memory_space<vmem>>, vector<1x1x15x2xf32>
    %355 = vector.shape_cast %354 : vector<1x1x15x2xf32> to vector<15x2xf32>
    %c0_581 = arith.constant 0 : index
    %c12_582 = arith.constant 12 : index
    %356 = vector.load %arg18[%c0_581, %c12_582] : memref<15x32xf32, #tpu.memory_space<vmem>>, vector<15x2xf32>
    tpu.vector_store %arg18[%c0_581, %c12_582], %355 {strides = array<i32>} : memref<15x32xf32, #tpu.memory_space<vmem>>, vector<15x2xf32>,
    %c0_583 = arith.constant 0 : index
    %c11_584 = arith.constant 11 : index
    %c3_585 = arith.constant 3 : index
    %c0_586 = arith.constant 0 : index
    %357 = vector.load %arg1[%c0_583, %c11_584, %c3_585, %c0_586] : memref<1x18x18x2xf32, #tpu.memory_space<vmem>>, vector<1x1x15x2xf32>
    %358 = vector.shape_cast %357 : vector<1x1x15x2xf32> to vector<15x2xf32>
    %c0_587 = arith.constant 0 : index
    %c14_588 = arith.constant 14 : index
    %359 = vector.load %arg18[%c0_587, %c14_588] : memref<15x32xf32, #tpu.memory_space<vmem>>, vector<15x2xf32>
    tpu.vector_store %arg18[%c0_587, %c14_588], %358 {strides = array<i32>} : memref<15x32xf32, #tpu.memory_space<vmem>>, vector<15x2xf32>,
    %c0_589 = arith.constant 0 : index
    %c12_590 = arith.constant 12 : index
    %c0_591 = arith.constant 0 : index
    %c0_592 = arith.constant 0 : index
    %360 = vector.load %arg1[%c0_589, %c12_590, %c0_591, %c0_592] : memref<1x18x18x2xf32, #tpu.memory_space<vmem>>, vector<1x1x15x2xf32>
    %361 = vector.shape_cast %360 : vector<1x1x15x2xf32> to vector<15x2xf32>
    %c0_593 = arith.constant 0 : index
    %c16_594 = arith.constant 16 : index
    %362 = vector.load %arg18[%c0_593, %c16_594] : memref<15x32xf32, #tpu.memory_space<vmem>>, vector<15x2xf32>
    tpu.vector_store %arg18[%c0_593, %c16_594], %361 {strides = array<i32>} : memref<15x32xf32, #tpu.memory_space<vmem>>, vector<15x2xf32>,
    %c0_595 = arith.constant 0 : index
    %c12_596 = arith.constant 12 : index
    %c1_597 = arith.constant 1 : index
    %c0_598 = arith.constant 0 : index
    %363 = vector.load %arg1[%c0_595, %c12_596, %c1_597, %c0_598] : memref<1x18x18x2xf32, #tpu.memory_space<vmem>>, vector<1x1x15x2xf32>
    %364 = vector.shape_cast %363 : vector<1x1x15x2xf32> to vector<15x2xf32>
    %c0_599 = arith.constant 0 : index
    %c18_600 = arith.constant 18 : index
    %365 = vector.load %arg18[%c0_599, %c18_600] : memref<15x32xf32, #tpu.memory_space<vmem>>, vector<15x2xf32>
    tpu.vector_store %arg18[%c0_599, %c18_600], %364 {strides = array<i32>} : memref<15x32xf32, #tpu.memory_space<vmem>>, vector<15x2xf32>,
    %c0_601 = arith.constant 0 : index
    %c12_602 = arith.constant 12 : index
    %c2_603 = arith.constant 2 : index
    %c0_604 = arith.constant 0 : index
    %366 = vector.load %arg1[%c0_601, %c12_602, %c2_603, %c0_604] : memref<1x18x18x2xf32, #tpu.memory_space<vmem>>, vector<1x1x15x2xf32>
    %367 = vector.shape_cast %366 : vector<1x1x15x2xf32> to vector<15x2xf32>
    %c0_605 = arith.constant 0 : index
    %c20_606 = arith.constant 20 : index
    %368 = vector.load %arg18[%c0_605, %c20_606] : memref<15x32xf32, #tpu.memory_space<vmem>>, vector<15x2xf32>
    tpu.vector_store %arg18[%c0_605, %c20_606], %367 {strides = array<i32>} : memref<15x32xf32, #tpu.memory_space<vmem>>, vector<15x2xf32>,
    %c0_607 = arith.constant 0 : index
    %c12_608 = arith.constant 12 : index
    %c3_609 = arith.constant 3 : index
    %c0_610 = arith.constant 0 : index
    %369 = vector.load %arg1[%c0_607, %c12_608, %c3_609, %c0_610] : memref<1x18x18x2xf32, #tpu.memory_space<vmem>>, vector<1x1x15x2xf32>
    %370 = vector.shape_cast %369 : vector<1x1x15x2xf32> to vector<15x2xf32>
    %c0_611 = arith.constant 0 : index
    %c22_612 = arith.constant 22 : index
    %371 = vector.load %arg18[%c0_611, %c22_612] : memref<15x32xf32, #tpu.memory_space<vmem>>, vector<15x2xf32>
    tpu.vector_store %arg18[%c0_611, %c22_612], %370 {strides = array<i32>} : memref<15x32xf32, #tpu.memory_space<vmem>>, vector<15x2xf32>,
    %c0_613 = arith.constant 0 : index
    %c13 = arith.constant 13 : index
    %c0_614 = arith.constant 0 : index
    %c0_615 = arith.constant 0 : index
    %372 = vector.load %arg1[%c0_613, %c13, %c0_614, %c0_615] : memref<1x18x18x2xf32, #tpu.memory_space<vmem>>, vector<1x1x15x2xf32>
    %373 = vector.shape_cast %372 : vector<1x1x15x2xf32> to vector<15x2xf32>
    %c0_616 = arith.constant 0 : index
    %c24_617 = arith.constant 24 : index
    %374 = vector.load %arg18[%c0_616, %c24_617] : memref<15x32xf32, #tpu.memory_space<vmem>>, vector<15x2xf32>
    tpu.vector_store %arg18[%c0_616, %c24_617], %373 {strides = array<i32>} : memref<15x32xf32, #tpu.memory_space<vmem>>, vector<15x2xf32>,
    %c0_618 = arith.constant 0 : index
    %c13_619 = arith.constant 13 : index
    %c1_620 = arith.constant 1 : index
    %c0_621 = arith.constant 0 : index
    %375 = vector.load %arg1[%c0_618, %c13_619, %c1_620, %c0_621] : memref<1x18x18x2xf32, #tpu.memory_space<vmem>>, vector<1x1x15x2xf32>
    %376 = vector.shape_cast %375 : vector<1x1x15x2xf32> to vector<15x2xf32>
    %c0_622 = arith.constant 0 : index
    %c26_623 = arith.constant 26 : index
    %377 = vector.load %arg18[%c0_622, %c26_623] : memref<15x32xf32, #tpu.memory_space<vmem>>, vector<15x2xf32>
    tpu.vector_store %arg18[%c0_622, %c26_623], %376 {strides = array<i32>} : memref<15x32xf32, #tpu.memory_space<vmem>>, vector<15x2xf32>,
    %c0_624 = arith.constant 0 : index
    %c13_625 = arith.constant 13 : index
    %c2_626 = arith.constant 2 : index
    %c0_627 = arith.constant 0 : index
    %378 = vector.load %arg1[%c0_624, %c13_625, %c2_626, %c0_627] : memref<1x18x18x2xf32, #tpu.memory_space<vmem>>, vector<1x1x15x2xf32>
    %379 = vector.shape_cast %378 : vector<1x1x15x2xf32> to vector<15x2xf32>
    %c0_628 = arith.constant 0 : index
    %c28_629 = arith.constant 28 : index
    %380 = vector.load %arg18[%c0_628, %c28_629] : memref<15x32xf32, #tpu.memory_space<vmem>>, vector<15x2xf32>
    tpu.vector_store %arg18[%c0_628, %c28_629], %379 {strides = array<i32>} : memref<15x32xf32, #tpu.memory_space<vmem>>, vector<15x2xf32>,
    %c0_630 = arith.constant 0 : index
    %c13_631 = arith.constant 13 : index
    %c3_632 = arith.constant 3 : index
    %c0_633 = arith.constant 0 : index
    %381 = vector.load %arg1[%c0_630, %c13_631, %c3_632, %c0_633] : memref<1x18x18x2xf32, #tpu.memory_space<vmem>>, vector<1x1x15x2xf32>
    %382 = vector.shape_cast %381 : vector<1x1x15x2xf32> to vector<15x2xf32>
    %c0_634 = arith.constant 0 : index
    %c30_635 = arith.constant 30 : index
    %383 = vector.load %arg18[%c0_634, %c30_635] : memref<15x32xf32, #tpu.memory_space<vmem>>, vector<15x2xf32>
    tpu.vector_store %arg18[%c0_634, %c30_635], %382 {strides = array<i32>} : memref<15x32xf32, #tpu.memory_space<vmem>>, vector<15x2xf32>,
    %c0_636 = arith.constant 0 : index
    %c0_637 = arith.constant 0 : index
    %384 = vector.load %arg18[%c0_636, %c0_637] : memref<15x32xf32, #tpu.memory_space<vmem>>, vector<15x32xf32>
    %385 = arith.truncf %384 : vector<15x32xf32> to vector<15x32xbf16>
    %cst_638 = arith.constant dense<0.000000e+00> : vector<15x8xf32>
    %386 = tpu.matmul %385, %4, %cst_638 {dimension_numbers = #tpu.dot_dimension_numbers<[1], [0], [0], [1], [0, 0, 1, 1], [], []>} : vector<15x32xbf16>, vector<32x8xbf16>, vector<15x8xf32> -> vector<15x8xf32>
    %cst_639 = arith.constant dense<0.000000e+00> : vector<8x8xf32>
    %387 = tpu.matmul %5, %386, %cst_639 {dimension_numbers = #tpu.dot_dimension_numbers<[1], [0], [0], [1], [0, 0, 1, 1], [], []>} : vector<8x15xf32>, vector<15x8xf32>, vector<8x8xf32> -> vector<8x8xf32>
    %388 = vector.broadcast %6 : vector<1x8xf32> to vector<8x8xf32>
    %389 = arith.mulf %387, %388 : vector<8x8xf32>
    %390 = vector.broadcast %7 : vector<1x8xf32> to vector<8x8xf32>
    %391 = arith.addf %389, %390 : vector<8x8xf32>
    %cst_640 = arith.constant 0.000000e+00 : f32
    %392 = vector.broadcast %cst_640 : f32 to vector<8x8xf32>
    %393 = arith.cmpf oge, %391, %392 : vector<8x8xf32>
    %cst_641 = arith.constant 2.000000e-01 : f32
    %394 = vector.broadcast %cst_641 : f32 to vector<8x8xf32>
    %395 = arith.mulf %394, %391 : vector<8x8xf32>
    %396 = arith.select %393, %391, %395 : vector<8x8xi1>, vector<8x8xf32>
    %c0_642 = arith.constant 0 : index
    %c6_643 = arith.constant 6 : index
    %c1_644 = arith.constant 1 : index
    %c0_645 = arith.constant 0 : index
    %397 = vector.load %arg16[%c0_642, %c6_643, %c1_644, %c0_645] : memref<1x10x10x8xf32, #tpu.memory_space<vmem>>, vector<1x1x8x8xf32>
    %398 = vector.shape_cast %397 : vector<1x1x8x8xf32> to vector<8x8xf32>
    %399 = vector.shape_cast %396 : vector<8x8xf32> to vector<1x1x8x8xf32>
    tpu.vector_store %arg16[%c0_642, %c6_643, %c1_644, %c0_645], %399 {strides = array<i32>} : memref<1x10x10x8xf32, #tpu.memory_space<vmem>>, vector<1x1x8x8xf32>,
    %c0_646 = arith.constant 0 : index
    %c12_647 = arith.constant 12 : index
    %c0_648 = arith.constant 0 : index
    %c0_649 = arith.constant 0 : index
    %400 = vector.load %arg1[%c0_646, %c12_647, %c0_648, %c0_649] : memref<1x18x18x2xf32, #tpu.memory_space<vmem>>, vector<1x1x15x2xf32>
    %401 = vector.shape_cast %400 : vector<1x1x15x2xf32> to vector<15x2xf32>
    %c0_650 = arith.constant 0 : index
    %c0_651 = arith.constant 0 : index
    %402 = vector.load %arg18[%c0_650, %c0_651] : memref<15x32xf32, #tpu.memory_space<vmem>>, vector<15x2xf32>
    tpu.vector_store %arg18[%c0_650, %c0_651], %401 {strides = array<i32>} : memref<15x32xf32, #tpu.memory_space<vmem>>, vector<15x2xf32>,
    %c0_652 = arith.constant 0 : index
    %c12_653 = arith.constant 12 : index
    %c1_654 = arith.constant 1 : index
    %c0_655 = arith.constant 0 : index
    %403 = vector.load %arg1[%c0_652, %c12_653, %c1_654, %c0_655] : memref<1x18x18x2xf32, #tpu.memory_space<vmem>>, vector<1x1x15x2xf32>
    %404 = vector.shape_cast %403 : vector<1x1x15x2xf32> to vector<15x2xf32>
    %c0_656 = arith.constant 0 : index
    %c2_657 = arith.constant 2 : index
    %405 = vector.load %arg18[%c0_656, %c2_657] : memref<15x32xf32, #tpu.memory_space<vmem>>, vector<15x2xf32>
    tpu.vector_store %arg18[%c0_656, %c2_657], %404 {strides = array<i32>} : memref<15x32xf32, #tpu.memory_space<vmem>>, vector<15x2xf32>,
    %c0_658 = arith.constant 0 : index
    %c12_659 = arith.constant 12 : index
    %c2_660 = arith.constant 2 : index
    %c0_661 = arith.constant 0 : index
    %406 = vector.load %arg1[%c0_658, %c12_659, %c2_660, %c0_661] : memref<1x18x18x2xf32, #tpu.memory_space<vmem>>, vector<1x1x15x2xf32>
    %407 = vector.shape_cast %406 : vector<1x1x15x2xf32> to vector<15x2xf32>
    %c0_662 = arith.constant 0 : index
    %c4_663 = arith.constant 4 : index
    %408 = vector.load %arg18[%c0_662, %c4_663] : memref<15x32xf32, #tpu.memory_space<vmem>>, vector<15x2xf32>
    tpu.vector_store %arg18[%c0_662, %c4_663], %407 {strides = array<i32>} : memref<15x32xf32, #tpu.memory_space<vmem>>, vector<15x2xf32>,
    %c0_664 = arith.constant 0 : index
    %c12_665 = arith.constant 12 : index
    %c3_666 = arith.constant 3 : index
    %c0_667 = arith.constant 0 : index
    %409 = vector.load %arg1[%c0_664, %c12_665, %c3_666, %c0_667] : memref<1x18x18x2xf32, #tpu.memory_space<vmem>>, vector<1x1x15x2xf32>
    %410 = vector.shape_cast %409 : vector<1x1x15x2xf32> to vector<15x2xf32>
    %c0_668 = arith.constant 0 : index
    %c6_669 = arith.constant 6 : index
    %411 = vector.load %arg18[%c0_668, %c6_669] : memref<15x32xf32, #tpu.memory_space<vmem>>, vector<15x2xf32>
    tpu.vector_store %arg18[%c0_668, %c6_669], %410 {strides = array<i32>} : memref<15x32xf32, #tpu.memory_space<vmem>>, vector<15x2xf32>,
    %c0_670 = arith.constant 0 : index
    %c13_671 = arith.constant 13 : index
    %c0_672 = arith.constant 0 : index
    %c0_673 = arith.constant 0 : index
    %412 = vector.load %arg1[%c0_670, %c13_671, %c0_672, %c0_673] : memref<1x18x18x2xf32, #tpu.memory_space<vmem>>, vector<1x1x15x2xf32>
    %413 = vector.shape_cast %412 : vector<1x1x15x2xf32> to vector<15x2xf32>
    %c0_674 = arith.constant 0 : index
    %c8_675 = arith.constant 8 : index
    %414 = vector.load %arg18[%c0_674, %c8_675] : memref<15x32xf32, #tpu.memory_space<vmem>>, vector<15x2xf32>
    tpu.vector_store %arg18[%c0_674, %c8_675], %413 {strides = array<i32>} : memref<15x32xf32, #tpu.memory_space<vmem>>, vector<15x2xf32>,
    %c0_676 = arith.constant 0 : index
    %c13_677 = arith.constant 13 : index
    %c1_678 = arith.constant 1 : index
    %c0_679 = arith.constant 0 : index
    %415 = vector.load %arg1[%c0_676, %c13_677, %c1_678, %c0_679] : memref<1x18x18x2xf32, #tpu.memory_space<vmem>>, vector<1x1x15x2xf32>
    %416 = vector.shape_cast %415 : vector<1x1x15x2xf32> to vector<15x2xf32>
    %c0_680 = arith.constant 0 : index
    %c10_681 = arith.constant 10 : index
    %417 = vector.load %arg18[%c0_680, %c10_681] : memref<15x32xf32, #tpu.memory_space<vmem>>, vector<15x2xf32>
    tpu.vector_store %arg18[%c0_680, %c10_681], %416 {strides = array<i32>} : memref<15x32xf32, #tpu.memory_space<vmem>>, vector<15x2xf32>,
    %c0_682 = arith.constant 0 : index
    %c13_683 = arith.constant 13 : index
    %c2_684 = arith.constant 2 : index
    %c0_685 = arith.constant 0 : index
    %418 = vector.load %arg1[%c0_682, %c13_683, %c2_684, %c0_685] : memref<1x18x18x2xf32, #tpu.memory_space<vmem>>, vector<1x1x15x2xf32>
    %419 = vector.shape_cast %418 : vector<1x1x15x2xf32> to vector<15x2xf32>
    %c0_686 = arith.constant 0 : index
    %c12_687 = arith.constant 12 : index
    %420 = vector.load %arg18[%c0_686, %c12_687] : memref<15x32xf32, #tpu.memory_space<vmem>>, vector<15x2xf32>
    tpu.vector_store %arg18[%c0_686, %c12_687], %419 {strides = array<i32>} : memref<15x32xf32, #tpu.memory_space<vmem>>, vector<15x2xf32>,
    %c0_688 = arith.constant 0 : index
    %c13_689 = arith.constant 13 : index
    %c3_690 = arith.constant 3 : index
    %c0_691 = arith.constant 0 : index
    %421 = vector.load %arg1[%c0_688, %c13_689, %c3_690, %c0_691] : memref<1x18x18x2xf32, #tpu.memory_space<vmem>>, vector<1x1x15x2xf32>
    %422 = vector.shape_cast %421 : vector<1x1x15x2xf32> to vector<15x2xf32>
    %c0_692 = arith.constant 0 : index
    %c14_693 = arith.constant 14 : index
    %423 = vector.load %arg18[%c0_692, %c14_693] : memref<15x32xf32, #tpu.memory_space<vmem>>, vector<15x2xf32>
    tpu.vector_store %arg18[%c0_692, %c14_693], %422 {strides = array<i32>} : memref<15x32xf32, #tpu.memory_space<vmem>>, vector<15x2xf32>,
    %c0_694 = arith.constant 0 : index
    %c14_695 = arith.constant 14 : index
    %c0_696 = arith.constant 0 : index
    %c0_697 = arith.constant 0 : index
    %424 = vector.load %arg1[%c0_694, %c14_695, %c0_696, %c0_697] : memref<1x18x18x2xf32, #tpu.memory_space<vmem>>, vector<1x1x15x2xf32>
    %425 = vector.shape_cast %424 : vector<1x1x15x2xf32> to vector<15x2xf32>
    %c0_698 = arith.constant 0 : index
    %c16_699 = arith.constant 16 : index
    %426 = vector.load %arg18[%c0_698, %c16_699] : memref<15x32xf32, #tpu.memory_space<vmem>>, vector<15x2xf32>
    tpu.vector_store %arg18[%c0_698, %c16_699], %425 {strides = array<i32>} : memref<15x32xf32, #tpu.memory_space<vmem>>, vector<15x2xf32>,
    %c0_700 = arith.constant 0 : index
    %c14_701 = arith.constant 14 : index
    %c1_702 = arith.constant 1 : index
    %c0_703 = arith.constant 0 : index
    %427 = vector.load %arg1[%c0_700, %c14_701, %c1_702, %c0_703] : memref<1x18x18x2xf32, #tpu.memory_space<vmem>>, vector<1x1x15x2xf32>
    %428 = vector.shape_cast %427 : vector<1x1x15x2xf32> to vector<15x2xf32>
    %c0_704 = arith.constant 0 : index
    %c18_705 = arith.constant 18 : index
    %429 = vector.load %arg18[%c0_704, %c18_705] : memref<15x32xf32, #tpu.memory_space<vmem>>, vector<15x2xf32>
    tpu.vector_store %arg18[%c0_704, %c18_705], %428 {strides = array<i32>} : memref<15x32xf32, #tpu.memory_space<vmem>>, vector<15x2xf32>,
    %c0_706 = arith.constant 0 : index
    %c14_707 = arith.constant 14 : index
    %c2_708 = arith.constant 2 : index
    %c0_709 = arith.constant 0 : index
    %430 = vector.load %arg1[%c0_706, %c14_707, %c2_708, %c0_709] : memref<1x18x18x2xf32, #tpu.memory_space<vmem>>, vector<1x1x15x2xf32>
    %431 = vector.shape_cast %430 : vector<1x1x15x2xf32> to vector<15x2xf32>
    %c0_710 = arith.constant 0 : index
    %c20_711 = arith.constant 20 : index
    %432 = vector.load %arg18[%c0_710, %c20_711] : memref<15x32xf32, #tpu.memory_space<vmem>>, vector<15x2xf32>
    tpu.vector_store %arg18[%c0_710, %c20_711], %431 {strides = array<i32>} : memref<15x32xf32, #tpu.memory_space<vmem>>, vector<15x2xf32>,
    %c0_712 = arith.constant 0 : index
    %c14_713 = arith.constant 14 : index
    %c3_714 = arith.constant 3 : index
    %c0_715 = arith.constant 0 : index
    %433 = vector.load %arg1[%c0_712, %c14_713, %c3_714, %c0_715] : memref<1x18x18x2xf32, #tpu.memory_space<vmem>>, vector<1x1x15x2xf32>
    %434 = vector.shape_cast %433 : vector<1x1x15x2xf32> to vector<15x2xf32>
    %c0_716 = arith.constant 0 : index
    %c22_717 = arith.constant 22 : index
    %435 = vector.load %arg18[%c0_716, %c22_717] : memref<15x32xf32, #tpu.memory_space<vmem>>, vector<15x2xf32>
    tpu.vector_store %arg18[%c0_716, %c22_717], %434 {strides = array<i32>} : memref<15x32xf32, #tpu.memory_space<vmem>>, vector<15x2xf32>,
    %c0_718 = arith.constant 0 : index
    %c15 = arith.constant 15 : index
    %c0_719 = arith.constant 0 : index
    %c0_720 = arith.constant 0 : index
    %436 = vector.load %arg1[%c0_718, %c15, %c0_719, %c0_720] : memref<1x18x18x2xf32, #tpu.memory_space<vmem>>, vector<1x1x15x2xf32>
    %437 = vector.shape_cast %436 : vector<1x1x15x2xf32> to vector<15x2xf32>
    %c0_721 = arith.constant 0 : index
    %c24_722 = arith.constant 24 : index
    %438 = vector.load %arg18[%c0_721, %c24_722] : memref<15x32xf32, #tpu.memory_space<vmem>>, vector<15x2xf32>
    tpu.vector_store %arg18[%c0_721, %c24_722], %437 {strides = array<i32>} : memref<15x32xf32, #tpu.memory_space<vmem>>, vector<15x2xf32>,
    %c0_723 = arith.constant 0 : index
    %c15_724 = arith.constant 15 : index
    %c1_725 = arith.constant 1 : index
    %c0_726 = arith.constant 0 : index
    %439 = vector.load %arg1[%c0_723, %c15_724, %c1_725, %c0_726] : memref<1x18x18x2xf32, #tpu.memory_space<vmem>>, vector<1x1x15x2xf32>
    %440 = vector.shape_cast %439 : vector<1x1x15x2xf32> to vector<15x2xf32>
    %c0_727 = arith.constant 0 : index
    %c26_728 = arith.constant 26 : index
    %441 = vector.load %arg18[%c0_727, %c26_728] : memref<15x32xf32, #tpu.memory_space<vmem>>, vector<15x2xf32>
    tpu.vector_store %arg18[%c0_727, %c26_728], %440 {strides = array<i32>} : memref<15x32xf32, #tpu.memory_space<vmem>>, vector<15x2xf32>,
    %c0_729 = arith.constant 0 : index
    %c15_730 = arith.constant 15 : index
    %c2_731 = arith.constant 2 : index
    %c0_732 = arith.constant 0 : index
    %442 = vector.load %arg1[%c0_729, %c15_730, %c2_731, %c0_732] : memref<1x18x18x2xf32, #tpu.memory_space<vmem>>, vector<1x1x15x2xf32>
    %443 = vector.shape_cast %442 : vector<1x1x15x2xf32> to vector<15x2xf32>
    %c0_733 = arith.constant 0 : index
    %c28_734 = arith.constant 28 : index
    %444 = vector.load %arg18[%c0_733, %c28_734] : memref<15x32xf32, #tpu.memory_space<vmem>>, vector<15x2xf32>
    tpu.vector_store %arg18[%c0_733, %c28_734], %443 {strides = array<i32>} : memref<15x32xf32, #tpu.memory_space<vmem>>, vector<15x2xf32>,
    %c0_735 = arith.constant 0 : index
    %c15_736 = arith.constant 15 : index
    %c3_737 = arith.constant 3 : index
    %c0_738 = arith.constant 0 : index
    %445 = vector.load %arg1[%c0_735, %c15_736, %c3_737, %c0_738] : memref<1x18x18x2xf32, #tpu.memory_space<vmem>>, vector<1x1x15x2xf32>
    %446 = vector.shape_cast %445 : vector<1x1x15x2xf32> to vector<15x2xf32>
    %c0_739 = arith.constant 0 : index
    %c30_740 = arith.constant 30 : index
    %447 = vector.load %arg18[%c0_739, %c30_740] : memref<15x32xf32, #tpu.memory_space<vmem>>, vector<15x2xf32>
    tpu.vector_store %arg18[%c0_739, %c30_740], %446 {strides = array<i32>} : memref<15x32xf32, #tpu.memory_space<vmem>>, vector<15x2xf32>,
    %c0_741 = arith.constant 0 : index
    %c0_742 = arith.constant 0 : index
    %448 = vector.load %arg18[%c0_741, %c0_742] : memref<15x32xf32, #tpu.memory_space<vmem>>, vector<15x32xf32>
    %449 = arith.truncf %448 : vector<15x32xf32> to vector<15x32xbf16>
    %cst_743 = arith.constant dense<0.000000e+00> : vector<15x8xf32>
    %450 = tpu.matmul %449, %4, %cst_743 {dimension_numbers = #tpu.dot_dimension_numbers<[1], [0], [0], [1], [0, 0, 1, 1], [], []>} : vector<15x32xbf16>, vector<32x8xbf16>, vector<15x8xf32> -> vector<15x8xf32>
    %cst_744 = arith.constant dense<0.000000e+00> : vector<8x8xf32>
    %451 = tpu.matmul %5, %450, %cst_744 {dimension_numbers = #tpu.dot_dimension_numbers<[1], [0], [0], [1], [0, 0, 1, 1], [], []>} : vector<8x15xf32>, vector<15x8xf32>, vector<8x8xf32> -> vector<8x8xf32>
    %452 = vector.broadcast %6 : vector<1x8xf32> to vector<8x8xf32>
    %453 = arith.mulf %451, %452 : vector<8x8xf32>
    %454 = vector.broadcast %7 : vector<1x8xf32> to vector<8x8xf32>
    %455 = arith.addf %453, %454 : vector<8x8xf32>
    %cst_745 = arith.constant 0.000000e+00 : f32
    %456 = vector.broadcast %cst_745 : f32 to vector<8x8xf32>
    %457 = arith.cmpf oge, %455, %456 : vector<8x8xf32>
    %cst_746 = arith.constant 2.000000e-01 : f32
    %458 = vector.broadcast %cst_746 : f32 to vector<8x8xf32>
    %459 = arith.mulf %458, %455 : vector<8x8xf32>
    %460 = arith.select %457, %455, %459 : vector<8x8xi1>, vector<8x8xf32>
    %c0_747 = arith.constant 0 : index
    %c7_748 = arith.constant 7 : index
    %c1_749 = arith.constant 1 : index
    %c0_750 = arith.constant 0 : index
    %461 = vector.load %arg16[%c0_747, %c7_748, %c1_749, %c0_750] : memref<1x10x10x8xf32, #tpu.memory_space<vmem>>, vector<1x1x8x8xf32>
    %462 = vector.shape_cast %461 : vector<1x1x8x8xf32> to vector<8x8xf32>
    %463 = vector.shape_cast %460 : vector<8x8xf32> to vector<1x1x8x8xf32>
    tpu.vector_store %arg16[%c0_747, %c7_748, %c1_749, %c0_750], %463 {strides = array<i32>} : memref<1x10x10x8xf32, #tpu.memory_space<vmem>>, vector<1x1x8x8xf32>,
    %c0_751 = arith.constant 0 : index
    %c14_752 = arith.constant 14 : index
    %c0_753 = arith.constant 0 : index
    %c0_754 = arith.constant 0 : index
    %464 = vector.load %arg1[%c0_751, %c14_752, %c0_753, %c0_754] : memref<1x18x18x2xf32, #tpu.memory_space<vmem>>, vector<1x1x15x2xf32>
    %465 = vector.shape_cast %464 : vector<1x1x15x2xf32> to vector<15x2xf32>
    %c0_755 = arith.constant 0 : index
    %c0_756 = arith.constant 0 : index
    %466 = vector.load %arg18[%c0_755, %c0_756] : memref<15x32xf32, #tpu.memory_space<vmem>>, vector<15x2xf32>
    tpu.vector_store %arg18[%c0_755, %c0_756], %465 {strides = array<i32>} : memref<15x32xf32, #tpu.memory_space<vmem>>, vector<15x2xf32>,
    %c0_757 = arith.constant 0 : index
    %c14_758 = arith.constant 14 : index
    %c1_759 = arith.constant 1 : index
    %c0_760 = arith.constant 0 : index
    %467 = vector.load %arg1[%c0_757, %c14_758, %c1_759, %c0_760] : memref<1x18x18x2xf32, #tpu.memory_space<vmem>>, vector<1x1x15x2xf32>
    %468 = vector.shape_cast %467 : vector<1x1x15x2xf32> to vector<15x2xf32>
    %c0_761 = arith.constant 0 : index
    %c2_762 = arith.constant 2 : index
    %469 = vector.load %arg18[%c0_761, %c2_762] : memref<15x32xf32, #tpu.memory_space<vmem>>, vector<15x2xf32>
    tpu.vector_store %arg18[%c0_761, %c2_762], %468 {strides = array<i32>} : memref<15x32xf32, #tpu.memory_space<vmem>>, vector<15x2xf32>,
    %c0_763 = arith.constant 0 : index
    %c14_764 = arith.constant 14 : index
    %c2_765 = arith.constant 2 : index
    %c0_766 = arith.constant 0 : index
    %470 = vector.load %arg1[%c0_763, %c14_764, %c2_765, %c0_766] : memref<1x18x18x2xf32, #tpu.memory_space<vmem>>, vector<1x1x15x2xf32>
    %471 = vector.shape_cast %470 : vector<1x1x15x2xf32> to vector<15x2xf32>
    %c0_767 = arith.constant 0 : index
    %c4_768 = arith.constant 4 : index
    %472 = vector.load %arg18[%c0_767, %c4_768] : memref<15x32xf32, #tpu.memory_space<vmem>>, vector<15x2xf32>
    tpu.vector_store %arg18[%c0_767, %c4_768], %471 {strides = array<i32>} : memref<15x32xf32, #tpu.memory_space<vmem>>, vector<15x2xf32>,
    %c0_769 = arith.constant 0 : index
    %c14_770 = arith.constant 14 : index
    %c3_771 = arith.constant 3 : index
    %c0_772 = arith.constant 0 : index
    %473 = vector.load %arg1[%c0_769, %c14_770, %c3_771, %c0_772] : memref<1x18x18x2xf32, #tpu.memory_space<vmem>>, vector<1x1x15x2xf32>
    %474 = vector.shape_cast %473 : vector<1x1x15x2xf32> to vector<15x2xf32>
    %c0_773 = arith.constant 0 : index
    %c6_774 = arith.constant 6 : index
    %475 = vector.load %arg18[%c0_773, %c6_774] : memref<15x32xf32, #tpu.memory_space<vmem>>, vector<15x2xf32>
    tpu.vector_store %arg18[%c0_773, %c6_774], %474 {strides = array<i32>} : memref<15x32xf32, #tpu.memory_space<vmem>>, vector<15x2xf32>,
    %c0_775 = arith.constant 0 : index
    %c15_776 = arith.constant 15 : index
    %c0_777 = arith.constant 0 : index
    %c0_778 = arith.constant 0 : index
    %476 = vector.load %arg1[%c0_775, %c15_776, %c0_777, %c0_778] : memref<1x18x18x2xf32, #tpu.memory_space<vmem>>, vector<1x1x15x2xf32>
    %477 = vector.shape_cast %476 : vector<1x1x15x2xf32> to vector<15x2xf32>
    %c0_779 = arith.constant 0 : index
    %c8_780 = arith.constant 8 : index
    %478 = vector.load %arg18[%c0_779, %c8_780] : memref<15x32xf32, #tpu.memory_space<vmem>>, vector<15x2xf32>
    tpu.vector_store %arg18[%c0_779, %c8_780], %477 {strides = array<i32>} : memref<15x32xf32, #tpu.memory_space<vmem>>, vector<15x2xf32>,
    %c0_781 = arith.constant 0 : index
    %c15_782 = arith.constant 15 : index
    %c1_783 = arith.constant 1 : index
    %c0_784 = arith.constant 0 : index
    %479 = vector.load %arg1[%c0_781, %c15_782, %c1_783, %c0_784] : memref<1x18x18x2xf32, #tpu.memory_space<vmem>>, vector<1x1x15x2xf32>
    %480 = vector.shape_cast %479 : vector<1x1x15x2xf32> to vector<15x2xf32>
    %c0_785 = arith.constant 0 : index
    %c10_786 = arith.constant 10 : index
    %481 = vector.load %arg18[%c0_785, %c10_786] : memref<15x32xf32, #tpu.memory_space<vmem>>, vector<15x2xf32>
    tpu.vector_store %arg18[%c0_785, %c10_786], %480 {strides = array<i32>} : memref<15x32xf32, #tpu.memory_space<vmem>>, vector<15x2xf32>,
    %c0_787 = arith.constant 0 : index
    %c15_788 = arith.constant 15 : index
    %c2_789 = arith.constant 2 : index
    %c0_790 = arith.constant 0 : index
    %482 = vector.load %arg1[%c0_787, %c15_788, %c2_789, %c0_790] : memref<1x18x18x2xf32, #tpu.memory_space<vmem>>, vector<1x1x15x2xf32>
    %483 = vector.shape_cast %482 : vector<1x1x15x2xf32> to vector<15x2xf32>
    %c0_791 = arith.constant 0 : index
    %c12_792 = arith.constant 12 : index
    %484 = vector.load %arg18[%c0_791, %c12_792] : memref<15x32xf32, #tpu.memory_space<vmem>>, vector<15x2xf32>
    tpu.vector_store %arg18[%c0_791, %c12_792], %483 {strides = array<i32>} : memref<15x32xf32, #tpu.memory_space<vmem>>, vector<15x2xf32>,
    %c0_793 = arith.constant 0 : index
    %c15_794 = arith.constant 15 : index
    %c3_795 = arith.constant 3 : index
    %c0_796 = arith.constant 0 : index
    %485 = vector.load %arg1[%c0_793, %c15_794, %c3_795, %c0_796] : memref<1x18x18x2xf32, #tpu.memory_space<vmem>>, vector<1x1x15x2xf32>
    %486 = vector.shape_cast %485 : vector<1x1x15x2xf32> to vector<15x2xf32>
    %c0_797 = arith.constant 0 : index
    %c14_798 = arith.constant 14 : index
    %487 = vector.load %arg18[%c0_797, %c14_798] : memref<15x32xf32, #tpu.memory_space<vmem>>, vector<15x2xf32>
    tpu.vector_store %arg18[%c0_797, %c14_798], %486 {strides = array<i32>} : memref<15x32xf32, #tpu.memory_space<vmem>>, vector<15x2xf32>,
    %c0_799 = arith.constant 0 : index
    %c16_800 = arith.constant 16 : index
    %c0_801 = arith.constant 0 : index
    %c0_802 = arith.constant 0 : index
    %488 = vector.load %arg1[%c0_799, %c16_800, %c0_801, %c0_802] : memref<1x18x18x2xf32, #tpu.memory_space<vmem>>, vector<1x1x15x2xf32>
    %489 = vector.shape_cast %488 : vector<1x1x15x2xf32> to vector<15x2xf32>
    %c0_803 = arith.constant 0 : index
    %c16_804 = arith.constant 16 : index
    %490 = vector.load %arg18[%c0_803, %c16_804] : memref<15x32xf32, #tpu.memory_space<vmem>>, vector<15x2xf32>
    tpu.vector_store %arg18[%c0_803, %c16_804], %489 {strides = array<i32>} : memref<15x32xf32, #tpu.memory_space<vmem>>, vector<15x2xf32>,
    %c0_805 = arith.constant 0 : index
    %c16_806 = arith.constant 16 : index
    %c1_807 = arith.constant 1 : index
    %c0_808 = arith.constant 0 : index
    %491 = vector.load %arg1[%c0_805, %c16_806, %c1_807, %c0_808] : memref<1x18x18x2xf32, #tpu.memory_space<vmem>>, vector<1x1x15x2xf32>
    %492 = vector.shape_cast %491 : vector<1x1x15x2xf32> to vector<15x2xf32>
    %c0_809 = arith.constant 0 : index
    %c18_810 = arith.constant 18 : index
    %493 = vector.load %arg18[%c0_809, %c18_810] : memref<15x32xf32, #tpu.memory_space<vmem>>, vector<15x2xf32>
    tpu.vector_store %arg18[%c0_809, %c18_810], %492 {strides = array<i32>} : memref<15x32xf32, #tpu.memory_space<vmem>>, vector<15x2xf32>,
    %c0_811 = arith.constant 0 : index
    %c16_812 = arith.constant 16 : index
    %c2_813 = arith.constant 2 : index
    %c0_814 = arith.constant 0 : index
    %494 = vector.load %arg1[%c0_811, %c16_812, %c2_813, %c0_814] : memref<1x18x18x2xf32, #tpu.memory_space<vmem>>, vector<1x1x15x2xf32>
    %495 = vector.shape_cast %494 : vector<1x1x15x2xf32> to vector<15x2xf32>
    %c0_815 = arith.constant 0 : index
    %c20_816 = arith.constant 20 : index
    %496 = vector.load %arg18[%c0_815, %c20_816] : memref<15x32xf32, #tpu.memory_space<vmem>>, vector<15x2xf32>
    tpu.vector_store %arg18[%c0_815, %c20_816], %495 {strides = array<i32>} : memref<15x32xf32, #tpu.memory_space<vmem>>, vector<15x2xf32>,
    %c0_817 = arith.constant 0 : index
    %c16_818 = arith.constant 16 : index
    %c3_819 = arith.constant 3 : index
    %c0_820 = arith.constant 0 : index
    %497 = vector.load %arg1[%c0_817, %c16_818, %c3_819, %c0_820] : memref<1x18x18x2xf32, #tpu.memory_space<vmem>>, vector<1x1x15x2xf32>
    %498 = vector.shape_cast %497 : vector<1x1x15x2xf32> to vector<15x2xf32>
    %c0_821 = arith.constant 0 : index
    %c22_822 = arith.constant 22 : index
    %499 = vector.load %arg18[%c0_821, %c22_822] : memref<15x32xf32, #tpu.memory_space<vmem>>, vector<15x2xf32>
    tpu.vector_store %arg18[%c0_821, %c22_822], %498 {strides = array<i32>} : memref<15x32xf32, #tpu.memory_space<vmem>>, vector<15x2xf32>,
    %c0_823 = arith.constant 0 : index
    %c17 = arith.constant 17 : index
    %c0_824 = arith.constant 0 : index
    %c0_825 = arith.constant 0 : index
    %500 = vector.load %arg1[%c0_823, %c17, %c0_824, %c0_825] : memref<1x18x18x2xf32, #tpu.memory_space<vmem>>, vector<1x1x15x2xf32>
    %501 = vector.shape_cast %500 : vector<1x1x15x2xf32> to vector<15x2xf32>
    %c0_826 = arith.constant 0 : index
    %c24_827 = arith.constant 24 : index
    %502 = vector.load %arg18[%c0_826, %c24_827] : memref<15x32xf32, #tpu.memory_space<vmem>>, vector<15x2xf32>
    tpu.vector_store %arg18[%c0_826, %c24_827], %501 {strides = array<i32>} : memref<15x32xf32, #tpu.memory_space<vmem>>, vector<15x2xf32>,
    %c0_828 = arith.constant 0 : index
    %c17_829 = arith.constant 17 : index
    %c1_830 = arith.constant 1 : index
    %c0_831 = arith.constant 0 : index
    %503 = vector.load %arg1[%c0_828, %c17_829, %c1_830, %c0_831] : memref<1x18x18x2xf32, #tpu.memory_space<vmem>>, vector<1x1x15x2xf32>
    %504 = vector.shape_cast %503 : vector<1x1x15x2xf32> to vector<15x2xf32>
    %c0_832 = arith.constant 0 : index
    %c26_833 = arith.constant 26 : index
    %505 = vector.load %arg18[%c0_832, %c26_833] : memref<15x32xf32, #tpu.memory_space<vmem>>, vector<15x2xf32>
    tpu.vector_store %arg18[%c0_832, %c26_833], %504 {strides = array<i32>} : memref<15x32xf32, #tpu.memory_space<vmem>>, vector<15x2xf32>,
    %c0_834 = arith.constant 0 : index
    %c17_835 = arith.constant 17 : index
    %c2_836 = arith.constant 2 : index
    %c0_837 = arith.constant 0 : index
    %506 = vector.load %arg1[%c0_834, %c17_835, %c2_836, %c0_837] : memref<1x18x18x2xf32, #tpu.memory_space<vmem>>, vector<1x1x15x2xf32>
    %507 = vector.shape_cast %506 : vector<1x1x15x2xf32> to vector<15x2xf32>
    %c0_838 = arith.constant 0 : index
    %c28_839 = arith.constant 28 : index
    %508 = vector.load %arg18[%c0_838, %c28_839] : memref<15x32xf32, #tpu.memory_space<vmem>>, vector<15x2xf32>
    tpu.vector_store %arg18[%c0_838, %c28_839], %507 {strides = array<i32>} : memref<15x32xf32, #tpu.memory_space<vmem>>, vector<15x2xf32>,
    %c0_840 = arith.constant 0 : index
    %c17_841 = arith.constant 17 : index
    %c3_842 = arith.constant 3 : index
    %c0_843 = arith.constant 0 : index
    %509 = vector.load %arg1[%c0_840, %c17_841, %c3_842, %c0_843] : memref<1x18x18x2xf32, #tpu.memory_space<vmem>>, vector<1x1x15x2xf32>
    %510 = vector.shape_cast %509 : vector<1x1x15x2xf32> to vector<15x2xf32>
    %c0_844 = arith.constant 0 : index
    %c30_845 = arith.constant 30 : index
    %511 = vector.load %arg18[%c0_844, %c30_845] : memref<15x32xf32, #tpu.memory_space<vmem>>, vector<15x2xf32>
    tpu.vector_store %arg18[%c0_844, %c30_845], %510 {strides = array<i32>} : memref<15x32xf32, #tpu.memory_space<vmem>>, vector<15x2xf32>,
    %c0_846 = arith.constant 0 : index
    %c0_847 = arith.constant 0 : index
    %512 = vector.load %arg18[%c0_846, %c0_847] : memref<15x32xf32, #tpu.memory_space<vmem>>, vector<15x32xf32>
    %513 = arith.truncf %512 : vector<15x32xf32> to vector<15x32xbf16>
    %cst_848 = arith.constant dense<0.000000e+00> : vector<15x8xf32>
    %514 = tpu.matmul %513, %4, %cst_848 {dimension_numbers = #tpu.dot_dimension_numbers<[1], [0], [0], [1], [0, 0, 1, 1], [], []>} : vector<15x32xbf16>, vector<32x8xbf16>, vector<15x8xf32> -> vector<15x8xf32>
    %cst_849 = arith.constant dense<0.000000e+00> : vector<8x8xf32>
    %515 = tpu.matmul %5, %514, %cst_849 {dimension_numbers = #tpu.dot_dimension_numbers<[1], [0], [0], [1], [0, 0, 1, 1], [], []>} : vector<8x15xf32>, vector<15x8xf32>, vector<8x8xf32> -> vector<8x8xf32>
    %516 = vector.broadcast %6 : vector<1x8xf32> to vector<8x8xf32>
    %517 = arith.mulf %515, %516 : vector<8x8xf32>
    %518 = vector.broadcast %7 : vector<1x8xf32> to vector<8x8xf32>
    %519 = arith.addf %517, %518 : vector<8x8xf32>
    %cst_850 = arith.constant 0.000000e+00 : f32
    %520 = vector.broadcast %cst_850 : f32 to vector<8x8xf32>
    %521 = arith.cmpf oge, %519, %520 : vector<8x8xf32>
    %cst_851 = arith.constant 2.000000e-01 : f32
    %522 = vector.broadcast %cst_851 : f32 to vector<8x8xf32>
    %523 = arith.mulf %522, %519 : vector<8x8xf32>
    %524 = arith.select %521, %519, %523 : vector<8x8xi1>, vector<8x8xf32>
    %c0_852 = arith.constant 0 : index
    %c8_853 = arith.constant 8 : index
    %c1_854 = arith.constant 1 : index
    %c0_855 = arith.constant 0 : index
    %525 = vector.load %arg16[%c0_852, %c8_853, %c1_854, %c0_855] : memref<1x10x10x8xf32, #tpu.memory_space<vmem>>, vector<1x1x8x8xf32>
    %526 = vector.shape_cast %525 : vector<1x1x8x8xf32> to vector<8x8xf32>
    %527 = vector.shape_cast %524 : vector<8x8xf32> to vector<1x1x8x8xf32>
    tpu.vector_store %arg16[%c0_852, %c8_853, %c1_854, %c0_855], %527 {strides = array<i32>} : memref<1x10x10x8xf32, #tpu.memory_space<vmem>>, vector<1x1x8x8xf32>,
    %c0_856 = arith.constant 0 : index
    %c0_857 = arith.constant 0 : index
    %c0_858 = arith.constant 0 : index
    %c0_859 = arith.constant 0 : index
    %528 = vector.load %arg16[%c0_856, %c0_857, %c0_858, %c0_859] : memref<1x10x10x8xf32, #tpu.memory_space<vmem>>, vector<1x1x7x8xf32>
    %529 = vector.shape_cast %528 : vector<1x1x7x8xf32> to vector<7x8xf32>
    %c0_860 = arith.constant 0 : index
    %c0_861 = arith.constant 0 : index
    %530 = vector.load %arg19[%c0_860, %c0_861] : memref<7x128xf32, #tpu.memory_space<vmem>>, vector<7x8xf32>
    tpu.vector_store %arg19[%c0_860, %c0_861], %529 {strides = array<i32>} : memref<7x128xf32, #tpu.memory_space<vmem>>, vector<7x8xf32>,
    %c0_862 = arith.constant 0 : index
    %c0_863 = arith.constant 0 : index
    %c1_864 = arith.constant 1 : index
    %c0_865 = arith.constant 0 : index
    %531 = vector.load %arg16[%c0_862, %c0_863, %c1_864, %c0_865] : memref<1x10x10x8xf32, #tpu.memory_space<vmem>>, vector<1x1x7x8xf32>
    %532 = vector.shape_cast %531 : vector<1x1x7x8xf32> to vector<7x8xf32>
    %c0_866 = arith.constant 0 : index
    %c8_867 = arith.constant 8 : index
    %533 = vector.load %arg19[%c0_866, %c8_867] : memref<7x128xf32, #tpu.memory_space<vmem>>, vector<7x8xf32>
    tpu.vector_store %arg19[%c0_866, %c8_867], %532 {strides = array<i32>} : memref<7x128xf32, #tpu.memory_space<vmem>>, vector<7x8xf32>,
    %c0_868 = arith.constant 0 : index
    %c0_869 = arith.constant 0 : index
    %c2_870 = arith.constant 2 : index
    %c0_871 = arith.constant 0 : index
    %534 = vector.load %arg16[%c0_868, %c0_869, %c2_870, %c0_871] : memref<1x10x10x8xf32, #tpu.memory_space<vmem>>, vector<1x1x7x8xf32>
    %535 = vector.shape_cast %534 : vector<1x1x7x8xf32> to vector<7x8xf32>
    %c0_872 = arith.constant 0 : index
    %c16_873 = arith.constant 16 : index
    %536 = vector.load %arg19[%c0_872, %c16_873] : memref<7x128xf32, #tpu.memory_space<vmem>>, vector<7x8xf32>
    tpu.vector_store %arg19[%c0_872, %c16_873], %535 {strides = array<i32>} : memref<7x128xf32, #tpu.memory_space<vmem>>, vector<7x8xf32>,
    %c0_874 = arith.constant 0 : index
    %c0_875 = arith.constant 0 : index
    %c3_876 = arith.constant 3 : index
    %c0_877 = arith.constant 0 : index
    %537 = vector.load %arg16[%c0_874, %c0_875, %c3_876, %c0_877] : memref<1x10x10x8xf32, #tpu.memory_space<vmem>>, vector<1x1x7x8xf32>
    %538 = vector.shape_cast %537 : vector<1x1x7x8xf32> to vector<7x8xf32>
    %c0_878 = arith.constant 0 : index
    %c24_879 = arith.constant 24 : index
    %539 = vector.load %arg19[%c0_878, %c24_879] : memref<7x128xf32, #tpu.memory_space<vmem>>, vector<7x8xf32>
    tpu.vector_store %arg19[%c0_878, %c24_879], %538 {strides = array<i32>} : memref<7x128xf32, #tpu.memory_space<vmem>>, vector<7x8xf32>,
    %c0_880 = arith.constant 0 : index
    %c1_881 = arith.constant 1 : index
    %c0_882 = arith.constant 0 : index
    %c0_883 = arith.constant 0 : index
    %540 = vector.load %arg16[%c0_880, %c1_881, %c0_882, %c0_883] : memref<1x10x10x8xf32, #tpu.memory_space<vmem>>, vector<1x1x7x8xf32>
    %541 = vector.shape_cast %540 : vector<1x1x7x8xf32> to vector<7x8xf32>
    %c0_884 = arith.constant 0 : index
    %c32 = arith.constant 32 : index
    %542 = vector.load %arg19[%c0_884, %c32] : memref<7x128xf32, #tpu.memory_space<vmem>>, vector<7x8xf32>
    tpu.vector_store %arg19[%c0_884, %c32], %541 {strides = array<i32>} : memref<7x128xf32, #tpu.memory_space<vmem>>, vector<7x8xf32>,
    %c0_885 = arith.constant 0 : index
    %c1_886 = arith.constant 1 : index
    %c1_887 = arith.constant 1 : index
    %c0_888 = arith.constant 0 : index
    %543 = vector.load %arg16[%c0_885, %c1_886, %c1_887, %c0_888] : memref<1x10x10x8xf32, #tpu.memory_space<vmem>>, vector<1x1x7x8xf32>
    %544 = vector.shape_cast %543 : vector<1x1x7x8xf32> to vector<7x8xf32>
    %c0_889 = arith.constant 0 : index
    %c40 = arith.constant 40 : index
    %545 = vector.load %arg19[%c0_889, %c40] : memref<7x128xf32, #tpu.memory_space<vmem>>, vector<7x8xf32>
    tpu.vector_store %arg19[%c0_889, %c40], %544 {strides = array<i32>} : memref<7x128xf32, #tpu.memory_space<vmem>>, vector<7x8xf32>,
    %c0_890 = arith.constant 0 : index
    %c1_891 = arith.constant 1 : index
    %c2_892 = arith.constant 2 : index
    %c0_893 = arith.constant 0 : index
    %546 = vector.load %arg16[%c0_890, %c1_891, %c2_892, %c0_893] : memref<1x10x10x8xf32, #tpu.memory_space<vmem>>, vector<1x1x7x8xf32>
    %547 = vector.shape_cast %546 : vector<1x1x7x8xf32> to vector<7x8xf32>
    %c0_894 = arith.constant 0 : index
    %c48 = arith.constant 48 : index
    %548 = vector.load %arg19[%c0_894, %c48] : memref<7x128xf32, #tpu.memory_space<vmem>>, vector<7x8xf32>
    tpu.vector_store %arg19[%c0_894, %c48], %547 {strides = array<i32>} : memref<7x128xf32, #tpu.memory_space<vmem>>, vector<7x8xf32>,
    %c0_895 = arith.constant 0 : index
    %c1_896 = arith.constant 1 : index
    %c3_897 = arith.constant 3 : index
    %c0_898 = arith.constant 0 : index
    %549 = vector.load %arg16[%c0_895, %c1_896, %c3_897, %c0_898] : memref<1x10x10x8xf32, #tpu.memory_space<vmem>>, vector<1x1x7x8xf32>
    %550 = vector.shape_cast %549 : vector<1x1x7x8xf32> to vector<7x8xf32>
    %c0_899 = arith.constant 0 : index
    %c56 = arith.constant 56 : index
    %551 = vector.load %arg19[%c0_899, %c56] : memref<7x128xf32, #tpu.memory_space<vmem>>, vector<7x8xf32>
    tpu.vector_store %arg19[%c0_899, %c56], %550 {strides = array<i32>} : memref<7x128xf32, #tpu.memory_space<vmem>>, vector<7x8xf32>,
    %c0_900 = arith.constant 0 : index
    %c2_901 = arith.constant 2 : index
    %c0_902 = arith.constant 0 : index
    %c0_903 = arith.constant 0 : index
    %552 = vector.load %arg16[%c0_900, %c2_901, %c0_902, %c0_903] : memref<1x10x10x8xf32, #tpu.memory_space<vmem>>, vector<1x1x7x8xf32>
    %553 = vector.shape_cast %552 : vector<1x1x7x8xf32> to vector<7x8xf32>
    %c0_904 = arith.constant 0 : index
    %c64 = arith.constant 64 : index
    %554 = vector.load %arg19[%c0_904, %c64] : memref<7x128xf32, #tpu.memory_space<vmem>>, vector<7x8xf32>
    tpu.vector_store %arg19[%c0_904, %c64], %553 {strides = array<i32>} : memref<7x128xf32, #tpu.memory_space<vmem>>, vector<7x8xf32>,
    %c0_905 = arith.constant 0 : index
    %c2_906 = arith.constant 2 : index
    %c1_907 = arith.constant 1 : index
    %c0_908 = arith.constant 0 : index
    %555 = vector.load %arg16[%c0_905, %c2_906, %c1_907, %c0_908] : memref<1x10x10x8xf32, #tpu.memory_space<vmem>>, vector<1x1x7x8xf32>
    %556 = vector.shape_cast %555 : vector<1x1x7x8xf32> to vector<7x8xf32>
    %c0_909 = arith.constant 0 : index
    %c72 = arith.constant 72 : index
    %557 = vector.load %arg19[%c0_909, %c72] : memref<7x128xf32, #tpu.memory_space<vmem>>, vector<7x8xf32>
    tpu.vector_store %arg19[%c0_909, %c72], %556 {strides = array<i32>} : memref<7x128xf32, #tpu.memory_space<vmem>>, vector<7x8xf32>,
    %c0_910 = arith.constant 0 : index
    %c2_911 = arith.constant 2 : index
    %c2_912 = arith.constant 2 : index
    %c0_913 = arith.constant 0 : index
    %558 = vector.load %arg16[%c0_910, %c2_911, %c2_912, %c0_913] : memref<1x10x10x8xf32, #tpu.memory_space<vmem>>, vector<1x1x7x8xf32>
    %559 = vector.shape_cast %558 : vector<1x1x7x8xf32> to vector<7x8xf32>
    %c0_914 = arith.constant 0 : index
    %c80 = arith.constant 80 : index
    %560 = vector.load %arg19[%c0_914, %c80] : memref<7x128xf32, #tpu.memory_space<vmem>>, vector<7x8xf32>
    tpu.vector_store %arg19[%c0_914, %c80], %559 {strides = array<i32>} : memref<7x128xf32, #tpu.memory_space<vmem>>, vector<7x8xf32>,
    %c0_915 = arith.constant 0 : index
    %c2_916 = arith.constant 2 : index
    %c3_917 = arith.constant 3 : index
    %c0_918 = arith.constant 0 : index
    %561 = vector.load %arg16[%c0_915, %c2_916, %c3_917, %c0_918] : memref<1x10x10x8xf32, #tpu.memory_space<vmem>>, vector<1x1x7x8xf32>
    %562 = vector.shape_cast %561 : vector<1x1x7x8xf32> to vector<7x8xf32>
    %c0_919 = arith.constant 0 : index
    %c88 = arith.constant 88 : index
    %563 = vector.load %arg19[%c0_919, %c88] : memref<7x128xf32, #tpu.memory_space<vmem>>, vector<7x8xf32>
    tpu.vector_store %arg19[%c0_919, %c88], %562 {strides = array<i32>} : memref<7x128xf32, #tpu.memory_space<vmem>>, vector<7x8xf32>,
    %c0_920 = arith.constant 0 : index
    %c3_921 = arith.constant 3 : index
    %c0_922 = arith.constant 0 : index
    %c0_923 = arith.constant 0 : index
    %564 = vector.load %arg16[%c0_920, %c3_921, %c0_922, %c0_923] : memref<1x10x10x8xf32, #tpu.memory_space<vmem>>, vector<1x1x7x8xf32>
    %565 = vector.shape_cast %564 : vector<1x1x7x8xf32> to vector<7x8xf32>
    %c0_924 = arith.constant 0 : index
    %c96 = arith.constant 96 : index
    %566 = vector.load %arg19[%c0_924, %c96] : memref<7x128xf32, #tpu.memory_space<vmem>>, vector<7x8xf32>
    tpu.vector_store %arg19[%c0_924, %c96], %565 {strides = array<i32>} : memref<7x128xf32, #tpu.memory_space<vmem>>, vector<7x8xf32>,
    %c0_925 = arith.constant 0 : index
    %c3_926 = arith.constant 3 : index
    %c1_927 = arith.constant 1 : index
    %c0_928 = arith.constant 0 : index
    %567 = vector.load %arg16[%c0_925, %c3_926, %c1_927, %c0_928] : memref<1x10x10x8xf32, #tpu.memory_space<vmem>>, vector<1x1x7x8xf32>
    %568 = vector.shape_cast %567 : vector<1x1x7x8xf32> to vector<7x8xf32>
    %c0_929 = arith.constant 0 : index
    %c104 = arith.constant 104 : index
    %569 = vector.load %arg19[%c0_929, %c104] : memref<7x128xf32, #tpu.memory_space<vmem>>, vector<7x8xf32>
    tpu.vector_store %arg19[%c0_929, %c104], %568 {strides = array<i32>} : memref<7x128xf32, #tpu.memory_space<vmem>>, vector<7x8xf32>,
    %c0_930 = arith.constant 0 : index
    %c3_931 = arith.constant 3 : index
    %c2_932 = arith.constant 2 : index
    %c0_933 = arith.constant 0 : index
    %570 = vector.load %arg16[%c0_930, %c3_931, %c2_932, %c0_933] : memref<1x10x10x8xf32, #tpu.memory_space<vmem>>, vector<1x1x7x8xf32>
    %571 = vector.shape_cast %570 : vector<1x1x7x8xf32> to vector<7x8xf32>
    %c0_934 = arith.constant 0 : index
    %c112 = arith.constant 112 : index
    %572 = vector.load %arg19[%c0_934, %c112] : memref<7x128xf32, #tpu.memory_space<vmem>>, vector<7x8xf32>
    tpu.vector_store %arg19[%c0_934, %c112], %571 {strides = array<i32>} : memref<7x128xf32, #tpu.memory_space<vmem>>, vector<7x8xf32>,
    %c0_935 = arith.constant 0 : index
    %c3_936 = arith.constant 3 : index
    %c3_937 = arith.constant 3 : index
    %c0_938 = arith.constant 0 : index
    %573 = vector.load %arg16[%c0_935, %c3_936, %c3_937, %c0_938] : memref<1x10x10x8xf32, #tpu.memory_space<vmem>>, vector<1x1x7x8xf32>
    %574 = vector.shape_cast %573 : vector<1x1x7x8xf32> to vector<7x8xf32>
    %c0_939 = arith.constant 0 : index
    %c120 = arith.constant 120 : index
    %575 = vector.load %arg19[%c0_939, %c120] : memref<7x128xf32, #tpu.memory_space<vmem>>, vector<7x8xf32>
    tpu.vector_store %arg19[%c0_939, %c120], %574 {strides = array<i32>} : memref<7x128xf32, #tpu.memory_space<vmem>>, vector<7x8xf32>,
    %c0_940 = arith.constant 0 : index
    %c0_941 = arith.constant 0 : index
    %576 = vector.load %arg19[%c0_940, %c0_941] : memref<7x128xf32, #tpu.memory_space<vmem>>, vector<7x128xf32>
    %577 = arith.truncf %576 : vector<7x128xf32> to vector<7x128xbf16>
    %cst_942 = arith.constant dense<0.000000e+00> : vector<7x16xf32>
    %578 = tpu.matmul %577, %8, %cst_942 {dimension_numbers = #tpu.dot_dimension_numbers<[1], [0], [0], [1], [0, 0, 1, 1], [], []>} : vector<7x128xbf16>, vector<128x16xbf16>, vector<7x16xf32> -> vector<7x16xf32>
    %cst_943 = arith.constant dense<0.000000e+00> : vector<4x16xf32>
    %579 = tpu.matmul %9, %578, %cst_943 {dimension_numbers = #tpu.dot_dimension_numbers<[1], [0], [0], [1], [0, 0, 1, 1], [], []>} : vector<4x7xf32>, vector<7x16xf32>, vector<4x16xf32> -> vector<4x16xf32>
    %580 = vector.broadcast %10 : vector<1x16xf32> to vector<4x16xf32>
    %581 = arith.mulf %579, %580 : vector<4x16xf32>
    %582 = vector.broadcast %11 : vector<1x16xf32> to vector<4x16xf32>
    %583 = arith.addf %581, %582 : vector<4x16xf32>
    %cst_944 = arith.constant 0.000000e+00 : f32
    %584 = vector.broadcast %cst_944 : f32 to vector<4x16xf32>
    %585 = arith.cmpf oge, %583, %584 : vector<4x16xf32>
    %cst_945 = arith.constant 2.000000e-01 : f32
    %586 = vector.broadcast %cst_945 : f32 to vector<4x16xf32>
    %587 = arith.mulf %586, %583 : vector<4x16xf32>
    %588 = arith.select %585, %583, %587 : vector<4x16xi1>, vector<4x16xf32>
    %c0_946 = arith.constant 0 : index
    %c1_947 = arith.constant 1 : index
    %c1_948 = arith.constant 1 : index
    %c0_949 = arith.constant 0 : index
    %589 = vector.load %arg17[%c0_946, %c1_947, %c1_948, %c0_949] : memref<1x6x6x16xf32, #tpu.memory_space<vmem>>, vector<1x1x4x16xf32>
    %590 = vector.shape_cast %589 : vector<1x1x4x16xf32> to vector<4x16xf32>
    %591 = vector.shape_cast %588 : vector<4x16xf32> to vector<1x1x4x16xf32>
    tpu.vector_store %arg17[%c0_946, %c1_947, %c1_948, %c0_949], %591 {strides = array<i32>} : memref<1x6x6x16xf32, #tpu.memory_space<vmem>>, vector<1x1x4x16xf32>,
    %c0_950 = arith.constant 0 : index
    %c2_951 = arith.constant 2 : index
    %c0_952 = arith.constant 0 : index
    %c0_953 = arith.constant 0 : index
    %592 = vector.load %arg16[%c0_950, %c2_951, %c0_952, %c0_953] : memref<1x10x10x8xf32, #tpu.memory_space<vmem>>, vector<1x1x7x8xf32>
    %593 = vector.shape_cast %592 : vector<1x1x7x8xf32> to vector<7x8xf32>
    %c0_954 = arith.constant 0 : index
    %c0_955 = arith.constant 0 : index
    %594 = vector.load %arg19[%c0_954, %c0_955] : memref<7x128xf32, #tpu.memory_space<vmem>>, vector<7x8xf32>
    tpu.vector_store %arg19[%c0_954, %c0_955], %593 {strides = array<i32>} : memref<7x128xf32, #tpu.memory_space<vmem>>, vector<7x8xf32>,
    %c0_956 = arith.constant 0 : index
    %c2_957 = arith.constant 2 : index
    %c1_958 = arith.constant 1 : index
    %c0_959 = arith.constant 0 : index
    %595 = vector.load %arg16[%c0_956, %c2_957, %c1_958, %c0_959] : memref<1x10x10x8xf32, #tpu.memory_space<vmem>>, vector<1x1x7x8xf32>
    %596 = vector.shape_cast %595 : vector<1x1x7x8xf32> to vector<7x8xf32>
    %c0_960 = arith.constant 0 : index
    %c8_961 = arith.constant 8 : index
    %597 = vector.load %arg19[%c0_960, %c8_961] : memref<7x128xf32, #tpu.memory_space<vmem>>, vector<7x8xf32>
    tpu.vector_store %arg19[%c0_960, %c8_961], %596 {strides = array<i32>} : memref<7x128xf32, #tpu.memory_space<vmem>>, vector<7x8xf32>,
    %c0_962 = arith.constant 0 : index
    %c2_963 = arith.constant 2 : index
    %c2_964 = arith.constant 2 : index
    %c0_965 = arith.constant 0 : index
    %598 = vector.load %arg16[%c0_962, %c2_963, %c2_964, %c0_965] : memref<1x10x10x8xf32, #tpu.memory_space<vmem>>, vector<1x1x7x8xf32>
    %599 = vector.shape_cast %598 : vector<1x1x7x8xf32> to vector<7x8xf32>
    %c0_966 = arith.constant 0 : index
    %c16_967 = arith.constant 16 : index
    %600 = vector.load %arg19[%c0_966, %c16_967] : memref<7x128xf32, #tpu.memory_space<vmem>>, vector<7x8xf32>
    tpu.vector_store %arg19[%c0_966, %c16_967], %599 {strides = array<i32>} : memref<7x128xf32, #tpu.memory_space<vmem>>, vector<7x8xf32>,
    %c0_968 = arith.constant 0 : index
    %c2_969 = arith.constant 2 : index
    %c3_970 = arith.constant 3 : index
    %c0_971 = arith.constant 0 : index
    %601 = vector.load %arg16[%c0_968, %c2_969, %c3_970, %c0_971] : memref<1x10x10x8xf32, #tpu.memory_space<vmem>>, vector<1x1x7x8xf32>
    %602 = vector.shape_cast %601 : vector<1x1x7x8xf32> to vector<7x8xf32>
    %c0_972 = arith.constant 0 : index
    %c24_973 = arith.constant 24 : index
    %603 = vector.load %arg19[%c0_972, %c24_973] : memref<7x128xf32, #tpu.memory_space<vmem>>, vector<7x8xf32>
    tpu.vector_store %arg19[%c0_972, %c24_973], %602 {strides = array<i32>} : memref<7x128xf32, #tpu.memory_space<vmem>>, vector<7x8xf32>,
    %c0_974 = arith.constant 0 : index
    %c3_975 = arith.constant 3 : index
    %c0_976 = arith.constant 0 : index
    %c0_977 = arith.constant 0 : index
    %604 = vector.load %arg16[%c0_974, %c3_975, %c0_976, %c0_977] : memref<1x10x10x8xf32, #tpu.memory_space<vmem>>, vector<1x1x7x8xf32>
    %605 = vector.shape_cast %604 : vector<1x1x7x8xf32> to vector<7x8xf32>
    %c0_978 = arith.constant 0 : index
    %c32_979 = arith.constant 32 : index
    %606 = vector.load %arg19[%c0_978, %c32_979] : memref<7x128xf32, #tpu.memory_space<vmem>>, vector<7x8xf32>
    tpu.vector_store %arg19[%c0_978, %c32_979], %605 {strides = array<i32>} : memref<7x128xf32, #tpu.memory_space<vmem>>, vector<7x8xf32>,
    %c0_980 = arith.constant 0 : index
    %c3_981 = arith.constant 3 : index
    %c1_982 = arith.constant 1 : index
    %c0_983 = arith.constant 0 : index
    %607 = vector.load %arg16[%c0_980, %c3_981, %c1_982, %c0_983] : memref<1x10x10x8xf32, #tpu.memory_space<vmem>>, vector<1x1x7x8xf32>
    %608 = vector.shape_cast %607 : vector<1x1x7x8xf32> to vector<7x8xf32>
    %c0_984 = arith.constant 0 : index
    %c40_985 = arith.constant 40 : index
    %609 = vector.load %arg19[%c0_984, %c40_985] : memref<7x128xf32, #tpu.memory_space<vmem>>, vector<7x8xf32>
    tpu.vector_store %arg19[%c0_984, %c40_985], %608 {strides = array<i32>} : memref<7x128xf32, #tpu.memory_space<vmem>>, vector<7x8xf32>,
    %c0_986 = arith.constant 0 : index
    %c3_987 = arith.constant 3 : index
    %c2_988 = arith.constant 2 : index
    %c0_989 = arith.constant 0 : index
    %610 = vector.load %arg16[%c0_986, %c3_987, %c2_988, %c0_989] : memref<1x10x10x8xf32, #tpu.memory_space<vmem>>, vector<1x1x7x8xf32>
    %611 = vector.shape_cast %610 : vector<1x1x7x8xf32> to vector<7x8xf32>
    %c0_990 = arith.constant 0 : index
    %c48_991 = arith.constant 48 : index
    %612 = vector.load %arg19[%c0_990, %c48_991] : memref<7x128xf32, #tpu.memory_space<vmem>>, vector<7x8xf32>
    tpu.vector_store %arg19[%c0_990, %c48_991], %611 {strides = array<i32>} : memref<7x128xf32, #tpu.memory_space<vmem>>, vector<7x8xf32>,
    %c0_992 = arith.constant 0 : index
    %c3_993 = arith.constant 3 : index
    %c3_994 = arith.constant 3 : index
    %c0_995 = arith.constant 0 : index
    %613 = vector.load %arg16[%c0_992, %c3_993, %c3_994, %c0_995] : memref<1x10x10x8xf32, #tpu.memory_space<vmem>>, vector<1x1x7x8xf32>
    %614 = vector.shape_cast %613 : vector<1x1x7x8xf32> to vector<7x8xf32>
    %c0_996 = arith.constant 0 : index
    %c56_997 = arith.constant 56 : index
    %615 = vector.load %arg19[%c0_996, %c56_997] : memref<7x128xf32, #tpu.memory_space<vmem>>, vector<7x8xf32>
    tpu.vector_store %arg19[%c0_996, %c56_997], %614 {strides = array<i32>} : memref<7x128xf32, #tpu.memory_space<vmem>>, vector<7x8xf32>,
    %c0_998 = arith.constant 0 : index
    %c4_999 = arith.constant 4 : index
    %c0_1000 = arith.constant 0 : index
    %c0_1001 = arith.constant 0 : index
    %616 = vector.load %arg16[%c0_998, %c4_999, %c0_1000, %c0_1001] : memref<1x10x10x8xf32, #tpu.memory_space<vmem>>, vector<1x1x7x8xf32>
    %617 = vector.shape_cast %616 : vector<1x1x7x8xf32> to vector<7x8xf32>
    %c0_1002 = arith.constant 0 : index
    %c64_1003 = arith.constant 64 : index
    %618 = vector.load %arg19[%c0_1002, %c64_1003] : memref<7x128xf32, #tpu.memory_space<vmem>>, vector<7x8xf32>
    tpu.vector_store %arg19[%c0_1002, %c64_1003], %617 {strides = array<i32>} : memref<7x128xf32, #tpu.memory_space<vmem>>, vector<7x8xf32>,
    %c0_1004 = arith.constant 0 : index
    %c4_1005 = arith.constant 4 : index
    %c1_1006 = arith.constant 1 : index
    %c0_1007 = arith.constant 0 : index
    %619 = vector.load %arg16[%c0_1004, %c4_1005, %c1_1006, %c0_1007] : memref<1x10x10x8xf32, #tpu.memory_space<vmem>>, vector<1x1x7x8xf32>
    %620 = vector.shape_cast %619 : vector<1x1x7x8xf32> to vector<7x8xf32>
    %c0_1008 = arith.constant 0 : index
    %c72_1009 = arith.constant 72 : index
    %621 = vector.load %arg19[%c0_1008, %c72_1009] : memref<7x128xf32, #tpu.memory_space<vmem>>, vector<7x8xf32>
    tpu.vector_store %arg19[%c0_1008, %c72_1009], %620 {strides = array<i32>} : memref<7x128xf32, #tpu.memory_space<vmem>>, vector<7x8xf32>,
    %c0_1010 = arith.constant 0 : index
    %c4_1011 = arith.constant 4 : index
    %c2_1012 = arith.constant 2 : index
    %c0_1013 = arith.constant 0 : index
    %622 = vector.load %arg16[%c0_1010, %c4_1011, %c2_1012, %c0_1013] : memref<1x10x10x8xf32, #tpu.memory_space<vmem>>, vector<1x1x7x8xf32>
    %623 = vector.shape_cast %622 : vector<1x1x7x8xf32> to vector<7x8xf32>
    %c0_1014 = arith.constant 0 : index
    %c80_1015 = arith.constant 80 : index
    %624 = vector.load %arg19[%c0_1014, %c80_1015] : memref<7x128xf32, #tpu.memory_space<vmem>>, vector<7x8xf32>
    tpu.vector_store %arg19[%c0_1014, %c80_1015], %623 {strides = array<i32>} : memref<7x128xf32, #tpu.memory_space<vmem>>, vector<7x8xf32>,
    %c0_1016 = arith.constant 0 : index
    %c4_1017 = arith.constant 4 : index
    %c3_1018 = arith.constant 3 : index
    %c0_1019 = arith.constant 0 : index
    %625 = vector.load %arg16[%c0_1016, %c4_1017, %c3_1018, %c0_1019] : memref<1x10x10x8xf32, #tpu.memory_space<vmem>>, vector<1x1x7x8xf32>
    %626 = vector.shape_cast %625 : vector<1x1x7x8xf32> to vector<7x8xf32>
    %c0_1020 = arith.constant 0 : index
    %c88_1021 = arith.constant 88 : index
    %627 = vector.load %arg19[%c0_1020, %c88_1021] : memref<7x128xf32, #tpu.memory_space<vmem>>, vector<7x8xf32>
    tpu.vector_store %arg19[%c0_1020, %c88_1021], %626 {strides = array<i32>} : memref<7x128xf32, #tpu.memory_space<vmem>>, vector<7x8xf32>,
    %c0_1022 = arith.constant 0 : index
    %c5_1023 = arith.constant 5 : index
    %c0_1024 = arith.constant 0 : index
    %c0_1025 = arith.constant 0 : index
    %628 = vector.load %arg16[%c0_1022, %c5_1023, %c0_1024, %c0_1025] : memref<1x10x10x8xf32, #tpu.memory_space<vmem>>, vector<1x1x7x8xf32>
    %629 = vector.shape_cast %628 : vector<1x1x7x8xf32> to vector<7x8xf32>
    %c0_1026 = arith.constant 0 : index
    %c96_1027 = arith.constant 96 : index
    %630 = vector.load %arg19[%c0_1026, %c96_1027] : memref<7x128xf32, #tpu.memory_space<vmem>>, vector<7x8xf32>
    tpu.vector_store %arg19[%c0_1026, %c96_1027], %629 {strides = array<i32>} : memref<7x128xf32, #tpu.memory_space<vmem>>, vector<7x8xf32>,
    %c0_1028 = arith.constant 0 : index
    %c5_1029 = arith.constant 5 : index
    %c1_1030 = arith.constant 1 : index
    %c0_1031 = arith.constant 0 : index
    %631 = vector.load %arg16[%c0_1028, %c5_1029, %c1_1030, %c0_1031] : memref<1x10x10x8xf32, #tpu.memory_space<vmem>>, vector<1x1x7x8xf32>
    %632 = vector.shape_cast %631 : vector<1x1x7x8xf32> to vector<7x8xf32>
    %c0_1032 = arith.constant 0 : index
    %c104_1033 = arith.constant 104 : index
    %633 = vector.load %arg19[%c0_1032, %c104_1033] : memref<7x128xf32, #tpu.memory_space<vmem>>, vector<7x8xf32>
    tpu.vector_store %arg19[%c0_1032, %c104_1033], %632 {strides = array<i32>} : memref<7x128xf32, #tpu.memory_space<vmem>>, vector<7x8xf32>,
    %c0_1034 = arith.constant 0 : index
    %c5_1035 = arith.constant 5 : index
    %c2_1036 = arith.constant 2 : index
    %c0_1037 = arith.constant 0 : index
    %634 = vector.load %arg16[%c0_1034, %c5_1035, %c2_1036, %c0_1037] : memref<1x10x10x8xf32, #tpu.memory_space<vmem>>, vector<1x1x7x8xf32>
    %635 = vector.shape_cast %634 : vector<1x1x7x8xf32> to vector<7x8xf32>
    %c0_1038 = arith.constant 0 : index
    %c112_1039 = arith.constant 112 : index
    %636 = vector.load %arg19[%c0_1038, %c112_1039] : memref<7x128xf32, #tpu.memory_space<vmem>>, vector<7x8xf32>
    tpu.vector_store %arg19[%c0_1038, %c112_1039], %635 {strides = array<i32>} : memref<7x128xf32, #tpu.memory_space<vmem>>, vector<7x8xf32>,
    %c0_1040 = arith.constant 0 : index
    %c5_1041 = arith.constant 5 : index
    %c3_1042 = arith.constant 3 : index
    %c0_1043 = arith.constant 0 : index
    %637 = vector.load %arg16[%c0_1040, %c5_1041, %c3_1042, %c0_1043] : memref<1x10x10x8xf32, #tpu.memory_space<vmem>>, vector<1x1x7x8xf32>
    %638 = vector.shape_cast %637 : vector<1x1x7x8xf32> to vector<7x8xf32>
    %c0_1044 = arith.constant 0 : index
    %c120_1045 = arith.constant 120 : index
    %639 = vector.load %arg19[%c0_1044, %c120_1045] : memref<7x128xf32, #tpu.memory_space<vmem>>, vector<7x8xf32>
    tpu.vector_store %arg19[%c0_1044, %c120_1045], %638 {strides = array<i32>} : memref<7x128xf32, #tpu.memory_space<vmem>>, vector<7x8xf32>,
    %c0_1046 = arith.constant 0 : index
    %c0_1047 = arith.constant 0 : index
    %640 = vector.load %arg19[%c0_1046, %c0_1047] : memref<7x128xf32, #tpu.memory_space<vmem>>, vector<7x128xf32>
    %641 = arith.truncf %640 : vector<7x128xf32> to vector<7x128xbf16>
    %cst_1048 = arith.constant dense<0.000000e+00> : vector<7x16xf32>
    %642 = tpu.matmul %641, %8, %cst_1048 {dimension_numbers = #tpu.dot_dimension_numbers<[1], [0], [0], [1], [0, 0, 1, 1], [], []>} : vector<7x128xbf16>, vector<128x16xbf16>, vector<7x16xf32> -> vector<7x16xf32>
    %cst_1049 = arith.constant dense<0.000000e+00> : vector<4x16xf32>
    %643 = tpu.matmul %9, %642, %cst_1049 {dimension_numbers = #tpu.dot_dimension_numbers<[1], [0], [0], [1], [0, 0, 1, 1], [], []>} : vector<4x7xf32>, vector<7x16xf32>, vector<4x16xf32> -> vector<4x16xf32>
    %644 = vector.broadcast %10 : vector<1x16xf32> to vector<4x16xf32>
    %645 = arith.mulf %643, %644 : vector<4x16xf32>
    %646 = vector.broadcast %11 : vector<1x16xf32> to vector<4x16xf32>
    %647 = arith.addf %645, %646 : vector<4x16xf32>
    %cst_1050 = arith.constant 0.000000e+00 : f32
    %648 = vector.broadcast %cst_1050 : f32 to vector<4x16xf32>
    %649 = arith.cmpf oge, %647, %648 : vector<4x16xf32>
    %cst_1051 = arith.constant 2.000000e-01 : f32
    %650 = vector.broadcast %cst_1051 : f32 to vector<4x16xf32>
    %651 = arith.mulf %650, %647 : vector<4x16xf32>
    %652 = arith.select %649, %647, %651 : vector<4x16xi1>, vector<4x16xf32>
    %c0_1052 = arith.constant 0 : index
    %c2_1053 = arith.constant 2 : index
    %c1_1054 = arith.constant 1 : index
    %c0_1055 = arith.constant 0 : index
    %653 = vector.load %arg17[%c0_1052, %c2_1053, %c1_1054, %c0_1055] : memref<1x6x6x16xf32, #tpu.memory_space<vmem>>, vector<1x1x4x16xf32>
    %654 = vector.shape_cast %653 : vector<1x1x4x16xf32> to vector<4x16xf32>
    %655 = vector.shape_cast %652 : vector<4x16xf32> to vector<1x1x4x16xf32>
    tpu.vector_store %arg17[%c0_1052, %c2_1053, %c1_1054, %c0_1055], %655 {strides = array<i32>} : memref<1x6x6x16xf32, #tpu.memory_space<vmem>>, vector<1x1x4x16xf32>,
    %c0_1056 = arith.constant 0 : index
    %c4_1057 = arith.constant 4 : index
    %c0_1058 = arith.constant 0 : index
    %c0_1059 = arith.constant 0 : index
    %656 = vector.load %arg16[%c0_1056, %c4_1057, %c0_1058, %c0_1059] : memref<1x10x10x8xf32, #tpu.memory_space<vmem>>, vector<1x1x7x8xf32>
    %657 = vector.shape_cast %656 : vector<1x1x7x8xf32> to vector<7x8xf32>
    %c0_1060 = arith.constant 0 : index
    %c0_1061 = arith.constant 0 : index
    %658 = vector.load %arg19[%c0_1060, %c0_1061] : memref<7x128xf32, #tpu.memory_space<vmem>>, vector<7x8xf32>
    tpu.vector_store %arg19[%c0_1060, %c0_1061], %657 {strides = array<i32>} : memref<7x128xf32, #tpu.memory_space<vmem>>, vector<7x8xf32>,
    %c0_1062 = arith.constant 0 : index
    %c4_1063 = arith.constant 4 : index
    %c1_1064 = arith.constant 1 : index
    %c0_1065 = arith.constant 0 : index
    %659 = vector.load %arg16[%c0_1062, %c4_1063, %c1_1064, %c0_1065] : memref<1x10x10x8xf32, #tpu.memory_space<vmem>>, vector<1x1x7x8xf32>
    %660 = vector.shape_cast %659 : vector<1x1x7x8xf32> to vector<7x8xf32>
    %c0_1066 = arith.constant 0 : index
    %c8_1067 = arith.constant 8 : index
    %661 = vector.load %arg19[%c0_1066, %c8_1067] : memref<7x128xf32, #tpu.memory_space<vmem>>, vector<7x8xf32>
    tpu.vector_store %arg19[%c0_1066, %c8_1067], %660 {strides = array<i32>} : memref<7x128xf32, #tpu.memory_space<vmem>>, vector<7x8xf32>,
    %c0_1068 = arith.constant 0 : index
    %c4_1069 = arith.constant 4 : index
    %c2_1070 = arith.constant 2 : index
    %c0_1071 = arith.constant 0 : index
    %662 = vector.load %arg16[%c0_1068, %c4_1069, %c2_1070, %c0_1071] : memref<1x10x10x8xf32, #tpu.memory_space<vmem>>, vector<1x1x7x8xf32>
    %663 = vector.shape_cast %662 : vector<1x1x7x8xf32> to vector<7x8xf32>
    %c0_1072 = arith.constant 0 : index
    %c16_1073 = arith.constant 16 : index
    %664 = vector.load %arg19[%c0_1072, %c16_1073] : memref<7x128xf32, #tpu.memory_space<vmem>>, vector<7x8xf32>
    tpu.vector_store %arg19[%c0_1072, %c16_1073], %663 {strides = array<i32>} : memref<7x128xf32, #tpu.memory_space<vmem>>, vector<7x8xf32>,
    %c0_1074 = arith.constant 0 : index
    %c4_1075 = arith.constant 4 : index
    %c3_1076 = arith.constant 3 : index
    %c0_1077 = arith.constant 0 : index
    %665 = vector.load %arg16[%c0_1074, %c4_1075, %c3_1076, %c0_1077] : memref<1x10x10x8xf32, #tpu.memory_space<vmem>>, vector<1x1x7x8xf32>
    %666 = vector.shape_cast %665 : vector<1x1x7x8xf32> to vector<7x8xf32>
    %c0_1078 = arith.constant 0 : index
    %c24_1079 = arith.constant 24 : index
    %667 = vector.load %arg19[%c0_1078, %c24_1079] : memref<7x128xf32, #tpu.memory_space<vmem>>, vector<7x8xf32>
    tpu.vector_store %arg19[%c0_1078, %c24_1079], %666 {strides = array<i32>} : memref<7x128xf32, #tpu.memory_space<vmem>>, vector<7x8xf32>,
    %c0_1080 = arith.constant 0 : index
    %c5_1081 = arith.constant 5 : index
    %c0_1082 = arith.constant 0 : index
    %c0_1083 = arith.constant 0 : index
    %668 = vector.load %arg16[%c0_1080, %c5_1081, %c0_1082, %c0_1083] : memref<1x10x10x8xf32, #tpu.memory_space<vmem>>, vector<1x1x7x8xf32>
    %669 = vector.shape_cast %668 : vector<1x1x7x8xf32> to vector<7x8xf32>
    %c0_1084 = arith.constant 0 : index
    %c32_1085 = arith.constant 32 : index
    %670 = vector.load %arg19[%c0_1084, %c32_1085] : memref<7x128xf32, #tpu.memory_space<vmem>>, vector<7x8xf32>
    tpu.vector_store %arg19[%c0_1084, %c32_1085], %669 {strides = array<i32>} : memref<7x128xf32, #tpu.memory_space<vmem>>, vector<7x8xf32>,
    %c0_1086 = arith.constant 0 : index
    %c5_1087 = arith.constant 5 : index
    %c1_1088 = arith.constant 1 : index
    %c0_1089 = arith.constant 0 : index
    %671 = vector.load %arg16[%c0_1086, %c5_1087, %c1_1088, %c0_1089] : memref<1x10x10x8xf32, #tpu.memory_space<vmem>>, vector<1x1x7x8xf32>
    %672 = vector.shape_cast %671 : vector<1x1x7x8xf32> to vector<7x8xf32>
    %c0_1090 = arith.constant 0 : index
    %c40_1091 = arith.constant 40 : index
    %673 = vector.load %arg19[%c0_1090, %c40_1091] : memref<7x128xf32, #tpu.memory_space<vmem>>, vector<7x8xf32>
    tpu.vector_store %arg19[%c0_1090, %c40_1091], %672 {strides = array<i32>} : memref<7x128xf32, #tpu.memory_space<vmem>>, vector<7x8xf32>,
    %c0_1092 = arith.constant 0 : index
    %c5_1093 = arith.constant 5 : index
    %c2_1094 = arith.constant 2 : index
    %c0_1095 = arith.constant 0 : index
    %674 = vector.load %arg16[%c0_1092, %c5_1093, %c2_1094, %c0_1095] : memref<1x10x10x8xf32, #tpu.memory_space<vmem>>, vector<1x1x7x8xf32>
    %675 = vector.shape_cast %674 : vector<1x1x7x8xf32> to vector<7x8xf32>
    %c0_1096 = arith.constant 0 : index
    %c48_1097 = arith.constant 48 : index
    %676 = vector.load %arg19[%c0_1096, %c48_1097] : memref<7x128xf32, #tpu.memory_space<vmem>>, vector<7x8xf32>
    tpu.vector_store %arg19[%c0_1096, %c48_1097], %675 {strides = array<i32>} : memref<7x128xf32, #tpu.memory_space<vmem>>, vector<7x8xf32>,
    %c0_1098 = arith.constant 0 : index
    %c5_1099 = arith.constant 5 : index
    %c3_1100 = arith.constant 3 : index
    %c0_1101 = arith.constant 0 : index
    %677 = vector.load %arg16[%c0_1098, %c5_1099, %c3_1100, %c0_1101] : memref<1x10x10x8xf32, #tpu.memory_space<vmem>>, vector<1x1x7x8xf32>
    %678 = vector.shape_cast %677 : vector<1x1x7x8xf32> to vector<7x8xf32>
    %c0_1102 = arith.constant 0 : index
    %c56_1103 = arith.constant 56 : index
    %679 = vector.load %arg19[%c0_1102, %c56_1103] : memref<7x128xf32, #tpu.memory_space<vmem>>, vector<7x8xf32>
    tpu.vector_store %arg19[%c0_1102, %c56_1103], %678 {strides = array<i32>} : memref<7x128xf32, #tpu.memory_space<vmem>>, vector<7x8xf32>,
    %c0_1104 = arith.constant 0 : index
    %c6_1105 = arith.constant 6 : index
    %c0_1106 = arith.constant 0 : index
    %c0_1107 = arith.constant 0 : index
    %680 = vector.load %arg16[%c0_1104, %c6_1105, %c0_1106, %c0_1107] : memref<1x10x10x8xf32, #tpu.memory_space<vmem>>, vector<1x1x7x8xf32>
    %681 = vector.shape_cast %680 : vector<1x1x7x8xf32> to vector<7x8xf32>
    %c0_1108 = arith.constant 0 : index
    %c64_1109 = arith.constant 64 : index
    %682 = vector.load %arg19[%c0_1108, %c64_1109] : memref<7x128xf32, #tpu.memory_space<vmem>>, vector<7x8xf32>
    tpu.vector_store %arg19[%c0_1108, %c64_1109], %681 {strides = array<i32>} : memref<7x128xf32, #tpu.memory_space<vmem>>, vector<7x8xf32>,
    %c0_1110 = arith.constant 0 : index
    %c6_1111 = arith.constant 6 : index
    %c1_1112 = arith.constant 1 : index
    %c0_1113 = arith.constant 0 : index
    %683 = vector.load %arg16[%c0_1110, %c6_1111, %c1_1112, %c0_1113] : memref<1x10x10x8xf32, #tpu.memory_space<vmem>>, vector<1x1x7x8xf32>
    %684 = vector.shape_cast %683 : vector<1x1x7x8xf32> to vector<7x8xf32>
    %c0_1114 = arith.constant 0 : index
    %c72_1115 = arith.constant 72 : index
    %685 = vector.load %arg19[%c0_1114, %c72_1115] : memref<7x128xf32, #tpu.memory_space<vmem>>, vector<7x8xf32>
    tpu.vector_store %arg19[%c0_1114, %c72_1115], %684 {strides = array<i32>} : memref<7x128xf32, #tpu.memory_space<vmem>>, vector<7x8xf32>,
    %c0_1116 = arith.constant 0 : index
    %c6_1117 = arith.constant 6 : index
    %c2_1118 = arith.constant 2 : index
    %c0_1119 = arith.constant 0 : index
    %686 = vector.load %arg16[%c0_1116, %c6_1117, %c2_1118, %c0_1119] : memref<1x10x10x8xf32, #tpu.memory_space<vmem>>, vector<1x1x7x8xf32>
    %687 = vector.shape_cast %686 : vector<1x1x7x8xf32> to vector<7x8xf32>
    %c0_1120 = arith.constant 0 : index
    %c80_1121 = arith.constant 80 : index
    %688 = vector.load %arg19[%c0_1120, %c80_1121] : memref<7x128xf32, #tpu.memory_space<vmem>>, vector<7x8xf32>
    tpu.vector_store %arg19[%c0_1120, %c80_1121], %687 {strides = array<i32>} : memref<7x128xf32, #tpu.memory_space<vmem>>, vector<7x8xf32>,
    %c0_1122 = arith.constant 0 : index
    %c6_1123 = arith.constant 6 : index
    %c3_1124 = arith.constant 3 : index
    %c0_1125 = arith.constant 0 : index
    %689 = vector.load %arg16[%c0_1122, %c6_1123, %c3_1124, %c0_1125] : memref<1x10x10x8xf32, #tpu.memory_space<vmem>>, vector<1x1x7x8xf32>
    %690 = vector.shape_cast %689 : vector<1x1x7x8xf32> to vector<7x8xf32>
    %c0_1126 = arith.constant 0 : index
    %c88_1127 = arith.constant 88 : index
    %691 = vector.load %arg19[%c0_1126, %c88_1127] : memref<7x128xf32, #tpu.memory_space<vmem>>, vector<7x8xf32>
    tpu.vector_store %arg19[%c0_1126, %c88_1127], %690 {strides = array<i32>} : memref<7x128xf32, #tpu.memory_space<vmem>>, vector<7x8xf32>,
    %c0_1128 = arith.constant 0 : index
    %c7_1129 = arith.constant 7 : index
    %c0_1130 = arith.constant 0 : index
    %c0_1131 = arith.constant 0 : index
    %692 = vector.load %arg16[%c0_1128, %c7_1129, %c0_1130, %c0_1131] : memref<1x10x10x8xf32, #tpu.memory_space<vmem>>, vector<1x1x7x8xf32>
    %693 = vector.shape_cast %692 : vector<1x1x7x8xf32> to vector<7x8xf32>
    %c0_1132 = arith.constant 0 : index
    %c96_1133 = arith.constant 96 : index
    %694 = vector.load %arg19[%c0_1132, %c96_1133] : memref<7x128xf32, #tpu.memory_space<vmem>>, vector<7x8xf32>
    tpu.vector_store %arg19[%c0_1132, %c96_1133], %693 {strides = array<i32>} : memref<7x128xf32, #tpu.memory_space<vmem>>, vector<7x8xf32>,
    %c0_1134 = arith.constant 0 : index
    %c7_1135 = arith.constant 7 : index
    %c1_1136 = arith.constant 1 : index
    %c0_1137 = arith.constant 0 : index
    %695 = vector.load %arg16[%c0_1134, %c7_1135, %c1_1136, %c0_1137] : memref<1x10x10x8xf32, #tpu.memory_space<vmem>>, vector<1x1x7x8xf32>
    %696 = vector.shape_cast %695 : vector<1x1x7x8xf32> to vector<7x8xf32>
    %c0_1138 = arith.constant 0 : index
    %c104_1139 = arith.constant 104 : index
    %697 = vector.load %arg19[%c0_1138, %c104_1139] : memref<7x128xf32, #tpu.memory_space<vmem>>, vector<7x8xf32>
    tpu.vector_store %arg19[%c0_1138, %c104_1139], %696 {strides = array<i32>} : memref<7x128xf32, #tpu.memory_space<vmem>>, vector<7x8xf32>,
    %c0_1140 = arith.constant 0 : index
    %c7_1141 = arith.constant 7 : index
    %c2_1142 = arith.constant 2 : index
    %c0_1143 = arith.constant 0 : index
    %698 = vector.load %arg16[%c0_1140, %c7_1141, %c2_1142, %c0_1143] : memref<1x10x10x8xf32, #tpu.memory_space<vmem>>, vector<1x1x7x8xf32>
    %699 = vector.shape_cast %698 : vector<1x1x7x8xf32> to vector<7x8xf32>
    %c0_1144 = arith.constant 0 : index
    %c112_1145 = arith.constant 112 : index
    %700 = vector.load %arg19[%c0_1144, %c112_1145] : memref<7x128xf32, #tpu.memory_space<vmem>>, vector<7x8xf32>
    tpu.vector_store %arg19[%c0_1144, %c112_1145], %699 {strides = array<i32>} : memref<7x128xf32, #tpu.memory_space<vmem>>, vector<7x8xf32>,
    %c0_1146 = arith.constant 0 : index
    %c7_1147 = arith.constant 7 : index
    %c3_1148 = arith.constant 3 : index
    %c0_1149 = arith.constant 0 : index
    %701 = vector.load %arg16[%c0_1146, %c7_1147, %c3_1148, %c0_1149] : memref<1x10x10x8xf32, #tpu.memory_space<vmem>>, vector<1x1x7x8xf32>
    %702 = vector.shape_cast %701 : vector<1x1x7x8xf32> to vector<7x8xf32>
    %c0_1150 = arith.constant 0 : index
    %c120_1151 = arith.constant 120 : index
    %703 = vector.load %arg19[%c0_1150, %c120_1151] : memref<7x128xf32, #tpu.memory_space<vmem>>, vector<7x8xf32>
    tpu.vector_store %arg19[%c0_1150, %c120_1151], %702 {strides = array<i32>} : memref<7x128xf32, #tpu.memory_space<vmem>>, vector<7x8xf32>,
    %c0_1152 = arith.constant 0 : index
    %c0_1153 = arith.constant 0 : index
    %704 = vector.load %arg19[%c0_1152, %c0_1153] : memref<7x128xf32, #tpu.memory_space<vmem>>, vector<7x128xf32>
    %705 = arith.truncf %704 : vector<7x128xf32> to vector<7x128xbf16>
    %cst_1154 = arith.constant dense<0.000000e+00> : vector<7x16xf32>
    %706 = tpu.matmul %705, %8, %cst_1154 {dimension_numbers = #tpu.dot_dimension_numbers<[1], [0], [0], [1], [0, 0, 1, 1], [], []>} : vector<7x128xbf16>, vector<128x16xbf16>, vector<7x16xf32> -> vector<7x16xf32>
    %cst_1155 = arith.constant dense<0.000000e+00> : vector<4x16xf32>
    %707 = tpu.matmul %9, %706, %cst_1155 {dimension_numbers = #tpu.dot_dimension_numbers<[1], [0], [0], [1], [0, 0, 1, 1], [], []>} : vector<4x7xf32>, vector<7x16xf32>, vector<4x16xf32> -> vector<4x16xf32>
    %708 = vector.broadcast %10 : vector<1x16xf32> to vector<4x16xf32>
    %709 = arith.mulf %707, %708 : vector<4x16xf32>
    %710 = vector.broadcast %11 : vector<1x16xf32> to vector<4x16xf32>
    %711 = arith.addf %709, %710 : vector<4x16xf32>
    %cst_1156 = arith.constant 0.000000e+00 : f32
    %712 = vector.broadcast %cst_1156 : f32 to vector<4x16xf32>
    %713 = arith.cmpf oge, %711, %712 : vector<4x16xf32>
    %cst_1157 = arith.constant 2.000000e-01 : f32
    %714 = vector.broadcast %cst_1157 : f32 to vector<4x16xf32>
    %715 = arith.mulf %714, %711 : vector<4x16xf32>
    %716 = arith.select %713, %711, %715 : vector<4x16xi1>, vector<4x16xf32>
    %c0_1158 = arith.constant 0 : index
    %c3_1159 = arith.constant 3 : index
    %c1_1160 = arith.constant 1 : index
    %c0_1161 = arith.constant 0 : index
    %717 = vector.load %arg17[%c0_1158, %c3_1159, %c1_1160, %c0_1161] : memref<1x6x6x16xf32, #tpu.memory_space<vmem>>, vector<1x1x4x16xf32>
    %718 = vector.shape_cast %717 : vector<1x1x4x16xf32> to vector<4x16xf32>
    %719 = vector.shape_cast %716 : vector<4x16xf32> to vector<1x1x4x16xf32>
    tpu.vector_store %arg17[%c0_1158, %c3_1159, %c1_1160, %c0_1161], %719 {strides = array<i32>} : memref<1x6x6x16xf32, #tpu.memory_space<vmem>>, vector<1x1x4x16xf32>,
    %c0_1162 = arith.constant 0 : index
    %c6_1163 = arith.constant 6 : index
    %c0_1164 = arith.constant 0 : index
    %c0_1165 = arith.constant 0 : index
    %720 = vector.load %arg16[%c0_1162, %c6_1163, %c0_1164, %c0_1165] : memref<1x10x10x8xf32, #tpu.memory_space<vmem>>, vector<1x1x7x8xf32>
    %721 = vector.shape_cast %720 : vector<1x1x7x8xf32> to vector<7x8xf32>
    %c0_1166 = arith.constant 0 : index
    %c0_1167 = arith.constant 0 : index
    %722 = vector.load %arg19[%c0_1166, %c0_1167] : memref<7x128xf32, #tpu.memory_space<vmem>>, vector<7x8xf32>
    tpu.vector_store %arg19[%c0_1166, %c0_1167], %721 {strides = array<i32>} : memref<7x128xf32, #tpu.memory_space<vmem>>, vector<7x8xf32>,
    %c0_1168 = arith.constant 0 : index
    %c6_1169 = arith.constant 6 : index
    %c1_1170 = arith.constant 1 : index
    %c0_1171 = arith.constant 0 : index
    %723 = vector.load %arg16[%c0_1168, %c6_1169, %c1_1170, %c0_1171] : memref<1x10x10x8xf32, #tpu.memory_space<vmem>>, vector<1x1x7x8xf32>
    %724 = vector.shape_cast %723 : vector<1x1x7x8xf32> to vector<7x8xf32>
    %c0_1172 = arith.constant 0 : index
    %c8_1173 = arith.constant 8 : index
    %725 = vector.load %arg19[%c0_1172, %c8_1173] : memref<7x128xf32, #tpu.memory_space<vmem>>, vector<7x8xf32>
    tpu.vector_store %arg19[%c0_1172, %c8_1173], %724 {strides = array<i32>} : memref<7x128xf32, #tpu.memory_space<vmem>>, vector<7x8xf32>,
    %c0_1174 = arith.constant 0 : index
    %c6_1175 = arith.constant 6 : index
    %c2_1176 = arith.constant 2 : index
    %c0_1177 = arith.constant 0 : index
    %726 = vector.load %arg16[%c0_1174, %c6_1175, %c2_1176, %c0_1177] : memref<1x10x10x8xf32, #tpu.memory_space<vmem>>, vector<1x1x7x8xf32>
    %727 = vector.shape_cast %726 : vector<1x1x7x8xf32> to vector<7x8xf32>
    %c0_1178 = arith.constant 0 : index
    %c16_1179 = arith.constant 16 : index
    %728 = vector.load %arg19[%c0_1178, %c16_1179] : memref<7x128xf32, #tpu.memory_space<vmem>>, vector<7x8xf32>
    tpu.vector_store %arg19[%c0_1178, %c16_1179], %727 {strides = array<i32>} : memref<7x128xf32, #tpu.memory_space<vmem>>, vector<7x8xf32>,
    %c0_1180 = arith.constant 0 : index
    %c6_1181 = arith.constant 6 : index
    %c3_1182 = arith.constant 3 : index
    %c0_1183 = arith.constant 0 : index
    %729 = vector.load %arg16[%c0_1180, %c6_1181, %c3_1182, %c0_1183] : memref<1x10x10x8xf32, #tpu.memory_space<vmem>>, vector<1x1x7x8xf32>
    %730 = vector.shape_cast %729 : vector<1x1x7x8xf32> to vector<7x8xf32>
    %c0_1184 = arith.constant 0 : index
    %c24_1185 = arith.constant 24 : index
    %731 = vector.load %arg19[%c0_1184, %c24_1185] : memref<7x128xf32, #tpu.memory_space<vmem>>, vector<7x8xf32>
    tpu.vector_store %arg19[%c0_1184, %c24_1185], %730 {strides = array<i32>} : memref<7x128xf32, #tpu.memory_space<vmem>>, vector<7x8xf32>,
    %c0_1186 = arith.constant 0 : index
    %c7_1187 = arith.constant 7 : index
    %c0_1188 = arith.constant 0 : index
    %c0_1189 = arith.constant 0 : index
    %732 = vector.load %arg16[%c0_1186, %c7_1187, %c0_1188, %c0_1189] : memref<1x10x10x8xf32, #tpu.memory_space<vmem>>, vector<1x1x7x8xf32>
    %733 = vector.shape_cast %732 : vector<1x1x7x8xf32> to vector<7x8xf32>
    %c0_1190 = arith.constant 0 : index
    %c32_1191 = arith.constant 32 : index
    %734 = vector.load %arg19[%c0_1190, %c32_1191] : memref<7x128xf32, #tpu.memory_space<vmem>>, vector<7x8xf32>
    tpu.vector_store %arg19[%c0_1190, %c32_1191], %733 {strides = array<i32>} : memref<7x128xf32, #tpu.memory_space<vmem>>, vector<7x8xf32>,
    %c0_1192 = arith.constant 0 : index
    %c7_1193 = arith.constant 7 : index
    %c1_1194 = arith.constant 1 : index
    %c0_1195 = arith.constant 0 : index
    %735 = vector.load %arg16[%c0_1192, %c7_1193, %c1_1194, %c0_1195] : memref<1x10x10x8xf32, #tpu.memory_space<vmem>>, vector<1x1x7x8xf32>
    %736 = vector.shape_cast %735 : vector<1x1x7x8xf32> to vector<7x8xf32>
    %c0_1196 = arith.constant 0 : index
    %c40_1197 = arith.constant 40 : index
    %737 = vector.load %arg19[%c0_1196, %c40_1197] : memref<7x128xf32, #tpu.memory_space<vmem>>, vector<7x8xf32>
    tpu.vector_store %arg19[%c0_1196, %c40_1197], %736 {strides = array<i32>} : memref<7x128xf32, #tpu.memory_space<vmem>>, vector<7x8xf32>,
    %c0_1198 = arith.constant 0 : index
    %c7_1199 = arith.constant 7 : index
    %c2_1200 = arith.constant 2 : index
    %c0_1201 = arith.constant 0 : index
    %738 = vector.load %arg16[%c0_1198, %c7_1199, %c2_1200, %c0_1201] : memref<1x10x10x8xf32, #tpu.memory_space<vmem>>, vector<1x1x7x8xf32>
    %739 = vector.shape_cast %738 : vector<1x1x7x8xf32> to vector<7x8xf32>
    %c0_1202 = arith.constant 0 : index
    %c48_1203 = arith.constant 48 : index
    %740 = vector.load %arg19[%c0_1202, %c48_1203] : memref<7x128xf32, #tpu.memory_space<vmem>>, vector<7x8xf32>
    tpu.vector_store %arg19[%c0_1202, %c48_1203], %739 {strides = array<i32>} : memref<7x128xf32, #tpu.memory_space<vmem>>, vector<7x8xf32>,
    %c0_1204 = arith.constant 0 : index
    %c7_1205 = arith.constant 7 : index
    %c3_1206 = arith.constant 3 : index
    %c0_1207 = arith.constant 0 : index
    %741 = vector.load %arg16[%c0_1204, %c7_1205, %c3_1206, %c0_1207] : memref<1x10x10x8xf32, #tpu.memory_space<vmem>>, vector<1x1x7x8xf32>
    %742 = vector.shape_cast %741 : vector<1x1x7x8xf32> to vector<7x8xf32>
    %c0_1208 = arith.constant 0 : index
    %c56_1209 = arith.constant 56 : index
    %743 = vector.load %arg19[%c0_1208, %c56_1209] : memref<7x128xf32, #tpu.memory_space<vmem>>, vector<7x8xf32>
    tpu.vector_store %arg19[%c0_1208, %c56_1209], %742 {strides = array<i32>} : memref<7x128xf32, #tpu.memory_space<vmem>>, vector<7x8xf32>,
    %c0_1210 = arith.constant 0 : index
    %c8_1211 = arith.constant 8 : index
    %c0_1212 = arith.constant 0 : index
    %c0_1213 = arith.constant 0 : index
    %744 = vector.load %arg16[%c0_1210, %c8_1211, %c0_1212, %c0_1213] : memref<1x10x10x8xf32, #tpu.memory_space<vmem>>, vector<1x1x7x8xf32>
    %745 = vector.shape_cast %744 : vector<1x1x7x8xf32> to vector<7x8xf32>
    %c0_1214 = arith.constant 0 : index
    %c64_1215 = arith.constant 64 : index
    %746 = vector.load %arg19[%c0_1214, %c64_1215] : memref<7x128xf32, #tpu.memory_space<vmem>>, vector<7x8xf32>
    tpu.vector_store %arg19[%c0_1214, %c64_1215], %745 {strides = array<i32>} : memref<7x128xf32, #tpu.memory_space<vmem>>, vector<7x8xf32>,
    %c0_1216 = arith.constant 0 : index
    %c8_1217 = arith.constant 8 : index
    %c1_1218 = arith.constant 1 : index
    %c0_1219 = arith.constant 0 : index
    %747 = vector.load %arg16[%c0_1216, %c8_1217, %c1_1218, %c0_1219] : memref<1x10x10x8xf32, #tpu.memory_space<vmem>>, vector<1x1x7x8xf32>
    %748 = vector.shape_cast %747 : vector<1x1x7x8xf32> to vector<7x8xf32>
    %c0_1220 = arith.constant 0 : index
    %c72_1221 = arith.constant 72 : index
    %749 = vector.load %arg19[%c0_1220, %c72_1221] : memref<7x128xf32, #tpu.memory_space<vmem>>, vector<7x8xf32>
    tpu.vector_store %arg19[%c0_1220, %c72_1221], %748 {strides = array<i32>} : memref<7x128xf32, #tpu.memory_space<vmem>>, vector<7x8xf32>,
    %c0_1222 = arith.constant 0 : index
    %c8_1223 = arith.constant 8 : index
    %c2_1224 = arith.constant 2 : index
    %c0_1225 = arith.constant 0 : index
    %750 = vector.load %arg16[%c0_1222, %c8_1223, %c2_1224, %c0_1225] : memref<1x10x10x8xf32, #tpu.memory_space<vmem>>, vector<1x1x7x8xf32>
    %751 = vector.shape_cast %750 : vector<1x1x7x8xf32> to vector<7x8xf32>
    %c0_1226 = arith.constant 0 : index
    %c80_1227 = arith.constant 80 : index
    %752 = vector.load %arg19[%c0_1226, %c80_1227] : memref<7x128xf32, #tpu.memory_space<vmem>>, vector<7x8xf32>
    tpu.vector_store %arg19[%c0_1226, %c80_1227], %751 {strides = array<i32>} : memref<7x128xf32, #tpu.memory_space<vmem>>, vector<7x8xf32>,
    %c0_1228 = arith.constant 0 : index
    %c8_1229 = arith.constant 8 : index
    %c3_1230 = arith.constant 3 : index
    %c0_1231 = arith.constant 0 : index
    %753 = vector.load %arg16[%c0_1228, %c8_1229, %c3_1230, %c0_1231] : memref<1x10x10x8xf32, #tpu.memory_space<vmem>>, vector<1x1x7x8xf32>
    %754 = vector.shape_cast %753 : vector<1x1x7x8xf32> to vector<7x8xf32>
    %c0_1232 = arith.constant 0 : index
    %c88_1233 = arith.constant 88 : index
    %755 = vector.load %arg19[%c0_1232, %c88_1233] : memref<7x128xf32, #tpu.memory_space<vmem>>, vector<7x8xf32>
    tpu.vector_store %arg19[%c0_1232, %c88_1233], %754 {strides = array<i32>} : memref<7x128xf32, #tpu.memory_space<vmem>>, vector<7x8xf32>,
    %c0_1234 = arith.constant 0 : index
    %c9_1235 = arith.constant 9 : index
    %c0_1236 = arith.constant 0 : index
    %c0_1237 = arith.constant 0 : index
    %756 = vector.load %arg16[%c0_1234, %c9_1235, %c0_1236, %c0_1237] : memref<1x10x10x8xf32, #tpu.memory_space<vmem>>, vector<1x1x7x8xf32>
    %757 = vector.shape_cast %756 : vector<1x1x7x8xf32> to vector<7x8xf32>
    %c0_1238 = arith.constant 0 : index
    %c96_1239 = arith.constant 96 : index
    %758 = vector.load %arg19[%c0_1238, %c96_1239] : memref<7x128xf32, #tpu.memory_space<vmem>>, vector<7x8xf32>
    tpu.vector_store %arg19[%c0_1238, %c96_1239], %757 {strides = array<i32>} : memref<7x128xf32, #tpu.memory_space<vmem>>, vector<7x8xf32>,
    %c0_1240 = arith.constant 0 : index
    %c9_1241 = arith.constant 9 : index
    %c1_1242 = arith.constant 1 : index
    %c0_1243 = arith.constant 0 : index
    %759 = vector.load %arg16[%c0_1240, %c9_1241, %c1_1242, %c0_1243] : memref<1x10x10x8xf32, #tpu.memory_space<vmem>>, vector<1x1x7x8xf32>
    %760 = vector.shape_cast %759 : vector<1x1x7x8xf32> to vector<7x8xf32>
    %c0_1244 = arith.constant 0 : index
    %c104_1245 = arith.constant 104 : index
    %761 = vector.load %arg19[%c0_1244, %c104_1245] : memref<7x128xf32, #tpu.memory_space<vmem>>, vector<7x8xf32>
    tpu.vector_store %arg19[%c0_1244, %c104_1245], %760 {strides = array<i32>} : memref<7x128xf32, #tpu.memory_space<vmem>>, vector<7x8xf32>,
    %c0_1246 = arith.constant 0 : index
    %c9_1247 = arith.constant 9 : index
    %c2_1248 = arith.constant 2 : index
    %c0_1249 = arith.constant 0 : index
    %762 = vector.load %arg16[%c0_1246, %c9_1247, %c2_1248, %c0_1249] : memref<1x10x10x8xf32, #tpu.memory_space<vmem>>, vector<1x1x7x8xf32>
    %763 = vector.shape_cast %762 : vector<1x1x7x8xf32> to vector<7x8xf32>
    %c0_1250 = arith.constant 0 : index
    %c112_1251 = arith.constant 112 : index
    %764 = vector.load %arg19[%c0_1250, %c112_1251] : memref<7x128xf32, #tpu.memory_space<vmem>>, vector<7x8xf32>
    tpu.vector_store %arg19[%c0_1250, %c112_1251], %763 {strides = array<i32>} : memref<7x128xf32, #tpu.memory_space<vmem>>, vector<7x8xf32>,
    %c0_1252 = arith.constant 0 : index
    %c9_1253 = arith.constant 9 : index
    %c3_1254 = arith.constant 3 : index
    %c0_1255 = arith.constant 0 : index
    %765 = vector.load %arg16[%c0_1252, %c9_1253, %c3_1254, %c0_1255] : memref<1x10x10x8xf32, #tpu.memory_space<vmem>>, vector<1x1x7x8xf32>
    %766 = vector.shape_cast %765 : vector<1x1x7x8xf32> to vector<7x8xf32>
    %c0_1256 = arith.constant 0 : index
    %c120_1257 = arith.constant 120 : index
    %767 = vector.load %arg19[%c0_1256, %c120_1257] : memref<7x128xf32, #tpu.memory_space<vmem>>, vector<7x8xf32>
    tpu.vector_store %arg19[%c0_1256, %c120_1257], %766 {strides = array<i32>} : memref<7x128xf32, #tpu.memory_space<vmem>>, vector<7x8xf32>,
    %c0_1258 = arith.constant 0 : index
    %c0_1259 = arith.constant 0 : index
    %768 = vector.load %arg19[%c0_1258, %c0_1259] : memref<7x128xf32, #tpu.memory_space<vmem>>, vector<7x128xf32>
    %769 = arith.truncf %768 : vector<7x128xf32> to vector<7x128xbf16>
    %cst_1260 = arith.constant dense<0.000000e+00> : vector<7x16xf32>
    %770 = tpu.matmul %769, %8, %cst_1260 {dimension_numbers = #tpu.dot_dimension_numbers<[1], [0], [0], [1], [0, 0, 1, 1], [], []>} : vector<7x128xbf16>, vector<128x16xbf16>, vector<7x16xf32> -> vector<7x16xf32>
    %cst_1261 = arith.constant dense<0.000000e+00> : vector<4x16xf32>
    %771 = tpu.matmul %9, %770, %cst_1261 {dimension_numbers = #tpu.dot_dimension_numbers<[1], [0], [0], [1], [0, 0, 1, 1], [], []>} : vector<4x7xf32>, vector<7x16xf32>, vector<4x16xf32> -> vector<4x16xf32>
    %772 = vector.broadcast %10 : vector<1x16xf32> to vector<4x16xf32>
    %773 = arith.mulf %771, %772 : vector<4x16xf32>
    %774 = vector.broadcast %11 : vector<1x16xf32> to vector<4x16xf32>
    %775 = arith.addf %773, %774 : vector<4x16xf32>
    %cst_1262 = arith.constant 0.000000e+00 : f32
    %776 = vector.broadcast %cst_1262 : f32 to vector<4x16xf32>
    %777 = arith.cmpf oge, %775, %776 : vector<4x16xf32>
    %cst_1263 = arith.constant 2.000000e-01 : f32
    %778 = vector.broadcast %cst_1263 : f32 to vector<4x16xf32>
    %779 = arith.mulf %778, %775 : vector<4x16xf32>
    %780 = arith.select %777, %775, %779 : vector<4x16xi1>, vector<4x16xf32>
    %c0_1264 = arith.constant 0 : index
    %c4_1265 = arith.constant 4 : index
    %c1_1266 = arith.constant 1 : index
    %c0_1267 = arith.constant 0 : index
    %781 = vector.load %arg17[%c0_1264, %c4_1265, %c1_1266, %c0_1267] : memref<1x6x6x16xf32, #tpu.memory_space<vmem>>, vector<1x1x4x16xf32>
    %782 = vector.shape_cast %781 : vector<1x1x4x16xf32> to vector<4x16xf32>
    %783 = vector.shape_cast %780 : vector<4x16xf32> to vector<1x1x4x16xf32>
    tpu.vector_store %arg17[%c0_1264, %c4_1265, %c1_1266, %c0_1267], %783 {strides = array<i32>} : memref<1x6x6x16xf32, #tpu.memory_space<vmem>>, vector<1x1x4x16xf32>,
    %c0_1268 = arith.constant 0 : index
    %c0_1269 = arith.constant 0 : index
    %c0_1270 = arith.constant 0 : index
    %c0_1271 = arith.constant 0 : index
    %784 = vector.load %arg17[%c0_1268, %c0_1269, %c0_1270, %c0_1271] : memref<1x6x6x16xf32, #tpu.memory_space<vmem>>, vector<1x1x3x16xf32>
    %785 = vector.shape_cast %784 : vector<1x1x3x16xf32> to vector<3x16xf32>
    %c0_1272 = arith.constant 0 : index
    %c0_1273 = arith.constant 0 : index
    %786 = vector.load %arg20[%c0_1272, %c0_1273] : memref<3x256xf32, #tpu.memory_space<vmem>>, vector<3x16xf32>
    tpu.vector_store %arg20[%c0_1272, %c0_1273], %785 {strides = array<i32>} : memref<3x256xf32, #tpu.memory_space<vmem>>, vector<3x16xf32>,
    %c0_1274 = arith.constant 0 : index
    %c0_1275 = arith.constant 0 : index
    %c1_1276 = arith.constant 1 : index
    %c0_1277 = arith.constant 0 : index
    %787 = vector.load %arg17[%c0_1274, %c0_1275, %c1_1276, %c0_1277] : memref<1x6x6x16xf32, #tpu.memory_space<vmem>>, vector<1x1x3x16xf32>
    %788 = vector.shape_cast %787 : vector<1x1x3x16xf32> to vector<3x16xf32>
    %c0_1278 = arith.constant 0 : index
    %c16_1279 = arith.constant 16 : index
    %789 = vector.load %arg20[%c0_1278, %c16_1279] : memref<3x256xf32, #tpu.memory_space<vmem>>, vector<3x16xf32>
    tpu.vector_store %arg20[%c0_1278, %c16_1279], %788 {strides = array<i32>} : memref<3x256xf32, #tpu.memory_space<vmem>>, vector<3x16xf32>,
    %c0_1280 = arith.constant 0 : index
    %c0_1281 = arith.constant 0 : index
    %c2_1282 = arith.constant 2 : index
    %c0_1283 = arith.constant 0 : index
    %790 = vector.load %arg17[%c0_1280, %c0_1281, %c2_1282, %c0_1283] : memref<1x6x6x16xf32, #tpu.memory_space<vmem>>, vector<1x1x3x16xf32>
    %791 = vector.shape_cast %790 : vector<1x1x3x16xf32> to vector<3x16xf32>
    %c0_1284 = arith.constant 0 : index
    %c32_1285 = arith.constant 32 : index
    %792 = vector.load %arg20[%c0_1284, %c32_1285] : memref<3x256xf32, #tpu.memory_space<vmem>>, vector<3x16xf32>
    tpu.vector_store %arg20[%c0_1284, %c32_1285], %791 {strides = array<i32>} : memref<3x256xf32, #tpu.memory_space<vmem>>, vector<3x16xf32>,
    %c0_1286 = arith.constant 0 : index
    %c0_1287 = arith.constant 0 : index
    %c3_1288 = arith.constant 3 : index
    %c0_1289 = arith.constant 0 : index
    %793 = vector.load %arg17[%c0_1286, %c0_1287, %c3_1288, %c0_1289] : memref<1x6x6x16xf32, #tpu.memory_space<vmem>>, vector<1x1x3x16xf32>
    %794 = vector.shape_cast %793 : vector<1x1x3x16xf32> to vector<3x16xf32>
    %c0_1290 = arith.constant 0 : index
    %c48_1291 = arith.constant 48 : index
    %795 = vector.load %arg20[%c0_1290, %c48_1291] : memref<3x256xf32, #tpu.memory_space<vmem>>, vector<3x16xf32>
    tpu.vector_store %arg20[%c0_1290, %c48_1291], %794 {strides = array<i32>} : memref<3x256xf32, #tpu.memory_space<vmem>>, vector<3x16xf32>,
    %c0_1292 = arith.constant 0 : index
    %c1_1293 = arith.constant 1 : index
    %c0_1294 = arith.constant 0 : index
    %c0_1295 = arith.constant 0 : index
    %796 = vector.load %arg17[%c0_1292, %c1_1293, %c0_1294, %c0_1295] : memref<1x6x6x16xf32, #tpu.memory_space<vmem>>, vector<1x1x3x16xf32>
    %797 = vector.shape_cast %796 : vector<1x1x3x16xf32> to vector<3x16xf32>
    %c0_1296 = arith.constant 0 : index
    %c64_1297 = arith.constant 64 : index
    %798 = vector.load %arg20[%c0_1296, %c64_1297] : memref<3x256xf32, #tpu.memory_space<vmem>>, vector<3x16xf32>
    tpu.vector_store %arg20[%c0_1296, %c64_1297], %797 {strides = array<i32>} : memref<3x256xf32, #tpu.memory_space<vmem>>, vector<3x16xf32>,
    %c0_1298 = arith.constant 0 : index
    %c1_1299 = arith.constant 1 : index
    %c1_1300 = arith.constant 1 : index
    %c0_1301 = arith.constant 0 : index
    %799 = vector.load %arg17[%c0_1298, %c1_1299, %c1_1300, %c0_1301] : memref<1x6x6x16xf32, #tpu.memory_space<vmem>>, vector<1x1x3x16xf32>
    %800 = vector.shape_cast %799 : vector<1x1x3x16xf32> to vector<3x16xf32>
    %c0_1302 = arith.constant 0 : index
    %c80_1303 = arith.constant 80 : index
    %801 = vector.load %arg20[%c0_1302, %c80_1303] : memref<3x256xf32, #tpu.memory_space<vmem>>, vector<3x16xf32>
    tpu.vector_store %arg20[%c0_1302, %c80_1303], %800 {strides = array<i32>} : memref<3x256xf32, #tpu.memory_space<vmem>>, vector<3x16xf32>,
    %c0_1304 = arith.constant 0 : index
    %c1_1305 = arith.constant 1 : index
    %c2_1306 = arith.constant 2 : index
    %c0_1307 = arith.constant 0 : index
    %802 = vector.load %arg17[%c0_1304, %c1_1305, %c2_1306, %c0_1307] : memref<1x6x6x16xf32, #tpu.memory_space<vmem>>, vector<1x1x3x16xf32>
    %803 = vector.shape_cast %802 : vector<1x1x3x16xf32> to vector<3x16xf32>
    %c0_1308 = arith.constant 0 : index
    %c96_1309 = arith.constant 96 : index
    %804 = vector.load %arg20[%c0_1308, %c96_1309] : memref<3x256xf32, #tpu.memory_space<vmem>>, vector<3x16xf32>
    tpu.vector_store %arg20[%c0_1308, %c96_1309], %803 {strides = array<i32>} : memref<3x256xf32, #tpu.memory_space<vmem>>, vector<3x16xf32>,
    %c0_1310 = arith.constant 0 : index
    %c1_1311 = arith.constant 1 : index
    %c3_1312 = arith.constant 3 : index
    %c0_1313 = arith.constant 0 : index
    %805 = vector.load %arg17[%c0_1310, %c1_1311, %c3_1312, %c0_1313] : memref<1x6x6x16xf32, #tpu.memory_space<vmem>>, vector<1x1x3x16xf32>
    %806 = vector.shape_cast %805 : vector<1x1x3x16xf32> to vector<3x16xf32>
    %c0_1314 = arith.constant 0 : index
    %c112_1315 = arith.constant 112 : index
    %807 = vector.load %arg20[%c0_1314, %c112_1315] : memref<3x256xf32, #tpu.memory_space<vmem>>, vector<3x16xf32>
    tpu.vector_store %arg20[%c0_1314, %c112_1315], %806 {strides = array<i32>} : memref<3x256xf32, #tpu.memory_space<vmem>>, vector<3x16xf32>,
    %c0_1316 = arith.constant 0 : index
    %c2_1317 = arith.constant 2 : index
    %c0_1318 = arith.constant 0 : index
    %c0_1319 = arith.constant 0 : index
    %808 = vector.load %arg17[%c0_1316, %c2_1317, %c0_1318, %c0_1319] : memref<1x6x6x16xf32, #tpu.memory_space<vmem>>, vector<1x1x3x16xf32>
    %809 = vector.shape_cast %808 : vector<1x1x3x16xf32> to vector<3x16xf32>
    %c0_1320 = arith.constant 0 : index
    %c128 = arith.constant 128 : index
    %810 = vector.load %arg20[%c0_1320, %c128] : memref<3x256xf32, #tpu.memory_space<vmem>>, vector<3x16xf32>
    tpu.vector_store %arg20[%c0_1320, %c128], %809 {strides = array<i32>} : memref<3x256xf32, #tpu.memory_space<vmem>>, vector<3x16xf32>,
    %c0_1321 = arith.constant 0 : index
    %c2_1322 = arith.constant 2 : index
    %c1_1323 = arith.constant 1 : index
    %c0_1324 = arith.constant 0 : index
    %811 = vector.load %arg17[%c0_1321, %c2_1322, %c1_1323, %c0_1324] : memref<1x6x6x16xf32, #tpu.memory_space<vmem>>, vector<1x1x3x16xf32>
    %812 = vector.shape_cast %811 : vector<1x1x3x16xf32> to vector<3x16xf32>
    %c0_1325 = arith.constant 0 : index
    %c144 = arith.constant 144 : index
    %813 = vector.load %arg20[%c0_1325, %c144] : memref<3x256xf32, #tpu.memory_space<vmem>>, vector<3x16xf32>
    tpu.vector_store %arg20[%c0_1325, %c144], %812 {strides = array<i32>} : memref<3x256xf32, #tpu.memory_space<vmem>>, vector<3x16xf32>,
    %c0_1326 = arith.constant 0 : index
    %c2_1327 = arith.constant 2 : index
    %c2_1328 = arith.constant 2 : index
    %c0_1329 = arith.constant 0 : index
    %814 = vector.load %arg17[%c0_1326, %c2_1327, %c2_1328, %c0_1329] : memref<1x6x6x16xf32, #tpu.memory_space<vmem>>, vector<1x1x3x16xf32>
    %815 = vector.shape_cast %814 : vector<1x1x3x16xf32> to vector<3x16xf32>
    %c0_1330 = arith.constant 0 : index
    %c160 = arith.constant 160 : index
    %816 = vector.load %arg20[%c0_1330, %c160] : memref<3x256xf32, #tpu.memory_space<vmem>>, vector<3x16xf32>
    tpu.vector_store %arg20[%c0_1330, %c160], %815 {strides = array<i32>} : memref<3x256xf32, #tpu.memory_space<vmem>>, vector<3x16xf32>,
    %c0_1331 = arith.constant 0 : index
    %c2_1332 = arith.constant 2 : index
    %c3_1333 = arith.constant 3 : index
    %c0_1334 = arith.constant 0 : index
    %817 = vector.load %arg17[%c0_1331, %c2_1332, %c3_1333, %c0_1334] : memref<1x6x6x16xf32, #tpu.memory_space<vmem>>, vector<1x1x3x16xf32>
    %818 = vector.shape_cast %817 : vector<1x1x3x16xf32> to vector<3x16xf32>
    %c0_1335 = arith.constant 0 : index
    %c176 = arith.constant 176 : index
    %819 = vector.load %arg20[%c0_1335, %c176] : memref<3x256xf32, #tpu.memory_space<vmem>>, vector<3x16xf32>
    tpu.vector_store %arg20[%c0_1335, %c176], %818 {strides = array<i32>} : memref<3x256xf32, #tpu.memory_space<vmem>>, vector<3x16xf32>,
    %c0_1336 = arith.constant 0 : index
    %c3_1337 = arith.constant 3 : index
    %c0_1338 = arith.constant 0 : index
    %c0_1339 = arith.constant 0 : index
    %820 = vector.load %arg17[%c0_1336, %c3_1337, %c0_1338, %c0_1339] : memref<1x6x6x16xf32, #tpu.memory_space<vmem>>, vector<1x1x3x16xf32>
    %821 = vector.shape_cast %820 : vector<1x1x3x16xf32> to vector<3x16xf32>
    %c0_1340 = arith.constant 0 : index
    %c192 = arith.constant 192 : index
    %822 = vector.load %arg20[%c0_1340, %c192] : memref<3x256xf32, #tpu.memory_space<vmem>>, vector<3x16xf32>
    tpu.vector_store %arg20[%c0_1340, %c192], %821 {strides = array<i32>} : memref<3x256xf32, #tpu.memory_space<vmem>>, vector<3x16xf32>,
    %c0_1341 = arith.constant 0 : index
    %c3_1342 = arith.constant 3 : index
    %c1_1343 = arith.constant 1 : index
    %c0_1344 = arith.constant 0 : index
    %823 = vector.load %arg17[%c0_1341, %c3_1342, %c1_1343, %c0_1344] : memref<1x6x6x16xf32, #tpu.memory_space<vmem>>, vector<1x1x3x16xf32>
    %824 = vector.shape_cast %823 : vector<1x1x3x16xf32> to vector<3x16xf32>
    %c0_1345 = arith.constant 0 : index
    %c208 = arith.constant 208 : index
    %825 = vector.load %arg20[%c0_1345, %c208] : memref<3x256xf32, #tpu.memory_space<vmem>>, vector<3x16xf32>
    tpu.vector_store %arg20[%c0_1345, %c208], %824 {strides = array<i32>} : memref<3x256xf32, #tpu.memory_space<vmem>>, vector<3x16xf32>,
    %c0_1346 = arith.constant 0 : index
    %c3_1347 = arith.constant 3 : index
    %c2_1348 = arith.constant 2 : index
    %c0_1349 = arith.constant 0 : index
    %826 = vector.load %arg17[%c0_1346, %c3_1347, %c2_1348, %c0_1349] : memref<1x6x6x16xf32, #tpu.memory_space<vmem>>, vector<1x1x3x16xf32>
    %827 = vector.shape_cast %826 : vector<1x1x3x16xf32> to vector<3x16xf32>
    %c0_1350 = arith.constant 0 : index
    %c224 = arith.constant 224 : index
    %828 = vector.load %arg20[%c0_1350, %c224] : memref<3x256xf32, #tpu.memory_space<vmem>>, vector<3x16xf32>
    tpu.vector_store %arg20[%c0_1350, %c224], %827 {strides = array<i32>} : memref<3x256xf32, #tpu.memory_space<vmem>>, vector<3x16xf32>,
    %c0_1351 = arith.constant 0 : index
    %c3_1352 = arith.constant 3 : index
    %c3_1353 = arith.constant 3 : index
    %c0_1354 = arith.constant 0 : index
    %829 = vector.load %arg17[%c0_1351, %c3_1352, %c3_1353, %c0_1354] : memref<1x6x6x16xf32, #tpu.memory_space<vmem>>, vector<1x1x3x16xf32>
    %830 = vector.shape_cast %829 : vector<1x1x3x16xf32> to vector<3x16xf32>
    %c0_1355 = arith.constant 0 : index
    %c240 = arith.constant 240 : index
    %831 = vector.load %arg20[%c0_1355, %c240] : memref<3x256xf32, #tpu.memory_space<vmem>>, vector<3x16xf32>
    tpu.vector_store %arg20[%c0_1355, %c240], %830 {strides = array<i32>} : memref<3x256xf32, #tpu.memory_space<vmem>>, vector<3x16xf32>,
    %c0_1356 = arith.constant 0 : index
    %c0_1357 = arith.constant 0 : index
    %832 = vector.load %arg20[%c0_1356, %c0_1357] : memref<3x256xf32, #tpu.memory_space<vmem>>, vector<3x256xf32>
    %833 = arith.truncf %832 : vector<3x256xf32> to vector<3x256xbf16>
    %cst_1358 = arith.constant dense<0.000000e+00> : vector<3x1xf32>
    %834 = tpu.matmul %833, %12, %cst_1358 {dimension_numbers = #tpu.dot_dimension_numbers<[1], [0], [0], [1], [0, 0, 1, 1], [], []>} : vector<3x256xbf16>, vector<256x1xbf16>, vector<3x1xf32> -> vector<3x1xf32>
    %cst_1359 = arith.constant dense<0.000000e+00> : vector<2x1xf32>
    %835 = tpu.matmul %13, %834, %cst_1359 {dimension_numbers = #tpu.dot_dimension_numbers<[1], [0], [0], [1], [0, 0, 1, 1], [], []>} : vector<2x3xf32>, vector<3x1xf32>, vector<2x1xf32> -> vector<2x1xf32>
    %836 = vector.broadcast %14 : vector<1x1xf32> to vector<2x1xf32>
    %837 = arith.addf %835, %836 : vector<2x1xf32>
    %c0_1360 = arith.constant 0 : index
    %c0_1361 = arith.constant 0 : index
    %838 = vector.load %arg13[%c0_1360, %c0_1361] : memref<4x1xf32, #tpu.memory_space<vmem>>, vector<2x1xf32>
    %839 = arith.mulf %837, %838 : vector<2x1xf32>
    %cst_1362 = arith.constant dense<0.000000e+00> : vector<1xf32>
    %840 = vector.multi_reduction <add>, %839, %cst_1362 [0] : vector<2x1xf32> to vector<1xf32>
    %841 = vector.shape_cast %840 : vector<1xf32> to vector<1x1xf32>
    %842 = arith.addf %15, %841 : vector<1x1xf32>
    %c0_1363 = arith.constant 0 : index
    %c2_1364 = arith.constant 2 : index
    %c0_1365 = arith.constant 0 : index
    %c0_1366 = arith.constant 0 : index
    %843 = vector.load %arg17[%c0_1363, %c2_1364, %c0_1365, %c0_1366] : memref<1x6x6x16xf32, #tpu.memory_space<vmem>>, vector<1x1x3x16xf32>
    %844 = vector.shape_cast %843 : vector<1x1x3x16xf32> to vector<3x16xf32>
    %c0_1367 = arith.constant 0 : index
    %c0_1368 = arith.constant 0 : index
    %845 = vector.load %arg20[%c0_1367, %c0_1368] : memref<3x256xf32, #tpu.memory_space<vmem>>, vector<3x16xf32>
    tpu.vector_store %arg20[%c0_1367, %c0_1368], %844 {strides = array<i32>} : memref<3x256xf32, #tpu.memory_space<vmem>>, vector<3x16xf32>,
    %c0_1369 = arith.constant 0 : index
    %c2_1370 = arith.constant 2 : index
    %c1_1371 = arith.constant 1 : index
    %c0_1372 = arith.constant 0 : index
    %846 = vector.load %arg17[%c0_1369, %c2_1370, %c1_1371, %c0_1372] : memref<1x6x6x16xf32, #tpu.memory_space<vmem>>, vector<1x1x3x16xf32>
    %847 = vector.shape_cast %846 : vector<1x1x3x16xf32> to vector<3x16xf32>
    %c0_1373 = arith.constant 0 : index
    %c16_1374 = arith.constant 16 : index
    %848 = vector.load %arg20[%c0_1373, %c16_1374] : memref<3x256xf32, #tpu.memory_space<vmem>>, vector<3x16xf32>
    tpu.vector_store %arg20[%c0_1373, %c16_1374], %847 {strides = array<i32>} : memref<3x256xf32, #tpu.memory_space<vmem>>, vector<3x16xf32>,
    %c0_1375 = arith.constant 0 : index
    %c2_1376 = arith.constant 2 : index
    %c2_1377 = arith.constant 2 : index
    %c0_1378 = arith.constant 0 : index
    %849 = vector.load %arg17[%c0_1375, %c2_1376, %c2_1377, %c0_1378] : memref<1x6x6x16xf32, #tpu.memory_space<vmem>>, vector<1x1x3x16xf32>
    %850 = vector.shape_cast %849 : vector<1x1x3x16xf32> to vector<3x16xf32>
    %c0_1379 = arith.constant 0 : index
    %c32_1380 = arith.constant 32 : index
    %851 = vector.load %arg20[%c0_1379, %c32_1380] : memref<3x256xf32, #tpu.memory_space<vmem>>, vector<3x16xf32>
    tpu.vector_store %arg20[%c0_1379, %c32_1380], %850 {strides = array<i32>} : memref<3x256xf32, #tpu.memory_space<vmem>>, vector<3x16xf32>,
    %c0_1381 = arith.constant 0 : index
    %c2_1382 = arith.constant 2 : index
    %c3_1383 = arith.constant 3 : index
    %c0_1384 = arith.constant 0 : index
    %852 = vector.load %arg17[%c0_1381, %c2_1382, %c3_1383, %c0_1384] : memref<1x6x6x16xf32, #tpu.memory_space<vmem>>, vector<1x1x3x16xf32>
    %853 = vector.shape_cast %852 : vector<1x1x3x16xf32> to vector<3x16xf32>
    %c0_1385 = arith.constant 0 : index
    %c48_1386 = arith.constant 48 : index
    %854 = vector.load %arg20[%c0_1385, %c48_1386] : memref<3x256xf32, #tpu.memory_space<vmem>>, vector<3x16xf32>
    tpu.vector_store %arg20[%c0_1385, %c48_1386], %853 {strides = array<i32>} : memref<3x256xf32, #tpu.memory_space<vmem>>, vector<3x16xf32>,
    %c0_1387 = arith.constant 0 : index
    %c3_1388 = arith.constant 3 : index
    %c0_1389 = arith.constant 0 : index
    %c0_1390 = arith.constant 0 : index
    %855 = vector.load %arg17[%c0_1387, %c3_1388, %c0_1389, %c0_1390] : memref<1x6x6x16xf32, #tpu.memory_space<vmem>>, vector<1x1x3x16xf32>
    %856 = vector.shape_cast %855 : vector<1x1x3x16xf32> to vector<3x16xf32>
    %c0_1391 = arith.constant 0 : index
    %c64_1392 = arith.constant 64 : index
    %857 = vector.load %arg20[%c0_1391, %c64_1392] : memref<3x256xf32, #tpu.memory_space<vmem>>, vector<3x16xf32>
    tpu.vector_store %arg20[%c0_1391, %c64_1392], %856 {strides = array<i32>} : memref<3x256xf32, #tpu.memory_space<vmem>>, vector<3x16xf32>,
    %c0_1393 = arith.constant 0 : index
    %c3_1394 = arith.constant 3 : index
    %c1_1395 = arith.constant 1 : index
    %c0_1396 = arith.constant 0 : index
    %858 = vector.load %arg17[%c0_1393, %c3_1394, %c1_1395, %c0_1396] : memref<1x6x6x16xf32, #tpu.memory_space<vmem>>, vector<1x1x3x16xf32>
    %859 = vector.shape_cast %858 : vector<1x1x3x16xf32> to vector<3x16xf32>
    %c0_1397 = arith.constant 0 : index
    %c80_1398 = arith.constant 80 : index
    %860 = vector.load %arg20[%c0_1397, %c80_1398] : memref<3x256xf32, #tpu.memory_space<vmem>>, vector<3x16xf32>
    tpu.vector_store %arg20[%c0_1397, %c80_1398], %859 {strides = array<i32>} : memref<3x256xf32, #tpu.memory_space<vmem>>, vector<3x16xf32>,
    %c0_1399 = arith.constant 0 : index
    %c3_1400 = arith.constant 3 : index
    %c2_1401 = arith.constant 2 : index
    %c0_1402 = arith.constant 0 : index
    %861 = vector.load %arg17[%c0_1399, %c3_1400, %c2_1401, %c0_1402] : memref<1x6x6x16xf32, #tpu.memory_space<vmem>>, vector<1x1x3x16xf32>
    %862 = vector.shape_cast %861 : vector<1x1x3x16xf32> to vector<3x16xf32>
    %c0_1403 = arith.constant 0 : index
    %c96_1404 = arith.constant 96 : index
    %863 = vector.load %arg20[%c0_1403, %c96_1404] : memref<3x256xf32, #tpu.memory_space<vmem>>, vector<3x16xf32>
    tpu.vector_store %arg20[%c0_1403, %c96_1404], %862 {strides = array<i32>} : memref<3x256xf32, #tpu.memory_space<vmem>>, vector<3x16xf32>,
    %c0_1405 = arith.constant 0 : index
    %c3_1406 = arith.constant 3 : index
    %c3_1407 = arith.constant 3 : index
    %c0_1408 = arith.constant 0 : index
    %864 = vector.load %arg17[%c0_1405, %c3_1406, %c3_1407, %c0_1408] : memref<1x6x6x16xf32, #tpu.memory_space<vmem>>, vector<1x1x3x16xf32>
    %865 = vector.shape_cast %864 : vector<1x1x3x16xf32> to vector<3x16xf32>
    %c0_1409 = arith.constant 0 : index
    %c112_1410 = arith.constant 112 : index
    %866 = vector.load %arg20[%c0_1409, %c112_1410] : memref<3x256xf32, #tpu.memory_space<vmem>>, vector<3x16xf32>
    tpu.vector_store %arg20[%c0_1409, %c112_1410], %865 {strides = array<i32>} : memref<3x256xf32, #tpu.memory_space<vmem>>, vector<3x16xf32>,
    %c0_1411 = arith.constant 0 : index
    %c4_1412 = arith.constant 4 : index
    %c0_1413 = arith.constant 0 : index
    %c0_1414 = arith.constant 0 : index
    %867 = vector.load %arg17[%c0_1411, %c4_1412, %c0_1413, %c0_1414] : memref<1x6x6x16xf32, #tpu.memory_space<vmem>>, vector<1x1x3x16xf32>
    %868 = vector.shape_cast %867 : vector<1x1x3x16xf32> to vector<3x16xf32>
    %c0_1415 = arith.constant 0 : index
    %c128_1416 = arith.constant 128 : index
    %869 = vector.load %arg20[%c0_1415, %c128_1416] : memref<3x256xf32, #tpu.memory_space<vmem>>, vector<3x16xf32>
    tpu.vector_store %arg20[%c0_1415, %c128_1416], %868 {strides = array<i32>} : memref<3x256xf32, #tpu.memory_space<vmem>>, vector<3x16xf32>,
    %c0_1417 = arith.constant 0 : index
    %c4_1418 = arith.constant 4 : index
    %c1_1419 = arith.constant 1 : index
    %c0_1420 = arith.constant 0 : index
    %870 = vector.load %arg17[%c0_1417, %c4_1418, %c1_1419, %c0_1420] : memref<1x6x6x16xf32, #tpu.memory_space<vmem>>, vector<1x1x3x16xf32>
    %871 = vector.shape_cast %870 : vector<1x1x3x16xf32> to vector<3x16xf32>
    %c0_1421 = arith.constant 0 : index
    %c144_1422 = arith.constant 144 : index
    %872 = vector.load %arg20[%c0_1421, %c144_1422] : memref<3x256xf32, #tpu.memory_space<vmem>>, vector<3x16xf32>
    tpu.vector_store %arg20[%c0_1421, %c144_1422], %871 {strides = array<i32>} : memref<3x256xf32, #tpu.memory_space<vmem>>, vector<3x16xf32>,
    %c0_1423 = arith.constant 0 : index
    %c4_1424 = arith.constant 4 : index
    %c2_1425 = arith.constant 2 : index
    %c0_1426 = arith.constant 0 : index
    %873 = vector.load %arg17[%c0_1423, %c4_1424, %c2_1425, %c0_1426] : memref<1x6x6x16xf32, #tpu.memory_space<vmem>>, vector<1x1x3x16xf32>
    %874 = vector.shape_cast %873 : vector<1x1x3x16xf32> to vector<3x16xf32>
    %c0_1427 = arith.constant 0 : index
    %c160_1428 = arith.constant 160 : index
    %875 = vector.load %arg20[%c0_1427, %c160_1428] : memref<3x256xf32, #tpu.memory_space<vmem>>, vector<3x16xf32>
    tpu.vector_store %arg20[%c0_1427, %c160_1428], %874 {strides = array<i32>} : memref<3x256xf32, #tpu.memory_space<vmem>>, vector<3x16xf32>,
    %c0_1429 = arith.constant 0 : index
    %c4_1430 = arith.constant 4 : index
    %c3_1431 = arith.constant 3 : index
    %c0_1432 = arith.constant 0 : index
    %876 = vector.load %arg17[%c0_1429, %c4_1430, %c3_1431, %c0_1432] : memref<1x6x6x16xf32, #tpu.memory_space<vmem>>, vector<1x1x3x16xf32>
    %877 = vector.shape_cast %876 : vector<1x1x3x16xf32> to vector<3x16xf32>
    %c0_1433 = arith.constant 0 : index
    %c176_1434 = arith.constant 176 : index
    %878 = vector.load %arg20[%c0_1433, %c176_1434] : memref<3x256xf32, #tpu.memory_space<vmem>>, vector<3x16xf32>
    tpu.vector_store %arg20[%c0_1433, %c176_1434], %877 {strides = array<i32>} : memref<3x256xf32, #tpu.memory_space<vmem>>, vector<3x16xf32>,
    %c0_1435 = arith.constant 0 : index
    %c5_1436 = arith.constant 5 : index
    %c0_1437 = arith.constant 0 : index
    %c0_1438 = arith.constant 0 : index
    %879 = vector.load %arg17[%c0_1435, %c5_1436, %c0_1437, %c0_1438] : memref<1x6x6x16xf32, #tpu.memory_space<vmem>>, vector<1x1x3x16xf32>
    %880 = vector.shape_cast %879 : vector<1x1x3x16xf32> to vector<3x16xf32>
    %c0_1439 = arith.constant 0 : index
    %c192_1440 = arith.constant 192 : index
    %881 = vector.load %arg20[%c0_1439, %c192_1440] : memref<3x256xf32, #tpu.memory_space<vmem>>, vector<3x16xf32>
    tpu.vector_store %arg20[%c0_1439, %c192_1440], %880 {strides = array<i32>} : memref<3x256xf32, #tpu.memory_space<vmem>>, vector<3x16xf32>,
    %c0_1441 = arith.constant 0 : index
    %c5_1442 = arith.constant 5 : index
    %c1_1443 = arith.constant 1 : index
    %c0_1444 = arith.constant 0 : index
    %882 = vector.load %arg17[%c0_1441, %c5_1442, %c1_1443, %c0_1444] : memref<1x6x6x16xf32, #tpu.memory_space<vmem>>, vector<1x1x3x16xf32>
    %883 = vector.shape_cast %882 : vector<1x1x3x16xf32> to vector<3x16xf32>
    %c0_1445 = arith.constant 0 : index
    %c208_1446 = arith.constant 208 : index
    %884 = vector.load %arg20[%c0_1445, %c208_1446] : memref<3x256xf32, #tpu.memory_space<vmem>>, vector<3x16xf32>
    tpu.vector_store %arg20[%c0_1445, %c208_1446], %883 {strides = array<i32>} : memref<3x256xf32, #tpu.memory_space<vmem>>, vector<3x16xf32>,
    %c0_1447 = arith.constant 0 : index
    %c5_1448 = arith.constant 5 : index
    %c2_1449 = arith.constant 2 : index
    %c0_1450 = arith.constant 0 : index
    %885 = vector.load %arg17[%c0_1447, %c5_1448, %c2_1449, %c0_1450] : memref<1x6x6x16xf32, #tpu.memory_space<vmem>>, vector<1x1x3x16xf32>
    %886 = vector.shape_cast %885 : vector<1x1x3x16xf32> to vector<3x16xf32>
    %c0_1451 = arith.constant 0 : index
    %c224_1452 = arith.constant 224 : index
    %887 = vector.load %arg20[%c0_1451, %c224_1452] : memref<3x256xf32, #tpu.memory_space<vmem>>, vector<3x16xf32>
    tpu.vector_store %arg20[%c0_1451, %c224_1452], %886 {strides = array<i32>} : memref<3x256xf32, #tpu.memory_space<vmem>>, vector<3x16xf32>,
    %c0_1453 = arith.constant 0 : index
    %c5_1454 = arith.constant 5 : index
    %c3_1455 = arith.constant 3 : index
    %c0_1456 = arith.constant 0 : index
    %888 = vector.load %arg17[%c0_1453, %c5_1454, %c3_1455, %c0_1456] : memref<1x6x6x16xf32, #tpu.memory_space<vmem>>, vector<1x1x3x16xf32>
    %889 = vector.shape_cast %888 : vector<1x1x3x16xf32> to vector<3x16xf32>
    %c0_1457 = arith.constant 0 : index
    %c240_1458 = arith.constant 240 : index
    %890 = vector.load %arg20[%c0_1457, %c240_1458] : memref<3x256xf32, #tpu.memory_space<vmem>>, vector<3x16xf32>
    tpu.vector_store %arg20[%c0_1457, %c240_1458], %889 {strides = array<i32>} : memref<3x256xf32, #tpu.memory_space<vmem>>, vector<3x16xf32>,
    %c0_1459 = arith.constant 0 : index
    %c0_1460 = arith.constant 0 : index
    %891 = vector.load %arg20[%c0_1459, %c0_1460] : memref<3x256xf32, #tpu.memory_space<vmem>>, vector<3x256xf32>
    %892 = arith.truncf %891 : vector<3x256xf32> to vector<3x256xbf16>
    %cst_1461 = arith.constant dense<0.000000e+00> : vector<3x1xf32>
    %893 = tpu.matmul %892, %12, %cst_1461 {dimension_numbers = #tpu.dot_dimension_numbers<[1], [0], [0], [1], [0, 0, 1, 1], [], []>} : vector<3x256xbf16>, vector<256x1xbf16>, vector<3x1xf32> -> vector<3x1xf32>
    %cst_1462 = arith.constant dense<0.000000e+00> : vector<2x1xf32>
    %894 = tpu.matmul %13, %893, %cst_1462 {dimension_numbers = #tpu.dot_dimension_numbers<[1], [0], [0], [1], [0, 0, 1, 1], [], []>} : vector<2x3xf32>, vector<3x1xf32>, vector<2x1xf32> -> vector<2x1xf32>
    %895 = vector.broadcast %14 : vector<1x1xf32> to vector<2x1xf32>
    %896 = arith.addf %894, %895 : vector<2x1xf32>
    %c2_1463 = arith.constant 2 : index
    %c0_1464 = arith.constant 0 : index
    %897 = vector.load %arg13[%c2_1463, %c0_1464] : memref<4x1xf32, #tpu.memory_space<vmem>>, vector<2x1xf32>
    %898 = arith.mulf %896, %897 : vector<2x1xf32>
    %cst_1465 = arith.constant dense<0.000000e+00> : vector<1xf32>
    %899 = vector.multi_reduction <add>, %898, %cst_1465 [0] : vector<2x1xf32> to vector<1xf32>
    %900 = vector.shape_cast %899 : vector<1xf32> to vector<1x1xf32>
    %901 = arith.addf %842, %900 : vector<1x1xf32>
    %c0_1466 = arith.constant 0 : index
    %c0_1467 = arith.constant 0 : index
    %c0_1468 = arith.constant 0 : index
    %902 = vector.load %arg15[%c0_1466, %c0_1467, %c0_1468] : memref<1x1x1xf32, #tpu.memory_space<vmem>>, vector<1x1x1xf32>
    %903 = vector.shape_cast %902 : vector<1x1x1xf32> to vector<1x1xf32>
    %904 = vector.shape_cast %901 : vector<1x1xf32> to vector<1x1x1xf32>
    tpu.vector_store %arg15[%c0_1466, %c0_1467, %c0_1468], %904 {strides = array<i32>} : memref<1x1x1xf32, #tpu.memory_space<vmem>>, vector<1x1x1xf32>,
    return
  }
  func.func @transform_0(%arg0: i32) -> (i32, i32, i32, i32) {
    %c0_i32 = arith.constant 0 : i32
    %c0_i32_0 = arith.constant 0 : i32
    %c0_i32_1 = arith.constant 0 : i32
    %c0_i32_2 = arith.constant 0 : i32
    return %arg0, %c0_i32, %c0_i32_0, %c0_i32_1 : i32, i32, i32, i32
  }
  func.func @transform_1(%arg0: i32) -> (i32, i32) {
    %c0_i32 = arith.constant 0 : i32
    %c0_i32_0 = arith.constant 0 : i32
    %c0_i32_1 = arith.constant 0 : i32
    return %c0_i32, %c0_i32_0 : i32, i32
  }
  func.func @transform_2(%arg0: i32) -> (i32, i32) {
    %c0_i32 = arith.constant 0 : i32
    %c0_i32_0 = arith.constant 0 : i32
    %c0_i32_1 = arith.constant 0 : i32
    return %c0_i32, %c0_i32_0 : i32, i32
  }
  func.func @transform_3(%arg0: i32) -> (i32, i32) {
    %c0_i32 = arith.constant 0 : i32
    %c0_i32_0 = arith.constant 0 : i32
    %c0_i32_1 = arith.constant 0 : i32
    return %c0_i32, %c0_i32_0 : i32, i32
  }
  func.func @transform_4(%arg0: i32) -> (i32, i32) {
    %c0_i32 = arith.constant 0 : i32
    %c0_i32_0 = arith.constant 0 : i32
    %c0_i32_1 = arith.constant 0 : i32
    return %c0_i32, %c0_i32_0 : i32, i32
  }
  func.func @transform_5(%arg0: i32) -> (i32, i32) {
    %c0_i32 = arith.constant 0 : i32
    %c0_i32_0 = arith.constant 0 : i32
    %c0_i32_1 = arith.constant 0 : i32
    return %c0_i32, %c0_i32_0 : i32, i32
  }
  func.func @transform_6(%arg0: i32) -> (i32, i32) {
    %c0_i32 = arith.constant 0 : i32
    %c0_i32_0 = arith.constant 0 : i32
    %c0_i32_1 = arith.constant 0 : i32
    return %c0_i32, %c0_i32_0 : i32, i32
  }
  func.func @transform_7(%arg0: i32) -> (i32, i32) {
    %c0_i32 = arith.constant 0 : i32
    %c0_i32_0 = arith.constant 0 : i32
    %c0_i32_1 = arith.constant 0 : i32
    return %c0_i32, %c0_i32_0 : i32, i32
  }
  func.func @transform_8(%arg0: i32) -> (i32, i32) {
    %c0_i32 = arith.constant 0 : i32
    %c0_i32_0 = arith.constant 0 : i32
    %c0_i32_1 = arith.constant 0 : i32
    return %c0_i32, %c0_i32_0 : i32, i32
  }
  func.func @transform_9(%arg0: i32) -> (i32, i32) {
    %c0_i32 = arith.constant 0 : i32
    %c0_i32_0 = arith.constant 0 : i32
    %c0_i32_1 = arith.constant 0 : i32
    return %c0_i32, %c0_i32_0 : i32, i32
  }
  func.func @transform_10(%arg0: i32) -> (i32, i32) {
    %c0_i32 = arith.constant 0 : i32
    %c0_i32_0 = arith.constant 0 : i32
    %c0_i32_1 = arith.constant 0 : i32
    return %c0_i32, %c0_i32_0 : i32, i32
  }
  func.func @transform_11(%arg0: i32) -> (i32, i32) {
    %c0_i32 = arith.constant 0 : i32
    %c0_i32_0 = arith.constant 0 : i32
    %c0_i32_1 = arith.constant 0 : i32
    return %c0_i32, %c0_i32_0 : i32, i32
  }
  func.func @transform_12(%arg0: i32) -> (i32, i32) {
    %c0_i32 = arith.constant 0 : i32
    %c0_i32_0 = arith.constant 0 : i32
    %c0_i32_1 = arith.constant 0 : i32
    return %c0_i32, %c0_i32_0 : i32, i32
  }
  func.func @transform_13(%arg0: i32) -> (i32, i32) {
    %c0_i32 = arith.constant 0 : i32
    %c0_i32_0 = arith.constant 0 : i32
    %c0_i32_1 = arith.constant 0 : i32
    return %c0_i32, %c0_i32_0 : i32, i32
  }
  func.func @transform_14(%arg0: i32) -> (i32, i32, i32) {
    %c0_i32 = arith.constant 0 : i32
    %c0_i32_0 = arith.constant 0 : i32
    %c0_i32_1 = arith.constant 0 : i32
    return %arg0, %c0_i32, %c0_i32_0 : i32, i32, i32
  }
}

</mosaic_0001>

<bundles_post_ra>
// kernel: forward.1
= control target key start
LH: loop header
LB: loop body
LE: loop exit
PB: predicated region body
PF: predicated region fallthrough
CT: control target
= control target key end

     0   :  { %s5547_s17 = smov 0   ;;  %s7161_s0 = inlined_call_operand.vmem [shape: f32[2,18,18,2], index: 0, kind: input, shape index: {}]   ;;  %s7162_s1 = inlined_call_operand.vmem [shape: bf16[32,8], index: 1, kind: input, shape index: {}]   ;;  %s7163_s2 = inlined_call_operand.vmem [shape: f32[8,15], index: 2, kind: input, shape index: {}]   ;;  %s7164_s3 = inlined_call_operand.vmem [shape: f32[1,8], index: 3, kind: input, shape index: {}]   ;;  %s7165_s4 = inlined_call_operand.vmem [shape: f32[1,8], index: 4, kind: input, shape index: {}]   ;;  %s7166_s5 = inlined_call_operand.vmem [shape: bf16[128,16], index: 5, kind: input, shape index: {}]   ;;  %s7167_s6 = inlined_call_operand.vmem [shape: f32[4,7], index: 6, kind: input, shape index: {}]   ;;  %s7168_s7 = inlined_call_operand.vmem [shape: f32[1,16], index: 7, kind: input, shape index: {}]   ;;  %s7169_s8 = inlined_call_operand.vmem [shape: f32[1,16], index: 8, kind: input, shape index: {}]   ;;  %s7170_s9 = inlined_call_operand.vmem [shape: bf16[256,1], index: 9, kind: input, shape index: {}]   ;;  %s7171_s10 = inlined_call_operand.vmem [shape: f32[2,3], index: 10, kind: input, shape index: {}]   ;;  %s7172_s11 = inlined_call_operand.<no memory space> [shape: f32[1,1], index: 11, kind: input, shape index: {}]   ;;  %s7173_s12 = inlined_call_operand.vmem [shape: f32[4,1], index: 12, kind: input, shape index: {}]   ;;  %s7174_s14 = inlined_call_operand.vmem [shape: f32[2,1,1], index: 14, kind: output, shape index: {}]   ;;  %s7175_s13 = inlined_call_operand.<no memory space> [shape: f32[1,1], index: 13, kind: input, shape index: {}]  }
   0x1   :  { %v19_v0 = vstv %s7172_s11  ;;  %v21_v1 = vstv %s7175_s13 }
   0x2   :  { %20 = vst [vmem:[#allocation7] sm:$0x1] %v19_v0  ;;  %22 = vst [vmem:[#allocation8] sm:$0x1] %v21_v1 }
   0x3 LB: > { %s4664_s18 = sadd.s32 4294967295, %s5435_s17   ;;  %p4668_p0 = scmp.ge.s32.totalorder %s5435_s17, 1  ;;  %s5435_s17 = sphi %s5547_s17, %s28_s17  }
   0x4   : > { %p416_p1 = scmp.lt.s32.totalorder %s5435_s17, 3 }
   0x6   : > { %p417_p2 = pnand %p4668_p0, %p416_p1 }
   0x7   : > { %p460_p3 = scmp.lt.s32.totalorder (!%p417_p2), %s4664_s18, 1  ;;  %s5437_s21 = smov (!%p417_p2), 4  }
   0x8   : > { %420 = sbr.rel (%p417_p2) target bundleno = 2572 (0xa0c), region = 76  ;;  %s5438_s22 = smov (!%p417_p2), 2  }
   0x9   : > { %s7204_s23 = smov (!%p417_p2), 6   ;;  %s7202_s24 = smov (!%p417_p2), 8  }
   0xa   : > { %s5441_s25 = smov (!%p417_p2), 10   ;;  %s5442_s26 = smov (!%p417_p2), 12  }
   0xb   : > { %s5443_s27 = smov (!%p417_p2), 14   ;;  %s7220_s28 = smov (!%p417_p2), 16  }
   0xc   : > { %s5445_s29 = smov (!%p417_p2), 18   ;;  %s5446_s30 = smov (!%p417_p2), 20  }
   0xd   : > { %s7424_s18 = smov (!%p460_p3, %s4664_s18), 1  ;;  %vm561_vm0 = vcmask 15360   ;;  %vm563_vm1 = vcmask 14336   ;;  %s5447_s15 = smov 22   ;;  %v5395_v28 = vld [vmem:[%s7162_s1 + $0x8] sm:$0xff]   ;;  %v5449_v31 = vmov 0.0  }
   0xe   : > { %s5357_s11 = smul.u32 432, %s7424_s18  ;;  %s7176_s16 = smov 24   ;;  %5127 = vmatprep.subr.bf16.mxu0 %v5449_v31  ;;  %5135 = vmatprep.subr.mxu1 %v5449_v31  ;;  %v5396_v32 = vld [vmem:[%s7162_s1] sm:$0xff]   ;;  %vm7197_vm2 = vmmov 0   ;;  %vm575_vm3 = vcmask 31760   ;;  %vm589_vm4 = vcmask 48160  }
   0xf   : > { %5128 = vmatpush3.bf16.msra.mxu0 %v5395_v28  ;;  %s5450_s19 = smov 26   ;;  %s5451_s13 = smov 28   ;;  %5131 = vmatprep.mubr.msk.bf16.mxu0 %vm7197_vm2, %v5449_v31  ;;  %vm7211_vm5 = vcmask 30736   ;;  %vm7210_vm6 = vcmask 47136   ;;  %vm7209_vm7 = vcmask 63536   ;;  %vm7199_vm8 = vcmask 64560  }
  0x10   : > { %s5561_s20 = scalar_lea.vmem %s7161_s0, %s5357_s11  ;;  %5129 = vmatprep.subr.bf16.mxu0 %v5449_v31  ;;  %5139 = vmatprep.mubr.msk.f32.mxu1 %vm7197_vm2, %v5449_v31  ;;  %s7226_s11 = smov 24   ;;  %vm7213_vm9 = vcmask 79936   ;;  %vm7178_vm10 = vcmask 80960   ;;  %vm7180_vm11 = vcmask 96336   ;;  %vm7179_vm12 = vcmask 97360  }
  0x11   : > { %v579_v2 = vld [vmem:[%s5561_s20 + $0x2] sm:$0xff]  ;;  %v580_v4 = vld [vmem:[%s5561_s20 + $0xa] sm:$0x7f]  ;;  %v4670_v9 = vld [vmem:[%s5561_s20 + $0x18] sm:$0xff]  ;;  %vm7208_vm13 = vcmask 112736   ;;  %vm7182_vm14 = vcmask 113760  }
  0x12   : > { %v565_v3 = vld [vmem:[%s5561_s20 + $0x1] sm:$0xff]  ;;  %583 = vrot.lane.b32.xlu1 %v579_v2, %s5437_s21  ;;  %v566_v5 = vld [vmem:[%s5561_s20 + $0x9] sm:$0x7f]  ;;  %v4672_v13 = vld [vmem:[%s5561_s20 + $0x19] sm:$0xff]  ;;  %vm7181_vm15 = vcmask 129136  }
  0x13   : > { %569 = vrot.lane.b32.xlu0 %v565_v3, %s5438_s22  ;;  %v594_v6 = vld [vmem:[%s5561_s20 + $0xb] sm:$0x7f]  ;;  %v593_v7 = vld [vmem:[%s5561_s20 + $0x3] sm:$0xff]  ;;  %v4674_v15 = vld [vmem:[%s5561_s20 + $0x1a] sm:$0xff]  ;;  %5130 = vmatpush3.bf16.msra.mxu0 %v5396_v32 }
  0x14   : > { %v4671_v8 = vld [vmem:[%s5561_s20 + $0x20] sm:$0x7f]  ;;  %v560_v11 = vld [vmem:[%s5561_s20 + $0x8] sm:$0x7f]  ;;  %v4679_v18 = vld [vmem:[%s5561_s20 + $0x38] sm:$0x7f]  ;;  %5150 = vmatprep.subr.mxu0 %v5449_v31 }
  0x15   : > { %v559_v10 = vld [vmem:[%s5561_s20] sm:$0xff]  ;;  %564 = vst.msk [vmem:[#allocation4 + $0x8] sm:$0x7f] %vm563_vm1, %v560_v11  ;;  %v5595_v19 = vld [vmem:[%s5561_s20 + $0x30] sm:$0xff]  ;;  %v4681_v20 = vld [vmem:[%s5561_s20 + $0x39] sm:$0x7f] }
  0x16   : > { %585 = vrot.lane.b32.xlu1 %v580_v4, %s5437_s21  ;;  %v4673_v12 = vld [vmem:[%s5561_s20 + $0x21] sm:$0x7f]  ;;  %562 = vst.msk [vmem:[#allocation4] sm:$0xff] %vm561_vm0, %v559_v10  ;;  %v4680_v21 = vld [vmem:[%s5561_s20 + $0x31] sm:$0xff]  ;;  %v4683_v22 = vld [vmem:[%s5561_s20 + $0x3a] sm:$0x7f] }
  0x17   : > { %571 = vrot.lane.b32.xlu0 %v566_v5, %s5438_s22  ;;  %v4675_v14 = vld [vmem:[%s5561_s20 + $0x22] sm:$0x7f]  ;;  %v4682_v23 = vld [vmem:[%s5561_s20 + $0x32] sm:$0xff]  ;;  %v4685_v24 = vld [vmem:[%s5561_s20 + $0x3b] sm:$0x7f] }
  0x18   : > { %v4677_v16 = vld [vmem:[%s5561_s20 + $0x23] sm:$0x7f]  ;;  %v4676_v17 = vld [vmem:[%s5561_s20 + $0x1b] sm:$0xff]  ;;  %v4684_v25 = vld [vmem:[%s5561_s20 + $0x33] sm:$0xff] }
  0x19   : > { %v4687_v26 = vld [vmem:[%s5561_s20 + $0x50] sm:$0x7f]  ;;  %v4686_v27 = vld [vmem:[%s5561_s20 + $0x48] sm:$0xff]  ;;  %v4704_v37 = vld [vmem:[%s5561_s20 + $0x39] sm:$0x7f] }
  0x1a   : > { %599 = vrot.lane.b32.xlu1 %v594_v6, %s7204_s23  ;;  %v4689_v29 = vld [vmem:[%s5561_s20 + $0x51] sm:$0x7f]  ;;  %v4688_v30 = vld [vmem:[%s5561_s20 + $0x49] sm:$0xff]  ;;  %v4706_v38 = vld [vmem:[%s5561_s20 + $0x3a] sm:$0x7f] }
  0x1b   : > { %597 = vrot.lane.b32.xlu0 %v593_v7, %s7204_s23  ;;  %v4691_v33 = vld [vmem:[%s5561_s20 + $0x52] sm:$0x7f]  ;;  %v4690_v34 = vld [vmem:[%s5561_s20 + $0x4a] sm:$0xff]  ;;  %v4708_v39 = vld [vmem:[%s5561_s20 + $0x3b] sm:$0x7f] }
  0x1c   : > { %v4693_v35 = vld [vmem:[%s5561_s20 + $0x53] sm:$0x7f]  ;;  %v4692_v36 = vld [vmem:[%s5561_s20 + $0x4b] sm:$0xff]  ;;  %v5667_v45 = vld [vmem:[%s5561_s20 + $0x60] sm:$0xff] }
  0x1d   : > { %v4710_v40 = vld [vmem:[%s5561_s20 + $0x50] sm:$0x7f]  ;;  %v4718_v44 = vld [vmem:[%s5561_s20 + $0x68] sm:$0x7f]  ;;  %v4726_v52 = vld [vmem:[%s5561_s20 + $0x80] sm:$0x7f] }
  0x1e   : > { %614 = vrot.lane.b32.xlu1 %v4671_v8, %s7202_s24  ;;  %v4712_v41 = vld [vmem:[%s5561_s20 + $0x51] sm:$0x7f]  ;;  %v4720_v46 = vld [vmem:[%s5561_s20 + $0x69] sm:$0x7f]  ;;  %v4719_v47 = vld [vmem:[%s5561_s20 + $0x61] sm:$0xff] }
  0x1f   : > { %612 = vrot.lane.b32.xlu0 %v4670_v9, %s7202_s24  ;;  %v4714_v42 = vld [vmem:[%s5561_s20 + $0x52] sm:$0x7f]  ;;  %v4722_v48 = vld [vmem:[%s5561_s20 + $0x6a] sm:$0x7f]  ;;  %v4721_v49 = vld [vmem:[%s5561_s20 + $0x62] sm:$0xff] }
  0x20   : > { %v4716_v43 = vld [vmem:[%s5561_s20 + $0x53] sm:$0x7f]  ;;  %v4724_v50 = vld [vmem:[%s5561_s20 + $0x6b] sm:$0x7f]  ;;  %v4723_v51 = vld [vmem:[%s5561_s20 + $0x63] sm:$0xff] }
  0x21   : > { %v4725_v53 = vld [vmem:[%s5561_s20 + $0x78] sm:$0xff]  ;;  %v4728_v54 = vld [vmem:[%s5561_s20 + $0x81] sm:$0x7f]  ;;  %v4739_v62 = vld [vmem:[%s5561_s20 + $0x69] sm:$0x7f] }
  0x22   : > { %628 = vrot.lane.b32.xlu1 %v4673_v12, %s5441_s25  ;;  %v4727_v55 = vld [vmem:[%s5561_s20 + $0x79] sm:$0xff]  ;;  %v4730_v56 = vld [vmem:[%s5561_s20 + $0x82] sm:$0x7f]  ;;  %v4741_v1 = vld [vmem:[%s5561_s20 + $0x6a] sm:$0x7f] }
  0x23   : > { %626 = vrot.lane.b32.xlu0 %v4672_v13, %s5441_s25  ;;  %v5694_v57 = vld [vmem:[%s5561_s20 + $0x7a] sm:$0xff]  ;;  %v4732_v58 = vld [vmem:[%s5561_s20 + $0x83] sm:$0x7f]  ;;  %v4743_v4 = vld [vmem:[%s5561_s20 + $0x6b] sm:$0x7f] }
  0x24   : > { %v5701_v59 = vld [vmem:[%s5561_s20 + $0x7b] sm:$0xff] }
  0x25   : > { %v4745_v7 = vld [vmem:[%s5561_s20 + $0x80] sm:$0x7f] }
  0x26   : > { %642 = vrot.lane.b32.xlu1 %v4675_v14, %s5442_s26  ;;  %v4747_v10 = vld [vmem:[%s5561_s20 + $0x81] sm:$0x7f]  ;;  %v4757_v28 = vld [vmem:[%s5561_s20 + $0x9a] sm:$0x7f] }
  0x27   : > { %640 = vrot.lane.b32.xlu0 %v4674_v15, %s5442_s26  ;;  %v4749_v13 = vld [vmem:[%s5561_s20 + $0x82] sm:$0x7f] }
  0x2a   : > { %656 = vrot.lane.b32.xlu1 %v4677_v16, %s5443_s27  ;;  %v4751_v16 = vld [vmem:[%s5561_s20 + $0x83] sm:$0x7f] }
  0x2b   : > { %654 = vrot.lane.b32.xlu0 %v4676_v17, %s5443_s27 }
  0x2e   : > { %671 = vrot.lane.b32.xlu1 %v4679_v18, %s7220_s28 }
  0x2f   : > { %669 = vrot.lane.b32.xlu0 %v5595_v19, %s7220_s28 }
  0x32   : > { %685 = vrot.lane.b32.xlu1 %v4681_v20, %s5445_s29  ;;  %v4753_v20 = vld [vmem:[%s5561_s20 + $0x98] sm:$0x7f] }
  0x33   : > { %683 = vrot.lane.b32.xlu0 %v4680_v21, %s5445_s29 }
  0x36   : > { %699 = vrot.lane.b32.xlu1 %v4683_v22, %s5446_s30 }
  0x37   : > { %697 = vrot.lane.b32.xlu0 %v4682_v23, %s5446_s30 }
  0x3a   : > { %713 = vrot.lane.b32.xlu1 %v4685_v24, %s5447_s15  ;;  %v4755_v24 = vld [vmem:[%s5561_s20 + $0x99] sm:$0x7f] }
  0x3b   : > { %711 = vrot.lane.b32.xlu0 %v4684_v25, %s5447_s15 }
  0x3e   : > { %728 = vrot.lane.b32.xlu1 %v4687_v26, %s7176_s16 }
  0x3f   : > { %726 = vrot.lane.b32.xlu0 %v4686_v27, %s7176_s16  ;;  %s5453_s16 = smov 30  }
  0x42   : > { %742 = vrot.lane.b32.xlu1 %v4689_v29, %s5450_s19  ;;  %v5765_v29 = vld [vmem:[%s5561_s20 + $0x92] sm:$0xff] }
  0x43   : > { %740 = vrot.lane.b32.xlu0 %v4688_v30, %s5450_s19 }
  0x46   : > { %756 = vrot.lane.b32.xlu1 %v4691_v33, %s5451_s13  ;;  %v4759_v33 = vld [vmem:[%s5561_s20 + $0x9b] sm:$0x7f] }
  0x47   : > { %754 = vrot.lane.b32.xlu0 %v4690_v34, %s5451_s13 }
  0x4a   : > { %770 = vrot.lane.b32.xlu1 %v4693_v35, %s5453_s16 }
  0x4b   : > { %768 = vrot.lane.b32.xlu0 %v4692_v36, %s5453_s16 }
  0x4e   : > { %945 = vrot.lane.b32.xlu1 %v4704_v37, %s5438_s22  ;;  %v4761_v37 = vld [vmem:[%s5561_s20 + $0xb0] sm:$0x7f] }
  0x4f   : > { %943 = vrot.lane.b32.xlu0 %v4680_v21, %s5438_s22  ;;  %v5747_v21 = vld [vmem:[%s5561_s20 + $0x90] sm:$0xff] }
  0x52   : > { %957 = vrot.lane.b32.xlu1 %v4706_v38, %s5437_s21  ;;  %v5783_v38 = vld [vmem:[%s5561_s20 + $0xa8] sm:$0xff] }
  0x53   : > { %955 = vrot.lane.b32.xlu0 %v4682_v23, %s5437_s21 }
  0x56   : > { %969 = vrot.lane.b32.xlu1 %v4708_v39, %s7204_s23 }
  0x57   : > { %967 = vrot.lane.b32.xlu0 %v4684_v25, %s7204_s23  ;;  %v5756_v25 = vld [vmem:[%s5561_s20 + $0x91] sm:$0xff] }
  0x5a   : > { %981 = vrot.lane.b32.xlu1 %v4710_v40, %s7202_s24 }
  0x5b   : > { %979 = vrot.lane.b32.xlu0 %v4686_v27, %s7202_s24 }
  0x5e   : > { %993 = vrot.lane.b32.xlu1 %v4712_v41, %s5441_s25  ;;  %v4763_v41 = vld [vmem:[%s5561_s20 + $0xb1] sm:$0x7f] }
  0x5f   : > { %991 = vrot.lane.b32.xlu0 %v4688_v30, %s5441_s25 }
  0x62   : > { %1005 = vrot.lane.b32.xlu1 %v4714_v42, %s5442_s26  ;;  %v5792_v42 = vld [vmem:[%s5561_s20 + $0xa9] sm:$0xff] }
  0x63   : > { %1003 = vrot.lane.b32.xlu0 %v4690_v34, %s5442_s26  ;;  %v5774_v34 = vld [vmem:[%s5561_s20 + $0x93] sm:$0xff] }
  0x66   : > { %1017 = vrot.lane.b32.xlu1 %v4716_v43, %s5443_s27 }
  0x67   : > { %1015 = vrot.lane.b32.xlu0 %v4692_v36, %s5443_s27 }
  0x6a   : > { %1030 = vrot.lane.b32.xlu1 %v4718_v44, %s7220_s28 }
  0x6b   : > { %1028 = vrot.lane.b32.xlu0 %v5667_v45, %s7220_s28 }
  0x6e   : > { %1042 = vrot.lane.b32.xlu1 %v4720_v46, %s5445_s29  ;;  %v4765_v46 = vld [vmem:[%s5561_s20 + $0xb2] sm:$0x7f] }
  0x6f   : > { %1040 = vrot.lane.b32.xlu0 %v4719_v47, %s5445_s29 }
  0x72   : > { %1054 = vrot.lane.b32.xlu1 %v4722_v48, %s5446_s30 }
  0x73   : > { %1052 = vrot.lane.b32.xlu0 %v4721_v49, %s5446_s30 }
  0x76   : > { %1066 = vrot.lane.b32.xlu1 %v4724_v50, %s5447_s15  ;;  %v4767_v50 = vld [vmem:[%s5561_s20 + $0xb3] sm:$0x7f] }
  0x77   : > { %1064 = vrot.lane.b32.xlu0 %v4723_v51, %s5447_s15 }
  0x7a   : > { %1079 = vrot.lane.b32.xlu1 %v4726_v52, %s7226_s11 }
  0x7b   : > { %1077 = vrot.lane.b32.xlu0 %v4725_v53, %s7226_s11 }
  0x7e   : > { %1091 = vrot.lane.b32.xlu1 %v4728_v54, %s5450_s19  ;;  %v4702_v54 = vld [vmem:[%s5561_s20 + $0x38] sm:$0x7f] }
  0x7f   : > { %1089 = vrot.lane.b32.xlu0 %v4727_v55, %s5450_s19 }
  0x82   : > { %1103 = vrot.lane.b32.xlu1 %v4730_v56, %s5451_s13 }
  0x83   : > { %1101 = vrot.lane.b32.xlu0 %v5694_v57, %s5451_s13 }
  0x84   : > { %v584_v60 = vpop.permute.xlu1 %583 }
  0x85   : > { %v570_v61 = vpop.permute.xlu0 %569 }
  0x86   : > { %576 = vst.msk [vmem:[#allocation4] sm:$0xff] %vm575_vm3, %v570_v61  ;;  %1115 = vrot.lane.b32.xlu1 %v4732_v58, %s5453_s16  ;;  %v4776_v61 = vld [vmem:[%s5561_s20 + $0x9a] sm:$0x7f] }
  0x87   : > { %590 = vst.msk [vmem:[#allocation4] sm:$0xff] %vm589_vm4, %v584_v60  ;;  %1113 = vrot.lane.b32.xlu0 %v5701_v59, %s5453_s16 }
  0x88   : > { %v586_v63 = vpop.permute.xlu1 %585 }
  0x89   : > { %v572_v0 = vpop.permute.xlu0 %571 }
  0x8a   : > { %578 = vst.msk [vmem:[#allocation4 + $0x8] sm:$0x7f] %vm7211_vm5, %v572_v0  ;;  %1258 = vrot.lane.b32.xlu1 %v4739_v62, %s5438_s22 }
  0x8b   : > { %592 = vst.msk [vmem:[#allocation4 + $0x8] sm:$0x7f] %vm7210_vm6, %v586_v63  ;;  %1256 = vrot.lane.b32.xlu0 %v4719_v47, %s5438_s22  ;;  %v5801_v47 = vld [vmem:[%s5561_s20 + $0xaa] sm:$0xff]  ;;  %v4778_v63 = vld [vmem:[%s5561_s20 + $0x9b] sm:$0x7f] }
  0x8c   : > { %v600_v2 = vpop.permute.xlu1 %599 }
  0x8d   : > { %v598_v3 = vpop.permute.xlu0 %597  ;;  %606 = vst.msk [vmem:[#allocation4 + $0x8] sm:$0x7f] %vm7209_vm7, %v600_v2  ;;  %v4780_v2 = vld [vmem:[%s5561_s20 + $0xb0] sm:$0x7f] }
  0x8e   : > { %604 = vst.msk [vmem:[#allocation4] sm:$0xff] %vm7199_vm8, %v598_v3  ;;  %1270 = vrot.lane.b32.xlu1 %v4741_v1, %s5437_s21 }
  0x8f   : > { %1268 = vrot.lane.b32.xlu0 %v4721_v49, %s5437_s21 }
  0x90   : > { %v615_v5 = vpop.permute.xlu1 %614 }
  0x91   : > { %v613_v6 = vpop.permute.xlu0 %612  ;;  %621 = vst.msk [vmem:[#allocation4 + $0x8] sm:$0x7f] %vm7213_vm9, %v615_v5  ;;  %v4782_v5 = vld [vmem:[%s5561_s20 + $0xb1] sm:$0x7f] }
  0x92   : > { %619 = vst.msk [vmem:[#allocation4] sm:$0xff] %vm7178_vm10, %v613_v6  ;;  %1282 = vrot.lane.b32.xlu1 %v4743_v4, %s7204_s23  ;;  %vm7200_vm10 = vcmask 130160  }
  0x93   : > { %1280 = vrot.lane.b32.xlu0 %v4723_v51, %s7204_s23  ;;  %v5810_v51 = vld [vmem:[%s5561_s20 + $0xab] sm:$0xff] }
  0x94   : > { %v629_v8 = vpop.permute.xlu1 %628 }
  0x95   : > { %v627_v9 = vpop.permute.xlu0 %626  ;;  %635 = vst.msk [vmem:[#allocation4 + $0x8] sm:$0x7f] %vm7180_vm11, %v629_v8  ;;  %vm7183_vm11 = vcmask 146560   ;;  %v4784_v8 = vld [vmem:[%s5561_s20 + $0xb2] sm:$0x7f] }
  0x96   : > { %633 = vst.msk [vmem:[#allocation4] sm:$0xff] %vm7179_vm12, %v627_v9  ;;  %1294 = vrot.lane.b32.xlu1 %v4745_v7, %s7202_s24  ;;  %vm7184_vm12 = vcmask 145536  }
  0x97   : > { %1292 = vrot.lane.b32.xlu0 %v4725_v53, %s7202_s24 }
  0x98   : > { %v643_v11 = vpop.permute.xlu1 %642 }
  0x99   : > { %v641_v12 = vpop.permute.xlu0 %640  ;;  %649 = vst.msk [vmem:[#allocation4 + $0x8] sm:$0x7f] %vm7208_vm13, %v643_v11  ;;  %v4786_v11 = vld [vmem:[%s5561_s20 + $0xb3] sm:$0x7f] }
  0x9a   : > { %647 = vst.msk [vmem:[#allocation4] sm:$0xff] %vm7182_vm14, %v641_v12  ;;  %1306 = vrot.lane.b32.xlu1 %v4747_v10, %s5441_s25  ;;  %vm7185_vm14 = vcmask 162960  }
  0x9b   : > { %1304 = vrot.lane.b32.xlu0 %v4727_v55, %s5441_s25  ;;  %v4774_v55 = vld [vmem:[%s5561_s20 + $0x99] sm:$0x7f] }
  0x9c   : > { %v657_v14 = vpop.permute.xlu1 %656 }
  0x9d   : > { %v655_v15 = vpop.permute.xlu0 %654  ;;  %663 = vst.msk [vmem:[#allocation4 + $0x8] sm:$0x7f] %vm7181_vm15, %v657_v14  ;;  %vm7186_vm15 = vcmask 161936   ;;  %v5867_v14 = vld [vmem:[%s5561_s20 + $0xc0] sm:$0xff] }
  0x9e   : > { %661 = vst.msk [vmem:[#allocation4] sm:$0xff] %vm7200_vm10, %v655_v15  ;;  %1318 = vrot.lane.b32.xlu1 %v4749_v13, %s5442_s26  ;;  %v4788_v15 = vld [vmem:[%s5561_s20 + $0xc8] sm:$0x7f] }
  0x9f   : > { %1316 = vrot.lane.b32.xlu0 %v5694_v57, %s5442_s26 }
  0xa0   : > { %v672_v17 = vpop.permute.xlu1 %671 }
  0xa1   : > { %v670_v18 = vpop.permute.xlu0 %669  ;;  %678 = vst.msk [vmem:[#allocation4 + $0x8] sm:$0x7f] %vm7184_vm12, %v672_v17  ;;  %vm7187_vm12 = vcmask 179360  }
  0xa2   : > { %676 = vst.msk [vmem:[#allocation4] sm:$0xff] %vm7183_vm11, %v670_v18  ;;  %1330 = vrot.lane.b32.xlu1 %v4751_v16, %s5443_s27  ;;  %vm7188_vm11 = vcmask 178336   ;;  %v5876_v18 = vld [vmem:[%s5561_s20 + $0xc1] sm:$0xff] }
  0xa3   : > { %1328 = vrot.lane.b32.xlu0 %v5701_v59, %s5443_s27 }
  0xa4   : > { %v686_v22 = vpop.permute.xlu1 %685 }
  0xa5   : > { %v684_v23 = vpop.permute.xlu0 %683  ;;  %692 = vst.msk [vmem:[#allocation4 + $0x8] sm:$0x7f] %vm7186_vm15, %v686_v22  ;;  %vm7189_vm15 = vcmask 195760  }
  0xa6   : > { %690 = vst.msk [vmem:[#allocation4] sm:$0xff] %vm7185_vm14, %v684_v23  ;;  %1343 = vrot.lane.b32.xlu1 %v4753_v20, %s7220_s28  ;;  %vm7190_vm14 = vcmask 194736   ;;  %v4790_v20 = vld [vmem:[%s5561_s20 + $0xc9] sm:$0x7f] }
  0xa7   : > { %1341 = vrot.lane.b32.xlu0 %v5747_v21, %s7220_s28 }
  0xa8   : > { %v700_v26 = vpop.permute.xlu1 %699 }
  0xa9   : > { %v698_v27 = vpop.permute.xlu0 %697  ;;  %706 = vst.msk [vmem:[#allocation4 + $0x8] sm:$0x7f] %vm7188_vm11, %v700_v26  ;;  %vm7191_vm11 = vcmask 212160  }
  0xaa   : > { %704 = vst.msk [vmem:[#allocation4] sm:$0xff] %vm7187_vm12, %v698_v27  ;;  %1355 = vrot.lane.b32.xlu1 %v4755_v24, %s5445_s29  ;;  %vm7192_vm12 = vcmask 211136   ;;  %v5885_v24 = vld [vmem:[%s5561_s20 + $0xc2] sm:$0xff] }
  0xab   : > { %1353 = vrot.lane.b32.xlu0 %v5756_v25, %s5445_s29 }
  0xac   : > { %v714_v30 = vpop.permute.xlu1 %713 }
  0xad   : > { %v712_v32 = vpop.permute.xlu0 %711  ;;  %720 = vst.msk [vmem:[#allocation4 + $0x8] sm:$0x7f] %vm7190_vm14, %v714_v30  ;;  %vm7193_vm14 = vcmask 228560  }
  0xae   : > { %718 = vst.msk [vmem:[#allocation4] sm:$0xff] %vm7189_vm15, %v712_v32  ;;  %1367 = vrot.lane.b32.xlu1 %v4757_v28, %s5446_s30  ;;  %vm7194_vm15 = vcmask 227536   ;;  %v5894_v28 = vld [vmem:[%s5561_s20 + $0xc3] sm:$0xff] }
  0xaf   : > { %1365 = vrot.lane.b32.xlu0 %v5765_v29, %s5446_s30 }
  0xb0   : > { %v729_v35 = vpop.permute.xlu1 %728 }
  0xb1   : > { %v727_v36 = vpop.permute.xlu0 %726  ;;  %735 = vst.msk [vmem:[#allocation4 + $0x8] sm:$0x7f] %vm7192_vm12, %v729_v35  ;;  %vm760_vm12 = vcmask 244960  }
  0xb2   : > { %733 = vst.msk [vmem:[#allocation4] sm:$0xff] %vm7191_vm11, %v727_v36  ;;  %1379 = vrot.lane.b32.xlu1 %v4759_v33, %s5447_s15  ;;  %vm762_vm11 = vcmask 243936   ;;  %v5903_v33 = vld [vmem:[%s5561_s20 + $0xd8] sm:$0xff] }
  0xb3   : > { %1377 = vrot.lane.b32.xlu0 %v5774_v34, %s5447_s15 }
  0xb4   : > { %v743_v39 = vpop.permute.xlu1 %742 }
  0xb5   : > { %v741_v40 = vpop.permute.xlu0 %740  ;;  %749 = vst.msk [vmem:[#allocation4 + $0x8] sm:$0x7f] %vm7194_vm15, %v743_v39  ;;  %vm7195_vm15 = vcmask 261360  }
  0xb6   : > { %747 = vst.msk [vmem:[#allocation4] sm:$0xff] %vm7193_vm14, %v741_v40  ;;  %1392 = vrot.lane.b32.xlu1 %v4761_v37, %s7226_s11  ;;  %vm776_vm14 = vcmask 260336   ;;  %v4797_v37 = vld [vmem:[%s5561_s20 + $0xd9] sm:$0xff] }
  0xb7   : > { %1390 = vrot.lane.b32.xlu0 %v5783_v38, %s7226_s11 }
  0xb8   : > { %v757_v43 = vpop.permute.xlu1 %756 }
  0xb9   : > { %v755_v44 = vpop.permute.xlu0 %754  ;;  %763 = vst.msk [vmem:[#allocation4 + $0x8] sm:$0x7f] %vm762_vm11, %v757_v43 }
  0xba   : > { %761 = vst.msk [vmem:[#allocation4] sm:$0xff] %vm760_vm12, %v755_v44  ;;  %1404 = vrot.lane.b32.xlu1 %v4763_v41, %s5450_s19  ;;  %v4799_v41 = vld [vmem:[%s5561_s20 + $0xda] sm:$0xff] }
  0xbb   : > { %1402 = vrot.lane.b32.xlu0 %v5792_v42, %s5450_s19 }
  0xbc   : > { %v771_v48 = vpop.permute.xlu1 %770 }
  0xbd   : > { %v769_v49 = vpop.permute.xlu0 %768  ;;  %777 = vst.msk [vmem:[#allocation4 + $0x8] sm:$0x7f] %vm776_vm14, %v771_v48 }
  0xbe   : > { %775 = vst.msk [vmem:[#allocation4] sm:$0xff] %vm7195_vm15, %v769_v49  ;;  %1416 = vrot.lane.b32.xlu1 %v4765_v46, %s5451_s13  ;;  %vm7196_vm15 = vcmask 261120   ;;  %v4801_v46 = vld [vmem:[%s5561_s20 + $0xdb] sm:$0xff] }
  0xbf   : > { %1414 = vrot.lane.b32.xlu0 %v5801_v47, %s5451_s13 }
  0xc0   : > { %v946_v52 = vpop.permute.xlu1 %945 }
  0xc1   : > { %v944_v53 = vpop.permute.xlu0 %943 }
  0xc2   : > { %1428 = vrot.lane.b32.xlu1 %v4767_v50, %s5453_s16  ;;  %v4737_v50 = vld [vmem:[%s5561_s20 + $0x68] sm:$0x7f] }
  0xc3   : > { %1426 = vrot.lane.b32.xlu0 %v5810_v51, %s5453_s16 }
  0xc4   : > { %v779_v56 = vld [vmem:[#allocation4 + $0x8] sm:$0x7f]  ;;  %v958_v58 = vpop.permute.xlu1 %957 }
  0xc5   : > { %v778_v57 = vld [vmem:[#allocation4] sm:$0xff]  ;;  %v956_v59 = vpop.permute.xlu0 %955  ;;  %938 = vst.msk [vmem:[#allocation4 + $0x8] sm:$0x7f] %vm563_vm1, %v4702_v54 }
  0xc6   : > { %v780_v60 = vpack.c.bf16 %v779_v56, %v778_v57  ;;  %937 = vst.msk [vmem:[#allocation4] sm:$0xff] %vm561_vm0, %v5595_v19  ;;  %1571 = vrot.lane.b32.xlu1 %v4774_v55, %s5438_s22  ;;  %v4811_v56 = vld [vmem:[%s5561_s20 + $0xca] sm:$0x7f] }
  0xc7   : > { %950 = vst.msk [vmem:[#allocation4 + $0x8] sm:$0x7f] %vm7211_vm5, %v946_v52  ;;  %1569 = vrot.lane.b32.xlu0 %v5756_v25, %s5438_s22  ;;  %v4792_v25 = vld [vmem:[%s5561_s20 + $0xca] sm:$0x7f] }
  0xc8   : > { %949 = vst.msk [vmem:[#allocation4] sm:$0xff] %vm575_vm3, %v944_v53  ;;  %5132 = vmatmul.mubr.msk.bf16.vlgmr.msra.gmra.mxu0 %vm7196_vm15, %v780_v60  ;;  %v970_v62 = vpop.permute.xlu1 %969  ;;  %vm7227_vm15 = vcmask 80960  }
  0xc9   : > { %962 = vst.msk [vmem:[#allocation4 + $0x8] sm:$0x7f] %vm7210_vm6, %v958_v58  ;;  %v968_v19 = vpop.permute.xlu0 %967  ;;  %5154 = vmatprep.mubr.msk.f32.mxu0 %vm7197_vm2, %v5449_v31  ;;  %vm7228_vm2 = vcmask 96336  }
  0xca   : > { %961 = vst.msk [vmem:[#allocation4] sm:$0xff] %vm589_vm4, %v956_v59  ;;  %1583 = vrot.lane.b32.xlu1 %v4776_v61, %s5437_s21  ;;  %v4815_v61 = vld [vmem:[%s5561_s20 + $0xe0] sm:$0x7f] }
  0xcb   : > { %974 = vst.msk [vmem:[#allocation4 + $0x8] sm:$0x7f] %vm7209_vm7, %v970_v62  ;;  %1581 = vrot.lane.b32.xlu0 %v5765_v29, %s5437_s21  ;;  %v4794_v29 = vld [vmem:[%s5561_s20 + $0xcb] sm:$0x7f] }
  0xcc   : > { %973 = vst.msk [vmem:[#allocation4] sm:$0xff] %vm7199_vm8, %v968_v19  ;;  %v982_v0 = vpop.permute.xlu1 %981  ;;  %vm7229_vm8 = vcmask 97360  }
  0xcd   : > { %v980_v1 = vpop.permute.xlu0 %979  ;;  %986 = vst.msk [vmem:[#allocation4 + $0x8] sm:$0x7f] %vm7213_vm9, %v982_v0 }
  0xce   : > { %985 = vst.msk [vmem:[#allocation4] sm:$0xff] %vm7227_vm15, %v980_v1  ;;  %1595 = vrot.lane.b32.xlu1 %v4778_v63, %s7204_s23  ;;  %vm7230_vm15 = vcmask 113760   ;;  %v4817_v63 = vld [vmem:[%s5561_s20 + $0xe1] sm:$0x7f] }
  0xcf   : > { %1593 = vrot.lane.b32.xlu0 %v5774_v34, %s7204_s23  ;;  %v4796_v34 = vld [vmem:[%s5561_s20 + $0xe0] sm:$0x7f] }
  0xd0   : > { %v994_v3 = vpop.permute.xlu1 %993 }
  0xd1   : > { %v992_v4 = vpop.permute.xlu0 %991  ;;  %998 = vst.msk [vmem:[#allocation4 + $0x8] sm:$0x7f] %vm7228_vm2, %v994_v3  ;;  %vm7231_vm2 = vcmask 129136  }
  0xd2   : > { %997 = vst.msk [vmem:[#allocation4] sm:$0xff] %vm7229_vm8, %v992_v4  ;;  %1607 = vrot.lane.b32.xlu1 %v4780_v2, %s7202_s24  ;;  %vm7232_vm8 = vcmask 145536   ;;  %v4819_v2 = vld [vmem:[%s5561_s20 + $0xe2] sm:$0x7f] }
  0xd3   : > { %1605 = vrot.lane.b32.xlu0 %v5783_v38, %s7202_s24  ;;  %v4798_v38 = vld [vmem:[%s5561_s20 + $0xe1] sm:$0x7f] }
  0xd4   : > { %v1006_v6 = vpop.permute.xlu1 %1005 }
  0xd5   : > { %v1004_v7 = vpop.permute.xlu0 %1003  ;;  %1010 = vst.msk [vmem:[#allocation4 + $0x8] sm:$0x7f] %vm7208_vm13, %v1006_v6 }
  0xd6   : > { %1009 = vst.msk [vmem:[#allocation4] sm:$0xff] %vm7230_vm15, %v1004_v7  ;;  %1619 = vrot.lane.b32.xlu1 %v4782_v5, %s5441_s25  ;;  %vm7233_vm15 = vcmask 146560   ;;  %v4821_v5 = vld [vmem:[%s5561_s20 + $0xe3] sm:$0x7f] }
  0xd7   : > { %1617 = vrot.lane.b32.xlu0 %v5792_v42, %s5441_s25  ;;  %v4800_v42 = vld [vmem:[%s5561_s20 + $0xe2] sm:$0x7f] }
  0xd8   : > { %v1018_v9 = vpop.permute.xlu1 %1017 }
  0xd9   : > { %v1016_v10 = vpop.permute.xlu0 %1015  ;;  %1022 = vst.msk [vmem:[#allocation4 + $0x8] sm:$0x7f] %vm7231_vm2, %v1018_v9  ;;  %vm7234_vm2 = vcmask 161936   ;;  %v4823_v9 = vld [vmem:[%s5561_s20 + $0xf8] sm:$0x7f] }
  0xda   : > { %1021 = vst.msk [vmem:[#allocation4] sm:$0xff] %vm7200_vm10, %v1016_v10  ;;  %1631 = vrot.lane.b32.xlu1 %v4784_v8, %s5442_s26  ;;  %vm7235_vm10 = vcmask 162960   ;;  %v5977_v8 = vld [vmem:[%s5561_s20 + $0xf0] sm:$0xff] }
  0xdb   : > { %1629 = vrot.lane.b32.xlu0 %v5801_v47, %s5442_s26  ;;  %v4802_v47 = vld [vmem:[%s5561_s20 + $0xe3] sm:$0x7f] }
  0xdc   : > { %v1031_v12 = vpop.permute.xlu1 %1030 }
  0xdd   : > { %v1029_v13 = vpop.permute.xlu0 %1028  ;;  %1035 = vst.msk [vmem:[#allocation4 + $0x8] sm:$0x7f] %vm7232_vm8, %v1031_v12  ;;  %vm7236_vm8 = vcmask 178336   ;;  %v5986_v12 = vld [vmem:[%s5561_s20 + $0xf1] sm:$0xff] }
  0xde   : > { %1034 = vst.msk [vmem:[#allocation4] sm:$0xff] %vm7233_vm15, %v1029_v13  ;;  %1643 = vrot.lane.b32.xlu1 %v4786_v11, %s5443_s27  ;;  %vm7237_vm15 = vcmask 179360   ;;  %v4825_v13 = vld [vmem:[%s5561_s20 + $0xf9] sm:$0x7f] }
  0xdf   : > { %1641 = vrot.lane.b32.xlu0 %v5810_v51, %s5443_s27  ;;  %v4809_v51 = vld [vmem:[%s5561_s20 + $0xc9] sm:$0x7f] }
  0xe0   : > { %v1043_v16 = vpop.permute.xlu1 %1042 }
  0xe1   : > { %v1041_v17 = vpop.permute.xlu0 %1040  ;;  %1047 = vst.msk [vmem:[#allocation4 + $0x8] sm:$0x7f] %vm7234_vm2, %v1043_v16  ;;  %vm7239_vm2 = vcmask 195760  }
  0xe2   : > { %1046 = vst.msk [vmem:[#allocation4] sm:$0xff] %vm7235_vm10, %v1041_v17  ;;  %1656 = vrot.lane.b32.xlu1 %v4788_v15, %s7220_s28  ;;  %vm7238_vm10 = vcmask 194736   ;;  %v5995_v17 = vld [vmem:[%s5561_s20 + $0xf2] sm:$0xff] }
  0xe3   : > { %1654 = vrot.lane.b32.xlu0 %v5867_v14, %s7220_s28 }
  0xe4   : > { %v1055_v22 = vpop.permute.xlu1 %1054 }
  0xe5   : > { %v1053_v23 = vpop.permute.xlu0 %1052  ;;  %1059 = vst.msk [vmem:[#allocation4 + $0x8] sm:$0x7f] %vm7236_vm8, %v1055_v22  ;;  %vm7240_vm8 = vcmask 211136  }
  0xe6   : > { %1058 = vst.msk [vmem:[#allocation4] sm:$0xff] %vm7237_vm15, %v1053_v23  ;;  %1668 = vrot.lane.b32.xlu1 %v4790_v20, %s5445_s29  ;;  %vm7241_vm15 = vcmask 212160   ;;  %v6004_v23 = vld [vmem:[%s5561_s20 + $0xf3] sm:$0xff] }
  0xe7   : > { %1666 = vrot.lane.b32.xlu0 %v5876_v18, %s5445_s29 }
  0xe8   : > { %v1067_v26 = vpop.permute.xlu1 %1066 }
  0xe9   : > { %v1065_v27 = vpop.permute.xlu0 %1064  ;;  %1071 = vst.msk [vmem:[#allocation4 + $0x8] sm:$0x7f] %vm7238_vm10, %v1067_v26  ;;  %vm7242_vm10 = vcmask 227536  }
  0xea   : > { %1070 = vst.msk [vmem:[#allocation4] sm:$0xff] %vm7239_vm2, %v1065_v27  ;;  %1680 = vrot.lane.b32.xlu1 %v4792_v25, %s5446_s30  ;;  %vm7243_vm2 = vcmask 228560   ;;  %v6013_v27 = vld [vmem:[%s5561_s20 + $0x108] sm:$0xff] }
  0xeb   : > { %1678 = vrot.lane.b32.xlu0 %v5885_v24, %s5446_s30 }
  0xec   : > { %v1080_v30 = vpop.permute.xlu1 %1079 }
  0xed   : > { %v1078_v32 = vpop.permute.xlu0 %1077  ;;  %1084 = vst.msk [vmem:[#allocation4 + $0x8] sm:$0x7f] %vm7240_vm8, %v1080_v30  ;;  %vm7244_vm8 = vcmask 261360  }
  0xee   : > { %1083 = vst.msk [vmem:[#allocation4] sm:$0xff] %vm7241_vm15, %v1078_v32  ;;  %1692 = vrot.lane.b32.xlu1 %v4794_v29, %s5447_s15  ;;  %vm7245_vm15 = vcmask 64560   ;;  %v4832_v32 = vld [vmem:[%s5561_s20 + $0x109] sm:$0xff] }
  0xef   : > { %1690 = vrot.lane.b32.xlu0 %v5894_v28, %s5447_s15 }
  0xf0   : > { %v1092_v35 = vpop.permute.xlu1 %1091 }
  0xf1   : > { %v1090_v36 = vpop.permute.xlu0 %1089  ;;  %1096 = vst.msk [vmem:[#allocation4 + $0x8] sm:$0x7f] %vm7242_vm10, %v1092_v35  ;;  %vm7246_vm10 = vcmask 80960  }
  0xf2   : > { %1095 = vst.msk [vmem:[#allocation4] sm:$0xff] %vm7243_vm2, %v1090_v36  ;;  %1705 = vrot.lane.b32.xlu1 %v4796_v34, %s7226_s11  ;;  %vm7247_vm2 = vcmask 96336   ;;  %v4834_v36 = vld [vmem:[%s5561_s20 + $0x10a] sm:$0xff] }
  0xf3   : > { %1703 = vrot.lane.b32.xlu0 %v5903_v33, %s7226_s11 }
  0xf4   : > { %v1104_v39 = vpop.permute.xlu1 %1103 }
  0xf5   : > { %v1102_v40 = vpop.permute.xlu0 %1101  ;;  %1108 = vst.msk [vmem:[#allocation4 + $0x8] sm:$0x7f] %vm762_vm11, %v1104_v39 }
  0xf6   : > { %1107 = vst.msk [vmem:[#allocation4] sm:$0xff] %vm760_vm12, %v1102_v40  ;;  %1717 = vrot.lane.b32.xlu1 %v4798_v38, %s5450_s19  ;;  %v4836_v40 = vld [vmem:[%s5561_s20 + $0x10b] sm:$0xff] }
  0xf7   : > { %1715 = vrot.lane.b32.xlu0 %v4797_v37, %s5450_s19 }
  0xf8   : > { %v1116_v43 = vpop.permute.xlu1 %1115 }
  0xf9   : > { %v1114_v44 = vpop.permute.xlu0 %1113  ;;  %1120 = vst.msk [vmem:[#allocation4 + $0x8] sm:$0x7f] %vm776_vm14, %v1116_v43 }
  0xfa   : > { %1119 = vst.msk [vmem:[#allocation4] sm:$0xff] %vm7244_vm8, %v1114_v44  ;;  %1729 = vrot.lane.b32.xlu1 %v4800_v42, %s5451_s13  ;;  %vm7248_vm8 = vcmask 97360   ;;  %v4772_v44 = vld [vmem:[%s5561_s20 + $0x98] sm:$0x7f] }
  0xfb   : > { %1727 = vrot.lane.b32.xlu0 %v4799_v41, %s5451_s13 }
  0xfc   : > { %v1259_v48 = vpop.permute.xlu1 %1258 }
  0xfd   : > { %v1257_v49 = vpop.permute.xlu0 %1256 }
  0xfe   : > { %1741 = vrot.lane.b32.xlu1 %v4802_v47, %s5453_s16 }
  0xff   : > { %1739 = vrot.lane.b32.xlu0 %v4801_v46, %s5453_s16 }
 0x100   : > { %v5929_v52 = vld [vmem:[#allocation4 + $0x8] sm:$0x7f]  ;;  %v1271_v54 = vpop.permute.xlu1 %1270 }
 0x101   : > { %v5931_v53 = vld [vmem:[#allocation4] sm:$0xff]  ;;  %v1269_v55 = vpop.permute.xlu0 %1268  ;;  %1251 = vst.msk [vmem:[#allocation4 + $0x8] sm:$0x7f] %vm563_vm1, %v4737_v50 }
 0x102   : > { %1250 = vst.msk [vmem:[#allocation4] sm:$0xff] %vm561_vm0, %v5667_v45  ;;  %1884 = vrot.lane.b32.xlu1 %v4809_v51, %s5438_s22  ;;  %v4813_v45 = vld [vmem:[%s5561_s20 + $0xcb] sm:$0x7f]  ;;  %v4846_v51 = vld [vmem:[%s5561_s20 + $0xfa] sm:$0x7f] }
 0x103   : > { %1263 = vst.msk [vmem:[#allocation4 + $0x8] sm:$0x7f] %vm7211_vm5, %v1259_v48  ;;  %1882 = vrot.lane.b32.xlu0 %v5876_v18, %s5438_s22  ;;  %v4827_v18 = vld [vmem:[%s5561_s20 + $0xfa] sm:$0x7f] }
 0x104   : > { %1262 = vst.msk [vmem:[#allocation4] sm:$0xff] %vm575_vm3, %v1257_v49  ;;  %v1283_v57 = vpop.permute.xlu1 %1282 }
 0x105   : > { %1275 = vst.msk [vmem:[#allocation4 + $0x8] sm:$0x7f] %vm7210_vm6, %v1271_v54  ;;  %v1281_v58 = vpop.permute.xlu0 %1280 }
 0x106   : > { %1274 = vst.msk [vmem:[#allocation4] sm:$0xff] %vm589_vm4, %v1269_v55  ;;  %1896 = vrot.lane.b32.xlu1 %v4811_v56, %s5437_s21 }
 0x107   : > { %1287 = vst.msk [vmem:[#allocation4 + $0x8] sm:$0x7f] %vm7209_vm7, %v1283_v57  ;;  %1894 = vrot.lane.b32.xlu0 %v5885_v24, %s5437_s21  ;;  %v4829_v24 = vld [vmem:[%s5561_s20 + $0xfb] sm:$0x7f] }
 0x108   : > { %1286 = vst.msk [vmem:[#allocation4] sm:$0xff] %vm7245_vm15, %v1281_v58  ;;  %v1295_v59 = vpop.permute.xlu1 %1294  ;;  %vm7249_vm15 = vcmask 113760   ;;  %v4850_v58 = vld [vmem:[%s5561_s20 + $0x110] sm:$0x7f] }
 0x109   : > { %v1293_v60 = vpop.permute.xlu0 %1292  ;;  %1299 = vst.msk [vmem:[#allocation4 + $0x8] sm:$0x7f] %vm7213_vm9, %v1295_v59 }
 0x10a   : > { %1298 = vst.msk [vmem:[#allocation4] sm:$0xff] %vm7246_vm10, %v1293_v60  ;;  %1908 = vrot.lane.b32.xlu1 %v4813_v45, %s7204_s23  ;;  %vm7250_vm10 = vcmask 129136   ;;  %v4852_v60 = vld [vmem:[%s5561_s20 + $0x111] sm:$0x7f] }
 0x10b   : > { %1906 = vrot.lane.b32.xlu0 %v5894_v28, %s7204_s23  ;;  %v4831_v28 = vld [vmem:[%s5561_s20 + $0x110] sm:$0x7f] }
 0x10c   : > { %v1307_v62 = vpop.permute.xlu1 %1306 }
 0x10d   : > { %v1305_v19 = vpop.permute.xlu0 %1304  ;;  %1311 = vst.msk [vmem:[#allocation4 + $0x8] sm:$0x7f] %vm7247_vm2, %v1307_v62  ;;  %vm7251_vm2 = vcmask 130160  }
 0x10e   : > { %1310 = vst.msk [vmem:[#allocation4] sm:$0xff] %vm7248_vm8, %v1305_v19  ;;  %1920 = vrot.lane.b32.xlu1 %v4815_v61, %s7202_s24  ;;  %vm7252_vm8 = vcmask 145536   ;;  %v4854_v19 = vld [vmem:[%s5561_s20 + $0x112] sm:$0x7f] }
 0x10f   : > { %1918 = vrot.lane.b32.xlu0 %v5903_v33, %s7202_s24  ;;  %v4833_v33 = vld [vmem:[%s5561_s20 + $0x111] sm:$0x7f] }
 0x110   : > { %v1319_v0 = vpop.permute.xlu1 %1318 }
 0x111   : > { %v1317_v1 = vpop.permute.xlu0 %1316  ;;  %1323 = vst.msk [vmem:[#allocation4 + $0x8] sm:$0x7f] %vm7208_vm13, %v1319_v0 }
 0x112   : > { %1322 = vst.msk [vmem:[#allocation4] sm:$0xff] %vm7249_vm15, %v1317_v1  ;;  %1932 = vrot.lane.b32.xlu1 %v4817_v63, %s5441_s25  ;;  %vm7253_vm15 = vcmask 146560   ;;  %v4856_v1 = vld [vmem:[%s5561_s20 + $0x113] sm:$0x7f] }
 0x113   : > { %1930 = vrot.lane.b32.xlu0 %v4797_v37, %s5441_s25  ;;  %v4835_v37 = vld [vmem:[%s5561_s20 + $0x112] sm:$0x7f] }
 0x114   : > { %v1331_v3 = vpop.permute.xlu1 %1330 }
 0x115   : > { %v1329_v4 = vpop.permute.xlu0 %1328  ;;  %1335 = vst.msk [vmem:[#allocation4 + $0x8] sm:$0x7f] %vm7250_vm10, %v1331_v3  ;;  %vm7254_vm10 = vcmask 161936  }
 0x116   : > { %1334 = vst.msk [vmem:[#allocation4] sm:$0xff] %vm7251_vm2, %v1329_v4  ;;  %1944 = vrot.lane.b32.xlu1 %v4819_v2, %s5442_s26  ;;  %vm7255_vm2 = vcmask 162960   ;;  %v6087_v4 = vld [vmem:[%s5561_s20 + $0x120] sm:$0xff] }
 0x117   : > { %1942 = vrot.lane.b32.xlu0 %v4799_v41, %s5442_s26  ;;  %v4837_v41 = vld [vmem:[%s5561_s20 + $0x113] sm:$0x7f] }
 0x118   : > { %v1344_v6 = vpop.permute.xlu1 %1343 }
 0x119   : > { %v1342_v7 = vpop.permute.xlu0 %1341  ;;  %1348 = vst.msk [vmem:[#allocation4 + $0x8] sm:$0x7f] %vm7252_vm8, %v1344_v6  ;;  %vm7256_vm8 = vcmask 178336  }
 0x11a   : > { %1347 = vst.msk [vmem:[#allocation4] sm:$0xff] %vm7253_vm15, %v1342_v7  ;;  %1956 = vrot.lane.b32.xlu1 %v4821_v5, %s5443_s27  ;;  %vm7257_vm15 = vcmask 179360   ;;  %v4858_v5 = vld [vmem:[%s5561_s20 + $0x128] sm:$0x7f] }
 0x11b   : > { %1954 = vrot.lane.b32.xlu0 %v4801_v46, %s5443_s27  ;;  %v4844_v46 = vld [vmem:[%s5561_s20 + $0xf9] sm:$0x7f] }
 0x11c   : > { %v1356_v10 = vpop.permute.xlu1 %1355 }
 0x11d   : > { %v1354_v11 = vpop.permute.xlu0 %1353  ;;  %1360 = vst.msk [vmem:[#allocation4 + $0x8] sm:$0x7f] %vm7254_vm10, %v1356_v10  ;;  %vm7258_vm10 = vcmask 194736   ;;  %v4860_v10 = vld [vmem:[%s5561_s20 + $0x129] sm:$0x7f] }
 0x11e   : > { %1359 = vst.msk [vmem:[#allocation4] sm:$0xff] %vm7255_vm2, %v1354_v11  ;;  %1969 = vrot.lane.b32.xlu1 %v4823_v9, %s7220_s28  ;;  %vm7259_vm2 = vcmask 195760   ;;  %v6096_v9 = vld [vmem:[%s5561_s20 + $0x121] sm:$0xff] }
 0x11f   : > { %1967 = vrot.lane.b32.xlu0 %v5977_v8, %s7220_s28 }
 0x120   : > { %v1368_v15 = vpop.permute.xlu1 %1367 }
 0x121   : > { %v1366_v16 = vpop.permute.xlu0 %1365  ;;  %1372 = vst.msk [vmem:[#allocation4 + $0x8] sm:$0x7f] %vm7256_vm8, %v1368_v15  ;;  %vm7260_vm8 = vcmask 211136   ;;  %v4862_v15 = vld [vmem:[%s5561_s20 + $0x12a] sm:$0x7f] }
 0x122   : > { %1371 = vst.msk [vmem:[#allocation4] sm:$0xff] %vm7257_vm15, %v1366_v16  ;;  %1981 = vrot.lane.b32.xlu1 %v4825_v13, %s5445_s29  ;;  %vm7261_vm15 = vcmask 212160   ;;  %v6105_v13 = vld [vmem:[%s5561_s20 + $0x122] sm:$0xff] }
 0x123   : > { %1979 = vrot.lane.b32.xlu0 %v5986_v12, %s5445_s29 }
 0x124   : > { %v1380_v20 = vpop.permute.xlu1 %1379 }
 0x125   : > { %v1378_v22 = vpop.permute.xlu0 %1377  ;;  %1384 = vst.msk [vmem:[#allocation4 + $0x8] sm:$0x7f] %vm7258_vm10, %v1380_v20  ;;  %vm7262_vm10 = vcmask 227536   ;;  %v4864_v20 = vld [vmem:[%s5561_s20 + $0x12b] sm:$0x7f] }
 0x126   : > { %1383 = vst.msk [vmem:[#allocation4] sm:$0xff] %vm7259_vm2, %v1378_v22  ;;  %1993 = vrot.lane.b32.xlu1 %v4827_v18, %s5446_s30  ;;  %vm7263_vm2 = vcmask 228560   ;;  %v6114_v18 = vld [vmem:[%s5561_s20 + $0x123] sm:$0xff] }
 0x127   : > { %1991 = vrot.lane.b32.xlu0 %v5995_v17, %s5446_s30 }
 0x128   : > { %v1393_v25 = vpop.permute.xlu1 %1392 }
 0x129   : > { %v1391_v26 = vpop.permute.xlu0 %1390  ;;  %1397 = vst.msk [vmem:[#allocation4 + $0x8] sm:$0x7f] %vm7260_vm8, %v1393_v25  ;;  %vm7264_vm8 = vcmask 261360   ;;  %v4866_v25 = vld [vmem:[%s5561_s20 + $0x140] sm:$0x7f] }
 0x12a   : > { %1396 = vst.msk [vmem:[#allocation4] sm:$0xff] %vm7261_vm15, %v1391_v26  ;;  %2005 = vrot.lane.b32.xlu1 %v4829_v24, %s5447_s15  ;;  %vm7265_vm15 = vcmask 64560   ;;  %v6123_v24 = vld [vmem:[%s5561_s20 + $0x138] sm:$0xff] }
 0x12b   : > { %2003 = vrot.lane.b32.xlu0 %v6004_v23, %s5447_s15 }
 0x12c   : > { %v1405_v29 = vpop.permute.xlu1 %1404 }
 0x12d   : > { %v1403_v30 = vpop.permute.xlu0 %1402  ;;  %1409 = vst.msk [vmem:[#allocation4 + $0x8] sm:$0x7f] %vm7262_vm10, %v1405_v29  ;;  %vm7266_vm10 = vcmask 80960   ;;  %v4868_v29 = vld [vmem:[%s5561_s20 + $0x141] sm:$0x7f] }
 0x12e   : > { %1408 = vst.msk [vmem:[#allocation4] sm:$0xff] %vm7263_vm2, %v1403_v30  ;;  %2018 = vrot.lane.b32.xlu1 %v4831_v28, %s7226_s11  ;;  %vm7267_vm2 = vcmask 97360   ;;  %v6132_v28 = vld [vmem:[%s5561_s20 + $0x139] sm:$0xff] }
 0x12f   : > { %2016 = vrot.lane.b32.xlu0 %v6013_v27, %s7226_s11 }
 0x130   : > { %v1417_v34 = vpop.permute.xlu1 %1416 }
 0x131   : > { %v1415_v35 = vpop.permute.xlu0 %1414  ;;  %1421 = vst.msk [vmem:[#allocation4 + $0x8] sm:$0x7f] %vm762_vm11, %v1417_v34  ;;  %v4870_v34 = vld [vmem:[%s5561_s20 + $0x142] sm:$0x7f] }
 0x132   : > { %1420 = vst.msk [vmem:[#allocation4] sm:$0xff] %vm760_vm12, %v1415_v35  ;;  %2030 = vrot.lane.b32.xlu1 %v4833_v33, %s5450_s19  ;;  %v6181_v33 = vld [vmem:[%s5561_s20 + $0x13a] sm:$0xff] }
 0x133   : > { %2028 = vrot.lane.b32.xlu0 %v4832_v32, %s5450_s19 }
 0x134   : > { %v1429_v38 = vpop.permute.xlu1 %1428 }
 0x135   : > { %v1427_v39 = vpop.permute.xlu0 %1426  ;;  %1433 = vst.msk [vmem:[#allocation4 + $0x8] sm:$0x7f] %vm776_vm14, %v1429_v38  ;;  %v4872_v38 = vld [vmem:[%s5561_s20 + $0x143] sm:$0x7f] }
 0x136   : > { %1432 = vst.msk [vmem:[#allocation4] sm:$0xff] %vm7264_vm8, %v1427_v39  ;;  %2042 = vrot.lane.b32.xlu1 %v4835_v37, %s5451_s13  ;;  %vm7268_vm8 = vcmask 96336   ;;  %v6190_v37 = vld [vmem:[%s5561_s20 + $0x13b] sm:$0xff] }
 0x137   : > { %2040 = vrot.lane.b32.xlu0 %v4834_v36, %s5451_s13 }
 0x138   : > { %v1572_v43 = vpop.permute.xlu1 %1571 }
 0x139   : > { %v1570_v42 = vpop.permute.xlu0 %1569 }
 0x13a   : > { %2054 = vrot.lane.b32.xlu1 %v4837_v41, %s5453_s16  ;;  %v4807_v41 = vld [vmem:[%s5561_s20 + $0xc8] sm:$0x7f] }
 0x13b   : > { %2052 = vrot.lane.b32.xlu0 %v4836_v40, %s5453_s16 }
 0x13c   : > { %v6039_v47 = vld [vmem:[#allocation4 + $0x8] sm:$0x7f]  ;;  %v1584_v50 = vpop.permute.xlu1 %1583 }
 0x13d   : > { %v6041_v48 = vld [vmem:[#allocation4] sm:$0xff]  ;;  %v1582_v49 = vpop.permute.xlu0 %1581  ;;  %1564 = vst.msk [vmem:[#allocation4 + $0x8] sm:$0x7f] %vm563_vm1, %v4772_v44 }
 0x13e   : > { %1563 = vst.msk [vmem:[#allocation4] sm:$0xff] %vm561_vm0, %v5747_v21  ;;  %2197 = vrot.lane.b32.xlu1 %v4844_v46, %s5438_s22  ;;  %v4848_v21 = vld [vmem:[%s5561_s20 + $0xfb] sm:$0x7f] }
 0x13f   : > { %1575 = vst.msk [vmem:[#allocation4] sm:$0xff] %vm575_vm3, %v1570_v42  ;;  %2195 = vrot.lane.b32.xlu0 %v5986_v12, %s5438_s22  ;;  %v4879_v42 = vld [vmem:[%s5561_s20 + $0x129] sm:$0x7f] }
 0x140   : > { %1576 = vst.msk [vmem:[#allocation4 + $0x8] sm:$0x7f] %vm7211_vm5, %v1572_v43  ;;  %v1596_v55 = vpop.permute.xlu1 %1595 }
 0x141   : > { %1587 = vst.msk [vmem:[#allocation4] sm:$0xff] %vm589_vm4, %v1582_v49  ;;  %v1594_v54 = vpop.permute.xlu0 %1593 }
 0x142   : > { %1588 = vst.msk [vmem:[#allocation4 + $0x8] sm:$0x7f] %vm7210_vm6, %v1584_v50  ;;  %2209 = vrot.lane.b32.xlu1 %v4846_v51, %s5437_s21  ;;  %v4881_v50 = vld [vmem:[%s5561_s20 + $0x12a] sm:$0x7f] }
 0x143   : > { %1599 = vst.msk [vmem:[#allocation4] sm:$0xff] %vm7265_vm15, %v1594_v54  ;;  %2207 = vrot.lane.b32.xlu0 %v5995_v17, %s5437_s21  ;;  %vm7269_vm15 = vcmask 113760  }
 0x144   : > { %1600 = vst.msk [vmem:[#allocation4 + $0x8] sm:$0x7f] %vm7209_vm7, %v1596_v55  ;;  %v1608_v57 = vpop.permute.xlu1 %1607 }
 0x145   : > { %v1606_v56 = vpop.permute.xlu0 %1605  ;;  %1612 = vst.msk [vmem:[#allocation4 + $0x8] sm:$0x7f] %vm7213_vm9, %v1608_v57 }
 0x146   : > { %1611 = vst.msk [vmem:[#allocation4] sm:$0xff] %vm7266_vm10, %v1606_v56  ;;  %2221 = vrot.lane.b32.xlu1 %v4848_v21, %s7204_s23  ;;  %vm7270_vm10 = vcmask 130160   ;;  %v4885_v56 = vld [vmem:[%s5561_s20 + $0x140] sm:$0x7f] }
 0x147   : > { %2219 = vrot.lane.b32.xlu0 %v6004_v23, %s7204_s23 }
 0x148   : > { %v1620_v59 = vpop.permute.xlu1 %1619 }
 0x149   : > { %v1618_v45 = vpop.permute.xlu0 %1617  ;;  %1624 = vst.msk [vmem:[#allocation4 + $0x8] sm:$0x7f] %vm7268_vm8, %v1620_v59  ;;  %vm7272_vm8 = vcmask 146560   ;;  %v4887_v59 = vld [vmem:[%s5561_s20 + $0x141] sm:$0x7f] }
 0x14a   : > { %1623 = vst.msk [vmem:[#allocation4] sm:$0xff] %vm7267_vm2, %v1618_v45  ;;  %2233 = vrot.lane.b32.xlu1 %v4850_v58, %s7202_s24  ;;  %vm7271_vm2 = vcmask 129136  }
 0x14b   : > { %2231 = vrot.lane.b32.xlu0 %v6013_v27, %s7202_s24 }
 0x14c   : > { %v1632_v62 = vpop.permute.xlu1 %1631 }
 0x14d   : > { %v1630_v61 = vpop.permute.xlu0 %1629  ;;  %1636 = vst.msk [vmem:[#allocation4 + $0x8] sm:$0x7f] %vm7208_vm13, %v1632_v62 }
 0x14e   : > { %1635 = vst.msk [vmem:[#allocation4] sm:$0xff] %vm7269_vm15, %v1630_v61  ;;  %2245 = vrot.lane.b32.xlu1 %v4852_v60, %s5441_s25  ;;  %vm7273_vm15 = vcmask 145536  }
 0x14f   : > { %2243 = vrot.lane.b32.xlu0 %v4832_v32, %s5441_s25 }
 0x150   : > { %v1644_v0 = vpop.permute.xlu1 %1643 }
 0x151   : > { %v1642_v63 = vpop.permute.xlu0 %1641  ;;  %1648 = vst.msk [vmem:[#allocation4 + $0x8] sm:$0x7f] %vm7271_vm2, %v1644_v0  ;;  %vm7275_vm2 = vcmask 161936  }
 0x152   : > { %1647 = vst.msk [vmem:[#allocation4] sm:$0xff] %vm7270_vm10, %v1642_v63  ;;  %2257 = vrot.lane.b32.xlu1 %v4854_v19, %s5442_s26  ;;  %vm7274_vm10 = vcmask 162960   ;;  %v6240_v63 = vld [vmem:[%s7163_s2] sm:$0xff] }
 0x153   : > { %2255 = vrot.lane.b32.xlu0 %v4834_v36, %s5442_s26 }
 0x154   : > { %v1657_v3 = vpop.permute.xlu1 %1656 }
 0x155   : > { %v1655_v2 = vpop.permute.xlu0 %1654  ;;  %1661 = vst.msk [vmem:[#allocation4 + $0x8] sm:$0x7f] %vm7273_vm15, %v1657_v3  ;;  %vm7277_vm15 = vcmask 178336   ;;  %v4889_v3 = vld [vmem:[%s5561_s20 + $0x142] sm:$0x7f] }
 0x156   : > { %1660 = vst.msk [vmem:[#allocation4] sm:$0xff] %vm7272_vm8, %v1655_v2  ;;  %2269 = vrot.lane.b32.xlu1 %v4856_v1, %s5443_s27  ;;  %vm7276_vm8 = vcmask 179360  }
 0x157   : > { %2267 = vrot.lane.b32.xlu0 %v4836_v40, %s5443_s27 }
 0x158   : > { %v1669_v7 = vpop.permute.xlu1 %1668 }
 0x159   : > { %v1667_v6 = vpop.permute.xlu0 %1666  ;;  %1673 = vst.msk [vmem:[#allocation4 + $0x8] sm:$0x7f] %vm7275_vm2, %v1669_v7  ;;  %vm7279_vm2 = vcmask 194736  }
 0x15a   : > { %1672 = vst.msk [vmem:[#allocation4] sm:$0xff] %vm7274_vm10, %v1667_v6  ;;  %2282 = vrot.lane.b32.xlu1 %v4858_v5, %s7220_s28  ;;  %vm7278_vm10 = vcmask 195760   ;;  %v6254_v5 = vld [vmem:[%s7162_s1 + $0x8] sm:$0xff]  }
 0x15b   : > { %2280 = vrot.lane.b32.xlu0 %v6087_v4, %s7220_s28 }
 0x15c   : > { %v1681_v12 = vpop.permute.xlu1 %1680 }
 0x15d   : > { %v1679_v11 = vpop.permute.xlu0 %1678  ;;  %1685 = vst.msk [vmem:[#allocation4 + $0x8] sm:$0x7f] %vm7277_vm15, %v1681_v12  ;;  %vm7281_vm15 = vcmask 211136  }
 0x15e   : > { %1684 = vst.msk [vmem:[#allocation4] sm:$0xff] %vm7276_vm8, %v1679_v11  ;;  %2294 = vrot.lane.b32.xlu1 %v4860_v10, %s5445_s29  ;;  %vm7280_vm8 = vcmask 212160   ;;  %v6267_v10 = vld [vmem:[%s5561_s20 + $0x150] sm:$0xff]  ;;  %v6272_v11 = vld [vmem:[%s7162_s1] sm:$0xff]  }
 0x15f   : > { %2292 = vrot.lane.b32.xlu0 %v6096_v9, %s5445_s29 }
 0x160   : > { %v1693_v17 = vpop.permute.xlu1 %1692 }
 0x161   : > { %v1691_v16 = vpop.permute.xlu0 %1690  ;;  %1697 = vst.msk [vmem:[#allocation4 + $0x8] sm:$0x7f] %vm7279_vm2, %v1693_v17  ;;  %vm7283_vm2 = vcmask 227536   ;;  %v6286_v17 = vld [vmem:[%s5561_s20 + $0x151] sm:$0xff] }
 0x162   : > { %1696 = vst.msk [vmem:[#allocation4] sm:$0xff] %vm7278_vm10, %v1691_v16  ;;  %2306 = vrot.lane.b32.xlu1 %v4862_v15, %s5446_s30  ;;  %vm7282_vm10 = vcmask 228560   ;;  %v1123_v15 = vpack.c.bf16 %v5929_v52, %v5931_v53  ;;  %v4893_v16 = vld [vmem:[%s5561_s20 + $0x158] sm:$0x7f] }
 0x163   : > { %2304 = vrot.lane.b32.xlu0 %v6105_v13, %s5446_s30 }
 0x164   : > { %v1706_v23 = vpop.permute.xlu1 %1705 }
 0x165   : > { %v1704_v22 = vpop.permute.xlu0 %1703  ;;  %1710 = vst.msk [vmem:[#allocation4 + $0x8] sm:$0x7f] %vm7281_vm15, %v1706_v23  ;;  %vm471_vm15 = vcmask 58368  }
 0x166   : > { %1709 = vst.msk [vmem:[#allocation4] sm:$0xff] %vm7280_vm8, %v1704_v22  ;;  %2318 = vrot.lane.b32.xlu1 %v4864_v20, %s5447_s15  ;;  %vm7201_vm8 = vcmask 64512   ;;  %v1436_v20 = vpack.c.bf16 %v6039_v47, %v6041_v48  ;;  %v6301_v22 = vld [vmem:[%s5561_s20 + $0x152] sm:$0xff]  ;;  %v4897_v47 = vld [vmem:[%s5561_s20 + $0x15a] sm:$0x7f] }
 0x167   : > { %2316 = vrot.lane.b32.xlu0 %v6114_v18, %s5447_s15  ;;  %473 = vst.msk [vmem:[#allocation2 + $0x10] sm:$0xff] %vm7201_vm8, %v5449_v31  ;;  %470 = vst.msk [vmem:[#allocation2] sm:$0xff] %vm7201_vm8, %v5449_v31  ;;  %v6313_v48 = vld [vmem:[%s5561_s20 + $0x153] sm:$0xff] }
 0x168   : > { %v1718_v27 = vpop.permute.xlu1 %1717  ;;  %474 = vst.msk [vmem:[#allocation2 + $0x18] sm:$0x3] %vm471_vm15, %v5449_v31  ;;  %472 = vst.msk [vmem:[#allocation2 + $0x8] sm:$0x3] %vm471_vm15, %v5449_v31 }
 0x169   : > { %v1716_v26 = vpop.permute.xlu0 %1715  ;;  %1722 = vst.msk [vmem:[#allocation4 + $0x8] sm:$0x7f] %vm7283_vm2, %v1718_v27  ;;  %vm7285_vm2 = vcmask 64560   ;;  %v4899_v27 = vld [vmem:[%s5561_s20 + $0x15b] sm:$0x7f] }
 0x16a   : > { %1721 = vst.msk [vmem:[#allocation4] sm:$0xff] %vm7282_vm10, %v1716_v26  ;;  %2331 = vrot.lane.b32.xlu1 %v4866_v25, %s7226_s11  ;;  %vm7284_vm10 = vcmask 261360  }
 0x16b   : > { %2329 = vrot.lane.b32.xlu0 %v6123_v24, %s7226_s11  ;;  %475 = vst.msk [vmem:[#allocation2 + $0x20] sm:$0xff] %vm7201_vm8, %v5449_v31  ;;  %477 = vst.msk [vmem:[#allocation2 + $0x30] sm:$0xff] %vm7201_vm8, %v5449_v31 }
 0x16c   : > { %476 = vst.msk [vmem:[#allocation2 + $0x28] sm:$0x3] %vm471_vm15, %v5449_v31  ;;  %478 = vst.msk [vmem:[#allocation2 + $0x38] sm:$0x3] %vm471_vm15, %v5449_v31  ;;  %v1730_v32 = vpop.permute.xlu1 %1729 }
 0x16d   : > { %479 = vst.msk [vmem:[#allocation2 + $0x40] sm:$0xff] %vm7201_vm8, %v5449_v31  ;;  %481 = vst.msk [vmem:[#allocation2 + $0x50] sm:$0xff] %vm7201_vm8, %v5449_v31  ;;  %v1728_v30 = vpop.permute.xlu0 %1727 }
 0x16e   : > { %480 = vst.msk [vmem:[#allocation2 + $0x48] sm:$0x3] %vm471_vm15, %v5449_v31  ;;  %482 = vst.msk [vmem:[#allocation2 + $0x58] sm:$0x3] %vm471_vm15, %v5449_v31  ;;  %2343 = vrot.lane.b32.xlu1 %v4868_v29, %s5450_s19 }
 0x16f   : > { %483 = vst.msk [vmem:[#allocation2 + $0x60] sm:$0xff] %vm7201_vm8, %v5449_v31  ;;  %485 = vst.msk [vmem:[#allocation2 + $0x70] sm:$0xff] %vm7201_vm8, %v5449_v31  ;;  %2341 = vrot.lane.b32.xlu0 %v6132_v28, %s5450_s19 }
 0x170   : > { %484 = vst.msk [vmem:[#allocation2 + $0x68] sm:$0x3] %vm471_vm15, %v5449_v31  ;;  %486 = vst.msk [vmem:[#allocation2 + $0x78] sm:$0x3] %vm471_vm15, %v5449_v31  ;;  %v1742_v36 = vpop.permute.xlu1 %1741 }
 0x171   : > { %487 = vst.msk [vmem:[#allocation2 + $0x80] sm:$0xff] %vm7201_vm8, %v5449_v31  ;;  %489 = vst.msk [vmem:[#allocation2 + $0x90] sm:$0xff] %vm7201_vm8, %v5449_v31  ;;  %v1740_v35 = vpop.permute.xlu0 %1739  ;;  %vm7289_vm8 = vcmask 113760  }
 0x172   : > { %488 = vst.msk [vmem:[#allocation2 + $0x88] sm:$0x3] %vm471_vm15, %v5449_v31  ;;  %490 = vst.msk [vmem:[#allocation2 + $0x98] sm:$0x3] %vm471_vm15, %v5449_v31  ;;  %2355 = vrot.lane.b32.xlu1 %v4870_v34, %s5451_s13  ;;  %vm7286_vm15 = vcmask 80960  }
 0x173   : > { %1733 = vst.msk [vmem:[#allocation4] sm:$0xff] %vm760_vm12, %v1728_v30  ;;  %2353 = vrot.lane.b32.xlu0 %v6181_v33, %s5451_s13 }
 0x174   : > { %1734 = vst.msk [vmem:[#allocation4 + $0x8] sm:$0x7f] %vm762_vm11, %v1730_v32  ;;  %v1885_v40 = vpop.permute.xlu1 %1884  ;;  %v4901_v32 = vld [vmem:[%s5561_s20 + $0x170] sm:$0x7f] }
 0x175   : > { %1745 = vst.msk [vmem:[#allocation4] sm:$0xff] %vm7284_vm10, %v1740_v35  ;;  %v1883_v39 = vpop.permute.xlu0 %1882  ;;  %vm7287_vm10 = vcmask 97360  }
 0x176   : > { %1746 = vst.msk [vmem:[#allocation4 + $0x8] sm:$0x7f] %vm776_vm14, %v1742_v36  ;;  %2367 = vrot.lane.b32.xlu1 %v4872_v38, %s5453_s16  ;;  %v4903_v36 = vld [vmem:[%s5561_s20 + $0x171] sm:$0x7f] }
 0x177   : > { %2365 = vrot.lane.b32.xlu0 %v6190_v37, %s5453_s16 }
 0x178   : > { %v1897_v49 = vpop.permute.xlu1 %1896 }
 0x179   : > { %v1895_v46 = vpop.permute.xlu0 %1894 }
 0x17a   : > { %2510 = vrot.lane.b32.xlu1 %v4879_v42, %s5438_s22 }
 0x17b   : > { %2508 = vrot.lane.b32.xlu0 %v6096_v9, %s5438_s22  ;;  %v4891_v9 = vld [vmem:[%s5561_s20 + $0x143] sm:$0x7f] }
 0x17c   : > { %v6200_v44 = vld [vmem:[#allocation4] sm:$0xff]  ;;  %v1909_v54 = vpop.permute.xlu1 %1908 }
 0x17d   : > { %v6198_v43 = vld [vmem:[#allocation4 + $0x8] sm:$0x7f]  ;;  %1876 = vst.msk [vmem:[#allocation4] sm:$0xff] %vm561_vm0, %v5867_v14  ;;  %v1907_v51 = vpop.permute.xlu0 %1906  ;;  %v4883_v14 = vld [vmem:[%s5561_s20 + $0x12b] sm:$0x7f] }
 0x17e   : > { %1877 = vst.msk [vmem:[#allocation4 + $0x8] sm:$0x7f] %vm563_vm1, %v4807_v41  ;;  %2522 = vrot.lane.b32.xlu1 %v4881_v50, %s5437_s21  ;;  %v4906_v41 = vld [vmem:[%s5561_s20 + $0x16b] sm:$0xff]  ;;  %v4907_v50 = vld [vmem:[%s5561_s20 + $0x173] sm:$0x7f] }
 0x17f   : > { %1888 = vst.msk [vmem:[#allocation4] sm:$0xff] %vm575_vm3, %v1883_v39  ;;  %2520 = vrot.lane.b32.xlu0 %v6105_v13, %s5437_s21 }
 0x180   : > { %1889 = vst.msk [vmem:[#allocation4 + $0x8] sm:$0x7f] %vm7211_vm5, %v1885_v40  ;;  %v1921_v21 = vpop.permute.xlu1 %1920  ;;  %v4905_v40 = vld [vmem:[%s5561_s20 + $0x172] sm:$0x7f] }
 0x181   : > { %1900 = vst.msk [vmem:[#allocation4] sm:$0xff] %vm589_vm4, %v1895_v46  ;;  %v1919_v55 = vpop.permute.xlu0 %1918 }
 0x182   : > { %1901 = vst.msk [vmem:[#allocation4 + $0x8] sm:$0x7f] %vm7210_vm6, %v1897_v49  ;;  %2534 = vrot.lane.b32.xlu1 %v4883_v14, %s7204_s23  ;;  %v4842_v49 = vld [vmem:[%s5561_s20 + $0xf8] sm:$0x7f] }
 0x183   : > { %1912 = vst.msk [vmem:[#allocation4] sm:$0xff] %vm7285_vm2, %v1907_v51  ;;  %2532 = vrot.lane.b32.xlu0 %v6114_v18, %s7204_s23  ;;  %vm7288_vm2 = vcmask 96336   ;;  %v4895_v18 = vld [vmem:[%s5561_s20 + $0x159] sm:$0x7f]  ;;  %s7310_s23 = smov 6  }
 0x184   : > { %1913 = vst.msk [vmem:[#allocation4 + $0x8] sm:$0x7f] %vm7209_vm7, %v1909_v54  ;;  %v1933_v58 = vpop.permute.xlu1 %1932 }
 0x185   : > { %1924 = vst.msk [vmem:[#allocation4] sm:$0xff] %vm7286_vm15, %v1919_v55  ;;  %v1931_v57 = vpop.permute.xlu0 %1930  ;;  %vm7207_vm15 = vcmask 1046528  }
 0x186   : > { %1925 = vst.msk [vmem:[#allocation4 + $0x8] sm:$0x7f] %vm7213_vm9, %v1921_v21  ;;  %2546 = vrot.lane.b32.xlu1 %v4885_v56, %s7202_s24  ;;  %v4914_v21 = vld [vmem:[%s5561_s20 + $0x159] sm:$0x7f] }
 0x187   : > { %1936 = vst.msk [vmem:[#allocation4] sm:$0xff] %vm7287_vm10, %v1931_v57  ;;  %2544 = vrot.lane.b32.xlu0 %v6123_v24, %s7202_s24  ;;  %vm7206_vm10 = vcmask 121856   ;;  %s5461_s24 = smov 80  }
 0x188   : > { %1937 = vst.msk [vmem:[#allocation4 + $0x8] sm:$0x7f] %vm7288_vm2, %v1933_v58  ;;  %v831_v45 = vpop.f32.mrf.mxu0  ;;  %v1945_v61 = vpop.permute.xlu1 %1944  ;;  %vm7291_vm2 = vcmask 129136  }
 0x189   : > { %v1943_v60 = vpop.permute.xlu0 %1942  ;;  %1949 = vst.msk [vmem:[#allocation4 + $0x8] sm:$0x7f] %vm7208_vm13, %v1945_v61  ;;  %vm7306_vm13 = vcmask 227536  }
 0x18a   : > { %v5133_v62 = vpop.f32.mrf.mxu0  ;;  %1948 = vst.msk [vmem:[#allocation4] sm:$0xff] %vm7289_vm8, %v1943_v60  ;;  %2558 = vrot.lane.b32.xlu1 %v4887_v59, %s5441_s25  ;;  %vm7290_vm8 = vcmask 130160   ;;  %v4918_v59 = vld [vmem:[%s5561_s20 + $0x15b] sm:$0x7f] }
 0x18b   : > { %2556 = vrot.lane.b32.xlu0 %v6132_v28, %s5441_s25  ;;  %v6324_v28 = vld [vmem:[%s5561_s20 + $0x168] sm:$0xff]  ;;  %v4920_v62 = vld [vmem:[%s5561_s20 + $0x170] sm:$0x7f] }
 0x18c   : > { %v834_v19 = vpop.f32.mrf.mxu0  ;;  %v1957_v1 = vpop.permute.xlu1 %1956 }
 0x18d   : > { %5136 = vmatpush3.msk.msra.mxu1 %vm7207_vm15, %v834_v19  ;;  %v1955_v0 = vpop.permute.xlu0 %1954  ;;  %1961 = vst.msk [vmem:[#allocation4 + $0x8] sm:$0x7f] %vm7291_vm2, %v1957_v1  ;;  %vm7293_vm2 = vcmask 146560   ;;  %vm7297_vm15 = vcmask 261120   ;;  %v4922_v1 = vld [vmem:[%s5561_s20 + $0x171] sm:$0x7f] }
 0x18e   : > { %v5134_v2 = vpop.f32.mrf.mxu0  ;;  %5137 = vmatprep.subr.mxu1 %v5449_v31  ;;  %1960 = vst.msk [vmem:[#allocation4] sm:$0xff] %vm7290_vm8, %v1955_v0  ;;  %vm7292_vm8 = vmmov 0   ;;  %2570 = vrot.lane.b32.xlu1 %v4889_v3, %s5442_s26 }
 0x18f   : > { %5138 = vmatpush3.msra.mxu1 %v831_v45  ;;  %2568 = vrot.lane.b32.xlu0 %v6181_v33, %s5442_s26  ;;  %v4902_v33 = vld [vmem:[%s5561_s20 + $0x169] sm:$0xff] }
 0x190   : > { %5140 = vmatmul.mubr.msk.f32.vlgmr.msra.gmra.mxu1 %vm7206_vm10, %v6240_v63  ;;  %5142 = vmatprep.subr.bf16.mxu1 %v5449_v31  ;;  %v1970_v7 = vpop.permute.xlu1 %1969  ;;  %vm7294_vm10 = vcmask 145536  }
 0x191   : > { %5143 = vmatpush3.bf16.msra.mxu1 %v6254_v5  ;;  %5146 = vmatprep.mubr.msk.bf16.mxu1 %vm7292_vm8, %v5449_v31  ;;  %v1968_v6 = vpop.permute.xlu0 %1967  ;;  %1974 = vst.msk [vmem:[#allocation4 + $0x8] sm:$0x7f] %vm7294_vm10, %v1970_v7  ;;  %vm7295_vm10 = vcmask 162960  }
 0x192   : > { %5144 = vmatprep.subr.bf16.mxu1 %v5449_v31  ;;  %1973 = vst.msk [vmem:[#allocation4] sm:$0xff] %vm7293_vm2, %v1968_v6  ;;  %2582 = vrot.lane.b32.xlu1 %v4891_v9, %s5443_s27  ;;  %vm7296_vm2 = vcmask 161936   ;;  %v4924_v6 = vld [vmem:[%s5561_s20 + $0x172] sm:$0x7f] }
 0x193   : > { %2580 = vrot.lane.b32.xlu0 %v6190_v37, %s5443_s27  ;;  %v4904_v37 = vld [vmem:[%s5561_s20 + $0x16a] sm:$0xff] }
 0x194   : > { %v1982_v13 = vpop.permute.xlu1 %1981 }
 0x195   : > { %5145 = vmatpush3.bf16.msra.mxu1 %v6272_v11  ;;  %v1980_v12 = vpop.permute.xlu0 %1979  ;;  %1986 = vst.msk [vmem:[#allocation4 + $0x8] sm:$0x7f] %vm7296_vm2, %v1982_v13  ;;  %vm7299_vm2 = vcmask 178336   ;;  %v4927_v13 = vld [vmem:[%s5561_s20 + $0x180] sm:$0xff] }
 0x196   : > { %5157 = vmatprep.subr.bf16.mxu1 %v5449_v31  ;;  %1985 = vst.msk [vmem:[#allocation4] sm:$0xff] %vm7295_vm10, %v1980_v12  ;;  %vm7298_vm10 = vcmask 179360   ;;  %2595 = vrot.lane.b32.xlu1 %v4893_v16, %s7220_s28  ;;  %v4926_v12 = vld [vmem:[%s5561_s20 + $0x173] sm:$0x7f] }
 0x197   : > { %2593 = vrot.lane.b32.xlu0 %v6267_v10, %s7220_s28 }
 0x198   : > { %5147 = vmatmul.mubr.msk.bf16.vlgmr.msra.gmra.mxu1 %vm7297_vm15, %v1123_v15  ;;  %v1994_v53 = vpop.permute.xlu1 %1993  ;;  %vm7300_vm15 = vcmask 195760  }
 0x199   : > { %5158 = vmatpush3.bf16.msra.mxu1 %v6254_v5  ;;  %5161 = vmatprep.mubr.msk.bf16.mxu1 %vm7292_vm8, %v5449_v31  ;;  %v1992_v52 = vpop.permute.xlu0 %1991  ;;  %1998 = vst.msk [vmem:[#allocation4 + $0x8] sm:$0x7f] %vm7299_vm2, %v1994_v53  ;;  %vm7302_vm2 = vcmask 261120  }
 0x19a   : > { %5159 = vmatprep.subr.bf16.mxu1 %v5449_v31  ;;  %1997 = vst.msk [vmem:[#allocation4] sm:$0xff] %vm7298_vm10, %v1992_v52  ;;  %2607 = vrot.lane.b32.xlu1 %v4895_v18, %s5445_s29  ;;  %vm7301_vm10 = vcmask 194736   ;;  %v4929_v52 = vld [vmem:[%s5561_s20 + $0x181] sm:$0xff] }
 0x19b   : > { %2605 = vrot.lane.b32.xlu0 %v6286_v17, %s5445_s29 }
 0x19c   : > { %v2006_v24 = vpop.permute.xlu1 %2005 }
 0x19d   : > { %5160 = vmatpush3.bf16.msra.mxu1 %v6272_v11  ;;  %v2004_v23 = vpop.permute.xlu0 %2003  ;;  %2010 = vst.msk [vmem:[#allocation4 + $0x8] sm:$0x7f] %vm7301_vm10, %v2006_v24  ;;  %vm7304_vm10 = vcmask 211136  }
 0x19e   : > { %2009 = vst.msk [vmem:[#allocation4] sm:$0xff] %vm7300_vm15, %v2004_v23  ;;  %5180 = vmatprep.subr.mxu1 %v5449_v31  ;;  %vm7303_vm15 = vcmask 212160   ;;  %2619 = vrot.lane.b32.xlu1 %v4897_v47, %s5446_s30  ;;  %v4932_v47 = vld [vmem:[%s5561_s20 + $0x18a] sm:$0x7f] }
 0x19f   : > { %2617 = vrot.lane.b32.xlu0 %v6301_v22, %s5446_s30 }
 0x1a0   : > { %5162 = vmatmul.mubr.msk.bf16.vlgmr.msra.gmra.mxu1 %vm7302_vm2, %v1436_v20  ;;  %v2019_v26 = vpop.permute.xlu1 %2018  ;;  %vm7305_vm2 = vcmask 228560   ;;  %v4930_v20 = vld [vmem:[%s5561_s20 + $0x189] sm:$0x7f] }
 0x1a1   : > { %v2017_v25 = vpop.permute.xlu0 %2016  ;;  %5184 = vmatprep.mubr.msk.f32.mxu1 %vm7292_vm8, %v5449_v31  ;;  %2023 = vst.msk [vmem:[#allocation4 + $0x8] sm:$0x7f] %vm7304_vm10, %v2019_v26  ;;  %vm7309_vm10 = vcmask 80960  }
 0x1a2   : > { %2022 = vst.msk [vmem:[#allocation4] sm:$0xff] %vm7303_vm15, %v2017_v25  ;;  %2631 = vrot.lane.b32.xlu1 %v4899_v27, %s5447_s15  ;;  %vm7308_vm15 = vcmask 64560   ;;  %v4934_v27 = vld [vmem:[%s5561_s20 + $0x18b] sm:$0x7f] }
 0x1a3   : > { %2629 = vrot.lane.b32.xlu0 %v6313_v48, %s5447_s15 }
 0x1a4   : > { %v2031_v30 = vpop.permute.xlu1 %2030 }
 0x1a5   : > { %v2029_v29 = vpop.permute.xlu0 %2028  ;;  %2035 = vst.msk [vmem:[#allocation4 + $0x8] sm:$0x7f] %vm7306_vm13, %v2031_v30  ;;  %vm7307_vm13 = vcmask 261360  }
 0x1a6   : > { %2034 = vst.msk [vmem:[#allocation4] sm:$0xff] %vm7305_vm2, %v2029_v29  ;;  %2644 = vrot.lane.b32.xlu1 %v4901_v32, %s7226_s11  ;;  %vm7311_vm2 = vcmask 97360   ;;  %v4936_v32 = vld [vmem:[%s5561_s20 + $0x1a0] sm:$0x7f] }
 0x1a7   : > { %2642 = vrot.lane.b32.xlu0 %v6324_v28, %s7226_s11 }
 0x1a8   : > { %v2043_v35 = vpop.permute.xlu1 %2042 }
 0x1a9   : > { %v2041_v34 = vpop.permute.xlu0 %2040  ;;  %2047 = vst.msk [vmem:[#allocation4 + $0x8] sm:$0x7f] %vm762_vm11, %v2043_v35 }
 0x1aa   : > { %2046 = vst.msk [vmem:[#allocation4] sm:$0xff] %vm760_vm12, %v2041_v34  ;;  %2656 = vrot.lane.b32.xlu1 %v4903_v36, %s5450_s19  ;;  %v4938_v36 = vld [vmem:[%s5561_s20 + $0x1a1] sm:$0x7f] }
 0x1ab   : > { %2654 = vrot.lane.b32.xlu0 %v4902_v33, %s5450_s19 }
 0x1ac   : > { %v2055_v39 = vpop.permute.xlu1 %2054 }
 0x1ad   : > { %v2053_v38 = vpop.permute.xlu0 %2052  ;;  %2059 = vst.msk [vmem:[#allocation4 + $0x8] sm:$0x7f] %vm776_vm14, %v2055_v39 }
 0x1ae   : > { %2058 = vst.msk [vmem:[#allocation4] sm:$0xff] %vm7307_vm13, %v2053_v38  ;;  %2668 = vrot.lane.b32.xlu1 %v4905_v40, %s5451_s13  ;;  %vm7312_vm13 = vcmask 96336   ;;  %v4940_v40 = vld [vmem:[%s5561_s20 + $0x1a2] sm:$0x7f] }
 0x1af   : > { %2666 = vrot.lane.b32.xlu0 %v4904_v37, %s5451_s13 }
 0x1b0   : > { %v2198_v46 = vpop.permute.xlu1 %2197 }
 0x1b1   : > { %v2196_v42 = vpop.permute.xlu0 %2195 }
 0x1b2   : > { %2680 = vrot.lane.b32.xlu1 %v4907_v50, %s5453_s16  ;;  %v4942_v50 = vld [vmem:[%s5561_s20 + $0x1a3] sm:$0x7f] }
 0x1b3   : > { %2678 = vrot.lane.b32.xlu0 %v4906_v41, %s5453_s16 }
 0x1b4   : > { %v6349_v51 = vld [vmem:[#allocation4 + $0x8] sm:$0x7f]  ;;  %v2210_v55 = vpop.permute.xlu1 %2209 }
 0x1b5   : > { %v6351_v54 = vld [vmem:[#allocation4] sm:$0xff]  ;;  %v2208_v14 = vpop.permute.xlu0 %2207  ;;  %2190 = vst.msk [vmem:[#allocation4 + $0x8] sm:$0x7f] %vm563_vm1, %v4842_v49  ;;  %v4877_v49 = vld [vmem:[%s5561_s20 + $0x128] sm:$0x7f] }
 0x1b6   : > { %2189 = vst.msk [vmem:[#allocation4] sm:$0xff] %vm561_vm0, %v5977_v8  ;;  %2823 = vrot.lane.b32.xlu1 %v4914_v21, %s5438_s22  ;;  %v4916_v8 = vld [vmem:[%s5561_s20 + $0x15a] sm:$0x7f] }
 0x1b7   : > { %2201 = vst.msk [vmem:[#allocation4] sm:$0xff] %vm575_vm3, %v2196_v42  ;;  %2821 = vrot.lane.b32.xlu0 %v6286_v17, %s5438_s22  ;;  %s7313_s22 = smov 8   ;;  %v4928_v17 = vld [vmem:[%s5561_s20 + $0x188] sm:$0x7f] }
 0x1b8   : > { %2202 = vst.msk [vmem:[#allocation4 + $0x8] sm:$0x7f] %vm7211_vm5, %v2198_v46  ;;  %v2222_v57 = vpop.permute.xlu1 %2221 }
 0x1b9   : > { %2213 = vst.msk [vmem:[#allocation4] sm:$0xff] %vm589_vm4, %v2208_v14  ;;  %v2220_v56 = vpop.permute.xlu0 %2219  ;;  %v3129_v14 = vld [vmem:[#allocation2 + $0x1] sm:$0x7f] }
 0x1ba   : > { %2214 = vst.msk [vmem:[#allocation4 + $0x8] sm:$0x7f] %vm7210_vm6, %v2210_v55  ;;  %2835 = vrot.lane.b32.xlu1 %v4916_v8, %s5437_s21  ;;  %v3136_v8 = vld [vmem:[#allocation2 + $0x2] sm:$0x7f] }
 0x1bb   : > { %2225 = vst.msk [vmem:[#allocation4] sm:$0xff] %vm7308_vm15, %v2220_v56  ;;  %2833 = vrot.lane.b32.xlu0 %v6301_v22, %s5437_s21  ;;  %vm7314_vm15 = vcmask 113760   ;;  %v4931_v22 = vld [vmem:[%s5561_s20 + $0x182] sm:$0xff]  ;;  %s5464_s21 = smov 120  }
 0x1bc   : > { %2226 = vst.msk [vmem:[#allocation4 + $0x8] sm:$0x7f] %vm7209_vm7, %v2222_v57  ;;  %v2234_v45 = vpop.permute.xlu1 %2233 }
 0x1bd   : > { %v2232_v58 = vpop.permute.xlu0 %2231  ;;  %2238 = vst.msk [vmem:[#allocation4 + $0x8] sm:$0x7f] %vm7213_vm9, %v2234_v45 }
 0x1be   : > { %2237 = vst.msk [vmem:[#allocation4] sm:$0xff] %vm7309_vm10, %v2232_v58  ;;  %2847 = vrot.lane.b32.xlu1 %v4918_v59, %s7310_s23  ;;  %vm7315_vm10 = vcmask 112736   ;;  %v3143_v58 = vld [vmem:[#allocation2 + $0x3] sm:$0x7f] }
 0x1bf   : > { %2845 = vrot.lane.b32.xlu0 %v6313_v48, %s7310_s23  ;;  %v4933_v48 = vld [vmem:[%s5561_s20 + $0x183] sm:$0xff]  ;;  %s5462_s23 = smov 104  }
 0x1c0   : > { %v2246_v61 = vpop.permute.xlu1 %2245 }
 0x1c1   : > { %v2244_v60 = vpop.permute.xlu0 %2243  ;;  %2250 = vst.msk [vmem:[#allocation4 + $0x8] sm:$0x7f] %vm7312_vm13, %v2246_v61  ;;  %vm7317_vm13 = vcmask 129136  }
 0x1c2   : > { %2249 = vst.msk [vmem:[#allocation4] sm:$0xff] %vm7311_vm2, %v2244_v60  ;;  %2859 = vrot.lane.b32.xlu1 %v4920_v62, %s7313_s22  ;;  %vm7316_vm2 = vcmask 130160  }
 0x1c3   : > { %2857 = vrot.lane.b32.xlu0 %v6324_v28, %s7313_s22  ;;  %v4935_v28 = vld [vmem:[%s5561_s20 + $0x198] sm:$0xff] }
 0x1c4   : > { %v2258_v0 = vpop.permute.xlu1 %2257 }
 0x1c5   : > { %v2256_v19 = vpop.permute.xlu0 %2255  ;;  %2262 = vst.msk [vmem:[#allocation4 + $0x8] sm:$0x7f] %vm7315_vm10, %v2258_v0  ;;  %vm7319_vm10 = vcmask 145536  }
 0x1c6   : > { %2261 = vst.msk [vmem:[#allocation4] sm:$0xff] %vm7314_vm15, %v2256_v19  ;;  %2871 = vrot.lane.b32.xlu1 %v4922_v1, %s5441_s25  ;;  %vm7318_vm15 = vcmask 146560  }
 0x1c7   : > { %2869 = vrot.lane.b32.xlu0 %v4902_v33, %s5441_s25  ;;  %v4937_v33 = vld [vmem:[%s5561_s20 + $0x199] sm:$0xff]  ;;  %s7222_s25 = smov 112  }
 0x1c8   : > { %v2270_v3 = vpop.permute.xlu1 %2269 }
 0x1c9   : > { %v2268_v2 = vpop.permute.xlu0 %2267  ;;  %2274 = vst.msk [vmem:[#allocation4 + $0x8] sm:$0x7f] %vm7317_vm13, %v2270_v3  ;;  %vm7321_vm13 = vcmask 161936  }
 0x1ca   : > { %2273 = vst.msk [vmem:[#allocation4] sm:$0xff] %vm7316_vm2, %v2268_v2  ;;  %2883 = vrot.lane.b32.xlu1 %v4924_v6, %s5442_s26  ;;  %vm7320_vm2 = vcmask 162960  }
 0x1cb   : > { %2881 = vrot.lane.b32.xlu0 %v4904_v37, %s5442_s26  ;;  %v4939_v37 = vld [vmem:[%s5561_s20 + $0x19a] sm:$0xff]  ;;  %s7408_s26 = smov 112  }
 0x1cc   : > { %v2283_v9 = vpop.permute.xlu1 %2282 }
 0x1cd   : > { %v2281_v7 = vpop.permute.xlu0 %2280  ;;  %2287 = vst.msk [vmem:[#allocation4 + $0x8] sm:$0x7f] %vm7319_vm10, %v2283_v9  ;;  %vm7323_vm10 = vcmask 178336  }
 0x1ce   : > { %2286 = vst.msk [vmem:[#allocation4] sm:$0xff] %vm7318_vm15, %v2281_v7  ;;  %2895 = vrot.lane.b32.xlu1 %v4926_v12, %s5443_s27  ;;  %vm7322_vm15 = vcmask 179360  }
 0x1cf   : > { %2893 = vrot.lane.b32.xlu0 %v4906_v41, %s5443_s27  ;;  %v4941_v41 = vld [vmem:[%s5561_s20 + $0x19b] sm:$0xff]  ;;  %s7225_s27 = smov 40  }
 0x1d0   : > { %v2295_v16 = vpop.permute.xlu1 %2294 }
 0x1d1   : > { %v2293_v15 = vpop.permute.xlu0 %2292  ;;  %2299 = vst.msk [vmem:[#allocation4 + $0x8] sm:$0x7f] %vm7321_vm13, %v2295_v16  ;;  %vm7325_vm13 = vcmask 194736  }
 0x1d2   : > { %2298 = vst.msk [vmem:[#allocation4] sm:$0xff] %vm7320_vm2, %v2293_v15  ;;  %2908 = vrot.lane.b32.xlu1 %v4928_v17, %s7220_s28  ;;  %vm7324_vm2 = vcmask 195760  }
 0x1d3   : > { %2906 = vrot.lane.b32.xlu0 %v4927_v13, %s7220_s28 }
 0x1d4   : > { %v2307_v18 = vpop.permute.xlu1 %2306 }
 0x1d5   : > { %v2305_v53 = vpop.permute.xlu0 %2304  ;;  %2311 = vst.msk [vmem:[#allocation4 + $0x8] sm:$0x7f] %vm7323_vm10, %v2307_v18  ;;  %vm7327_vm10 = vcmask 211136  }
 0x1d6   : > { %2310 = vst.msk [vmem:[#allocation4] sm:$0xff] %vm7322_vm15, %v2305_v53  ;;  %2920 = vrot.lane.b32.xlu1 %v4930_v20, %s5445_s29  ;;  %vm7326_vm15 = vcmask 212160  }
 0x1d7   : > { %2918 = vrot.lane.b32.xlu0 %v4929_v52, %s5445_s29  ;;  %s5455_s29 = smov 32  }
 0x1d8   : > { %v2319_v24 = vpop.permute.xlu1 %2318 }
 0x1d9   : > { %v2317_v23 = vpop.permute.xlu0 %2316  ;;  %2323 = vst.msk [vmem:[#allocation4 + $0x8] sm:$0x7f] %vm7325_vm13, %v2319_v24  ;;  %vm7329_vm13 = vcmask 227536  }
 0x1da   : > { %2322 = vst.msk [vmem:[#allocation4] sm:$0xff] %vm7324_vm2, %v2317_v23  ;;  %2932 = vrot.lane.b32.xlu1 %v4932_v47, %s5446_s30  ;;  %vm7328_vm2 = vcmask 228560  }
 0x1db   : > { %2930 = vrot.lane.b32.xlu0 %v4931_v22, %s5446_s30  ;;  %s7224_s30 = smov 56  }
 0x1dc   : > { %v2332_v26 = vpop.permute.xlu1 %2331 }
 0x1dd   : > { %v2330_v25 = vpop.permute.xlu0 %2329  ;;  %2336 = vst.msk [vmem:[#allocation4 + $0x8] sm:$0x7f] %vm7327_vm10, %v2332_v26  ;;  %vm7331_vm10 = vcmask 64560  }
 0x1de   : > { %2335 = vst.msk [vmem:[#allocation4] sm:$0xff] %vm7326_vm15, %v2330_v25  ;;  %2944 = vrot.lane.b32.xlu1 %v4934_v27, %s5447_s15  ;;  %vm7330_vm15 = vcmask 261360  }
 0x1df   : > { %2942 = vrot.lane.b32.xlu0 %v4933_v48, %s5447_s15  ;;  %s5457_s15 = smov 48  }
 0x1e0   : > { %v2344_v30 = vpop.permute.xlu1 %2343 }
 0x1e1   : > { %v2342_v29 = vpop.permute.xlu0 %2341  ;;  %2348 = vst.msk [vmem:[#allocation4 + $0x8] sm:$0x7f] %vm7329_vm13, %v2344_v30  ;;  %vm7332_vm13 = vcmask 80960  }
 0x1e2   : > { %2347 = vst.msk [vmem:[#allocation4] sm:$0xff] %vm7328_vm2, %v2342_v29  ;;  %2957 = vrot.lane.b32.xlu1 %v4936_v32, %s7226_s11  ;;  %vm7212_vm2 = vcmask 63488  }
 0x1e3   : > { %2955 = vrot.lane.b32.xlu0 %v4935_v28, %s7226_s11  ;;  %v4912_v28 = vld [vmem:[%s5561_s20 + $0x158] sm:$0x7f]  ;;  %s5463_s20 = smov 96  }
 0x1e4   : > { %v2356_v35 = vpop.permute.xlu1 %2355 }
 0x1e5   : > { %v2354_v34 = vpop.permute.xlu0 %2353  ;;  %2360 = vst.msk [vmem:[#allocation4 + $0x8] sm:$0x7f] %vm762_vm11, %v2356_v35 }
 0x1e6   : > { %2359 = vst.msk [vmem:[#allocation4] sm:$0xff] %vm760_vm12, %v2354_v34  ;;  %2969 = vrot.lane.b32.xlu1 %v4938_v36, %s5450_s19 }
 0x1e7   : > { %2967 = vrot.lane.b32.xlu0 %v4937_v33, %s5450_s19  ;;  %s5458_s19 = smov 72  }
 0x1e8   : > { %v2368_v39 = vpop.permute.xlu1 %2367 }
 0x1e9   : > { %v2366_v38 = vpop.permute.xlu0 %2365  ;;  %2372 = vst.msk [vmem:[#allocation4 + $0x8] sm:$0x7f] %vm776_vm14, %v2368_v39 }
 0x1ea   : > { %2371 = vst.msk [vmem:[#allocation4] sm:$0xff] %vm7330_vm15, %v2366_v38  ;;  %2981 = vrot.lane.b32.xlu1 %v4940_v40, %s5451_s13  ;;  %vm7333_vm15 = vcmask 97360  }
 0x1eb   : > { %2979 = vrot.lane.b32.xlu0 %v4939_v37, %s5451_s13  ;;  %s7218_s13 = smov 64  }
 0x1ec   : > { %v2511_v46 = vpop.permute.xlu1 %2510 }
 0x1ed   : > { %v2509_v42 = vpop.permute.xlu0 %2508 }
 0x1ee   : > { %2993 = vrot.lane.b32.xlu1 %v4942_v50, %s5453_s16 }
 0x1ef   : > { %2991 = vrot.lane.b32.xlu0 %v4941_v41, %s5453_s16  ;;  %s5460_s16 = smov 88  }
 0x1f0   : > { %v6444_v55 = vld [vmem:[#allocation4 + $0x8] sm:$0x7f]  ;;  %v2523_v57 = vpop.permute.xlu1 %2522 }
 0x1f1   : > { %v6446_v21 = vld [vmem:[#allocation4] sm:$0xff]  ;;  %v2521_v56 = vpop.permute.xlu0 %2520  ;;  %2503 = vst.msk [vmem:[#allocation4 + $0x8] sm:$0x7f] %vm563_vm1, %v4877_v49 }
 0x1f2   : > { %2502 = vst.msk [vmem:[#allocation4] sm:$0xff] %vm561_vm0, %v6087_v4  ;;  %3138 = vrot.lane.b32.xlu1 %v3136_v8, %s7220_s28  ;;  %v3126_v4 = vld [vmem:[#allocation2] sm:$0x7f] }
 0x1f3   : > { %2514 = vst.msk [vmem:[#allocation4] sm:$0xff] %vm575_vm3, %v2509_v42  ;;  %3131 = vrot.lane.b32.xlu0 %v3129_v14, %s7313_s22 }
 0x1f4   : > { %2515 = vst.msk [vmem:[#allocation4 + $0x8] sm:$0x7f] %vm7211_vm5, %v2511_v46  ;;  %v2535_v59 = vpop.permute.xlu1 %2534  ;;  %vm7337_vm5 = vcmask 130160  }
 0x1f5   : > { %2526 = vst.msk [vmem:[#allocation4] sm:$0xff] %vm589_vm4, %v2521_v56  ;;  %v2533_v45 = vpop.permute.xlu0 %2532  ;;  %v6517_v56 = vld [vmem:[%s7164_s3] ss:$0 sm:$0xff] }
 0x1f6   : > { %2527 = vst.msk [vmem:[#allocation4 + $0x8] sm:$0x7f] %vm7210_vm6, %v2523_v57  ;;  %vm7336_vm6 = vcmask 112736   ;;  %v6523_v57 = vld [vmem:[%s7165_s4] ss:$0 sm:$0xff] }
 0x1f7   : > { %2538 = vst.msk [vmem:[#allocation4] sm:$0xff] %vm7331_vm10, %v2533_v45  ;;  %3145 = vrot.lane.b32.xlu0 %v3143_v58, %s7226_s11  ;;  %vm7334_vm10 = vcmask 96336  }
 0x1f8   : > { %2539 = vst.msk [vmem:[#allocation4 + $0x8] sm:$0x7f] %vm7209_vm7, %v2535_v59  ;;  %v2547_v61 = vpop.permute.xlu1 %2546  ;;  %vm7335_vm7 = vcmask 113760  }
 0x1f9   : > { %v2545_v60 = vpop.permute.xlu0 %2544  ;;  %3128 = vst.msk [vmem:[#allocation5] sm:$0x7f] %vm7212_vm2, %v3126_v4  ;;  %vm7338_vm2 = vcmask 129136  }
 0x1fa   : > { %2550 = vst.msk [vmem:[#allocation4] sm:$0xff] %vm7332_vm13, %v2545_v60  ;;  %vm7339_vm13 = vcmask 146560  }
 0x1fb   : > { %2551 = vst.msk [vmem:[#allocation4 + $0x8] sm:$0x7f] %vm7213_vm9, %v2547_v61  ;;  %vm7340_vm9 = vcmask 145536  }
 0x1fc   : > { %v2559_v19 = vpop.permute.xlu1 %2558 }
 0x1fd   : > { %v2557_v62 = vpop.permute.xlu0 %2556  ;;  %2563 = vst.msk [vmem:[#allocation4 + $0x8] sm:$0x7f] %vm7334_vm10, %v2559_v19  ;;  %vm7346_vm10 = vcmask 194736  }
 0x1fe   : > { %2562 = vst.msk [vmem:[#allocation4] sm:$0xff] %vm7333_vm15, %v2557_v62  ;;  %vm7341_vm15 = vcmask 162960  }
 0x200   : > { %v2571_v1 = vpop.permute.xlu1 %2570 }
 0x201   : > { %v2569_v0 = vpop.permute.xlu0 %2568  ;;  %2575 = vst.msk [vmem:[#allocation4 + $0x8] sm:$0x7f] %vm7336_vm6, %v2571_v1  ;;  %vm7343_vm6 = vcmask 179360  }
 0x202   : > { %2574 = vst.msk [vmem:[#allocation4] sm:$0xff] %vm7335_vm7, %v2569_v0  ;;  %vm7342_vm7 = vcmask 161936  }
 0x204   : > { %v2583_v3 = vpop.permute.xlu1 %2582 }
 0x205   : > { %v2581_v2 = vpop.permute.xlu0 %2580  ;;  %2587 = vst.msk [vmem:[#allocation4 + $0x8] sm:$0x7f] %vm7338_vm2, %v2583_v3  ;;  %vm7345_vm2 = vcmask 195760  }
 0x206   : > { %2586 = vst.msk [vmem:[#allocation4] sm:$0xff] %vm7337_vm5, %v2581_v2  ;;  %vm7344_vm5 = vcmask 178336  }
 0x208   : > { %v2596_v7 = vpop.permute.xlu1 %2595 }
 0x209   : > { %v2594_v6 = vpop.permute.xlu0 %2593  ;;  %2600 = vst.msk [vmem:[#allocation4 + $0x8] sm:$0x7f] %vm7340_vm9, %v2596_v7  ;;  %vm7347_vm9 = vcmask 212160  }
 0x20a   : > { %2599 = vst.msk [vmem:[#allocation4] sm:$0xff] %vm7339_vm13, %v2594_v6  ;;  %vm7348_vm13 = vcmask 211136  }
 0x20c   : > { %v2608_v12 = vpop.permute.xlu1 %2607 }
 0x20d   : > { %v2606_v9 = vpop.permute.xlu0 %2605  ;;  %2612 = vst.msk [vmem:[#allocation4 + $0x8] sm:$0x7f] %vm7342_vm7, %v2608_v12  ;;  %vm7350_vm7 = vcmask 227536  }
 0x20e   : > { %2611 = vst.msk [vmem:[#allocation4] sm:$0xff] %vm7341_vm15, %v2606_v9  ;;  %vm7349_vm15 = vcmask 228560  }
 0x210   : > { %v2620_v15 = vpop.permute.xlu1 %2619 }
 0x211   : > { %v2618_v13 = vpop.permute.xlu0 %2617  ;;  %2624 = vst.msk [vmem:[#allocation4 + $0x8] sm:$0x7f] %vm7344_vm5, %v2620_v15  ;;  %vm7352_vm5 = vcmask 30736  }
 0x212   : > { %2623 = vst.msk [vmem:[#allocation4] sm:$0xff] %vm7343_vm6, %v2618_v13  ;;  %vm7351_vm6 = vcmask 261360  }
 0x214   : > { %v2632_v17 = vpop.permute.xlu1 %2631 }
 0x215   : > { %v2630_v16 = vpop.permute.xlu0 %2629  ;;  %2636 = vst.msk [vmem:[#allocation4 + $0x8] sm:$0x7f] %vm7346_vm10, %v2632_v17  ;;  %vm7354_vm10 = vcmask 47136  }
 0x216   : > { %2635 = vst.msk [vmem:[#allocation4] sm:$0xff] %vm7345_vm2, %v2630_v16  ;;  %vm7353_vm2 = vcmask 64560  }
 0x218   : > { %v2645_v53 = vpop.permute.xlu1 %2644 }
 0x219   : > { %v2643_v52 = vpop.permute.xlu0 %2642  ;;  %2649 = vst.msk [vmem:[#allocation4 + $0x8] sm:$0x7f] %vm7348_vm13, %v2645_v53  ;;  %vm7360_vm13 = vcmask 113760  }
 0x21a   : > { %2648 = vst.msk [vmem:[#allocation4] sm:$0xff] %vm7347_vm9, %v2643_v52  ;;  %vm7359_vm9 = vcmask 96336  }
 0x21c   : > { %v2657_v20 = vpop.permute.xlu1 %2656 }
 0x21d   : > { %v2655_v18 = vpop.permute.xlu0 %2654  ;;  %2661 = vst.msk [vmem:[#allocation4 + $0x8] sm:$0x7f] %vm7350_vm7, %v2657_v20  ;;  %vm7362_vm7 = vcmask 130160  }
 0x21e   : > { %2660 = vst.msk [vmem:[#allocation4] sm:$0xff] %vm7349_vm15, %v2655_v18  ;;  %vm7361_vm15 = vcmask 112736  }
 0x220   : > { %v2669_v23 = vpop.permute.xlu1 %2668 }
 0x221   : > { %v2667_v22 = vpop.permute.xlu0 %2666  ;;  %2673 = vst.msk [vmem:[#allocation4 + $0x8] sm:$0x7f] %vm762_vm11, %v2669_v23 }
 0x222   : > { %2672 = vst.msk [vmem:[#allocation4] sm:$0xff] %vm760_vm12, %v2667_v22 }
 0x224   : > { %v2681_v47 = vpop.permute.xlu1 %2680 }
 0x225   : > { %v2679_v24 = vpop.permute.xlu0 %2678  ;;  %2685 = vst.msk [vmem:[#allocation4 + $0x8] sm:$0x7f] %vm776_vm14, %v2681_v47 }
 0x226   : > { %2684 = vst.msk [vmem:[#allocation4] sm:$0xff] %vm7351_vm6, %v2679_v24  ;;  %vm7363_vm6 = vcmask 129136  }
 0x228   : > { %v2824_v25 = vpop.permute.xlu1 %2823 }
 0x229   : > { %v2822_v48 = vpop.permute.xlu0 %2821 }
 0x22c   : > { %v6492_v29 = vld [vmem:[#allocation4 + $0x8] sm:$0x7f]  ;;  %v2836_v30 = vpop.permute.xlu1 %2835 }
 0x22d   : > { %v6486_v26 = vld [vmem:[#allocation4] sm:$0xff]  ;;  %v2834_v27 = vpop.permute.xlu0 %2833  ;;  %2816 = vst.msk [vmem:[#allocation4 + $0x8] sm:$0x7f] %vm563_vm1, %v4912_v28  ;;  %vm7358_vm1 = vcmask 97360   ;;  %v1749_v28 = vpack.c.bf16 %v6198_v43, %v6200_v44 }
 0x22e   : > { %2815 = vst.msk [vmem:[#allocation4] sm:$0xff] %vm561_vm0, %v6267_v10  ;;  %v2688_v32 = vpack.c.bf16 %v6492_v29, %v6486_v26  ;;  %vm7355_vm0 = vcmask 63536  }
 0x22f   : > { %2827 = vst.msk [vmem:[#allocation4] sm:$0xff] %vm575_vm3, %v2822_v48  ;;  %vm7356_vm3 = vcmask 80960  }
 0x230   : > { %2839 = vst.msk [vmem:[#allocation4] sm:$0xff] %vm589_vm4, %v2834_v27  ;;  %v2848_v10 = vpop.permute.xlu1 %2847  ;;  %vm7357_vm4 = vcmask 79936  }
 0x231   : > { %v2846_v33 = vpop.permute.xlu0 %2845  ;;  %2828 = vst.msk [vmem:[#allocation4 + $0x8] sm:$0x7f] %vm7352_vm5, %v2824_v25  ;;  %vm7364_vm5 = vcmask 146560  }
 0x232   : > { %2851 = vst.msk [vmem:[#allocation4] sm:$0xff] %vm7353_vm2, %v2846_v33  ;;  %vm7365_vm2 = vcmask 145536  }
 0x233   : > { %2840 = vst.msk [vmem:[#allocation4 + $0x8] sm:$0x7f] %vm7354_vm10, %v2836_v30  ;;  %vm7366_vm10 = vcmask 162960   ;;  %v2062_v30 = vpack.c.bf16 %v6349_v51, %v6351_v54 }
 0x234   : > { %2852 = vst.msk [vmem:[#allocation4 + $0x8] sm:$0x7f] %vm7355_vm0, %v2848_v10  ;;  %v2860_v35 = vpop.permute.xlu1 %2859  ;;  %vm7367_vm0 = vcmask 161936  }
 0x235   : > { %v2858_v34 = vpop.permute.xlu0 %2857  ;;  %2864 = vst.msk [vmem:[#allocation4 + $0x8] sm:$0x7f] %vm7357_vm4, %v2860_v35  ;;  %vm7369_vm4 = vcmask 178336  }
 0x236   : > { %2863 = vst.msk [vmem:[#allocation4] sm:$0xff] %vm7356_vm3, %v2858_v34  ;;  %vm7368_vm3 = vcmask 179360  }
 0x238   : > { %v2872_v37 = vpop.permute.xlu1 %2871 }
 0x239   : > { %v2870_v36 = vpop.permute.xlu0 %2869  ;;  %2876 = vst.msk [vmem:[#allocation4 + $0x8] sm:$0x7f] %vm7359_vm9, %v2872_v37 }
 0x23a   : > { %2875 = vst.msk [vmem:[#allocation4] sm:$0xff] %vm7358_vm1, %v2870_v36  ;;  %vm7370_vm1 = vcmask 195760  }
 0x23c   : > { %v2884_v39 = vpop.permute.xlu1 %2883 }
 0x23d   : > { %v2882_v38 = vpop.permute.xlu0 %2881  ;;  %2888 = vst.msk [vmem:[#allocation4 + $0x8] sm:$0x7f] %vm7361_vm15, %v2884_v39  ;;  %vm7372_vm15 = vcmask 212160  }
 0x23e   : > { %2887 = vst.msk [vmem:[#allocation4] sm:$0xff] %vm7360_vm13, %v2882_v38  ;;  %vm7371_vm13 = vcmask 194736  }
 0x240   : > { %v2896_v41 = vpop.permute.xlu1 %2895 }
 0x241   : > { %v2894_v40 = vpop.permute.xlu0 %2893  ;;  %2900 = vst.msk [vmem:[#allocation4 + $0x8] sm:$0x7f] %vm7363_vm6, %v2896_v41  ;;  %vm7374_vm6 = vcmask 211136  }
 0x242   : > { %2899 = vst.msk [vmem:[#allocation4] sm:$0xff] %vm7362_vm7, %v2894_v40  ;;  %vm7373_vm7 = vcmask 64512  }
 0x244   : > { %v2909_v46 = vpop.permute.xlu1 %2908 }
 0x245   : > { %v2907_v42 = vpop.permute.xlu0 %2906  ;;  %2913 = vst.msk [vmem:[#allocation4 + $0x8] sm:$0x7f] %vm7365_vm2, %v2909_v46  ;;  %vm7376_vm2 = vcmask 1046528  }
 0x246   : > { %2912 = vst.msk [vmem:[#allocation4] sm:$0xff] %vm7364_vm5, %v2907_v42  ;;  %vm7375_vm5 = vcmask 228560  }
 0x248   : > { %v2921_v50 = vpop.permute.xlu1 %2920 }
 0x249   : > { %v2919_v49 = vpop.permute.xlu0 %2918  ;;  %2925 = vst.msk [vmem:[#allocation4 + $0x8] sm:$0x7f] %vm7367_vm0, %v2921_v50  ;;  %vm7378_vm0 = vcmask 121856  }
 0x24a   : > { %2924 = vst.msk [vmem:[#allocation4] sm:$0xff] %vm7366_vm10, %v2919_v49  ;;  %vm7377_vm10 = vcmask 227536  }
 0x24c   : > { %v2933_v58 = vpop.permute.xlu1 %2932 }
 0x24d   : > { %v2931_v14 = vpop.permute.xlu0 %2930  ;;  %2937 = vst.msk [vmem:[#allocation4 + $0x8] sm:$0x7f] %vm7369_vm4, %v2933_v58  ;;  %vm7380_vm4 = vmmov %vm7376_vm2 }
 0x24e   : > { %2936 = vst.msk [vmem:[#allocation4] sm:$0xff] %vm7368_vm3, %v2931_v14  ;;  %vm3134_vm3 = vcmask 129088  }
 0x250   : > { %v912_v8 = vpop.f32.mrf.mxu1  ;;  %v2945_v61 = vpop.permute.xlu1 %2944 }
 0x251   : > { %v922_v45 = vmul.f32 %v6517_v56, %v912_v8  ;;  %v2943_v59 = vpop.permute.xlu0 %2942  ;;  %2949 = vst.msk [vmem:[#allocation4 + $0x8] sm:$0x7f] %vm7371_vm13, %v2945_v61 }
 0x252   : > { %v5141_v4 = vpop.f32.mrf.mxu1  ;;  %2948 = vst.msk [vmem:[#allocation4] sm:$0xff] %vm7370_vm1, %v2943_v59  ;;  %vm7215_vm1 = vcmask 260288  }
 0x253   : > { %v929_v60 = vadd.f32 %v6523_v57, %v922_v45 }
 0x254   : > { %v2958_v2 = vpop.permute.xlu1 %2957 }
 0x255   : > { %vm930_vm9 = vcmp.ge.f32.partialorder %v929_v60, 0.0  ;;  %v931_v62 = vmul.f32 0.2, %v929_v60  ;;  %v2956_v19 = vpop.permute.xlu0 %2955  ;;  %2962 = vst.msk [vmem:[#allocation4 + $0x8] sm:$0x7f] %vm7374_vm6, %v2958_v2  ;;  %vm7216_vm6 = vcmask 457088  }
 0x256   : > { %2961 = vst.msk [vmem:[#allocation4] sm:$0xff] %vm7372_vm15, %v2956_v19  ;;  %vm3155_vm15 = vcmask 325888  }
 0x257   : > { %v932_v0 = vsel %vm930_vm9, %v929_v60, %v931_v62  ;;  %vm7381_vm9 = vmmov %vm7378_vm0 }
 0x258   : > { %934 = vst.msk [vmem:[#allocation2 + $0x11] sm:$0xff] %vm7373_vm7, %v932_v0  ;;  %v1161_v1 = vpop.f32.mrf.mxu1  ;;  %v2970_v9 = vpop.permute.xlu1 %2969  ;;  %vm3162_vm7 = vcmask 391488  }
 0x259   : > { %v2968_v3 = vpop.permute.xlu0 %2967  ;;  %2974 = vst.msk [vmem:[#allocation4 + $0x8] sm:$0x7f] %vm7377_vm10, %v2970_v9  ;;  %vm7384_vm10 = vcmask 64512  }
 0x25a   : > { %v5148_v6 = vpop.f32.mrf.mxu1  ;;  %2973 = vst.msk [vmem:[#allocation4] sm:$0xff] %vm7375_vm5, %v2968_v3  ;;  %vm7217_vm5 = vcmask 522688  }
 0x25c   : > { %v1164_v7 = vpop.f32.mrf.mxu1  ;;  %v2982_v52 = vpop.permute.xlu1 %2981 }
 0x25d   : > { %5151 = vmatpush3.msk.msra.mxu0 %vm7376_vm2, %v1164_v7  ;;  %v2980_v12 = vpop.permute.xlu0 %2979  ;;  %2986 = vst.msk [vmem:[#allocation4 + $0x8] sm:$0x7f] %vm762_vm11, %v2982_v52  ;;  %vm3141_vm11 = vcmask 194688  }
 0x25e   : > { %v5149_v13 = vpop.f32.mrf.mxu1  ;;  %5152 = vmatprep.subr.mxu0 %v5449_v31  ;;  %2985 = vst.msk [vmem:[#allocation4] sm:$0xff] %vm760_vm12, %v2980_v12  ;;  %vm7379_vm12 = vcmask 261360  }
 0x25f   : > { %5153 = vmatpush3.msra.mxu0 %v1161_v1  ;;  %v3157_v15 = vld [vmem:[#allocation2 + $0x11] sm:$0x7f] }
 0x260   : > { %v3150_v16 = vld [vmem:[#allocation2 + $0x10] sm:$0x7f]  ;;  %3159 = vrot.lane.b32.xlu0 %v3157_v15, %s7225_s27  ;;  %v1474_v17 = vpop.f32.mrf.mxu1  ;;  %5155 = vmatmul.mubr.msk.f32.vlgmr.msra.gmra.mxu0 %vm7378_vm0, %v6240_v63  ;;  %v2994_v24 = vpop.permute.xlu1 %2993 }
 0x261   : > { %3152 = vrot.lane.b32.xlu1 %v3150_v16, %s5455_s29  ;;  %5165 = vmatprep.subr.mxu0 %v5449_v31  ;;  %v2992_v53 = vpop.permute.xlu0 %2991  ;;  %v3171_v20 = vld [vmem:[#allocation2 + $0x13] sm:$0x7f]  ;;  %2998 = vst.msk [vmem:[#allocation4 + $0x8] sm:$0x7f] %vm776_vm14, %v2994_v24  ;;  %vm7382_vm14 = vcmask 261120  }
 0x262   : > { %v5163_v18 = vpop.f32.mrf.mxu1  ;;  %5169 = vmatprep.mubr.msk.f32.mxu0 %vm7292_vm8, %v5449_v31  ;;  %2997 = vst.msk [vmem:[#allocation4] sm:$0xff] %vm7379_vm12, %v2992_v53  ;;  %v3164_v22 = vld [vmem:[#allocation2 + $0x12] sm:$0x7f]  ;;  %vm7383_vm13 = vmmov %vm7382_vm14 }
 0x263   : > { %vm7385_vm12 = vmmov %vm7384_vm10 }
 0x264   : > { %3173 = vrot.lane.b32.xlu0 %v3171_v20, %s7224_s30  ;;  %v1477_v23 = vpop.f32.mrf.mxu1  ;;  %v3139_v25 = vpop.permute.xlu1 %3138 }
 0x265   : > { %3166 = vrot.lane.b32.xlu1 %v3164_v22, %s5457_s15  ;;  %5166 = vmatpush3.msk.msra.mxu0 %vm7380_vm4, %v1477_v23  ;;  %v3132_v47 = vpop.permute.xlu0 %3131 }
 0x266   : > { %v5164_v48 = vpop.f32.mrf.mxu1  ;;  %5167 = vmatprep.subr.mxu0 %v5449_v31  ;;  %3135 = vst.msk [vmem:[#allocation5] sm:$0x7f] %vm3134_vm3, %v3132_v47 }
 0x267   : > { %5168 = vmatpush3.msra.mxu0 %v1474_v17  ;;  %3142 = vst.msk [vmem:[#allocation5] sm:$0x7f] %vm3141_vm11, %v3139_v25 }
 0x268   : > { %5170 = vmatmul.mubr.msk.f32.vlgmr.msra.gmra.mxu0 %vm7381_vm9, %v6240_v63  ;;  %5172 = vmatprep.subr.bf16.mxu0 %v5449_v31 }
 0x269   : > { %5173 = vmatpush3.bf16.msra.mxu0 %v6254_v5  ;;  %5176 = vmatprep.mubr.msk.bf16.mxu0 %vm7292_vm8, %v5449_v31  ;;  %v3146_v27 = vpop.permute.xlu0 %3145 }
 0x26a   : > { %5174 = vmatprep.subr.bf16.mxu0 %v5449_v31  ;;  %3149 = vst.msk [vmem:[#allocation5] sm:$0x7f] %vm7215_vm1, %v3146_v27 }
 0x26d   : > { %5175 = vmatpush3.bf16.msra.mxu0 %v6272_v11 }
 0x26e   : > { %5187 = vmatprep.subr.bf16.mxu0 %v5449_v31 }
 0x270   : > { %5177 = vmatmul.mubr.msk.bf16.vlgmr.msra.gmra.mxu0 %vm7382_vm14, %v1749_v28  ;;  %vm7386_vm14 = vmmov %vm7380_vm4 }
 0x271   : > { %5188 = vmatpush3.bf16.msra.mxu0 %v6254_v5  ;;  %5191 = vmatprep.mubr.msk.bf16.mxu0 %vm7292_vm8, %v5449_v31 }
 0x272   : > { %5189 = vmatprep.subr.bf16.mxu0 %v5449_v31 }
 0x275   : > { %5190 = vmatpush3.bf16.msra.mxu0 %v6272_v11 }
 0x276   : > { %5210 = vmatprep.subr.mxu0 %v5449_v31 }
 0x278   : > { %5192 = vmatmul.mubr.msk.bf16.vlgmr.msra.gmra.mxu0 %vm7383_vm13, %v2062_v30  ;;  %vm7387_vm13 = vmmov %vm7381_vm9 }
 0x279   : > { %5214 = vmatprep.mubr.msk.f32.mxu0 %vm7292_vm8, %v5449_v31 }
 0x2d2   : > { %v3160_v43 = vpop.permute.xlu0 %3159 }
 0x2d3   : > { %v3153_v44 = vpop.permute.xlu1 %3152 }
 0x2d4   : > { %3156 = vst.msk [vmem:[#allocation5] sm:$0x7f] %vm3155_vm15, %v3153_v44 }
 0x2d5   : > { %3163 = vst.msk [vmem:[#allocation5] sm:$0x7f] %vm3162_vm7, %v3160_v43 }
 0x2d6   : > { %v3174_v51 = vpop.permute.xlu0 %3173 }
 0x2d7   : > { %v3167_v54 = vpop.permute.xlu1 %3166 }
 0x2d8   : > { %3170 = vst.msk [vmem:[#allocation5] sm:$0x7f] %vm7216_vm6, %v3167_v54 }
 0x2d9   : > { %3177 = vst.msk [vmem:[#allocation5] sm:$0x7f] %vm7217_vm5, %v3174_v51 }
 0x320   : > { %v1237_v33 = vpop.f32.mrf.mxu0 }
 0x321   : > { %v1241_v10 = vmul.f32 %v6517_v56, %v1237_v33 }
 0x322   : > { %v5156_v34 = vpop.f32.mrf.mxu0 }
 0x323   : > { %v1242_v35 = vadd.f32 %v6523_v57, %v1241_v10 }
 0x325   : > { %vm1243_vm2 = vcmp.ge.f32.partialorder %v1242_v35, 0.0  ;;  %v1244_v36 = vmul.f32 0.2, %v1242_v35 }
 0x327   : > { %v1245_v37 = vsel %vm1243_vm2, %v1242_v35, %v1244_v36  ;;  %vm7388_vm2 = vcmask 261120  }
 0x328   : > { %v1550_v38 = vpop.f32.mrf.mxu0  ;;  %1247 = vst.msk [vmem:[#allocation2 + $0x21] sm:$0xff] %vm7384_vm10, %v1245_v37  ;;  %vm7389_vm10 = vmmov %vm7388_vm2 }
 0x329   : > { %v1554_v39 = vmul.f32 %v6517_v56, %v1550_v38 }
 0x32a   : > { %v5171_v40 = vpop.f32.mrf.mxu0 }
 0x32b   : > { %v1555_v41 = vadd.f32 %v6523_v57, %v1554_v39 }
 0x32d   : > { %vm1556_vm0 = vcmp.ge.f32.partialorder %v1555_v41, 0.0  ;;  %v1557_v42 = vmul.f32 0.2, %v1555_v41 }
 0x32f   : > { %v1558_v46 = vsel %vm1556_vm0, %v1555_v41, %v1557_v42  ;;  %v3185_v49 = vld [vmem:[#allocation2 + $0x21] sm:$0x7f]  ;;  %vm3183_vm0 = vcmask 588288  }
 0x330   : > { %1560 = vst.msk [vmem:[#allocation2 + $0x31] sm:$0xff] %vm7385_vm12, %v1558_v46  ;;  %v3178_v50 = vld [vmem:[#allocation2 + $0x20] sm:$0x7f]  ;;  %v1787_v14 = vpop.f32.mrf.mxu0  ;;  %3187 = vrot.lane.b32.xlu0 %v3185_v49, %s5458_s19  ;;  %vm3190_vm12 = vcmask 653888  }
 0x331   : > { %3180 = vrot.lane.b32.xlu1 %v3178_v50, %s7218_s13  ;;  %v3199_v58 = vld [vmem:[#allocation2 + $0x23] sm:$0x7f] }
 0x332   : > { %v5178_v8 = vpop.f32.mrf.mxu0  ;;  %v3192_v45 = vld [vmem:[#allocation2 + $0x22] sm:$0x7f] }
 0x333   : > { %v3429_v6 = vld [vmem:[#allocation2 + $0x22] sm:$0x7f] }
 0x334   : > { %v1790_v59 = vpop.f32.mrf.mxu0  ;;  %3201 = vrot.lane.b32.xlu0 %v3199_v58, %s5460_s16  ;;  %v3423_v7 = vld [vmem:[#allocation2 + $0x21] sm:$0x7f] }
 0x335   : > { %3194 = vrot.lane.b32.xlu1 %v3192_v45, %s5461_s24  ;;  %5181 = vmatpush3.msk.msra.mxu1 %vm7380_vm4, %v1790_v59  ;;  %v3435_v12 = vld [vmem:[#allocation2 + $0x23] sm:$0x7f]  ;;  %vm3197_vm4 = vcmask 719488  }
 0x336   : > { %v5179_v4 = vpop.f32.mrf.mxu0  ;;  %5182 = vmatprep.subr.mxu1 %v5449_v31  ;;  %v3421_v22 = vld [vmem:[#allocation2 + $0x20] sm:$0x7f] }
 0x337   : > { %v3213_v60 = vld [vmem:[#allocation2 + $0x31] sm:$0x7f]  ;;  %5183 = vmatpush3.msra.mxu1 %v1787_v14  ;;  %v6671_v8 = vld [vmem:[%s7163_s2] sm:$0xff] }
 0x338   : > { %v3206_v61 = vld [vmem:[#allocation2 + $0x30] sm:$0x7f]  ;;  %v2100_v62 = vpop.f32.mrf.mxu0  ;;  %3215 = vrot.lane.b32.xlu0 %v3213_v60, %s5462_s23  ;;  %5185 = vmatmul.mubr.msk.f32.vlgmr.msra.gmra.mxu1 %vm7381_vm9, %v6240_v63  ;;  %vm7214_vm9 = vcmask 785088  }
 0x339   : > { %3208 = vrot.lane.b32.xlu1 %v3206_v61, %s5463_s20  ;;  %5195 = vmatprep.subr.mxu1 %v5449_v31  ;;  %v3227_v0 = vld [vmem:[#allocation2 + $0x33] sm:$0x7f] }
 0x33a   : > { %v5193_v19 = vpop.f32.mrf.mxu0  ;;  %5199 = vmatprep.mubr.msk.f32.mxu1 %vm7292_vm8, %v5449_v31  ;;  %v3220_v1 = vld [vmem:[#allocation2 + $0x32] sm:$0x7f] }
 0x33b   : > { %v3441_v9 = vld [vmem:[#allocation2 + $0x30] sm:$0x7f]  ;;  %v5425_v19 = vld [vmem:[%s7162_s1 + $0x8] sm:$0xff]  }
 0x33c   : > { %v2103_v2 = vpop.f32.mrf.mxu0  ;;  %3229 = vrot.lane.b32.xlu0 %v3227_v0, %s5464_s21  ;;  %v3453_v13 = vld [vmem:[#allocation2 + $0x32] sm:$0x7f] }
 0x33d   : > { %3222 = vrot.lane.b32.xlu1 %v3220_v1, %s7222_s25  ;;  %5196 = vmatpush3.msk.msra.mxu1 %vm7386_vm14, %v2103_v2  ;;  %v3447_v15 = vld [vmem:[#allocation2 + $0x31] sm:$0x7f]  ;;  %vm3211_vm14 = vcmask 850688   ;;  %v3000_v1 = vld [vmem:[#allocation4 + $0x8] sm:$0x7f] }
 0x33e   : > { %v5194_v3 = vpop.f32.mrf.mxu0  ;;  %5197 = vmatprep.subr.mxu1 %v5449_v31  ;;  %v3459_v16 = vld [vmem:[#allocation2 + $0x33] sm:$0x7f] }
 0x33f   : > { %5198 = vmatpush3.msra.mxu1 %v2100_v62  ;;  %v2999_v0 = vld [vmem:[#allocation4] sm:$0xff] }
 0x340   : > { %3431 = vrot.lane.b32.xlu0 %v3429_v6, %s7220_s28  ;;  %5200 = vmatmul.mubr.msk.f32.vlgmr.msra.gmra.mxu1 %vm7387_vm13, %v6240_v63  ;;  %v2375_v63 = vpack.c.bf16 %v6444_v55, %v6446_v21  ;;  %vm3218_vm13 = vcmask 916288   ;;  %v3001_v6 = vpack.c.bf16 %v3000_v1, %v2999_v0 }
 0x341   : > { %3425 = vrot.lane.b32.xlu1 %v3423_v7, %s7313_s22  ;;  %5202 = vmatprep.subr.bf16.mxu1 %v5449_v31  ;;  %v5426_v7 = vld [vmem:[%s7162_s1] sm:$0xff]  }
 0x342   : > { %5203 = vmatpush3.bf16.msra.mxu1 %v6254_v5  ;;  %5206 = vmatprep.mubr.msk.bf16.mxu1 %vm7292_vm8, %v5449_v31 }
 0x343   : > { %5204 = vmatprep.subr.bf16.mxu1 %v5449_v31 }
 0x344   : > { %3443 = vrot.lane.b32.xlu0 %v3441_v9, %s5455_s29  ;;  %v6701_v9 = vld [vmem:[%s7166_s5 + $0x38] sm:$0xff]  }
 0x345   : > { %3437 = vrot.lane.b32.xlu1 %v3435_v12, %s7226_s11 }
 0x346   : > { %5205 = vmatpush3.bf16.msra.mxu1 %v6272_v11 }
 0x347   : > { %5217 = vmatprep.subr.bf16.mxu1 %v5449_v31 }
 0x348   : > { %3455 = vrot.lane.b32.xlu0 %v3453_v13, %s5457_s15 }
 0x349   : > { %3449 = vrot.lane.b32.xlu1 %v3447_v15, %s7225_s27  ;;  %5207 = vmatmul.mubr.msk.bf16.vlgmr.msra.gmra.mxu1 %vm7388_vm2, %v2375_v63  ;;  %vm3225_vm2 = vcmask 981888   ;;  %v6711_v15 = vld [vmem:[%s7166_s5 + $0x30] sm:$0xff]  }
 0x34a   : > { %5218 = vmatpush3.bf16.msra.mxu1 %v6254_v5  ;;  %5221 = vmatprep.mubr.msk.bf16.mxu1 %vm7292_vm8, %v5449_v31 }
 0x34b   : > { %5219 = vmatprep.subr.bf16.mxu1 %v5449_v31 }
 0x34d   : > { %3461 = vrot.lane.b32.xlu1 %v3459_v16, %s7224_s30  ;;  %v6721_v16 = vld [vmem:[%s7166_s5 + $0x28] sm:$0xff]  }
 0x34e   : > { %5220 = vmatpush3.bf16.msra.mxu1 %v6272_v11 }
 0x34f   : > { %5240 = vmatprep.subr.mxu1 %v5449_v31 }
 0x351   : > { %5222 = vmatmul.mubr.msk.bf16.vlgmr.msra.gmra.mxu1 %vm7389_vm10, %v2688_v32  ;;  %vm3232_vm10 = vcmask 1047488  }
 0x352   : > { %5244 = vmatprep.mubr.msk.f32.mxu1 %vm7292_vm8, %v5449_v31 }
 0x3a2   : > { %v3188_v5 = vpop.permute.xlu0 %3187 }
 0x3a3   : > { %v3181_v55 = vpop.permute.xlu1 %3180 }
 0x3a4   : > { %3184 = vst.msk [vmem:[#allocation5] sm:$0x7f] %vm3183_vm0, %v3181_v55  ;;  %v6735_v55 = vld [vmem:[%s7166_s5 + $0x18] sm:$0xff]  }
 0x3a5   : > { %3191 = vst.msk [vmem:[#allocation5] sm:$0x7f] %vm3190_vm12, %v3188_v5  ;;  %v6728_v5 = vld [vmem:[%s7166_s5 + $0x20] sm:$0xff]  }
 0x3a6   : > { %v3202_v11 = vpop.permute.xlu0 %3201 }
 0x3a7   : > { %v3195_v21 = vpop.permute.xlu1 %3194 }
 0x3a8   : > { %3198 = vst.msk [vmem:[#allocation5] sm:$0x7f] %vm3197_vm4, %v3195_v21  ;;  %v6749_v21 = vld [vmem:[%s7166_s5 + $0x8] sm:$0xff]  }
 0x3a9   : > { %3205 = vst.msk [vmem:[#allocation5] sm:$0x7f] %vm7214_vm9, %v3202_v11  ;;  %vm7390_vm9 = vcmask 63488   ;;  %v6742_v11 = vld [vmem:[%s7166_s5 + $0x10] sm:$0xff]  }
 0x3aa   : > { %v3216_v26 = vpop.permute.xlu0 %3215 }
 0x3ab   : > { %v3209_v29 = vpop.permute.xlu1 %3208 }
 0x3ac   : > { %3212 = vst.msk [vmem:[#allocation5] sm:$0x7f] %vm3211_vm14, %v3209_v29 }
 0x3ad   : > { %3219 = vst.msk [vmem:[#allocation5] sm:$0x7f] %vm3218_vm13, %v3216_v26  ;;  %v6756_v26 = vld [vmem:[%s7166_s5] sm:$0xff]  }
 0x3ae   : > { %v3230_v32 = vpop.permute.xlu0 %3229 }
 0x3af   : > { %v3223_v17 = vpop.permute.xlu1 %3222 }
 0x3b0   : > { %3226 = vst.msk [vmem:[#allocation5] sm:$0x7f] %vm3225_vm2, %v3223_v17 }
 0x3b1   : > { %3233 = vst.msk [vmem:[#allocation5] sm:$0x7f] %vm3232_vm10, %v3230_v32 }
 0x3b2   : > { %v3432_v52 = vpop.permute.xlu0 %3431 }
 0x3b3   : > { %v3426_v53 = vpop.permute.xlu1 %3425 }
 0x3b6   : > { %v3444_v23 = vpop.permute.xlu0 %3443 }
 0x3b7   : > { %v3438_v18 = vpop.permute.xlu1 %3437 }
 0x3b8   : > { %v6644_v20 = vld [vmem:[#allocation5] sm:$0x7f] }
 0x3b9   : > { %3422 = vst.msk [vmem:[#allocation5] sm:$0x7f] %vm7390_vm9, %v3421_v22  ;;  %v3235_v29 = vpack.c.bf16 %v6644_v20, %v6644_v20 }
 0x3ba   : > { %3428 = vst.msk [vmem:[#allocation5] sm:$0x7f] %vm3134_vm3, %v3426_v53  ;;  %v3456_v47 = vpop.permute.xlu0 %3455 }
 0x3bb   : > { %3434 = vst.msk [vmem:[#allocation5] sm:$0x7f] %vm3141_vm11, %v3432_v52  ;;  %v3450_v24 = vpop.permute.xlu1 %3449 }
 0x3bc   : > { %3440 = vst.msk [vmem:[#allocation5] sm:$0x7f] %vm7215_vm1, %v3438_v18  ;;  %vm7391_vm1 = vcmask 64512  }
 0x3bd   : > { %3446 = vst.msk [vmem:[#allocation5] sm:$0x7f] %vm3155_vm15, %v3444_v23 }
 0x3be   : > { %3452 = vst.msk [vmem:[#allocation5] sm:$0x7f] %vm3162_vm7, %v3450_v24 }
 0x3bf   : > { %3458 = vst.msk [vmem:[#allocation5] sm:$0x7f] %vm7216_vm6, %v3456_v47  ;;  %v3462_v48 = vpop.permute.xlu1 %3461 }
 0x3c0   : > { %3464 = vst.msk [vmem:[#allocation5] sm:$0x7f] %vm7217_vm5, %v3462_v48  ;;  %vm7392_vm5 = vmmov %vm7391_vm1 }
 0x3f8   : > { %v1863_v25 = vpop.f32.mrf.mxu1 }
 0x3f9   : > { %v1867_v27 = vmul.f32 %v6517_v56, %v1863_v25 }
 0x3fa   : > { %v5186_v28 = vpop.f32.mrf.mxu1 }
 0x3fb   : > { %v1868_v30 = vadd.f32 %v6523_v57, %v1867_v27 }
 0x3fd   : > { %vm1869_vm9 = vcmp.ge.f32.partialorder %v1868_v30, 0.0  ;;  %v1870_v43 = vmul.f32 0.2, %v1868_v30 }
 0x3ff   : > { %v1871_v44 = vsel %vm1869_vm9, %v1868_v30, %v1870_v43 }
 0x400   : > { %1873 = vst.msk [vmem:[#allocation2 + $0x41] sm:$0xff] %vm7391_vm1, %v1871_v44  ;;  %v2176_v51 = vpop.f32.mrf.mxu1  ;;  %vm7393_vm1 = vcmask 1046528  }
 0x401   : > { %v2180_v54 = vmul.f32 %v6517_v56, %v2176_v51 }
 0x402   : > { %v5201_v33 = vpop.f32.mrf.mxu1 }
 0x403   : > { %v2181_v10 = vadd.f32 %v6523_v57, %v2180_v54 }
 0x405   : > { %vm2182_vm6 = vcmp.ge.f32.partialorder %v2181_v10, 0.0  ;;  %v2183_v34 = vmul.f32 0.2, %v2181_v10 }
 0x407   : > { %v2184_v35 = vsel %vm2182_vm6, %v2181_v10, %v2183_v34  ;;  %v3471_v36 = vld [vmem:[#allocation2 + $0x41] sm:$0x7f]  ;;  %vm7394_vm6 = vcmask 121856  }
 0x408   : > { %v3465_v37 = vld [vmem:[#allocation2 + $0x40] sm:$0x7f]  ;;  %2186 = vst.msk [vmem:[#allocation2 + $0x51] sm:$0xff] %vm7392_vm5, %v2184_v35  ;;  %3473 = vrot.lane.b32.xlu1 %v3471_v36, %s5458_s19  ;;  %vm7395_vm5 = vmmov %vm7393_vm1 }
 0x409   : > { %3467 = vrot.lane.b32.xlu0 %v3465_v37, %s7218_s13  ;;  %v2413_v38 = vpop.f32.mrf.mxu1  ;;  %v3483_v39 = vld [vmem:[#allocation2 + $0x43] sm:$0x7f]  ;;  %vm7396_vm9 = vmmov %vm7394_vm6  ;;  %s7405_s13 = smov 64  }
 0x40a   : > { %v3477_v40 = vld [vmem:[#allocation2 + $0x42] sm:$0x7f] }
 0x40b   : > { %v5208_v41 = vpop.f32.mrf.mxu1  ;;  %v3643_v61 = vld [vmem:[#allocation2 + $0x42] sm:$0x7f] }
 0x40c   : > { %3485 = vrot.lane.b32.xlu1 %v3483_v39, %s5460_s16  ;;  %v3637_v62 = vld [vmem:[#allocation2 + $0x41] sm:$0x7f] }
 0x40d   : > { %3479 = vrot.lane.b32.xlu0 %v3477_v40, %s5461_s24  ;;  %v2416_v42 = vpop.f32.mrf.mxu1  ;;  %v3649_v3 = vld [vmem:[#allocation2 + $0x43] sm:$0x7f] }
 0x40e   : > { %5211 = vmatpush3.msk.msra.mxu0 %vm7393_vm1, %v2416_v42  ;;  %vm7397_vm1 = vcmask 261120   ;;  %v3635_v27 = vld [vmem:[#allocation2 + $0x40] sm:$0x7f] }
 0x40f   : > { %v5209_v46 = vpop.f32.mrf.mxu1  ;;  %5212 = vmatprep.subr.mxu0 %v5449_v31  ;;  %v3495_v49 = vld [vmem:[#allocation2 + $0x51] sm:$0x7f] }
 0x410   : > { %5213 = vmatpush3.msra.mxu0 %v2413_v38  ;;  %v3489_v50 = vld [vmem:[#allocation2 + $0x50] sm:$0x7f]  ;;  %3497 = vrot.lane.b32.xlu1 %v3495_v49, %s5462_s23 }
 0x411   : > { %3491 = vrot.lane.b32.xlu0 %v3489_v50, %s5463_s20  ;;  %v2726_v14 = vpop.f32.mrf.mxu1  ;;  %5215 = vmatmul.mubr.msk.f32.vlgmr.msra.gmra.mxu0 %vm7394_vm6, %v6671_v8  ;;  %v3507_v45 = vld [vmem:[#allocation2 + $0x53] sm:$0x7f]  ;;  %vm7398_vm6 = vcmask 785088  }
 0x412   : > { %5225 = vmatprep.subr.mxu0 %v5449_v31  ;;  %5229 = vmatprep.mubr.msk.f32.mxu0 %vm7292_vm8, %v5449_v31  ;;  %v3501_v59 = vld [vmem:[#allocation2 + $0x52] sm:$0x7f] }
 0x413   : > { %v5223_v58 = vpop.f32.mrf.mxu1  ;;  %v3655_v2 = vld [vmem:[#allocation2 + $0x50] sm:$0x7f] }
 0x414   : > { %3509 = vrot.lane.b32.xlu1 %v3507_v45, %s5464_s21  ;;  %v3667_v12 = vld [vmem:[#allocation2 + $0x52] sm:$0x7f] }
 0x415   : > { %3503 = vrot.lane.b32.xlu0 %v3501_v59, %s7222_s25  ;;  %v2729_v4 = vpop.f32.mrf.mxu1  ;;  %v3661_v13 = vld [vmem:[#allocation2 + $0x51] sm:$0x7f]  ;;  %s7410_s25 = smov 40  }
 0x416   : > { %5226 = vmatpush3.msk.msra.mxu0 %vm7395_vm5, %v2729_v4  ;;  %v3673_v63 = vld [vmem:[#allocation2 + $0x53] sm:$0x7f]  ;;  %vm7399_vm5 = vcmask 63488  }
 0x417   : > { %v5224_v60 = vpop.f32.mrf.mxu1  ;;  %5227 = vmatprep.subr.mxu0 %v5449_v31 }
 0x418   : > { %5228 = vmatpush3.msra.mxu0 %v2726_v14  ;;  %3645 = vrot.lane.b32.xlu1 %v3643_v61, %s7220_s28  ;;  %s7409_s28 = smov 16  }
 0x419   : > { %3639 = vrot.lane.b32.xlu0 %v3637_v62, %s7313_s22  ;;  %5230 = vmatmul.mubr.msk.f32.vlgmr.msra.gmra.mxu0 %vm7396_vm9, %v6671_v8  ;;  %vm7400_vm9 = vcmask 260288  }
 0x41a   : > { %5232 = vmatprep.subr.bf16.mxu0 %v5449_v31  ;;  %5236 = vmatprep.mubr.msk.bf16.mxu0 %vm7292_vm8, %v5449_v31 }
 0x41b   : > { %5233 = vmatpush3.bf16.msra.mxu0 %v5425_v19  ;;  %v3918_v19 = vld [vmem:[#allocation2 + $0x90] sm:$0x7f] }
 0x41c   : > { %5234 = vmatprep.subr.bf16.mxu0 %v5449_v31  ;;  %3657 = vrot.lane.b32.xlu1 %v3655_v2, %s5455_s29 }
 0x41d   : > { %3651 = vrot.lane.b32.xlu0 %v3649_v3, %s7226_s11 }
 0x41f   : > { %5235 = vmatpush3.bf16.msra.mxu0 %v5426_v7  ;;  %v6815_v7 = vld [vmem:[%s7167_s6] sm:$0xf] }
 0x420   : > { %5247 = vmatprep.subr.bf16.mxu0 %v5449_v31  ;;  %3669 = vrot.lane.b32.xlu1 %v3667_v12, %s5457_s15 }
 0x421   : > { %3663 = vrot.lane.b32.xlu0 %v3661_v13, %s7225_s27 }
 0x422   : > { %5237 = vmatmul.mubr.msk.bf16.vlgmr.msra.gmra.mxu0 %vm7397_vm1, %v3001_v6  ;;  %vm7401_vm1 = vcmask 457088  }
 0x423   : > { %5248 = vmatpush3.bf16.msra.mxu0 %v6701_v9  ;;  %5263 = vmatprep.mubr.msk.bf16.mxu0 %vm7292_vm8, %v5449_v31 }
 0x424   : > { %5249 = vmatprep.subr.bf16.mxu0 %v5449_v31 }
 0x425   : > { %3675 = vrot.lane.b32.xlu0 %v3673_v63, %s7224_s30 }
 0x427   : > { %5250 = vmatpush3.bf16.msra.mxu0 %v6711_v15 }
 0x428   : > { %5251 = vmatprep.subr.bf16.mxu0 %v5449_v31 }
 0x42b   : > { %5252 = vmatpush3.bf16.msra.mxu0 %v6721_v16 }
 0x42c   : > { %5253 = vmatprep.subr.bf16.mxu0 %v5449_v31 }
 0x42f   : > { %5254 = vmatpush3.bf16.msra.mxu0 %v6728_v5 }
 0x430   : > { %5255 = vmatprep.subr.bf16.mxu0 %v5449_v31 }
 0x433   : > { %5256 = vmatpush3.bf16.msra.mxu0 %v6735_v55 }
 0x434   : > { %5257 = vmatprep.subr.bf16.mxu0 %v5449_v31 }
 0x437   : > { %5258 = vmatpush3.bf16.msra.mxu0 %v6742_v11 }
 0x438   : > { %5259 = vmatprep.subr.bf16.mxu0 %v5449_v31 }
 0x43b   : > { %5260 = vmatpush3.bf16.msra.mxu0 %v6749_v21 }
 0x43c   : > { %5261 = vmatprep.subr.bf16.mxu0 %v5449_v31 }
 0x43f   : > { %5262 = vmatpush3.bf16.msra.mxu0 %v6756_v26 }
 0x440   : > { %5292 = vmatprep.subr.mxu0 %v5449_v31 }
 0x442   : > { %5264 = vmatmul.mubr.bf16.vlgmr.msra.gmra.mxu0 %v3235_v29 }
 0x443   : > { %5294 = vmatprep.mubr.msk.f32.mxu0 %vm7292_vm8, %v5449_v31 }
 0x47a   : > { %v3474_v32 = vpop.permute.xlu1 %3473 }
 0x47b   : > { %v3468_v17 = vpop.permute.xlu0 %3467 }
 0x47c   : > { %3470 = vst.msk [vmem:[#allocation5] sm:$0x7f] %vm3183_vm0, %v3468_v17 }
 0x47d   : > { %3476 = vst.msk [vmem:[#allocation5] sm:$0x7f] %vm3190_vm12, %v3474_v32 }
 0x47e   : > { %v3486_v52 = vpop.permute.xlu1 %3485 }
 0x47f   : > { %v3480_v53 = vpop.permute.xlu0 %3479 }
 0x480   : > { %3482 = vst.msk [vmem:[#allocation5] sm:$0x7f] %vm3197_vm4, %v3480_v53 }
 0x481   : > { %3488 = vst.msk [vmem:[#allocation5] sm:$0x7f] %vm7398_vm6, %v3486_v52  ;;  %vm7402_vm6 = vcmask 522688  }
 0x482   : > { %v3498_v18 = vpop.permute.xlu1 %3497 }
 0x483   : > { %v3492_v20 = vpop.permute.xlu0 %3491 }
 0x484   : > { %3494 = vst.msk [vmem:[#allocation5] sm:$0x7f] %vm3211_vm14, %v3492_v20 }
 0x485   : > { %3500 = vst.msk [vmem:[#allocation5] sm:$0x7f] %vm3218_vm13, %v3498_v18 }
 0x486   : > { %v3510_v22 = vpop.permute.xlu1 %3509 }
 0x487   : > { %v3504_v23 = vpop.permute.xlu0 %3503 }
 0x488   : > { %3506 = vst.msk [vmem:[#allocation5] sm:$0x7f] %vm3225_vm2, %v3504_v23 }
 0x489   : > { %3512 = vst.msk [vmem:[#allocation5] sm:$0x7f] %vm3232_vm10, %v3510_v22 }
 0x48a   : > { %v3646_v24 = vpop.permute.xlu1 %3645 }
 0x48b   : > { %v3640_v47 = vpop.permute.xlu0 %3639 }
 0x48e   : > { %v3658_v28 = vpop.permute.xlu1 %3657 }
 0x48f   : > { %v3652_v48 = vpop.permute.xlu0 %3651 }
 0x490   : > { %v6773_v25 = vld [vmem:[#allocation5] sm:$0x7f] }
 0x491   : > { %3636 = vst.msk [vmem:[#allocation5] sm:$0x7f] %vm7399_vm5, %v3635_v27  ;;  %v3514_v32 = vpack.c.bf16 %v6773_v25, %v6773_v25 }
 0x492   : > { %3642 = vst.msk [vmem:[#allocation5] sm:$0x7f] %vm3134_vm3, %v3640_v47  ;;  %v3670_v43 = vpop.permute.xlu1 %3669 }
 0x493   : > { %3648 = vst.msk [vmem:[#allocation5] sm:$0x7f] %vm3141_vm11, %v3646_v24  ;;  %v3664_v30 = vpop.permute.xlu0 %3663 }
 0x494   : > { %3654 = vst.msk [vmem:[#allocation5] sm:$0x7f] %vm7400_vm9, %v3652_v48  ;;  %vm7403_vm9 = vcmask 64512  }
 0x495   : > { %3660 = vst.msk [vmem:[#allocation5] sm:$0x7f] %vm3155_vm15, %v3658_v28 }
 0x496   : > { %3666 = vst.msk [vmem:[#allocation5] sm:$0x7f] %vm3162_vm7, %v3664_v30 }
 0x497   : > { %3672 = vst.msk [vmem:[#allocation5] sm:$0x7f] %vm7401_vm1, %v3670_v43  ;;  %v3676_v44 = vpop.permute.xlu0 %3675 }
 0x498   : > { %3678 = vst.msk [vmem:[#allocation5] sm:$0x7f] %vm7402_vm6, %v3676_v44  ;;  %vm7404_vm6 = vmmov %vm7403_vm9 }
 0x4d1   : > { %v2489_v51 = vpop.f32.mrf.mxu0 }
 0x4d2   : > { %v2493_v54 = vmul.f32 %v6517_v56, %v2489_v51 }
 0x4d3   : > { %v5216_v33 = vpop.f32.mrf.mxu0 }
 0x4d4   : > { %v2494_v10 = vadd.f32 %v6523_v57, %v2493_v54 }
 0x4d6   : > { %vm2495_vm5 = vcmp.ge.f32.partialorder %v2494_v10, 0.0  ;;  %v2496_v34 = vmul.f32 0.2, %v2494_v10 }
 0x4d8   : > { %v2497_v35 = vsel %vm2495_vm5, %v2494_v10, %v2496_v34  ;;  %vm7406_vm5 = vcmask 1046528  }
 0x4d9   : > { %2499 = vst.msk [vmem:[#allocation2 + $0x61] sm:$0xff] %vm7403_vm9, %v2497_v35  ;;  %v2802_v36 = vpop.f32.mrf.mxu0  ;;  %vm7407_vm9 = vcmask 121856   ;;  %v5427_v35 = vld [vmem:[%s7164_s3] ss:$0 sm:$0xff] }
 0x4da   : > { %v2806_v37 = vmul.f32 %v6517_v56, %v2802_v36 }
 0x4db   : > { %v5231_v38 = vpop.f32.mrf.mxu0 }
 0x4dc   : > { %v2807_v39 = vadd.f32 %v6523_v57, %v2806_v37  ;;  %v5428_v38 = vld [vmem:[%s7165_s4] ss:$0 sm:$0xff] }
 0x4de   : > { %vm2808_vm1 = vcmp.ge.f32.partialorder %v2807_v39, 0.0  ;;  %v2809_v40 = vmul.f32 0.2, %v2807_v39 }
 0x4e0   : > { %v2810_v41 = vsel %vm2808_vm1, %v2807_v39, %v2809_v40  ;;  %v3685_v42 = vld [vmem:[#allocation2 + $0x61] sm:$0x7f]  ;;  %vm3324_vm1 = vcmask 56320  }
 0x4e1   : > { %v3679_v46 = vld [vmem:[#allocation2 + $0x60] sm:$0x7f]  ;;  %2812 = vst.msk [vmem:[#allocation2 + $0x71] sm:$0xff] %vm7404_vm6, %v2810_v41  ;;  %3687 = vrot.lane.b32.xlu0 %v3685_v42, %s5458_s19  ;;  %vm7412_vm6 = vmmov %vm7406_vm5 }
 0x4e2   : > { %3681 = vrot.lane.b32.xlu1 %v3679_v46, %s7405_s13  ;;  %v3039_v49 = vpop.f32.mrf.mxu0  ;;  %v3697_v14 = vld [vmem:[#allocation2 + $0x63] sm:$0x7f] }
 0x4e3   : > { %v3691_v58 = vld [vmem:[#allocation2 + $0x62] sm:$0x7f] }
 0x4e4   : > { %v5238_v50 = vpop.f32.mrf.mxu0  ;;  %v3857_v61 = vld [vmem:[#allocation2 + $0x62] sm:$0x7f] }
 0x4e5   : > { %3699 = vrot.lane.b32.xlu0 %v3697_v14, %s5460_s16  ;;  %v3851_v62 = vld [vmem:[#allocation2 + $0x61] sm:$0x7f]  ;;  %v3930_v14 = vld [vmem:[#allocation2 + $0x92] sm:$0x7f] }
 0x4e6   : > { %3693 = vrot.lane.b32.xlu1 %v3691_v58, %s5461_s24  ;;  %v3042_v56 = vpop.f32.mrf.mxu0  ;;  %v3863_v0 = vld [vmem:[#allocation2 + $0x63] sm:$0x7f]  ;;  %v3936_v58 = vld [vmem:[#allocation2 + $0x93] sm:$0x7f] }
 0x4e7   : > { %5241 = vmatpush3.msk.msra.mxu1 %vm7406_vm5, %v3042_v56  ;;  %vm491_vm5 = vcmask 128000   ;;  %v3849_v30 = vld [vmem:[#allocation2 + $0x60] sm:$0x7f] }
 0x4e8   : > { %5242 = vmatprep.subr.mxu1 %v5449_v31  ;;  %v5239_v57 = vpop.f32.mrf.mxu0  ;;  %v3709_v45 = vld [vmem:[#allocation2 + $0x71] sm:$0x7f]  ;;  %492 = vst.msk [vmem:[#allocation3] sm:$0x3f] %vm491_vm5, %v5449_v31  ;;  %493 = vst.msk [vmem:[#allocation3 + $0x8] sm:$0x3f] %vm491_vm5, %v5449_v31 }
 0x4e9   : > { %5243 = vmatpush3.msra.mxu1 %v3039_v49  ;;  %v3703_v59 = vld [vmem:[#allocation2 + $0x70] sm:$0x7f]  ;;  %3711 = vrot.lane.b32.xlu0 %v3709_v45, %s5462_s23  ;;  %497 = vst.msk [vmem:[#allocation3 + $0x28] sm:$0x3f] %vm491_vm5, %v5449_v31  ;;  %494 = vst.msk [vmem:[#allocation3 + $0x10] sm:$0x3f] %vm491_vm5, %v5449_v31 }
 0x4ea   : > { %3705 = vrot.lane.b32.xlu1 %v3703_v59, %s5463_s20  ;;  %5245 = vmatmul.mubr.msk.f32.vlgmr.msra.gmra.mxu1 %vm7407_vm9, %v6671_v8  ;;  %v3721_v4 = vld [vmem:[#allocation2 + $0x73] sm:$0x7f]  ;;  %495 = vst.msk [vmem:[#allocation3 + $0x18] sm:$0x3f] %vm491_vm5, %v5449_v31  ;;  %496 = vst.msk [vmem:[#allocation3 + $0x20] sm:$0x3f] %vm491_vm5, %v5449_v31 }
 0x4eb   : > { %5267 = vmatprep.subr.mxu1 %v5449_v31  ;;  %5269 = vmatprep.mubr.msk.f32.mxu1 %vm7292_vm8, %v5449_v31  ;;  %v3715_v60 = vld [vmem:[#allocation2 + $0x72] sm:$0x7f]  ;;  %vm7413_vm9 = vcmask 785088   ;;  %vm7415_vm5 = vcmask 260288   ;;  %v6902_v56 = vld [vmem:[%s7168_s7] ss:$0 sm:$0xff] }
 0x4ec   : > { %v3924_v8 = vld [vmem:[#allocation2 + $0x91] sm:$0x7f]  ;;  %v6909_v57 = vld [vmem:[%s7169_s8] ss:$0 sm:$0xff] }
 0x4ed   : > { %3723 = vrot.lane.b32.xlu0 %v3721_v4, %s5464_s21  ;;  %v3869_v1 = vld [vmem:[#allocation2 + $0x70] sm:$0x7f] }
 0x4ee   : > { %3717 = vrot.lane.b32.xlu1 %v3715_v60, %s7408_s26  ;;  %v3881_v2 = vld [vmem:[#allocation2 + $0x72] sm:$0x7f] }
 0x4ef   : > { %v3875_v3 = vld [vmem:[#allocation2 + $0x71] sm:$0x7f]  ;;  %v4067_v59 = vld [vmem:[#allocation3 + $0x1] sm:$0x7] }
 0x4f0   : > { %v3887_v6 = vld [vmem:[#allocation2 + $0x73] sm:$0x7f] }
 0x4f1   : > { %3859 = vrot.lane.b32.xlu0 %v3857_v61, %s7409_s28 }
 0x4f2   : > { %3853 = vrot.lane.b32.xlu1 %v3851_v62, %s7313_s22  ;;  %v4074_v62 = vld [vmem:[#allocation3 + $0x2] sm:$0x7] }
 0x4f5   : > { %3920 = vrot.lane.b32.xlu0 %v3918_v19, %s5463_s20 }
 0x4f6   : > { %3865 = vrot.lane.b32.xlu1 %v3863_v0, %s7226_s11  ;;  %s7411_s11 = smov 56  }
 0x4f9   : > { %3871 = vrot.lane.b32.xlu0 %v3869_v1, %s5455_s29  ;;  %v4064_v1 = vld [vmem:[#allocation3] sm:$0x7] }
 0x4fa   : > { %3926 = vrot.lane.b32.xlu1 %v3924_v8, %s5462_s23  ;;  %v4081_v8 = vld [vmem:[#allocation3 + $0x3] sm:$0x7] }
 0x4fd   : > { %3883 = vrot.lane.b32.xlu0 %v3881_v2, %s5457_s15 }
 0x4fe   : > { %3877 = vrot.lane.b32.xlu1 %v3875_v3, %s7410_s25 }
 0x502   : > { %3889 = vrot.lane.b32.xlu1 %v3887_v6, %s7411_s11  ;;  %v3318_v12 = vpop.f32.mrf.mxu0  ;;  %s467_s11 = scalar_lea.vmem %s7174_s14, %s7424_s18 }
 0x503   : > { %5268 = vmatpush3.msk.msra.mxu1 %vm7412_vm6, %v3318_v12  ;;  %vm7414_vm6 = vcmask 63488  }
 0x504   : > { %v5265_v13 = vpop.f32.mrf.mxu0  ;;  %5272 = vmatprep.subr.bf16.mxu1 %v5449_v31  ;;  %5270 = vmatmul.mubr.msk.f32.vlgmr.msra.gmra.mxu1 %vm3324_vm1, %v6815_v7 }
 0x505   : > { %5273 = vmatpush3.bf16.msra.mxu1 %v6701_v9  ;;  %5288 = vmatprep.mubr.msk.bf16.mxu1 %vm7292_vm8, %v5449_v31 }
 0x506   : > { %v3321_v63 = vpop.f32.mrf.mxu0  ;;  %5274 = vmatprep.subr.bf16.mxu1 %v5449_v31 }
 0x508   : > { %v5266_v29 = vpop.f32.mrf.mxu0 }
 0x509   : > { %5275 = vmatpush3.bf16.msra.mxu1 %v6711_v15 }
 0x50a   : > { %5276 = vmatprep.subr.bf16.mxu1 %v5449_v31 }
 0x50d   : > { %5277 = vmatpush3.bf16.msra.mxu1 %v6721_v16 }
 0x50e   : > { %5278 = vmatprep.subr.bf16.mxu1 %v5449_v31 }
 0x511   : > { %5279 = vmatpush3.bf16.msra.mxu1 %v6728_v5 }
 0x512   : > { %5280 = vmatprep.subr.bf16.mxu1 %v5449_v31 }
 0x515   : > { %5281 = vmatpush3.bf16.msra.mxu1 %v6735_v55 }
 0x516   : > { %5282 = vmatprep.subr.bf16.mxu1 %v5449_v31 }
 0x519   : > { %5283 = vmatpush3.bf16.msra.mxu1 %v6742_v11 }
 0x51a   : > { %5284 = vmatprep.subr.bf16.mxu1 %v5449_v31 }
 0x51d   : > { %5285 = vmatpush3.bf16.msra.mxu1 %v6749_v21 }
 0x51e   : > { %5286 = vmatprep.subr.bf16.mxu1 %v5449_v31 }
 0x521   : > { %5287 = vmatpush3.bf16.msra.mxu1 %v6756_v26 }
 0x522   : > { %5297 = vmatprep.subr.bf16.mxu1 %v5449_v31 }
 0x524   : > { %5289 = vmatmul.mubr.bf16.vlgmr.msra.gmra.mxu1 %v3514_v32 }
 0x525   : > { %5298 = vmatpush3.bf16.msra.mxu1 %v6701_v9  ;;  %5313 = vmatprep.mubr.msk.bf16.mxu1 %vm7292_vm8, %v5449_v31 }
 0x526   : > { %5299 = vmatprep.subr.bf16.mxu1 %v5449_v31 }
 0x529   : > { %5300 = vmatpush3.bf16.msra.mxu1 %v6711_v15 }
 0x52a   : > { %5301 = vmatprep.subr.bf16.mxu1 %v5449_v31 }
 0x52d   : > { %5302 = vmatpush3.bf16.msra.mxu1 %v6721_v16 }
 0x52e   : > { %5303 = vmatprep.subr.bf16.mxu1 %v5449_v31 }
 0x531   : > { %5304 = vmatpush3.bf16.msra.mxu1 %v6728_v5 }
 0x532   : > { %5305 = vmatprep.subr.bf16.mxu1 %v5449_v31 }
 0x535   : > { %5306 = vmatpush3.bf16.msra.mxu1 %v6735_v55 }
 0x536   : > { %5307 = vmatprep.subr.bf16.mxu1 %v5449_v31 }
 0x539   : > { %5308 = vmatpush3.bf16.msra.mxu1 %v6742_v11 }
 0x53a   : > { %5309 = vmatprep.subr.bf16.mxu1 %v5449_v31 }
 0x53d   : > { %5310 = vmatpush3.bf16.msra.mxu1 %v6749_v21 }
 0x53e   : > { %5311 = vmatprep.subr.bf16.mxu1 %v5449_v31 }
 0x541   : > { %5312 = vmatpush3.bf16.msra.mxu1 %v6756_v26 }
 0x542   : > { %5342 = vmatprep.subr.mxu1 %v5449_v31 }
 0x553   : > { %v3688_v17 = vpop.permute.xlu0 %3687 }
 0x554   : > { %v3682_v52 = vpop.permute.xlu1 %3681 }
 0x555   : > { %3684 = vst.msk [vmem:[#allocation5] sm:$0x7f] %vm3183_vm0, %v3682_v52 }
 0x556   : > { %3690 = vst.msk [vmem:[#allocation5] sm:$0x7f] %vm3190_vm12, %v3688_v17 }
 0x557   : > { %v3700_v53 = vpop.permute.xlu0 %3699 }
 0x558   : > { %v3694_v18 = vpop.permute.xlu1 %3693 }
 0x559   : > { %3696 = vst.msk [vmem:[#allocation5] sm:$0x7f] %vm3197_vm4, %v3694_v18 }
 0x55a   : > { %3702 = vst.msk [vmem:[#allocation5] sm:$0x7f] %vm7413_vm9, %v3700_v53  ;;  %vm7416_vm9 = vcmask 457088  }
 0x55b   : > { %v3712_v20 = vpop.permute.xlu0 %3711 }
 0x55c   : > { %v3706_v22 = vpop.permute.xlu1 %3705 }
 0x55d   : > { %3708 = vst.msk [vmem:[#allocation5] sm:$0x7f] %vm3211_vm14, %v3706_v22 }
 0x55e   : > { %3714 = vst.msk [vmem:[#allocation5] sm:$0x7f] %vm3218_vm13, %v3712_v20 }
 0x55f   : > { %v3724_v23 = vpop.permute.xlu0 %3723 }
 0x560   : > { %v3718_v24 = vpop.permute.xlu1 %3717 }
 0x561   : > { %3720 = vst.msk [vmem:[#allocation5] sm:$0x7f] %vm3225_vm2, %v3718_v24 }
 0x562   : > { %3726 = vst.msk [vmem:[#allocation5] sm:$0x7f] %vm3232_vm10, %v3724_v23 }
 0x563   : > { %v3860_v47 = vpop.permute.xlu0 %3859 }
 0x564   : > { %v3854_v48 = vpop.permute.xlu1 %3853 }
 0x567   : > { %v6874_v25 = vpop.permute.xlu0 %3920 }
 0x568   : > { %v3866_v27 = vpop.permute.xlu1 %3865 }
 0x569   : > { %v3727_v28 = vld [vmem:[#allocation5] sm:$0x7f] }
 0x56a   : > { %3850 = vst.msk [vmem:[#allocation5] sm:$0x7f] %vm7414_vm6, %v3849_v30  ;;  %v3728_v43 = vpack.c.bf16 %v3727_v28, %v3727_v28  ;;  %vm3419_vm6 = vcmask 125952  }
 0x56b   : > { %3856 = vst.msk [vmem:[#allocation5] sm:$0x7f] %vm3134_vm3, %v3854_v48  ;;  %v3872_v44 = vpop.permute.xlu0 %3871  ;;  %vm7417_vm3 = vcmask 522688  }
 0x56c   : > { %3862 = vst.msk [vmem:[#allocation5] sm:$0x7f] %vm3141_vm11, %v3860_v47  ;;  %v6879_v51 = vpop.permute.xlu1 %3926  ;;  %5314 = vmatmul.mubr.bf16.vlgmr.msra.gmra.mxu1 %v3728_v43 }
 0x56d   : > { %3868 = vst.msk [vmem:[#allocation5] sm:$0x7f] %vm7415_vm5, %v3866_v27  ;;  %5344 = vmatprep.mubr.msk.f32.mxu1 %vm7292_vm8, %v5449_v31  ;;  %vm4065_vm5 = vcmask 124928  }
 0x56e   : > { %3874 = vst.msk [vmem:[#allocation5] sm:$0x7f] %vm3155_vm15, %v3872_v44  ;;  %vm7418_vm15 = vcmask 64512  }
 0x56f   : > { %v3884_v54 = vpop.permute.xlu0 %3883  ;;  %4066 = vst.msk [vmem:[#allocation6] sm:$0x7] %vm4065_vm5, %v4064_v1  ;;  %v7049_v1 = vld [vmem:[%s7170_s9 + $0x10] sm:$0xff]  }
 0x570   : > { %v3878_v33 = vpop.permute.xlu1 %3877 }
 0x571   : > { %3880 = vst.msk [vmem:[#allocation5] sm:$0x7f] %vm3162_vm7, %v3878_v33  ;;  %v6977_v33 = vld [vmem:[%s7170_s9 + $0x38] sm:$0xff]  }
 0x572   : > { %3886 = vst.msk [vmem:[#allocation5] sm:$0x7f] %vm7416_vm9, %v3884_v54  ;;  %vm7419_vm9 = vcmask 1046528   ;;  %v6972_v54 = vld [vmem:[%s7170_s9 + $0x78] sm:$0xff]  }
 0x574   : > { %v3890_v10 = vpop.permute.xlu1 %3889 }
 0x575   : > { %3892 = vst.msk [vmem:[#allocation5] sm:$0x7f] %vm7417_vm3, %v3890_v10  ;;  %vm7420_vm3 = vmmov %vm7419_vm9  ;;  %v6982_v10 = vld [vmem:[%s7170_s9 + $0x70] sm:$0xff]  }
 0x5aa   : > { %v3115_v34 = vpop.f32.mrf.mxu1 }
 0x5ab   : > { %v3119_v36 = vmul.f32 %v5427_v35, %v3115_v34  ;;  %v6989_v34 = vld [vmem:[%s7170_s9 + $0x30] sm:$0xff]  }
 0x5ac   : > { %v5246_v37 = vpop.f32.mrf.mxu1 }
 0x5ad   : > { %v3120_v39 = vadd.f32 %v5428_v38, %v3119_v36 }
 0x5af   : > { %vm3121_vm11 = vcmp.ge.f32.partialorder %v3120_v39, 0.0  ;;  %v3122_v40 = vmul.f32 0.2, %v3120_v39 }
 0x5b1   : > { %v3123_v41 = vsel %vm3121_vm11, %v3120_v39, %v3122_v40  ;;  %vm4114_vm11 = vcmask 1043328  }
 0x5b2   : > { %3125 = vst.msk [vmem:[#allocation2 + $0x81] sm:$0xff] %vm7418_vm15, %v3123_v41 }
 0x5b9   : > { %v3893_v42 = vld [vmem:[#allocation2 + $0x80] sm:$0x7f] }
 0x5ba   : > { %v3899_v46 = vld [vmem:[#allocation2 + $0x81] sm:$0x7f]  ;;  %3895 = vrot.lane.b32.xlu0 %v3893_v42, %s7405_s13 }
 0x5bb   : > { %3901 = vrot.lane.b32.xlu1 %v3899_v46, %s5458_s19  ;;  %v3905_v49 = vld [vmem:[#allocation2 + $0x82] sm:$0x7f] }
 0x5bc   : > { %v3911_v50 = vld [vmem:[#allocation2 + $0x83] sm:$0x7f] }
 0x5be   : > { %3907 = vrot.lane.b32.xlu0 %v3905_v49, %s5461_s24 }
 0x5bf   : > { %3913 = vrot.lane.b32.xlu1 %v3911_v50, %s5460_s16 }
 0x5c2   : > { %3932 = vrot.lane.b32.xlu0 %v3930_v14, %s7408_s26  ;;  %v7005_v14 = vld [vmem:[%s7170_s9 + $0x68] sm:$0xff]  }
 0x5c3   : > { %3938 = vrot.lane.b32.xlu1 %v3936_v58, %s5464_s21  ;;  %v7010_v58 = vld [vmem:[%s7170_s9 + $0x28] sm:$0xff]  }
 0x5c4   : > { %v3397_v45 = vpop.f32.mrf.mxu1 }
 0x5c5   : > { %v3407_v4 = vmul.f32 %v6902_v56, %v3397_v45 }
 0x5c6   : > { %v5271_v60 = vpop.f32.mrf.mxu1  ;;  %4069 = vrot.lane.b32.xlu0 %v4067_v59, %s7409_s28 }
 0x5c7   : > { %v3414_v61 = vadd.f32 %v6909_v57, %v3407_v4  ;;  %v7017_v4 = vld [vmem:[%s7170_s9 + $0x60] sm:$0xff]  }
 0x5c8   : > { %v7022_v60 = vld [vmem:[%s7170_s9 + $0x20] sm:$0xff]  }
 0x5c9   : > { %vm3415_vm7 = vcmp.ge.f32.partialorder %v3414_v61, 0.0  ;;  %v3416_v19 = vmul.f32 0.2, %v3414_v61 }
 0x5ca   : > { %4076 = vrot.lane.b32.xlu0 %v4074_v62, %s5455_s29  ;;  %v7035_v62 = vld [vmem:[%s7170_s9 + $0x18] sm:$0xff]  }
 0x5cb   : > { %v3417_v0 = vsel %vm3415_vm7, %v3414_v61, %v3416_v19  ;;  %v7030_v61 = vld [vmem:[%s7170_s9 + $0x58] sm:$0xff]  }
 0x5cc   : > { %3420 = vst.msk [vmem:[#allocation3 + $0x9] sm:$0xf] %vm3419_vm6, %v3417_v0 }
 0x5ce   : > { %4083 = vrot.lane.b32.xlu0 %v4081_v8, %s5457_s15  ;;  %v7044_v8 = vld [vmem:[%s7170_s9 + $0x50] sm:$0xff]  }
 0x5d3   : > { %v4088_v2 = vld [vmem:[#allocation3 + $0x8] sm:$0x7]  ;;  %v4109_v12 = vld [vmem:[#allocation3 + $0xb] sm:$0x7] }
 0x5d4   : > { %4090 = vrot.lane.b32.xlu0 %v4088_v2, %s7405_s13  ;;  %v4095_v3 = vld [vmem:[#allocation3 + $0x9] sm:$0x7] }
 0x5d5   : > { %v4102_v6 = vld [vmem:[#allocation3 + $0xa] sm:$0x7] }
 0x5d8   : > { %4097 = vrot.lane.b32.xlu0 %v4095_v3, %s5461_s24 }
 0x5dc   : > { %4104 = vrot.lane.b32.xlu0 %v4102_v6, %s5463_s20  ;;  %v7057_v6 = vld [vmem:[%s7170_s9 + $0x48] sm:$0xff]  }
 0x5e0   : > { %4111 = vrot.lane.b32.xlu0 %v4109_v12, %s7408_s26  ;;  %v7063_v12 = vld [vmem:[%s7170_s9 + $0x8] sm:$0xff]  }
 0x5e4   : > { %v3549_v13 = vpop.f32.mrf.mxu1 }
 0x5e5   : > { %5293 = vmatpush3.msk.msra.mxu0 %vm7419_vm9, %v3549_v13  ;;  %vm7422_vm9 = vmmov %vm7420_vm3 }
 0x5e6   : > { %v5290_v63 = vpop.f32.mrf.mxu1  ;;  %5295 = vmatmul.mubr.msk.f32.vlgmr.msra.gmra.mxu0 %vm3324_vm1, %v6815_v7  ;;  %5317 = vmatprep.subr.mxu0 %v5449_v31 }
 0x5e7   : > { %5319 = vmatprep.mubr.msk.f32.mxu0 %vm7292_vm8, %v5449_v31 }
 0x5e8   : > { %v3552_v29 = vpop.f32.mrf.mxu1 }
 0x5e9   : > { %v7071_v29 = vld [vmem:[%s7170_s9 + $0x40] sm:$0xff]  }
 0x5ea   : > { %v5291_v32 = vpop.f32.mrf.mxu1 }
 0x5eb   : > { %v7077_v32 = vld [vmem:[%s7170_s9] sm:$0xff]  }
 0x62c   : > { %v3763_v17 = vpop.f32.mrf.mxu1  ;;  %v3896_v52 = vpop.permute.xlu0 %3895 }
 0x62d   : > { %v3902_v53 = vpop.permute.xlu1 %3901  ;;  %5318 = vmatpush3.msk.msra.mxu0 %vm7420_vm3, %v3763_v17  ;;  %3898 = vst.msk [vmem:[#allocation5] sm:$0x7f] %vm3183_vm0, %v3896_v52  ;;  %vm7421_vm0 = vcmask 785088   ;;  %vm4615_vm3 = vcmask 0  }
 0x62e   : > { %v5315_v18 = vpop.f32.mrf.mxu1  ;;  %5320 = vmatmul.mubr.msk.f32.vlgmr.msra.gmra.mxu0 %vm3324_vm1, %v6815_v7  ;;  %5322 = vmatprep.subr.bf16.mxu0 %v5449_v31  ;;  %3904 = vst.msk [vmem:[#allocation5] sm:$0x7f] %vm3190_vm12, %v3902_v53  ;;  %vm4072_vm12 = vcmask 256128  }
 0x62f   : > { %5323 = vmatpush3.bf16.msra.mxu0 %v6701_v9  ;;  %5338 = vmatprep.mubr.msk.bf16.mxu0 %vm7292_vm8, %v5449_v31 }
 0x630   : > { %v3766_v20 = vpop.f32.mrf.mxu1  ;;  %5324 = vmatprep.subr.bf16.mxu0 %v5449_v31  ;;  %v3908_v22 = vpop.permute.xlu0 %3907 }
 0x631   : > { %v3914_v23 = vpop.permute.xlu1 %3913  ;;  %3910 = vst.msk [vmem:[#allocation5] sm:$0x7f] %vm3197_vm4, %v3908_v22  ;;  %vm4079_vm4 = vcmask 387328  }
 0x632   : > { %v5316_v24 = vpop.f32.mrf.mxu1  ;;  %3916 = vst.msk [vmem:[#allocation5] sm:$0x7f] %vm7421_vm0, %v3914_v23 }
 0x633   : > { %5325 = vmatpush3.bf16.msra.mxu0 %v6711_v15  ;;  %3923 = vst.msk [vmem:[#allocation5] sm:$0x7f] %vm3211_vm14, %v6874_v25  ;;  %vm4086_vm14 = vcmask 518528  }
 0x634   : > { %5326 = vmatprep.subr.bf16.mxu0 %v5449_v31  ;;  %3929 = vst.msk [vmem:[#allocation5] sm:$0x7f] %vm3218_vm13, %v6879_v51  ;;  %v3933_v9 = vpop.permute.xlu0 %3932  ;;  %vm4093_vm13 = vcmask 649728  }
 0x635   : > { %v3939_v47 = vpop.permute.xlu1 %3938  ;;  %3935 = vst.msk [vmem:[#allocation5] sm:$0x7f] %vm3225_vm2, %v3933_v9  ;;  %vm4100_vm2 = vcmask 780928  }
 0x636   : > { %3941 = vst.msk [vmem:[#allocation5] sm:$0x7f] %vm3232_vm10, %v3939_v47  ;;  %vm4107_vm10 = vcmask 912128   ;;  %v4462_v47 = vld [vmem:[#allocation3 + $0x28] sm:$0x7] }
 0x637   : > { %5327 = vmatpush3.bf16.msra.mxu0 %v6721_v16 }
 0x638   : > { %5328 = vmatprep.subr.bf16.mxu0 %v5449_v31  ;;  %v4070_v15 = vpop.permute.xlu0 %4069 }
 0x639   : > { %4073 = vst.msk [vmem:[#allocation6] sm:$0x7] %vm4072_vm12, %v4070_v15  ;;  %v4474_v15 = vld [vmem:[#allocation3 + $0x2a] sm:$0x7] }
 0x63b   : > { %5329 = vmatpush3.bf16.msra.mxu0 %v6728_v5 }
 0x63c   : > { %5330 = vmatprep.subr.bf16.mxu0 %v5449_v31  ;;  %v4077_v48 = vpop.permute.xlu0 %4076 }
 0x63d   : > { %4080 = vst.msk [vmem:[#allocation6] sm:$0x7] %vm4079_vm4, %v4077_v48  ;;  %v3942_v25 = vld [vmem:[#allocation5] sm:$0x7f] }
 0x63f   : > { %5331 = vmatpush3.bf16.msra.mxu0 %v6735_v55  ;;  %v3943_v55 = vpack.c.bf16 %v3942_v25, %v3942_v25 }
 0x640   : > { %5332 = vmatprep.subr.bf16.mxu0 %v5449_v31  ;;  %v4084_v16 = vpop.permute.xlu0 %4083 }
 0x641   : > { %4087 = vst.msk [vmem:[#allocation6] sm:$0x7] %vm4086_vm14, %v4084_v16 }
 0x643   : > { %5333 = vmatpush3.bf16.msra.mxu0 %v6742_v11 }
 0x644   : > { %5334 = vmatprep.subr.bf16.mxu0 %v5449_v31 }
 0x646   : > { %v4091_v5 = vpop.permute.xlu0 %4090 }
 0x647   : > { %5335 = vmatpush3.bf16.msra.mxu0 %v6749_v21  ;;  %4094 = vst.msk [vmem:[#allocation6] sm:$0x7] %vm4093_vm13, %v4091_v5 }
 0x648   : > { %5336 = vmatprep.subr.bf16.mxu0 %v5449_v31 }
 0x64a   : > { %v4098_v27 = vpop.permute.xlu0 %4097 }
 0x64b   : > { %5337 = vmatpush3.bf16.msra.mxu0 %v6756_v26  ;;  %4101 = vst.msk [vmem:[#allocation6] sm:$0x7] %vm4100_vm2, %v4098_v27 }
 0x64c   : > { %5079 = vmatprep.subr.bf16.mxu0 %v6972_v54 }
 0x64e   : > { %5339 = vmatmul.mubr.bf16.vlgmr.msra.gmra.mxu0 %v3943_v55  ;;  %v4105_v11 = vpop.permute.xlu0 %4104 }
 0x64f   : > { %4108 = vst.msk [vmem:[#allocation6] sm:$0x7] %vm4107_vm10, %v4105_v11  ;;  %5080 = vmatpush3.bf16.msra.mxu0 %v6977_v33 }
 0x650   : > { %5081 = vmatprep.subr.bf16.mxu0 %v6982_v10 }
 0x652   : > { %v4112_v28 = vpop.permute.xlu0 %4111 }
 0x653   : > { %4115 = vst.msk [vmem:[#allocation6] sm:$0x7] %vm4114_vm11, %v4112_v28  ;;  %5082 = vmatpush3.bf16.msra.mxu0 %v6989_v34 }
 0x654   : > { %5083 = vmatprep.subr.bf16.mxu0 %v7005_v14 }
 0x657   : > { %5084 = vmatpush3.bf16.msra.mxu0 %v7010_v58 }
 0x658   : > { %5085 = vmatprep.subr.bf16.mxu0 %v7017_v4 }
 0x65b   : > { %5086 = vmatpush3.bf16.msra.mxu0 %v7022_v60 }
 0x65c   : > { %5087 = vmatprep.subr.bf16.mxu0 %v7030_v61 }
 0x65f   : > { %5088 = vmatpush3.bf16.msra.mxu0 %v7035_v62 }
 0x660   : > { %5089 = vmatprep.subr.bf16.mxu0 %v7044_v8 }
 0x663   : > { %5090 = vmatpush3.bf16.msra.mxu0 %v7049_v1 }
 0x664   : > { %5091 = vmatprep.subr.bf16.mxu0 %v7057_v6 }
 0x667   : > { %5092 = vmatpush3.bf16.msra.mxu0 %v7063_v12 }
 0x668   : > { %5093 = vmatprep.subr.bf16.mxu0 %v7071_v29 }
 0x66b   : > { %5094 = vmatpush3.bf16.msra.mxu0 %v7077_v32 }
 0x66c   : > { %5352 = vmatprep.subr.mxu0 %v5449_v31 }
 0x6a6   : > { %v3624_v21 = vpop.f32.mrf.mxu0 }
 0x6a7   : > { %v3628_v30 = vmul.f32 %v6902_v56, %v3624_v21 }
 0x6a8   : > { %v5296_v43 = vpop.f32.mrf.mxu0 }
 0x6a9   : > { %v3629_v44 = vadd.f32 %v6909_v57, %v3628_v30 }
 0x6ab   : > { %vm3630_vm15 = vcmp.ge.f32.partialorder %v3629_v44, 0.0  ;;  %v3631_v51 = vmul.f32 0.2, %v3629_v44 }
 0x6ad   : > { %v3632_v26 = vsel %vm3630_vm15, %v3629_v44, %v3631_v51 }
 0x6ae   : > { %3634 = vst.msk [vmem:[#allocation3 + $0x11] sm:$0xf] %vm3419_vm6, %v3632_v26 }
 0x6b5   : > { %v4399_v35 = vld [vmem:[#allocation3 + $0x11] sm:$0x7] }
 0x6b6   : > { %v4118_v36 = vld [vmem:[#allocation3 + $0x11] sm:$0x7]  ;;  %4401 = vrot.lane.b32.xlu0 %v4399_v35, %s7409_s28 }
 0x6b7   : > { %4120 = vrot.lane.b32.xlu1 %v4118_v36, %s7409_s28  ;;  %v4405_v37 = vld [vmem:[#allocation3 + $0x12] sm:$0x7] }
 0x6b8   : > { %v4124_v38 = vld [vmem:[#allocation3 + $0x12] sm:$0x7] }
 0x6b9   : > { %v4116_v39 = vld [vmem:[#allocation3 + $0x10] sm:$0x7]  ;;  %v4411_v40 = vld [vmem:[#allocation3 + $0x13] sm:$0x7] }
 0x6ba   : > { %4117 = vst.msk [vmem:[#allocation6 + $0x4] sm:$0x7] %vm4065_vm5, %v4116_v39  ;;  %4407 = vrot.lane.b32.xlu0 %v4405_v37, %s5455_s29  ;;  %v4130_v41 = vld [vmem:[#allocation3 + $0x13] sm:$0x7]  ;;  %v4397_v30 = vld [vmem:[#allocation3 + $0x10] sm:$0x7] }
 0x6bb   : > { %4126 = vrot.lane.b32.xlu1 %v4124_v38, %s5455_s29 }
 0x6be   : > { %4413 = vrot.lane.b32.xlu0 %v4411_v40, %s5457_s15 }
 0x6bf   : > { %4132 = vrot.lane.b32.xlu1 %v4130_v41, %s5457_s15 }
 0x6ee   : > { %v3838_v42 = vpop.f32.mrf.mxu0 }
 0x6ef   : > { %v3842_v46 = vmul.f32 %v6902_v56, %v3838_v42 }
 0x6f0   : > { %v5321_v49 = vpop.f32.mrf.mxu0 }
 0x6f1   : > { %v3843_v50 = vadd.f32 %v6909_v57, %v3842_v46 }
 0x6f3   : > { %vm3844_vm7 = vcmp.ge.f32.partialorder %v3843_v50, 0.0  ;;  %v3845_v45 = vmul.f32 0.2, %v3843_v50 }
 0x6f5   : > { %v3846_v59 = vsel %vm3844_vm7, %v3843_v50, %v3845_v45 }
 0x6f6   : > { %3848 = vst.msk [vmem:[#allocation3 + $0x19] sm:$0xf] %vm3419_vm6, %v3846_v59 }
 0x6fd   : > { %v4417_v19 = vld [vmem:[#allocation3 + $0x18] sm:$0x7]  ;;  %v4435_v17 = vld [vmem:[#allocation3 + $0x1b] sm:$0x7] }
 0x6fe   : > { %v4136_v0 = vld [vmem:[#allocation3 + $0x18] sm:$0x7]  ;;  %4419 = vrot.lane.b32.xlu0 %v4417_v19, %s7405_s13  ;;  %v4154_v52 = vld [vmem:[#allocation3 + $0x1b] sm:$0x7] }
 0x6ff   : > { %4138 = vrot.lane.b32.xlu1 %v4136_v0, %s7405_s13  ;;  %v4423_v2 = vld [vmem:[#allocation3 + $0x19] sm:$0x7] }
 0x700   : > { %v4142_v3 = vld [vmem:[#allocation3 + $0x19] sm:$0x7] }
 0x701   : > { %v4429_v13 = vld [vmem:[#allocation3 + $0x1a] sm:$0x7] }
 0x702   : > { %4425 = vrot.lane.b32.xlu0 %v4423_v2, %s5461_s24  ;;  %v4148_v63 = vld [vmem:[#allocation3 + $0x1a] sm:$0x7] }
 0x703   : > { %4144 = vrot.lane.b32.xlu1 %v4142_v3, %s5461_s24  ;;  %v556_v3 = vld [vmem:[%s7171_s10] sm:$0x3] }
 0x706   : > { %4431 = vrot.lane.b32.xlu0 %v4429_v13, %s5463_s20 }
 0x707   : > { %4150 = vrot.lane.b32.xlu1 %v4148_v63, %s5463_s20 }
 0x70a   : > { %4437 = vrot.lane.b32.xlu0 %v4435_v17, %s7408_s26 }
 0x70b   : > { %4156 = vrot.lane.b32.xlu1 %v4154_v52, %s7408_s26 }
 0x70e   : > { %v3978_v53 = vpop.f32.mrf.mxu0 }
 0x70f   : > { %5343 = vmatpush3.msk.msra.mxu1 %vm7422_vm9, %v3978_v53  ;;  %4464 = vrot.lane.b32.xlu1 %v4462_v47, %s7405_s13 }
 0x710   : > { %v5340_v18 = vpop.f32.mrf.mxu0  ;;  %5345 = vmatmul.mubr.msk.f32.vlgmr.msra.gmra.mxu1 %vm3324_vm1, %v6815_v7  ;;  %5347 = vmatprep.subr.mxu1 %v5449_v31  ;;  %v4468_v7 = vld [vmem:[#allocation3 + $0x29] sm:$0x7] }
 0x711   : > { %5349 = vmatprep.mubr.msk.f32.mxu1 %vm7292_vm8, %v5449_v31 }
 0x712   : > { %v3981_v20 = vpop.f32.mrf.mxu0 }
 0x713   : > { %4470 = vrot.lane.b32.xlu1 %v4468_v7, %s5461_s24 }
 0x714   : > { %v5341_v22 = vpop.f32.mrf.mxu0 }
 0x717   : > { %4476 = vrot.lane.b32.xlu1 %v4474_v15, %s5463_s20 }
 0x728   : > { %v4402_v48 = vpop.permute.xlu0 %4401 }
 0x729   : > { %v4121_v23 = vpop.permute.xlu1 %4120 }
 0x72a   : > { %4123 = vst.msk [vmem:[#allocation6 + $0x4] sm:$0x7] %vm4072_vm12, %v4121_v23 }
 0x72c   : > { %v4408_v16 = vpop.permute.xlu0 %4407 }
 0x72d   : > { %v4127_v24 = vpop.permute.xlu1 %4126 }
 0x72e   : > { %4129 = vst.msk [vmem:[#allocation6 + $0x4] sm:$0x7] %vm4079_vm4, %v4127_v24 }
 0x730   : > { %v4414_v55 = vpop.permute.xlu0 %4413 }
 0x731   : > { %v4133_v9 = vpop.permute.xlu1 %4132 }
 0x732   : > { %4135 = vst.msk [vmem:[#allocation6 + $0x4] sm:$0x7] %vm4086_vm14, %v4133_v9  ;;  %v4605_v9 = vld [vmem:[%s7173_s12 + $0x2] sm:$0x3] }
 0x770   : > { %v4420_v11 = vpop.permute.xlu0 %4419 }
 0x771   : > { %v4139_v5 = vpop.permute.xlu1 %4138 }
 0x772   : > { %4141 = vst.msk [vmem:[#allocation6 + $0x4] sm:$0x7] %vm4093_vm13, %v4139_v5 }
 0x774   : > { %v4426_v21 = vpop.permute.xlu0 %4425 }
 0x775   : > { %v4145_v25 = vpop.permute.xlu1 %4144 }
 0x776   : > { %4147 = vst.msk [vmem:[#allocation6 + $0x4] sm:$0x7] %vm4100_vm2, %v4145_v25 }
 0x778   : > { %v4432_v44 = vpop.permute.xlu0 %4431 }
 0x779   : > { %v4151_v27 = vpop.permute.xlu1 %4150 }
 0x77a   : > { %4153 = vst.msk [vmem:[#allocation6 + $0x4] sm:$0x7] %vm4107_vm10, %v4151_v27 }
 0x77c   : > { %v4438_v36 = vpop.permute.xlu0 %4437 }
 0x77d   : > { %v4157_v28 = vpop.permute.xlu1 %4156 }
 0x77e   : > { %4159 = vst.msk [vmem:[#allocation6 + $0x4] sm:$0x7] %vm4114_vm11, %v4157_v28 }
 0x785   : > { %v4160_v43 = vld [vmem:[#allocation6] sm:$0x77] }
 0x786   : > { %4398 = vst.msk [vmem:[#allocation6] sm:$0x7] %vm4065_vm5, %v4397_v30  ;;  %v4162_v51 = vcombine.high %v4160_v43, %v4160_v43  ;;  %v4164_v35 = vpack.c.bf16 %v4160_v43, %v4160_v43 }
 0x787   : > { %4404 = vst.msk [vmem:[#allocation6] sm:$0x7] %vm4072_vm12, %v4402_v48 }
 0x788   : > { %4410 = vst.msk [vmem:[#allocation6] sm:$0x7] %vm4079_vm4, %v4408_v16  ;;  %v4165_v26 = vpack.c.bf16 %v4162_v51, %v4162_v51 }
 0x789   : > { %4416 = vst.msk [vmem:[#allocation6] sm:$0x7] %vm4086_vm14, %v4414_v55 }
 0x78a   : > { %4422 = vst.msk [vmem:[#allocation6] sm:$0x7] %vm4093_vm13, %v4420_v11  ;;  %4294 = vmatprep.mubr.bf16.mxu0 %v4165_v26 }
 0x78b   : > { %4428 = vst.msk [vmem:[#allocation6] sm:$0x7] %vm4100_vm2, %v4426_v21  ;;  %4295 = vmatmul.mubr.bf16.vlgmr.msra.gmra.mxu0 %v4164_v35  ;;  %v558_v21 = vld [vmem:[#allocation8] sm:$0x1] }
 0x78c   : > { %4434 = vst.msk [vmem:[#allocation6] sm:$0x7] %vm4107_vm10, %v4432_v44  ;;  %5354 = vmatprep.mubr.msk.f32.mxu0 %vm7292_vm8, %v5449_v31  ;;  %vm4312_vm8 = vcmask 1042432  }
 0x78d   : > { %4440 = vst.msk [vmem:[#allocation6] sm:$0x7] %vm4114_vm11, %v4438_v36 }
 0x7d0   : > { %v4053_v37 = vpop.f32.mrf.mxu1 }
 0x7d1   : > { %v4057_v38 = vmul.f32 %v6902_v56, %v4053_v37  ;;  %v4480_v56 = vld [vmem:[#allocation3 + $0x2b] sm:$0x7] }
 0x7d2   : > { %v5346_v39 = vpop.f32.mrf.mxu1 }
 0x7d3   : > { %v4058_v40 = vadd.f32 %v6909_v57, %v4057_v38  ;;  %v4465_v57 = vpop.permute.xlu1 %4464 }
 0x7d5   : > { %vm4059_vm1 = vcmp.ge.f32.partialorder %v4058_v40, 0.0  ;;  %v4060_v41 = vmul.f32 0.2, %v4058_v40 }
 0x7d7   : > { %v4061_v42 = vsel %vm4059_vm1, %v4058_v40, %v4060_v41  ;;  %v4471_v45 = vpop.permute.xlu1 %4470 }
 0x7d8   : > { %4063 = vst.msk [vmem:[#allocation3 + $0x21] sm:$0xf] %vm3419_vm6, %v4061_v42  ;;  %vm4308_vm6 = vcmask 23552  }
 0x7db   : > { %v4477_v0 = vpop.permute.xlu1 %4476 }
 0x7df   : > { %v4443_v46 = vld [vmem:[#allocation3 + $0x21] sm:$0x7] }
 0x7e0   : > { %4445 = vrot.lane.b32.xlu1 %v4443_v46, %s7409_s28  ;;  %v4441_v49 = vld [vmem:[#allocation3 + $0x20] sm:$0x7]  ;;  %v4455_v50 = vld [vmem:[#allocation3 + $0x23] sm:$0x7] }
 0x7e1   : > { %4442 = vst.msk [vmem:[#allocation6 + $0x4] sm:$0x7] %vm4065_vm5, %v4441_v49  ;;  %v4449_v31 = vld [vmem:[#allocation3 + $0x22] sm:$0x7]  ;;  %vm4388_vm5 = vcmask 1024  }
 0x7e4   : > { %4451 = vrot.lane.b32.xlu1 %v4449_v31, %s5455_s29 }
 0x7e8   : > { %4457 = vrot.lane.b32.xlu1 %v4455_v50, %s5457_s15 }
 0x7ec   : > { %4482 = vrot.lane.b32.xlu1 %v4480_v56, %s7408_s26 }
 0x84b   : > { %v5095_v59 = vpop.f32.mrf.mxu0 }
 0x84d   : > { %v5096_v19 = vpop.f32.mrf.mxu0 }
 0x84e   : > { %v5097_v2 = vadd.f32 %v5096_v19, %v5095_v59 }
 0x84f   : > { %v5098_v13 = vpop.f32.mrf.mxu0 }
 0x850   : > { %5348 = vmatpush3.msk.msra.mxu1 %vm4312_vm8, %v5097_v2 }
 0x851   : > { %v5099_v63 = vpop.f32.mrf.mxu0  ;;  %5350 = vmatmul.mubr.msk.f32.vlgmr.msra.gmra.mxu1 %vm4308_vm6, %v556_v3  ;;  %5103 = vmatprep.subr.bf16.mxu1 %v6972_v54 }
 0x852   : > { %5104 = vmatpush3.bf16.msra.mxu1 %v6977_v33  ;;  %v4446_v17 = vpop.permute.xlu1 %4445 }
 0x853   : > { %5105 = vmatprep.subr.bf16.mxu1 %v6982_v10  ;;  %4448 = vst.msk [vmem:[#allocation6 + $0x4] sm:$0x7] %vm4072_vm12, %v4446_v17 }
 0x856   : > { %5106 = vmatpush3.bf16.msra.mxu1 %v6989_v34  ;;  %v4452_v52 = vpop.permute.xlu1 %4451 }
 0x857   : > { %5107 = vmatprep.subr.bf16.mxu1 %v7005_v14  ;;  %4454 = vst.msk [vmem:[#allocation6 + $0x4] sm:$0x7] %vm4079_vm4, %v4452_v52 }
 0x85a   : > { %5108 = vmatpush3.bf16.msra.mxu1 %v7010_v58  ;;  %v4458_v53 = vpop.permute.xlu1 %4457 }
 0x85b   : > { %5109 = vmatprep.subr.bf16.mxu1 %v7017_v4  ;;  %4460 = vst.msk [vmem:[#allocation6 + $0x4] sm:$0x7] %vm4086_vm14, %v4458_v53 }
 0x85c   : > { %4467 = vst.msk [vmem:[#allocation6 + $0x4] sm:$0x7] %vm4093_vm13, %v4465_v57 }
 0x85d   : > { %4473 = vst.msk [vmem:[#allocation6 + $0x4] sm:$0x7] %vm4100_vm2, %v4471_v45 }
 0x85e   : > { %5110 = vmatpush3.bf16.msra.mxu1 %v7022_v60  ;;  %4479 = vst.msk [vmem:[#allocation6 + $0x4] sm:$0x7] %vm4107_vm10, %v4477_v0  ;;  %v4483_v54 = vpop.permute.xlu1 %4482 }
 0x85f   : > { %5111 = vmatprep.subr.bf16.mxu1 %v7030_v61  ;;  %4485 = vst.msk [vmem:[#allocation6 + $0x4] sm:$0x7] %vm4114_vm11, %v4483_v54 }
 0x862   : > { %5112 = vmatpush3.bf16.msra.mxu1 %v7035_v62 }
 0x863   : > { %5113 = vmatprep.subr.bf16.mxu1 %v7044_v8 }
 0x866   : > { %5114 = vmatpush3.bf16.msra.mxu1 %v7049_v1  ;;  %v4486_v33 = vld [vmem:[#allocation6] sm:$0x77] }
 0x867   : > { %5115 = vmatprep.subr.bf16.mxu1 %v7057_v6  ;;  %v4488_v10 = vcombine.high %v4486_v33, %v4486_v33  ;;  %v4490_v14 = vpack.c.bf16 %v4486_v33, %v4486_v33  ;;  %v4980_v6 = vld [vmem:[#allocation7] ss:$0 sm:$0xff] }
 0x869   : > { %v4491_v34 = vpack.c.bf16 %v4488_v10, %v4488_v10 }
 0x86a   : > { %5116 = vmatpush3.bf16.msra.mxu1 %v7063_v12 }
 0x86b   : > { %5117 = vmatprep.subr.bf16.mxu1 %v7071_v29  ;;  %4524 = vmatprep.mubr.bf16.mxu1 %v4491_v34  ;;  %v4386_v29 = vld [vmem:[%s7173_s12] sm:$0x3] }
 0x86e   : > { %5118 = vmatpush3.bf16.msra.mxu1 %v7077_v32 }
 0x871   : > { %4525 = vmatmul.mubr.bf16.vlgmr.msra.gmra.mxu1 %v4490_v14 }
 0x911   : > { %v4382_v58 = vpop.f32.mrf.mxu1 }
 0x912   : > { %v4383_v12 = vadd.f32 %v4980_v6, %v4382_v58 }
 0x913   : > { %v5351_v4 = vpop.f32.mrf.mxu1 }
 0x914   : > { %v4387_v32 = vmul.f32 %v4386_v29, %v4383_v12 }
 0x916   : > { %v4389_v18 = vsel %vm4388_vm5, %v4387_v32, 0.0 }
 0x917   : > { %v4390_v20 = vrot.slane %v4389_v18, 4 }
 0x919   : > { %v4391_v22 = vadd.f32 %v4390_v20, %v4389_v18 }
 0x91b   : > { %v4392_v23 = vrot.slane %v4391_v22, 2 }
 0x91d   : > { %v4393_v48 = vadd.f32 %v4392_v23, %v4391_v22 }
 0x91f   : > { %v4394_v25 = vrot.slane %v4393_v48, 1 }
 0x921   : > { %v4395_v11 = vadd.f32 %v4394_v25, %v4393_v48 }
 0x923   : > { %v4396_v43 = vadd.f32 %v4395_v11, %v558_v21 }
 0x931   : > { %v5119_v60 = vpop.f32.mrf.mxu1 }
 0x933   : > { %v5120_v61 = vpop.f32.mrf.mxu1 }
 0x934   : > { %v5121_v62 = vadd.f32 %v5120_v61, %v5119_v60 }
 0x935   : > { %v5122_v8 = vpop.f32.mrf.mxu1 }
 0x936   : > { %5353 = vmatpush3.msk.msra.mxu0 %vm4312_vm8, %v5121_v62 }
 0x937   : > { %v5123_v1 = vpop.f32.mrf.mxu1  ;;  %5355 = vmatmul.mubr.msk.f32.vlgmr.msra.gmra.mxu0 %vm4308_vm6, %v556_v3 }
 0x9f7   : > { %v4601_v24 = vpop.f32.mrf.mxu0 }
 0x9f8   : > { %v4602_v47 = vadd.f32 %v4980_v6, %v4601_v24 }
 0x9f9   : > { %v5356_v7 = vpop.f32.mrf.mxu0 }
 0x9fa   : > { %v4606_v15 = vmul.f32 %v4605_v9, %v4602_v47 }
 0x9fc   : > { %v4607_v16 = vsel %vm4388_vm5, %v4606_v15, 0.0 }
 0x9fd   : > { %v4608_v5 = vrot.slane %v4607_v16, 4 }
 0x9ff   : > { %v4609_v55 = vadd.f32 %v4608_v5, %v4607_v16 }
 0xa01   : > { %v4610_v27 = vrot.slane %v4609_v55, 2 }
 0xa03   : > { %v4611_v28 = vadd.f32 %v4610_v27, %v4609_v55 }
 0xa05   : > { %v4612_v30 = vrot.slane %v4611_v28, 1 }
 0xa07   : > { %v4613_v44 = vadd.f32 %v4612_v30, %v4611_v28 }
 0xa09   : > { %v4614_v51 = vadd.f32 %v4613_v44, %v4396_v43 }
 0xa0b   : > { %4616 = vst.msk [vmem:[%s467_s11] sm:$0x1] %vm4615_vm3, %v4614_v51 }
 0xa0c PF: > { %s28_s17 = sadd.s32 1, %s5435_s17  }
 0xa0d   : > { %p25_p4 = scmp.ge.s32.totalorder %s28_s17, 4  }
 0xa0f   :  { %27 = sbr.rel (!%p25_p4) target bundleno = 3 (0x3), region = 137 }

</bundles_post_ra>
